<compile_context>
chip_gen: v5e
topology: v5e:2x2
jax: 0.10.0
libtpu: 0.0.40
codegen_flags: <defaults>
</compile_context>

<pallas_src>
import functools

import jax
import jax.numpy as jnp
from jax import lax
from jax.experimental import pallas as pl
from jax.experimental.pallas import tpu as pltpu

NC = 3                      # input channels (spec)
NDF = 64                    # base feature width (spec)
EPS = 1e-5
LEAKY_SLOPE = 0.01          # nn.LeakyReLU() default

TK_MAX = 8192               # max K per grid step (full K for every layer here)
TC_MAX = 128                # C_out tile (lane-dense) when C_out > 128
VMEM_LIMIT = 32 * 1024 * 1024


# ----------------------------------------------------------------------------
# Fused kernel: conv-as-matmul (MXU, bf16 in / f32 acc) + training-mode
# BatchNorm over the batch axis + LeakyReLU / Sigmoid, one pallas_call/layer.
# Grid: (C_out tiles [parallel], K tiles [arbitrary]); full M resident.
# ----------------------------------------------------------------------------
def _fused_conv_bn_act_kernel(p_ref, w_ref, g_ref, b_ref, o_ref, acc_ref, *,
                              inv_m, eps, negative_slope, act):
    # p_ref: (M, TK) bf16 patches      w_ref: (TK, TC) bf16
    # g_ref, b_ref: (1, TC) f32        o_ref: (M, TC) bf16/f32
    # acc_ref: (M, TC) f32 VMEM accumulator (resident across the K axis)
    k = pl.program_id(1)
    nk = pl.num_programs(1)

    @pl.when(k == 0)
    def _():
        acc_ref[...] = jnp.zeros_like(acc_ref)

    acc_ref[...] += jnp.dot(p_ref[...], w_ref[...],
                            preferred_element_type=jnp.float32)

    @pl.when(k == nk - 1)
    def _():
        y = acc_ref[...]
        # Per-channel batch statistics over M = N*Ho*Wo (two-pass, f32).
        mean = jnp.sum(y, axis=0, keepdims=True) * inv_m          # (1, TC)
        d = y - mean
        var = jnp.sum(d * d, axis=0, keepdims=True) * inv_m       # biased var
        scale = jax.lax.rsqrt(var + eps) * g_ref[...]
        z = d * scale + b_ref[...]

        if act == "leaky":
            out = jnp.where(z >= 0, z, negative_slope * z)
        else:  # sigmoid; exact division keeps output strictly inside [0, 1]
            out = 1.0 / (1.0 + jnp.exp(-z))

        o_ref[...] = out.astype(o_ref.dtype)


# ----------------------------------------------------------------------------
# Glue: patch extraction (layout plumbing; compute stays in the kernel)
# ----------------------------------------------------------------------------
def _extract_patches(x_nhwc, k, stride, pad):
    # Feature ordering of the output is (C_in, kH, kW) row-major, matching the
    # PyTorch (C_out, C_in, kH, kW) weight flattening used in prepack_params.
    pat = lax.conv_general_dilated_patches(
        x_nhwc,
        filter_shape=(k, k),
        window_strides=(stride, stride),
        padding=((pad, pad), (pad, pad)),
        dimension_numbers=("NHWC", "HWIO", "NHWC"))
    n, ho, wo, k_dim = pat.shape
    return pat.reshape(n * ho * wo, k_dim), ho, wo


def _conv_bn_act(x_nhwc, w_mat, gamma, beta, *, stride, pad, act, out_dtype):
    n = x_nhwc.shape[0]
    patches, ho, wo = _extract_patches(x_nhwc, 4, stride, pad)   # (M, K) bf16
    m, k_dim = patches.shape
    c_out = w_mat.shape[1]

    tk = min(k_dim, TK_MAX)
    tc = c_out if c_out <= TC_MAX else TC_MAX
    assert k_dim % tk == 0 and c_out % tc == 0, (k_dim, c_out)
    kt, ct = k_dim // tk, c_out // tc
    # Full M stays resident in the f32 accumulator (fine for small/medium M;
    # a two-pass stats variant would be needed for very large batches).

    kern = functools.partial(_fused_conv_bn_act_kernel, inv_m=1.0 / m, eps=EPS,
                             negative_slope=LEAKY_SLOPE, act=act)
    out = pl.pallas_call(
        kern,
        grid=(ct, kt),
        in_specs=[pl.BlockSpec((m, tk), lambda c, k: (0, k)),
                  pl.BlockSpec((tk, tc), lambda c, k: (k, c)),
                  pl.BlockSpec((1, tc), lambda c, k: (0, c)),
                  pl.BlockSpec((1, tc), lambda c, k: (0, c))],
        out_specs=pl.BlockSpec((m, tc), lambda c, k: (0, c)),
        out_shape=jax.ShapeDtypeStruct((m, c_out), out_dtype),
        scratch_shapes=[pltpu.VMEM((m, tc), jnp.float32)],
        compiler_params=pltpu.CompilerParams(
            dimension_semantics=("parallel", "arbitrary"),
            vmem_limit_bytes=VMEM_LIMIT),
    )(patches, w_mat, gamma, beta)

    return out.reshape(n, ho, wo, c_out)


# ----------------------------------------------------------------------------
# Parameters: PyTorch-layout init + one-time prepack to MXU-friendly layout
# ----------------------------------------------------------------------------
def init_params(key):
    shapes = [
        (NDF, NC, 4, 4),
        (NDF * 2, NDF, 4, 4),
        (NDF * 4, NDF * 2, 4, 4),
        (NDF * 8, NDF * 4, 4, 4),
        (1, NDF * 8, 4, 4),
    ]
    params = []
    for shp in shapes:
        key, sub = jax.random.split(key)
        w = 0.05 * jax.random.normal(sub, shp, dtype=jnp.float32)
        c_out = shp[0]
        gamma = jnp.ones((c_out,), jnp.float32)   # PyTorch BN default init
        beta = jnp.zeros((c_out,), jnp.float32)
        params.append((w, gamma, beta))
    return params


def prepack_params(params):
    """PyTorch (C_out, C_in, kH, kW) -> (K, C_out) bf16, done once. No padding."""
    packed = []
    for w, gamma, beta in params:
        c_out, c_in, kh, kw = w.shape
        # K ordering (C_in, kH, kW) matches conv_general_dilated_patches.
        w_mat = w.reshape(c_out, c_in * kh * kw).T.astype(jnp.bfloat16)
        packed.append((w_mat,
                       gamma.reshape(1, c_out).astype(jnp.float32),
                       beta.reshape(1, c_out).astype(jnp.float32)))
    return packed


# ----------------------------------------------------------------------------
# Forward pass:  Discriminator.forward
# ----------------------------------------------------------------------------
LAYER_CFG = (
    (2, 1, "leaky"),    # Conv(3,64,4,2,1)    + BN + LeakyReLU
    (2, 1, "leaky"),    # Conv(64,128,4,2,1)  + BN + LeakyReLU
    (2, 1, "leaky"),    # Conv(128,256,4,2,1) + BN + LeakyReLU
    (2, 1, "leaky"),    # Conv(256,512,4,2,1) + BN + LeakyReLU
    (1, 1, "sigmoid"),  # Conv(512,1,4,1,1)   + BN + Sigmoid
)


def discriminator_forward(x_nchw, packed_params):
    x = jnp.transpose(x_nchw, (0, 2, 3, 1)).astype(jnp.bfloat16)   # NCHW->NHWC
    n_layers = len(packed_params)
    for li, ((w_mat, g, b), (stride, pad, act)) in enumerate(
            zip(packed_params, LAYER_CFG)):
        last = li == n_layers - 1
        x = _conv_bn_act(x, w_mat, g, b, stride=stride, pad=pad, act=act,
                         out_dtype=jnp.float32 if last else jnp.bfloat16)
    # Final activation is (N, 1, 1, 1) f32; PyTorch's output.view(-1, 1).
    return x.reshape(-1, 1)


if __name__ == "__main__":
    key = jax.random.PRNGKey(0)
    key, pkey, xkey = jax.random.split(key, 3)

    params = init_params(pkey)          # PyTorch-layout weights + BN affine
    packed = prepack_params(params)     # matmul-ready bf16 (once)

    # Small DCGAN-compatible input: batch=2, nc=3, 32x32 spatial
    # (32 -> 16 -> 8 -> 4 -> 2 -> 1 through the five convs)
    x = jax.random.normal(xkey, (2, 3, 32, 32), dtype=jnp.float32)

    fwd = jax.jit(discriminator_forward)
    out = jax.block_until_ready(fwd(x, packed))

    assert out.shape == (2, 1), out.shape
    assert jnp.all(jnp.isfinite(out))
    assert jnp.all((out >= 0.0) & (out <= 1.0))  # sigmoid output range
    print("KERNEL_OK")
</pallas_src>

<mosaic_0001>
module attributes {stable_mosaic.version = 11 : i64} {
  func.func @_fused_conv_bn_act_kernel(%arg0: i32, %arg1: i32, %arg2: memref<512x48xbf16, #tpu.memory_space<vmem>>, %arg3: memref<48x64xbf16, #tpu.memory_space<vmem>>, %arg4: memref<1x64xf32, #tpu.memory_space<vmem>>, %arg5: memref<1x64xf32, #tpu.memory_space<vmem>>, %arg6: memref<512x64xbf16, #tpu.memory_space<vmem>>, %arg7: memref<512x64xf32, #tpu.memory_space<vmem>>) attributes {dimension_semantics = [#tpu.dimension_semantics<parallel>, #tpu.dimension_semantics<arbitrary>], iteration_bounds = array<i64: 1, 1>, scalar_prefetch = 0 : i64, scratch_operands = 1 : i64, tpu.core_type = #tpu.core_type<tc>, window_params = [{transform_indices = @transform_0, window_bounds = array<i64: 512, 48>}, {transform_indices = @transform_1, window_bounds = array<i64: 48, 64>}, {transform_indices = @transform_2, window_bounds = array<i64: 1, 64>}, {transform_indices = @transform_3, window_bounds = array<i64: 1, 64>}, {transform_indices = @transform_4, window_bounds = array<i64: 512, 64>}]} {
    %c0_i32 = arith.constant 0 : i32
    %0 = arith.cmpi eq, %arg1, %c0_i32 : i32
    %1 = arith.extui %0 : i1 to i32
    %c0_i32_0 = arith.constant 0 : i32
    %2 = arith.cmpi ne, %1, %c0_i32_0 : i32
    scf.if %2 {
      %cst_10 = arith.constant 0.000000e+00 : f32
      %12 = vector.broadcast %cst_10 : f32 to vector<512x64xf32>
      %c0_11 = arith.constant 0 : index
      %c0_12 = arith.constant 0 : index
      %13 = vector.load %arg7[%c0_11, %c0_12] : memref<512x64xf32, #tpu.memory_space<vmem>>, vector<512x64xf32>
      tpu.vector_store %arg7[%c0_11, %c0_12], %12 {strides = array<i32>} : memref<512x64xf32, #tpu.memory_space<vmem>>, vector<512x64xf32>,
    } else {
    }
    %c0 = arith.constant 0 : index
    %c0_1 = arith.constant 0 : index
    %3 = vector.load %arg7[%c0, %c0_1] : memref<512x64xf32, #tpu.memory_space<vmem>>, vector<512x64xf32>
    %c0_2 = arith.constant 0 : index
    %c0_3 = arith.constant 0 : index
    %4 = vector.load %arg2[%c0_2, %c0_3] : memref<512x48xbf16, #tpu.memory_space<vmem>>, vector<512x48xbf16>
    %c0_4 = arith.constant 0 : index
    %c0_5 = arith.constant 0 : index
    %5 = vector.load %arg3[%c0_4, %c0_5] : memref<48x64xbf16, #tpu.memory_space<vmem>>, vector<48x64xbf16>
    %cst = arith.constant dense<0.000000e+00> : vector<512x64xf32>
    %6 = tpu.matmul %4, %5, %cst {dimension_numbers = #tpu.dot_dimension_numbers<[1], [0], [0], [1], [0, 0, 1, 1], [], []>} : vector<512x48xbf16>, vector<48x64xbf16>, vector<512x64xf32> -> vector<512x64xf32>
    %7 = arith.addf %3, %6 : vector<512x64xf32>
    %c0_6 = arith.constant 0 : index
    %c0_7 = arith.constant 0 : index
    %8 = vector.load %arg7[%c0_6, %c0_7] : memref<512x64xf32, #tpu.memory_space<vmem>>, vector<512x64xf32>
    tpu.vector_store %arg7[%c0_6, %c0_7], %7 {strides = array<i32>} : memref<512x64xf32, #tpu.memory_space<vmem>>, vector<512x64xf32>,
    %c0_i32_8 = arith.constant 0 : i32
    %9 = arith.cmpi eq, %arg1, %c0_i32_8 : i32
    %10 = arith.extui %9 : i1 to i32
    %c0_i32_9 = arith.constant 0 : i32
    %11 = arith.cmpi ne, %10, %c0_i32_9 : i32
    scf.if %11 {
      %c0_10 = arith.constant 0 : index
      %c0_11 = arith.constant 0 : index
      %12 = vector.load %arg7[%c0_10, %c0_11] : memref<512x64xf32, #tpu.memory_space<vmem>>, vector<512x64xf32>
      %cst_12 = arith.constant dense<0.000000e+00> : vector<64xf32>
      %13 = vector.multi_reduction <add>, %12, %cst_12 [0] : vector<512x64xf32> to vector<64xf32>
      %14 = vector.shape_cast %13 : vector<64xf32> to vector<1x64xf32>
      %cst_13 = arith.constant 0.001953125 : f32
      %15 = vector.broadcast %cst_13 : f32 to vector<1x64xf32>
      %16 = arith.mulf %14, %15 : vector<1x64xf32>
      %17 = vector.broadcast %16 : vector<1x64xf32> to vector<512x64xf32>
      %18 = arith.subf %12, %17 : vector<512x64xf32>
      %19 = arith.mulf %18, %18 : vector<512x64xf32>
      %cst_14 = arith.constant dense<0.000000e+00> : vector<64xf32>
      %20 = vector.multi_reduction <add>, %19, %cst_14 [0] : vector<512x64xf32> to vector<64xf32>
      %21 = vector.shape_cast %20 : vector<64xf32> to vector<1x64xf32>
      %cst_15 = arith.constant 0.001953125 : f32
      %22 = vector.broadcast %cst_15 : f32 to vector<1x64xf32>
      %23 = arith.mulf %21, %22 : vector<1x64xf32>
      %cst_16 = arith.constant 9.99999974E-6 : f32
      %24 = vector.broadcast %cst_16 : f32 to vector<1x64xf32>
      %25 = arith.addf %23, %24 : vector<1x64xf32>
      %26 = math.rsqrt %25 : vector<1x64xf32>
      %c0_17 = arith.constant 0 : index
      %c0_18 = arith.constant 0 : index
      %27 = vector.load %arg4[%c0_17, %c0_18] : memref<1x64xf32, #tpu.memory_space<vmem>>, vector<1x64xf32>
      %28 = arith.mulf %26, %27 : vector<1x64xf32>
      %29 = vector.broadcast %28 : vector<1x64xf32> to vector<512x64xf32>
      %30 = arith.mulf %18, %29 : vector<512x64xf32>
      %c0_19 = arith.constant 0 : index
      %c0_20 = arith.constant 0 : index
      %31 = vector.load %arg5[%c0_19, %c0_20] : memref<1x64xf32, #tpu.memory_space<vmem>>, vector<1x64xf32>
      %32 = vector.broadcast %31 : vector<1x64xf32> to vector<512x64xf32>
      %33 = arith.addf %30, %32 : vector<512x64xf32>
      %cst_21 = arith.constant 0.000000e+00 : f32
      %34 = vector.broadcast %cst_21 : f32 to vector<512x64xf32>
      %35 = arith.cmpf oge, %33, %34 : vector<512x64xf32>
      %cst_22 = arith.constant 0.00999999977 : f32
      %36 = vector.broadcast %cst_22 : f32 to vector<512x64xf32>
      %37 = arith.mulf %36, %33 : vector<512x64xf32>
      %38 = arith.select %35, %33, %37 : vector<512x64xi1>, vector<512x64xf32>
      %39 = arith.truncf %38 : vector<512x64xf32> to vector<512x64xbf16>
      %c0_23 = arith.constant 0 : index
      %c0_24 = arith.constant 0 : index
      %40 = vector.load %arg6[%c0_23, %c0_24] : memref<512x64xbf16, #tpu.memory_space<vmem>>, vector<512x64xbf16>
      tpu.vector_store %arg6[%c0_23, %c0_24], %39 {strides = array<i32>} : memref<512x64xbf16, #tpu.memory_space<vmem>>, vector<512x64xbf16>,
    } else {
    }
    return
  }
  func.func @transform_0(%arg0: i32, %arg1: i32) -> (i32, i32) {
    %c0_i32 = arith.constant 0 : i32
    %c0_i32_0 = arith.constant 0 : i32
    return %c0_i32, %arg1 : i32, i32
  }
  func.func @transform_1(%arg0: i32, %arg1: i32) -> (i32, i32) {
    %c0_i32 = arith.constant 0 : i32
    return %arg1, %arg0 : i32, i32
  }
  func.func @transform_2(%arg0: i32, %arg1: i32) -> (i32, i32) {
    %c0_i32 = arith.constant 0 : i32
    %c0_i32_0 = arith.constant 0 : i32
    return %c0_i32, %arg0 : i32, i32
  }
  func.func @transform_3(%arg0: i32, %arg1: i32) -> (i32, i32) {
    %c0_i32 = arith.constant 0 : i32
    %c0_i32_0 = arith.constant 0 : i32
    return %c0_i32, %arg0 : i32, i32
  }
  func.func @transform_4(%arg0: i32, %arg1: i32) -> (i32, i32) {
    %c0_i32 = arith.constant 0 : i32
    %c0_i32_0 = arith.constant 0 : i32
    return %c0_i32, %arg0 : i32, i32
  }
}

module attributes {stable_mosaic.version = 11 : i64} {
  func.func @_fused_conv_bn_act_kernel(%arg0: i32, %arg1: i32, %arg2: memref<128x1024xbf16, #tpu.memory_space<vmem>>, %arg3: memref<1024x128xbf16, #tpu.memory_space<vmem>>, %arg4: memref<1x128xf32, #tpu.memory_space<vmem>>, %arg5: memref<1x128xf32, #tpu.memory_space<vmem>>, %arg6: memref<128x128xbf16, #tpu.memory_space<vmem>>, %arg7: memref<128x128xf32, #tpu.memory_space<vmem>>) attributes {dimension_semantics = [#tpu.dimension_semantics<parallel>, #tpu.dimension_semantics<arbitrary>], iteration_bounds = array<i64: 1, 1>, scalar_prefetch = 0 : i64, scratch_operands = 1 : i64, tpu.core_type = #tpu.core_type<tc>, window_params = [{transform_indices = @transform_0, window_bounds = array<i64: 128, 1024>}, {transform_indices = @transform_1, window_bounds = array<i64: 1024, 128>}, {transform_indices = @transform_2, window_bounds = array<i64: 1, 128>}, {transform_indices = @transform_3, window_bounds = array<i64: 1, 128>}, {transform_indices = @transform_4, window_bounds = array<i64: 128, 128>}]} {
    %c0_i32 = arith.constant 0 : i32
    %0 = arith.cmpi eq, %arg1, %c0_i32 : i32
    %1 = arith.extui %0 : i1 to i32
    %c0_i32_0 = arith.constant 0 : i32
    %2 = arith.cmpi ne, %1, %c0_i32_0 : i32
    scf.if %2 {
      %cst_10 = arith.constant 0.000000e+00 : f32
      %12 = vector.broadcast %cst_10 : f32 to vector<128x128xf32>
      %c0_11 = arith.constant 0 : index
      %c0_12 = arith.constant 0 : index
      %13 = vector.load %arg7[%c0_11, %c0_12] : memref<128x128xf32, #tpu.memory_space<vmem>>, vector<128x128xf32>
      tpu.vector_store %arg7[%c0_11, %c0_12], %12 {strides = array<i32>} : memref<128x128xf32, #tpu.memory_space<vmem>>, vector<128x128xf32>,
    } else {
    }
    %c0 = arith.constant 0 : index
    %c0_1 = arith.constant 0 : index
    %3 = vector.load %arg7[%c0, %c0_1] : memref<128x128xf32, #tpu.memory_space<vmem>>, vector<128x128xf32>
    %c0_2 = arith.constant 0 : index
    %c0_3 = arith.constant 0 : index
    %4 = vector.load %arg2[%c0_2, %c0_3] : memref<128x1024xbf16, #tpu.memory_space<vmem>>, vector<128x1024xbf16>
    %c0_4 = arith.constant 0 : index
    %c0_5 = arith.constant 0 : index
    %5 = vector.load %arg3[%c0_4, %c0_5] : memref<1024x128xbf16, #tpu.memory_space<vmem>>, vector<1024x128xbf16>
    %cst = arith.constant dense<0.000000e+00> : vector<128x128xf32>
    %6 = tpu.matmul %4, %5, %cst {dimension_numbers = #tpu.dot_dimension_numbers<[1], [0], [0], [1], [0, 0, 1, 1], [], []>} : vector<128x1024xbf16>, vector<1024x128xbf16>, vector<128x128xf32> -> vector<128x128xf32>
    %7 = arith.addf %3, %6 : vector<128x128xf32>
    %c0_6 = arith.constant 0 : index
    %c0_7 = arith.constant 0 : index
    %8 = vector.load %arg7[%c0_6, %c0_7] : memref<128x128xf32, #tpu.memory_space<vmem>>, vector<128x128xf32>
    tpu.vector_store %arg7[%c0_6, %c0_7], %7 {strides = array<i32>} : memref<128x128xf32, #tpu.memory_space<vmem>>, vector<128x128xf32>,
    %c0_i32_8 = arith.constant 0 : i32
    %9 = arith.cmpi eq, %arg1, %c0_i32_8 : i32
    %10 = arith.extui %9 : i1 to i32
    %c0_i32_9 = arith.constant 0 : i32
    %11 = arith.cmpi ne, %10, %c0_i32_9 : i32
    scf.if %11 {
      %c0_10 = arith.constant 0 : index
      %c0_11 = arith.constant 0 : index
      %12 = vector.load %arg7[%c0_10, %c0_11] : memref<128x128xf32, #tpu.memory_space<vmem>>, vector<128x128xf32>
      %cst_12 = arith.constant dense<0.000000e+00> : vector<128xf32>
      %13 = vector.multi_reduction <add>, %12, %cst_12 [0] : vector<128x128xf32> to vector<128xf32>
      %14 = vector.shape_cast %13 : vector<128xf32> to vector<1x128xf32>
      %cst_13 = arith.constant 7.812500e-03 : f32
      %15 = vector.broadcast %cst_13 : f32 to vector<1x128xf32>
      %16 = arith.mulf %14, %15 : vector<1x128xf32>
      %17 = vector.broadcast %16 : vector<1x128xf32> to vector<128x128xf32>
      %18 = arith.subf %12, %17 : vector<128x128xf32>
      %19 = arith.mulf %18, %18 : vector<128x128xf32>
      %cst_14 = arith.constant dense<0.000000e+00> : vector<128xf32>
      %20 = vector.multi_reduction <add>, %19, %cst_14 [0] : vector<128x128xf32> to vector<128xf32>
      %21 = vector.shape_cast %20 : vector<128xf32> to vector<1x128xf32>
      %cst_15 = arith.constant 7.812500e-03 : f32
      %22 = vector.broadcast %cst_15 : f32 to vector<1x128xf32>
      %23 = arith.mulf %21, %22 : vector<1x128xf32>
      %cst_16 = arith.constant 9.99999974E-6 : f32
      %24 = vector.broadcast %cst_16 : f32 to vector<1x128xf32>
      %25 = arith.addf %23, %24 : vector<1x128xf32>
      %26 = math.rsqrt %25 : vector<1x128xf32>
      %c0_17 = arith.constant 0 : index
      %c0_18 = arith.constant 0 : index
      %27 = vector.load %arg4[%c0_17, %c0_18] : memref<1x128xf32, #tpu.memory_space<vmem>>, vector<1x128xf32>
      %28 = arith.mulf %26, %27 : vector<1x128xf32>
      %29 = vector.broadcast %28 : vector<1x128xf32> to vector<128x128xf32>
      %30 = arith.mulf %18, %29 : vector<128x128xf32>
      %c0_19 = arith.constant 0 : index
      %c0_20 = arith.constant 0 : index
      %31 = vector.load %arg5[%c0_19, %c0_20] : memref<1x128xf32, #tpu.memory_space<vmem>>, vector<1x128xf32>
      %32 = vector.broadcast %31 : vector<1x128xf32> to vector<128x128xf32>
      %33 = arith.addf %30, %32 : vector<128x128xf32>
      %cst_21 = arith.constant 0.000000e+00 : f32
      %34 = vector.broadcast %cst_21 : f32 to vector<128x128xf32>
      %35 = arith.cmpf oge, %33, %34 : vector<128x128xf32>
      %cst_22 = arith.constant 0.00999999977 : f32
      %36 = vector.broadcast %cst_22 : f32 to vector<128x128xf32>
      %37 = arith.mulf %36, %33 : vector<128x128xf32>
      %38 = arith.select %35, %33, %37 : vector<128x128xi1>, vector<128x128xf32>
      %39 = arith.truncf %38 : vector<128x128xf32> to vector<128x128xbf16>
      %c0_23 = arith.constant 0 : index
      %c0_24 = arith.constant 0 : index
      %40 = vector.load %arg6[%c0_23, %c0_24] : memref<128x128xbf16, #tpu.memory_space<vmem>>, vector<128x128xbf16>
      tpu.vector_store %arg6[%c0_23, %c0_24], %39 {strides = array<i32>} : memref<128x128xbf16, #tpu.memory_space<vmem>>, vector<128x128xbf16>,
    } else {
    }
    return
  }
  func.func @transform_0(%arg0: i32, %arg1: i32) -> (i32, i32) {
    %c0_i32 = arith.constant 0 : i32
    %c0_i32_0 = arith.constant 0 : i32
    return %c0_i32, %arg1 : i32, i32
  }
  func.func @transform_1(%arg0: i32, %arg1: i32) -> (i32, i32) {
    %c0_i32 = arith.constant 0 : i32
    return %arg1, %arg0 : i32, i32
  }
  func.func @transform_2(%arg0: i32, %arg1: i32) -> (i32, i32) {
    %c0_i32 = arith.constant 0 : i32
    %c0_i32_0 = arith.constant 0 : i32
    return %c0_i32, %arg0 : i32, i32
  }
  func.func @transform_3(%arg0: i32, %arg1: i32) -> (i32, i32) {
    %c0_i32 = arith.constant 0 : i32
    %c0_i32_0 = arith.constant 0 : i32
    return %c0_i32, %arg0 : i32, i32
  }
  func.func @transform_4(%arg0: i32, %arg1: i32) -> (i32, i32) {
    %c0_i32 = arith.constant 0 : i32
    %c0_i32_0 = arith.constant 0 : i32
    return %c0_i32, %arg0 : i32, i32
  }
}

module attributes {stable_mosaic.version = 11 : i64} {
  func.func @_fused_conv_bn_act_kernel(%arg0: i32, %arg1: i32, %arg2: memref<32x2048xbf16, #tpu.memory_space<vmem>>, %arg3: memref<2048x128xbf16, #tpu.memory_space<vmem>>, %arg4: memref<1x128xf32, #tpu.memory_space<vmem>>, %arg5: memref<1x128xf32, #tpu.memory_space<vmem>>, %arg6: memref<32x128xbf16, #tpu.memory_space<vmem>>, %arg7: memref<32x128xf32, #tpu.memory_space<vmem>>) attributes {dimension_semantics = [#tpu.dimension_semantics<parallel>, #tpu.dimension_semantics<arbitrary>], iteration_bounds = array<i64: 2, 1>, scalar_prefetch = 0 : i64, scratch_operands = 1 : i64, tpu.core_type = #tpu.core_type<tc>, window_params = [{transform_indices = @transform_0, window_bounds = array<i64: 32, 2048>}, {transform_indices = @transform_1, window_bounds = array<i64: 2048, 128>}, {transform_indices = @transform_2, window_bounds = array<i64: 1, 128>}, {transform_indices = @transform_3, window_bounds = array<i64: 1, 128>}, {transform_indices = @transform_4, window_bounds = array<i64: 32, 128>}]} {
    %c0_i32 = arith.constant 0 : i32
    %0 = arith.cmpi eq, %arg1, %c0_i32 : i32
    %1 = arith.extui %0 : i1 to i32
    %c0_i32_0 = arith.constant 0 : i32
    %2 = arith.cmpi ne, %1, %c0_i32_0 : i32
    scf.if %2 {
      %cst_10 = arith.constant 0.000000e+00 : f32
      %12 = vector.broadcast %cst_10 : f32 to vector<32x128xf32>
      %c0_11 = arith.constant 0 : index
      %c0_12 = arith.constant 0 : index
      %13 = vector.load %arg7[%c0_11, %c0_12] : memref<32x128xf32, #tpu.memory_space<vmem>>, vector<32x128xf32>
      tpu.vector_store %arg7[%c0_11, %c0_12], %12 {strides = array<i32>} : memref<32x128xf32, #tpu.memory_space<vmem>>, vector<32x128xf32>,
    } else {
    }
    %c0 = arith.constant 0 : index
    %c0_1 = arith.constant 0 : index
    %3 = vector.load %arg7[%c0, %c0_1] : memref<32x128xf32, #tpu.memory_space<vmem>>, vector<32x128xf32>
    %c0_2 = arith.constant 0 : index
    %c0_3 = arith.constant 0 : index
    %4 = vector.load %arg2[%c0_2, %c0_3] : memref<32x2048xbf16, #tpu.memory_space<vmem>>, vector<32x2048xbf16>
    %c0_4 = arith.constant 0 : index
    %c0_5 = arith.constant 0 : index
    %5 = vector.load %arg3[%c0_4, %c0_5] : memref<2048x128xbf16, #tpu.memory_space<vmem>>, vector<2048x128xbf16>
    %cst = arith.constant dense<0.000000e+00> : vector<32x128xf32>
    %6 = tpu.matmul %4, %5, %cst {dimension_numbers = #tpu.dot_dimension_numbers<[1], [0], [0], [1], [0, 0, 1, 1], [], []>} : vector<32x2048xbf16>, vector<2048x128xbf16>, vector<32x128xf32> -> vector<32x128xf32>
    %7 = arith.addf %3, %6 : vector<32x128xf32>
    %c0_6 = arith.constant 0 : index
    %c0_7 = arith.constant 0 : index
    %8 = vector.load %arg7[%c0_6, %c0_7] : memref<32x128xf32, #tpu.memory_space<vmem>>, vector<32x128xf32>
    tpu.vector_store %arg7[%c0_6, %c0_7], %7 {strides = array<i32>} : memref<32x128xf32, #tpu.memory_space<vmem>>, vector<32x128xf32>,
    %c0_i32_8 = arith.constant 0 : i32
    %9 = arith.cmpi eq, %arg1, %c0_i32_8 : i32
    %10 = arith.extui %9 : i1 to i32
    %c0_i32_9 = arith.constant 0 : i32
    %11 = arith.cmpi ne, %10, %c0_i32_9 : i32
    scf.if %11 {
      %c0_10 = arith.constant 0 : index
      %c0_11 = arith.constant 0 : index
      %12 = vector.load %arg7[%c0_10, %c0_11] : memref<32x128xf32, #tpu.memory_space<vmem>>, vector<32x128xf32>
      %cst_12 = arith.constant dense<0.000000e+00> : vector<128xf32>
      %13 = vector.multi_reduction <add>, %12, %cst_12 [0] : vector<32x128xf32> to vector<128xf32>
      %14 = vector.shape_cast %13 : vector<128xf32> to vector<1x128xf32>
      %cst_13 = arith.constant 3.125000e-02 : f32
      %15 = vector.broadcast %cst_13 : f32 to vector<1x128xf32>
      %16 = arith.mulf %14, %15 : vector<1x128xf32>
      %17 = vector.broadcast %16 : vector<1x128xf32> to vector<32x128xf32>
      %18 = arith.subf %12, %17 : vector<32x128xf32>
      %19 = arith.mulf %18, %18 : vector<32x128xf32>
      %cst_14 = arith.constant dense<0.000000e+00> : vector<128xf32>
      %20 = vector.multi_reduction <add>, %19, %cst_14 [0] : vector<32x128xf32> to vector<128xf32>
      %21 = vector.shape_cast %20 : vector<128xf32> to vector<1x128xf32>
      %cst_15 = arith.constant 3.125000e-02 : f32
      %22 = vector.broadcast %cst_15 : f32 to vector<1x128xf32>
      %23 = arith.mulf %21, %22 : vector<1x128xf32>
      %cst_16 = arith.constant 9.99999974E-6 : f32
      %24 = vector.broadcast %cst_16 : f32 to vector<1x128xf32>
      %25 = arith.addf %23, %24 : vector<1x128xf32>
      %26 = math.rsqrt %25 : vector<1x128xf32>
      %c0_17 = arith.constant 0 : index
      %c0_18 = arith.constant 0 : index
      %27 = vector.load %arg4[%c0_17, %c0_18] : memref<1x128xf32, #tpu.memory_space<vmem>>, vector<1x128xf32>
      %28 = arith.mulf %26, %27 : vector<1x128xf32>
      %29 = vector.broadcast %28 : vector<1x128xf32> to vector<32x128xf32>
      %30 = arith.mulf %18, %29 : vector<32x128xf32>
      %c0_19 = arith.constant 0 : index
      %c0_20 = arith.constant 0 : index
      %31 = vector.load %arg5[%c0_19, %c0_20] : memref<1x128xf32, #tpu.memory_space<vmem>>, vector<1x128xf32>
      %32 = vector.broadcast %31 : vector<1x128xf32> to vector<32x128xf32>
      %33 = arith.addf %30, %32 : vector<32x128xf32>
      %cst_21 = arith.constant 0.000000e+00 : f32
      %34 = vector.broadcast %cst_21 : f32 to vector<32x128xf32>
      %35 = arith.cmpf oge, %33, %34 : vector<32x128xf32>
      %cst_22 = arith.constant 0.00999999977 : f32
      %36 = vector.broadcast %cst_22 : f32 to vector<32x128xf32>
      %37 = arith.mulf %36, %33 : vector<32x128xf32>
      %38 = arith.select %35, %33, %37 : vector<32x128xi1>, vector<32x128xf32>
      %39 = arith.truncf %38 : vector<32x128xf32> to vector<32x128xbf16>
      %c0_23 = arith.constant 0 : index
      %c0_24 = arith.constant 0 : index
      %40 = vector.load %arg6[%c0_23, %c0_24] : memref<32x128xbf16, #tpu.memory_space<vmem>>, vector<32x128xbf16>
      tpu.vector_store %arg6[%c0_23, %c0_24], %39 {strides = array<i32>} : memref<32x128xbf16, #tpu.memory_space<vmem>>, vector<32x128xbf16>,
    } else {
    }
    return
  }
  func.func @transform_0(%arg0: i32, %arg1: i32) -> (i32, i32) {
    %c0_i32 = arith.constant 0 : i32
    %c0_i32_0 = arith.constant 0 : i32
    return %c0_i32, %arg1 : i32, i32
  }
  func.func @transform_1(%arg0: i32, %arg1: i32) -> (i32, i32) {
    %c0_i32 = arith.constant 0 : i32
    return %arg1, %arg0 : i32, i32
  }
  func.func @transform_2(%arg0: i32, %arg1: i32) -> (i32, i32) {
    %c0_i32 = arith.constant 0 : i32
    %c0_i32_0 = arith.constant 0 : i32
    return %c0_i32, %arg0 : i32, i32
  }
  func.func @transform_3(%arg0: i32, %arg1: i32) -> (i32, i32) {
    %c0_i32 = arith.constant 0 : i32
    %c0_i32_0 = arith.constant 0 : i32
    return %c0_i32, %arg0 : i32, i32
  }
  func.func @transform_4(%arg0: i32, %arg1: i32) -> (i32, i32) {
    %c0_i32 = arith.constant 0 : i32
    %c0_i32_0 = arith.constant 0 : i32
    return %c0_i32, %arg0 : i32, i32
  }
}

module attributes {stable_mosaic.version = 11 : i64} {
  func.func @_fused_conv_bn_act_kernel(%arg0: i32, %arg1: i32, %arg2: memref<8x4096xbf16, #tpu.memory_space<vmem>>, %arg3: memref<4096x128xbf16, #tpu.memory_space<vmem>>, %arg4: memref<1x128xf32, #tpu.memory_space<vmem>>, %arg5: memref<1x128xf32, #tpu.memory_space<vmem>>, %arg6: memref<8x128xbf16, #tpu.memory_space<vmem>>, %arg7: memref<8x128xf32, #tpu.memory_space<vmem>>) attributes {dimension_semantics = [#tpu.dimension_semantics<parallel>, #tpu.dimension_semantics<arbitrary>], iteration_bounds = array<i64: 4, 1>, scalar_prefetch = 0 : i64, scratch_operands = 1 : i64, tpu.core_type = #tpu.core_type<tc>, window_params = [{transform_indices = @transform_0, window_bounds = array<i64: 8, 4096>}, {transform_indices = @transform_1, window_bounds = array<i64: 4096, 128>}, {transform_indices = @transform_2, window_bounds = array<i64: 1, 128>}, {transform_indices = @transform_3, window_bounds = array<i64: 1, 128>}, {transform_indices = @transform_4, window_bounds = array<i64: 8, 128>}]} {
    %c0_i32 = arith.constant 0 : i32
    %0 = arith.cmpi eq, %arg1, %c0_i32 : i32
    %1 = arith.extui %0 : i1 to i32
    %c0_i32_0 = arith.constant 0 : i32
    %2 = arith.cmpi ne, %1, %c0_i32_0 : i32
    scf.if %2 {
      %cst_10 = arith.constant 0.000000e+00 : f32
      %12 = vector.broadcast %cst_10 : f32 to vector<8x128xf32>
      %c0_11 = arith.constant 0 : index
      %c0_12 = arith.constant 0 : index
      %13 = vector.load %arg7[%c0_11, %c0_12] : memref<8x128xf32, #tpu.memory_space<vmem>>, vector<8x128xf32>
      tpu.vector_store %arg7[%c0_11, %c0_12], %12 {strides = array<i32>} : memref<8x128xf32, #tpu.memory_space<vmem>>, vector<8x128xf32>,
    } else {
    }
    %c0 = arith.constant 0 : index
    %c0_1 = arith.constant 0 : index
    %3 = vector.load %arg7[%c0, %c0_1] : memref<8x128xf32, #tpu.memory_space<vmem>>, vector<8x128xf32>
    %c0_2 = arith.constant 0 : index
    %c0_3 = arith.constant 0 : index
    %4 = vector.load %arg2[%c0_2, %c0_3] : memref<8x4096xbf16, #tpu.memory_space<vmem>>, vector<8x4096xbf16>
    %c0_4 = arith.constant 0 : index
    %c0_5 = arith.constant 0 : index
    %5 = vector.load %arg3[%c0_4, %c0_5] : memref<4096x128xbf16, #tpu.memory_space<vmem>>, vector<4096x128xbf16>
    %cst = arith.constant dense<0.000000e+00> : vector<8x128xf32>
    %6 = tpu.matmul %4, %5, %cst {dimension_numbers = #tpu.dot_dimension_numbers<[1], [0], [0], [1], [0, 0, 1, 1], [], []>} : vector<8x4096xbf16>, vector<4096x128xbf16>, vector<8x128xf32> -> vector<8x128xf32>
    %7 = arith.addf %3, %6 : vector<8x128xf32>
    %c0_6 = arith.constant 0 : index
    %c0_7 = arith.constant 0 : index
    %8 = vector.load %arg7[%c0_6, %c0_7] : memref<8x128xf32, #tpu.memory_space<vmem>>, vector<8x128xf32>
    tpu.vector_store %arg7[%c0_6, %c0_7], %7 {strides = array<i32>} : memref<8x128xf32, #tpu.memory_space<vmem>>, vector<8x128xf32>,
    %c0_i32_8 = arith.constant 0 : i32
    %9 = arith.cmpi eq, %arg1, %c0_i32_8 : i32
    %10 = arith.extui %9 : i1 to i32
    %c0_i32_9 = arith.constant 0 : i32
    %11 = arith.cmpi ne, %10, %c0_i32_9 : i32
    scf.if %11 {
      %c0_10 = arith.constant 0 : index
      %c0_11 = arith.constant 0 : index
      %12 = vector.load %arg7[%c0_10, %c0_11] : memref<8x128xf32, #tpu.memory_space<vmem>>, vector<8x128xf32>
      %cst_12 = arith.constant dense<0.000000e+00> : vector<128xf32>
      %13 = vector.multi_reduction <add>, %12, %cst_12 [0] : vector<8x128xf32> to vector<128xf32>
      %14 = vector.shape_cast %13 : vector<128xf32> to vector<1x128xf32>
      %cst_13 = arith.constant 1.250000e-01 : f32
      %15 = vector.broadcast %cst_13 : f32 to vector<1x128xf32>
      %16 = arith.mulf %14, %15 : vector<1x128xf32>
      %17 = vector.broadcast %16 : vector<1x128xf32> to vector<8x128xf32>
      %18 = arith.subf %12, %17 : vector<8x128xf32>
      %19 = arith.mulf %18, %18 : vector<8x128xf32>
      %cst_14 = arith.constant dense<0.000000e+00> : vector<128xf32>
      %20 = vector.multi_reduction <add>, %19, %cst_14 [0] : vector<8x128xf32> to vector<128xf32>
      %21 = vector.shape_cast %20 : vector<128xf32> to vector<1x128xf32>
      %cst_15 = arith.constant 1.250000e-01 : f32
      %22 = vector.broadcast %cst_15 : f32 to vector<1x128xf32>
      %23 = arith.mulf %21, %22 : vector<1x128xf32>
      %cst_16 = arith.constant 9.99999974E-6 : f32
      %24 = vector.broadcast %cst_16 : f32 to vector<1x128xf32>
      %25 = arith.addf %23, %24 : vector<1x128xf32>
      %26 = math.rsqrt %25 : vector<1x128xf32>
      %c0_17 = arith.constant 0 : index
      %c0_18 = arith.constant 0 : index
      %27 = vector.load %arg4[%c0_17, %c0_18] : memref<1x128xf32, #tpu.memory_space<vmem>>, vector<1x128xf32>
      %28 = arith.mulf %26, %27 : vector<1x128xf32>
      %29 = vector.broadcast %28 : vector<1x128xf32> to vector<8x128xf32>
      %30 = arith.mulf %18, %29 : vector<8x128xf32>
      %c0_19 = arith.constant 0 : index
      %c0_20 = arith.constant 0 : index
      %31 = vector.load %arg5[%c0_19, %c0_20] : memref<1x128xf32, #tpu.memory_space<vmem>>, vector<1x128xf32>
      %32 = vector.broadcast %31 : vector<1x128xf32> to vector<8x128xf32>
      %33 = arith.addf %30, %32 : vector<8x128xf32>
      %cst_21 = arith.constant 0.000000e+00 : f32
      %34 = vector.broadcast %cst_21 : f32 to vector<8x128xf32>
      %35 = arith.cmpf oge, %33, %34 : vector<8x128xf32>
      %cst_22 = arith.constant 0.00999999977 : f32
      %36 = vector.broadcast %cst_22 : f32 to vector<8x128xf32>
      %37 = arith.mulf %36, %33 : vector<8x128xf32>
      %38 = arith.select %35, %33, %37 : vector<8x128xi1>, vector<8x128xf32>
      %39 = arith.truncf %38 : vector<8x128xf32> to vector<8x128xbf16>
      %c0_23 = arith.constant 0 : index
      %c0_24 = arith.constant 0 : index
      %40 = vector.load %arg6[%c0_23, %c0_24] : memref<8x128xbf16, #tpu.memory_space<vmem>>, vector<8x128xbf16>
      tpu.vector_store %arg6[%c0_23, %c0_24], %39 {strides = array<i32>} : memref<8x128xbf16, #tpu.memory_space<vmem>>, vector<8x128xbf16>,
    } else {
    }
    return
  }
  func.func @transform_0(%arg0: i32, %arg1: i32) -> (i32, i32) {
    %c0_i32 = arith.constant 0 : i32
    %c0_i32_0 = arith.constant 0 : i32
    return %c0_i32, %arg1 : i32, i32
  }
  func.func @transform_1(%arg0: i32, %arg1: i32) -> (i32, i32) {
    %c0_i32 = arith.constant 0 : i32
    return %arg1, %arg0 : i32, i32
  }
  func.func @transform_2(%arg0: i32, %arg1: i32) -> (i32, i32) {
    %c0_i32 = arith.constant 0 : i32
    %c0_i32_0 = arith.constant 0 : i32
    return %c0_i32, %arg0 : i32, i32
  }
  func.func @transform_3(%arg0: i32, %arg1: i32) -> (i32, i32) {
    %c0_i32 = arith.constant 0 : i32
    %c0_i32_0 = arith.constant 0 : i32
    return %c0_i32, %arg0 : i32, i32
  }
  func.func @transform_4(%arg0: i32, %arg1: i32) -> (i32, i32) {
    %c0_i32 = arith.constant 0 : i32
    %c0_i32_0 = arith.constant 0 : i32
    return %c0_i32, %arg0 : i32, i32
  }
}

module attributes {stable_mosaic.version = 11 : i64} {
  func.func @_fused_conv_bn_act_kernel(%arg0: i32, %arg1: i32, %arg2: memref<2x8192xbf16, #tpu.memory_space<vmem>>, %arg3: memref<8192x1xbf16, #tpu.memory_space<vmem>>, %arg4: memref<1x1xf32, #tpu.memory_space<vmem>>, %arg5: memref<1x1xf32, #tpu.memory_space<vmem>>, %arg6: memref<2x1xf32, #tpu.memory_space<vmem>>, %arg7: memref<2x1xf32, #tpu.memory_space<vmem>>) attributes {dimension_semantics = [#tpu.dimension_semantics<parallel>, #tpu.dimension_semantics<arbitrary>], iteration_bounds = array<i64: 1, 1>, scalar_prefetch = 0 : i64, scratch_operands = 1 : i64, tpu.core_type = #tpu.core_type<tc>, window_params = [{transform_indices = @transform_0, window_bounds = array<i64: 2, 8192>}, {transform_indices = @transform_1, window_bounds = array<i64: 8192, 1>}, {transform_indices = @transform_2, window_bounds = array<i64: 1, 1>}, {transform_indices = @transform_3, window_bounds = array<i64: 1, 1>}, {transform_indices = @transform_4, window_bounds = array<i64: 2, 1>}]} {
    %c0_i32 = arith.constant 0 : i32
    %0 = arith.cmpi eq, %arg1, %c0_i32 : i32
    %1 = arith.extui %0 : i1 to i32
    %c0_i32_0 = arith.constant 0 : i32
    %2 = arith.cmpi ne, %1, %c0_i32_0 : i32
    scf.if %2 {
      %cst_10 = arith.constant 0.000000e+00 : f32
      %12 = vector.broadcast %cst_10 : f32 to vector<2x1xf32>
      %c0_11 = arith.constant 0 : index
      %c0_12 = arith.constant 0 : index
      %13 = vector.load %arg7[%c0_11, %c0_12] : memref<2x1xf32, #tpu.memory_space<vmem>>, vector<2x1xf32>
      tpu.vector_store %arg7[%c0_11, %c0_12], %12 {strides = array<i32>} : memref<2x1xf32, #tpu.memory_space<vmem>>, vector<2x1xf32>,
    } else {
    }
    %c0 = arith.constant 0 : index
    %c0_1 = arith.constant 0 : index
    %3 = vector.load %arg7[%c0, %c0_1] : memref<2x1xf32, #tpu.memory_space<vmem>>, vector<2x1xf32>
    %c0_2 = arith.constant 0 : index
    %c0_3 = arith.constant 0 : index
    %4 = vector.load %arg2[%c0_2, %c0_3] : memref<2x8192xbf16, #tpu.memory_space<vmem>>, vector<2x8192xbf16>
    %c0_4 = arith.constant 0 : index
    %c0_5 = arith.constant 0 : index
    %5 = vector.load %arg3[%c0_4, %c0_5] : memref<8192x1xbf16, #tpu.memory_space<vmem>>, vector<8192x1xbf16>
    %cst = arith.constant dense<0.000000e+00> : vector<2x1xf32>
    %6 = tpu.matmul %4, %5, %cst {dimension_numbers = #tpu.dot_dimension_numbers<[1], [0], [0], [1], [0, 0, 1, 1], [], []>} : vector<2x8192xbf16>, vector<8192x1xbf16>, vector<2x1xf32> -> vector<2x1xf32>
    %7 = arith.addf %3, %6 : vector<2x1xf32>
    %c0_6 = arith.constant 0 : index
    %c0_7 = arith.constant 0 : index
    %8 = vector.load %arg7[%c0_6, %c0_7] : memref<2x1xf32, #tpu.memory_space<vmem>>, vector<2x1xf32>
    tpu.vector_store %arg7[%c0_6, %c0_7], %7 {strides = array<i32>} : memref<2x1xf32, #tpu.memory_space<vmem>>, vector<2x1xf32>,
    %c0_i32_8 = arith.constant 0 : i32
    %9 = arith.cmpi eq, %arg1, %c0_i32_8 : i32
    %10 = arith.extui %9 : i1 to i32
    %c0_i32_9 = arith.constant 0 : i32
    %11 = arith.cmpi ne, %10, %c0_i32_9 : i32
    scf.if %11 {
      %c0_10 = arith.constant 0 : index
      %c0_11 = arith.constant 0 : index
      %12 = vector.load %arg7[%c0_10, %c0_11] : memref<2x1xf32, #tpu.memory_space<vmem>>, vector<2x1xf32>
      %cst_12 = arith.constant dense<0.000000e+00> : vector<1xf32>
      %13 = vector.multi_reduction <add>, %12, %cst_12 [0] : vector<2x1xf32> to vector<1xf32>
      %14 = vector.shape_cast %13 : vector<1xf32> to vector<1x1xf32>
      %cst_13 = arith.constant 5.000000e-01 : f32
      %15 = vector.broadcast %cst_13 : f32 to vector<1x1xf32>
      %16 = arith.mulf %14, %15 : vector<1x1xf32>
      %17 = vector.broadcast %16 : vector<1x1xf32> to vector<2x1xf32>
      %18 = arith.subf %12, %17 : vector<2x1xf32>
      %19 = arith.mulf %18, %18 : vector<2x1xf32>
      %cst_14 = arith.constant dense<0.000000e+00> : vector<1xf32>
      %20 = vector.multi_reduction <add>, %19, %cst_14 [0] : vector<2x1xf32> to vector<1xf32>
      %21 = vector.shape_cast %20 : vector<1xf32> to vector<1x1xf32>
      %cst_15 = arith.constant 5.000000e-01 : f32
      %22 = vector.broadcast %cst_15 : f32 to vector<1x1xf32>
      %23 = arith.mulf %21, %22 : vector<1x1xf32>
      %cst_16 = arith.constant 9.99999974E-6 : f32
      %24 = vector.broadcast %cst_16 : f32 to vector<1x1xf32>
      %25 = arith.addf %23, %24 : vector<1x1xf32>
      %26 = math.rsqrt %25 : vector<1x1xf32>
      %c0_17 = arith.constant 0 : index
      %c0_18 = arith.constant 0 : index
      %27 = vector.load %arg4[%c0_17, %c0_18] : memref<1x1xf32, #tpu.memory_space<vmem>>, vector<1x1xf32>
      %28 = arith.mulf %26, %27 : vector<1x1xf32>
      %29 = vector.broadcast %28 : vector<1x1xf32> to vector<2x1xf32>
      %30 = arith.mulf %18, %29 : vector<2x1xf32>
      %c0_19 = arith.constant 0 : index
      %c0_20 = arith.constant 0 : index
      %31 = vector.load %arg5[%c0_19, %c0_20] : memref<1x1xf32, #tpu.memory_space<vmem>>, vector<1x1xf32>
      %32 = vector.broadcast %31 : vector<1x1xf32> to vector<2x1xf32>
      %33 = arith.addf %30, %32 : vector<2x1xf32>
      %cst_21 = arith.constant 0.000000e+00 : f32
      %34 = vector.broadcast %cst_21 : f32 to vector<2x1xf32>
      %35 = arith.subf %34, %33 : vector<2x1xf32>
      %36 = math.exp %35 : vector<2x1xf32>
      %cst_22 = arith.constant 1.000000e+00 : f32
      %37 = vector.broadcast %cst_22 : f32 to vector<2x1xf32>
      %38 = arith.addf %37, %36 : vector<2x1xf32>
      %cst_23 = arith.constant 1.000000e+00 : f32
      %39 = vector.broadcast %cst_23 : f32 to vector<2x1xf32>
      %40 = arith.divf %39, %38 : vector<2x1xf32>
      %c0_24 = arith.constant 0 : index
      %c0_25 = arith.constant 0 : index
      %41 = vector.load %arg6[%c0_24, %c0_25] : memref<2x1xf32, #tpu.memory_space<vmem>>, vector<2x1xf32>
      tpu.vector_store %arg6[%c0_24, %c0_25], %40 {strides = array<i32>} : memref<2x1xf32, #tpu.memory_space<vmem>>, vector<2x1xf32>,
    } else {
    }
    return
  }
  func.func @transform_0(%arg0: i32, %arg1: i32) -> (i32, i32) {
    %c0_i32 = arith.constant 0 : i32
    %c0_i32_0 = arith.constant 0 : i32
    return %c0_i32, %arg1 : i32, i32
  }
  func.func @transform_1(%arg0: i32, %arg1: i32) -> (i32, i32) {
    %c0_i32 = arith.constant 0 : i32
    return %arg1, %arg0 : i32, i32
  }
  func.func @transform_2(%arg0: i32, %arg1: i32) -> (i32, i32) {
    %c0_i32 = arith.constant 0 : i32
    %c0_i32_0 = arith.constant 0 : i32
    return %c0_i32, %arg0 : i32, i32
  }
  func.func @transform_3(%arg0: i32, %arg1: i32) -> (i32, i32) {
    %c0_i32 = arith.constant 0 : i32
    %c0_i32_0 = arith.constant 0 : i32
    return %c0_i32, %arg0 : i32, i32
  }
  func.func @transform_4(%arg0: i32, %arg1: i32) -> (i32, i32) {
    %c0_i32 = arith.constant 0 : i32
    %c0_i32_0 = arith.constant 0 : i32
    return %c0_i32, %arg0 : i32, i32
  }
}

</mosaic_0001>

<bundles_post_ra>
// kernel: discriminator_forward.5
= control target key start
LH: loop header
LB: loop body
LE: loop exit
PB: predicated region body
PF: predicated region fallthrough
CT: control target
= control target key end

     0   :  { %vm399_vm0 = vcmask 392192   ;;  %vm22_vm1 = vcmask 523264   ;;  %v1948_v23 = vmov 0.0   ;;  %vm1659_vm15 = vcmask 519168   ;;  %s4078_s1 = inlined_call_operand.vmem [shape: bf16[48,64], index: 1, kind: input, shape index: {}]   ;;  %s4079_s0 = inlined_call_operand.vmem [shape: bf16[512,48], index: 0, kind: input, shape index: {}]   ;;  %s4080_s3 = inlined_call_operand.vmem [shape: f32[1,64], index: 3, kind: input, shape index: {}]   ;;  %s4081_s2 = inlined_call_operand.vmem [shape: f32[1,64], index: 2, kind: input, shape index: {}]   ;;  %s4082_s4 = inlined_call_operand.vmem [shape: bf16[512,64], index: 4, kind: output, shape index: {}]  }
   0x1   :  { %v1934_v0 = vld [vmem:[%s4078_s1 + $0x10] sm:$0xff]  ;;  %v1933_v1 = vld [vmem:[%s4078_s1 + $0x8] sm:$0xff]  ;;  %v1932_v2 = vld [vmem:[%s4078_s1] sm:$0xff]  ;;  %23 = vst.msk [vmem:[#allocation2] sm:$0xff] %vm22_vm1, %v1948_v23 }
   0x2   :  { %501 = vmatpush.bf16.msra.mxu0 %v1934_v0  ;;  %1935 = vmatpush.bf16.msra.mxu1 %v1934_v0  ;;  %v1900_v3 = vld [vmem:[%s4079_s0] sm:$0xff]  ;;  %v1901_v5 = vld [vmem:[%s4079_s0 + $0x8] sm:$0xff]  ;;  %v1902_v8 = vld [vmem:[%s4079_s0 + $0x10] sm:$0xff]  ;;  %24 = vst.msk [vmem:[#allocation2 + $0x8] sm:$0xff] %vm22_vm1, %v1948_v23 }
   0x3   :  { %1936 = vmatpush.bf16.msra.mxu2 %v1934_v0  ;;  %1937 = vmatpush.bf16.msra.mxu3 %v1934_v0  ;;  %v1908_v4 = vld [vmem:[%s4079_s0 + $0x40] sm:$0xff]  ;;  %v1909_v6 = vld [vmem:[%s4079_s0 + $0x48] sm:$0xff]  ;;  %v1910_v9 = vld [vmem:[%s4079_s0 + $0x50] sm:$0xff]  ;;  %25 = vst.msk [vmem:[#allocation2 + $0x10] sm:$0xff] %vm22_vm1, %v1948_v23 }
   0x4   :  { %v1916_v7 = vld [vmem:[%s4079_s0 + $0x80] sm:$0xff]  ;;  %v1917_v10 = vld [vmem:[%s4079_s0 + $0x88] sm:$0xff]  ;;  %v1903_v11 = vld [vmem:[%s4079_s0 + $0x18] sm:$0xff]  ;;  %26 = vst.msk [vmem:[#allocation2 + $0x18] sm:$0xff] %vm22_vm1, %v1948_v23 }
   0x5   :  { %v1911_v12 = vld [vmem:[%s4079_s0 + $0x58] sm:$0xff]  ;;  %v1918_v13 = vld [vmem:[%s4079_s0 + $0x90] sm:$0xff]  ;;  %v1924_v14 = vld [vmem:[%s4079_s0 + $0xc0] sm:$0xff]  ;;  %27 = vst.msk [vmem:[#allocation2 + $0x20] sm:$0xff] %vm22_vm1, %v1948_v23 }
   0x6   :  { %502 = vmatpush.bf16.msra.mxu0 %v1933_v1  ;;  %1938 = vmatpush.bf16.msra.mxu1 %v1933_v1  ;;  %v1904_v15 = vld [vmem:[%s4079_s0 + $0x20] sm:$0xff]  ;;  %v1919_v17 = vld [vmem:[%s4079_s0 + $0x98] sm:$0xff]  ;;  %v1925_v18 = vld [vmem:[%s4079_s0 + $0xc8] sm:$0xff]  ;;  %28 = vst.msk [vmem:[#allocation2 + $0x28] sm:$0xff] %vm22_vm1, %v1948_v23 }
   0x7   :  { %1939 = vmatpush.bf16.msra.mxu2 %v1933_v1  ;;  %1940 = vmatpush.bf16.msra.mxu3 %v1933_v1  ;;  %v1912_v16 = vld [vmem:[%s4079_s0 + $0x60] sm:$0xff]  ;;  %v1905_v19 = vld [vmem:[%s4079_s0 + $0x28] sm:$0xff]  ;;  %v1926_v22 = vld [vmem:[%s4079_s0 + $0xd0] sm:$0xff]  ;;  %29 = vst.msk [vmem:[#allocation2 + $0x30] sm:$0xff] %vm22_vm1, %v1948_v23 }
   0x8   :  { %v1913_v20 = vld [vmem:[%s4079_s0 + $0x68] sm:$0xff]  ;;  %v1920_v21 = vld [vmem:[%s4079_s0 + $0xa0] sm:$0xff]  ;;  %30 = vst.msk [vmem:[#allocation2 + $0x38] sm:$0xff] %vm22_vm1, %v1948_v23  ;;  %v1906_v24 = vld [vmem:[%s4079_s0 + $0x30] sm:$0xff] }
   0x9   :  { %31 = vst.msk [vmem:[#allocation2 + $0x40] sm:$0xff] %vm22_vm1, %v1948_v23  ;;  %v1914_v25 = vld [vmem:[%s4079_s0 + $0x70] sm:$0xff]  ;;  %v1921_v26 = vld [vmem:[%s4079_s0 + $0xa8] sm:$0xff]  ;;  %v1927_v27 = vld [vmem:[%s4079_s0 + $0xd8] sm:$0xff] }
   0xa   :  { %503 = vmatpush.bf16.msra.mxu0 %v1932_v2  ;;  %1941 = vmatpush.bf16.msra.mxu1 %v1932_v2  ;;  %32 = vst.msk [vmem:[#allocation2 + $0x48] sm:$0xff] %vm22_vm1, %v1948_v23  ;;  %v1907_v28 = vld [vmem:[%s4079_s0 + $0x38] sm:$0xff]  ;;  %v1922_v30 = vld [vmem:[%s4079_s0 + $0xb0] sm:$0xff]  ;;  %v1928_v31 = vld [vmem:[%s4079_s0 + $0xe0] sm:$0xff] }
   0xb   :  { %1942 = vmatpush.bf16.msra.mxu2 %v1932_v2  ;;  %1943 = vmatpush.bf16.msra.mxu3 %v1932_v2  ;;  %33 = vst.msk [vmem:[#allocation2 + $0x50] sm:$0xff] %vm22_vm1, %v1948_v23  ;;  %v1915_v29 = vld [vmem:[%s4079_s0 + $0x78] sm:$0xff]  ;;  %v87_v32 = vld [vmem:[#allocation2] sm:$0xff]  ;;  %v1929_v39 = vld [vmem:[%s4079_s0 + $0xe8] sm:$0xff] }
   0xc   :  { %34 = vst.msk [vmem:[#allocation2 + $0x58] sm:$0xff] %vm22_vm1, %v1948_v23  ;;  %v1923_v38 = vld [vmem:[%s4079_s0 + $0xb8] sm:$0xff]  ;;  %v88_v40 = vld [vmem:[#allocation2 + $0x8] sm:$0xff]  ;;  %v89_v41 = vld [vmem:[#allocation2 + $0x10] sm:$0xff] }
   0xd   :  { %1868 = vmatmul.msk.bf16.vlgmr.msra.gmra.mxu0 %vm399_vm0, %v1900_v3  ;;  %1876 = vmatmul.msk.bf16.vlgmr.msra.gmra.mxu1 %vm399_vm0, %v1908_v4  ;;  %35 = vst.msk [vmem:[#allocation2 + $0x60] sm:$0xff] %vm22_vm1, %v1948_v23  ;;  %v90_v52 = vld [vmem:[#allocation2 + $0x18] sm:$0xff]  ;;  %v1930_v58 = vld [vmem:[%s4079_s0 + $0xf0] sm:$0xff]  ;;  %v91_v59 = vld [vmem:[#allocation2 + $0x20] sm:$0xff] }
   0xe   :  { %1884 = vmatmul.msk.bf16.vlgmr.msra.gmra.mxu2 %vm399_vm0, %v1916_v7  ;;  %1892 = vmatmul.msk.bf16.vlgmr.msra.gmra.mxu3 %vm399_vm0, %v1924_v14  ;;  %36 = vst.msk [vmem:[#allocation2 + $0x68] sm:$0xff] %vm22_vm1, %v1948_v23  ;;  %v92_v4 = vld [vmem:[#allocation2 + $0x28] sm:$0xff]  ;;  %v93_v14 = vld [vmem:[#allocation2 + $0x30] sm:$0xff] }
   0xf   :  { %37 = vst.msk [vmem:[#allocation2 + $0x70] sm:$0xff] %vm22_vm1, %v1948_v23 }
  0x10   :  { %38 = vst.msk [vmem:[#allocation2 + $0x78] sm:$0xff] %vm22_vm1, %v1948_v23 }
  0x11   :  { %39 = vst.msk [vmem:[#allocation2 + $0x80] sm:$0xff] %vm22_vm1, %v1948_v23 }
  0x12   :  { %40 = vst.msk [vmem:[#allocation2 + $0x88] sm:$0xff] %vm22_vm1, %v1948_v23 }
  0x13   :  { %41 = vst.msk [vmem:[#allocation2 + $0x90] sm:$0xff] %vm22_vm1, %v1948_v23 }
  0x14   :  { %42 = vst.msk [vmem:[#allocation2 + $0x98] sm:$0xff] %vm22_vm1, %v1948_v23 }
  0x15   :  { %43 = vst.msk [vmem:[#allocation2 + $0xa0] sm:$0xff] %vm22_vm1, %v1948_v23 }
  0x16   :  { %44 = vst.msk [vmem:[#allocation2 + $0xa8] sm:$0xff] %vm22_vm1, %v1948_v23 }
  0x17   :  { %45 = vst.msk [vmem:[#allocation2 + $0xb0] sm:$0xff] %vm22_vm1, %v1948_v23 }
  0x18   :  { %46 = vst.msk [vmem:[#allocation2 + $0xb8] sm:$0xff] %vm22_vm1, %v1948_v23  ;;  %v103_v43 = vld [vmem:[#allocation2 + $0x80] sm:$0xff] }
  0x19   :  { %47 = vst.msk [vmem:[#allocation2 + $0xc0] sm:$0xff] %vm22_vm1, %v1948_v23  ;;  %v104_v45 = vld [vmem:[#allocation2 + $0x88] sm:$0xff] }
  0x1a   :  { %48 = vst.msk [vmem:[#allocation2 + $0xc8] sm:$0xff] %vm22_vm1, %v1948_v23  ;;  %v105_v50 = vld [vmem:[#allocation2 + $0x90] sm:$0xff] }
  0x1b   :  { %49 = vst.msk [vmem:[#allocation2 + $0xd0] sm:$0xff] %vm22_vm1, %v1948_v23  ;;  %v106_v55 = vld [vmem:[#allocation2 + $0x98] sm:$0xff] }
  0x1c   :  { %50 = vst.msk [vmem:[#allocation2 + $0xd8] sm:$0xff] %vm22_vm1, %v1948_v23  ;;  %v107_v0 = vld [vmem:[#allocation2 + $0xa0] sm:$0xff] }
  0x1d   :  { %1869 = vmatmul.msk.bf16.gmra.mxu0 %vm399_vm0, %v1901_v5  ;;  %1877 = vmatmul.msk.bf16.gmra.mxu1 %vm399_vm0, %v1909_v6  ;;  %51 = vst.msk [vmem:[#allocation2 + $0xe0] sm:$0xff] %vm22_vm1, %v1948_v23  ;;  %v108_v7 = vld [vmem:[#allocation2 + $0xa8] sm:$0xff] }
  0x1e   :  { %1885 = vmatmul.msk.bf16.gmra.mxu2 %vm399_vm0, %v1917_v10  ;;  %1893 = vmatmul.msk.bf16.gmra.mxu3 %vm399_vm0, %v1925_v18  ;;  %52 = vst.msk [vmem:[#allocation2 + $0xe8] sm:$0xff] %vm22_vm1, %v1948_v23 }
  0x1f   :  { %53 = vst.msk [vmem:[#allocation2 + $0xf0] sm:$0xff] %vm22_vm1, %v1948_v23 }
  0x20   :  { %54 = vst.msk [vmem:[#allocation2 + $0xf8] sm:$0xff] %vm22_vm1, %v1948_v23 }
  0x21   :  { %55 = vst.msk [vmem:[#allocation2 + $0x100] sm:$0xff] %vm22_vm1, %v1948_v23 }
  0x22   :  { %56 = vst.msk [vmem:[#allocation2 + $0x108] sm:$0xff] %vm22_vm1, %v1948_v23 }
  0x23   :  { %57 = vst.msk [vmem:[#allocation2 + $0x110] sm:$0xff] %vm22_vm1, %v1948_v23 }
  0x24   :  { %58 = vst.msk [vmem:[#allocation2 + $0x118] sm:$0xff] %vm22_vm1, %v1948_v23 }
  0x25   :  { %59 = vst.msk [vmem:[#allocation2 + $0x120] sm:$0xff] %vm22_vm1, %v1948_v23 }
  0x26   :  { %60 = vst.msk [vmem:[#allocation2 + $0x128] sm:$0xff] %vm22_vm1, %v1948_v23 }
  0x27   :  { %61 = vst.msk [vmem:[#allocation2 + $0x130] sm:$0xff] %vm22_vm1, %v1948_v23 }
  0x28   :  { %62 = vst.msk [vmem:[#allocation2 + $0x138] sm:$0xff] %vm22_vm1, %v1948_v23  ;;  %v119_v1 = vld [vmem:[#allocation2 + $0x100] sm:$0xff] }
  0x29   :  { %63 = vst.msk [vmem:[#allocation2 + $0x140] sm:$0xff] %vm22_vm1, %v1948_v23 }
  0x2a   :  { %64 = vst.msk [vmem:[#allocation2 + $0x148] sm:$0xff] %vm22_vm1, %v1948_v23 }
  0x2b   :  { %65 = vst.msk [vmem:[#allocation2 + $0x150] sm:$0xff] %vm22_vm1, %v1948_v23 }
  0x2c   :  { %66 = vst.msk [vmem:[#allocation2 + $0x158] sm:$0xff] %vm22_vm1, %v1948_v23 }
  0x2d   :  { %1870 = vmatmul.msk.bf16.gmra.mxu0 %vm399_vm0, %v1902_v8  ;;  %1878 = vmatmul.msk.bf16.gmra.mxu1 %vm399_vm0, %v1910_v9  ;;  %67 = vst.msk [vmem:[#allocation2 + $0x160] sm:$0xff] %vm22_vm1, %v1948_v23  ;;  %v120_v9 = vld [vmem:[#allocation2 + $0x108] sm:$0xff] }
  0x2e   :  { %1886 = vmatmul.msk.bf16.gmra.mxu2 %vm399_vm0, %v1918_v13  ;;  %1894 = vmatmul.msk.bf16.gmra.mxu3 %vm399_vm0, %v1926_v22  ;;  %68 = vst.msk [vmem:[#allocation2 + $0x168] sm:$0xff] %vm22_vm1, %v1948_v23  ;;  %v1931_v13 = vld [vmem:[%s4079_s0 + $0xf8] sm:$0xff] }
  0x2f   :  { %69 = vst.msk [vmem:[#allocation2 + $0x170] sm:$0xff] %vm22_vm1, %v1948_v23 }
  0x30   :  { %70 = vst.msk [vmem:[#allocation2 + $0x178] sm:$0xff] %vm22_vm1, %v1948_v23 }
  0x31   :  { %71 = vst.msk [vmem:[#allocation2 + $0x180] sm:$0xff] %vm22_vm1, %v1948_v23 }
  0x32   :  { %72 = vst.msk [vmem:[#allocation2 + $0x188] sm:$0xff] %vm22_vm1, %v1948_v23 }
  0x33   :  { %73 = vst.msk [vmem:[#allocation2 + $0x190] sm:$0xff] %vm22_vm1, %v1948_v23 }
  0x34   :  { %74 = vst.msk [vmem:[#allocation2 + $0x198] sm:$0xff] %vm22_vm1, %v1948_v23 }
  0x35   :  { %75 = vst.msk [vmem:[#allocation2 + $0x1a0] sm:$0xff] %vm22_vm1, %v1948_v23 }
  0x36   :  { %76 = vst.msk [vmem:[#allocation2 + $0x1a8] sm:$0xff] %vm22_vm1, %v1948_v23 }
  0x37   :  { %77 = vst.msk [vmem:[#allocation2 + $0x1b0] sm:$0xff] %vm22_vm1, %v1948_v23 }
  0x38   :  { %78 = vst.msk [vmem:[#allocation2 + $0x1b8] sm:$0xff] %vm22_vm1, %v1948_v23 }
  0x39   :  { %79 = vst.msk [vmem:[#allocation2 + $0x1c0] sm:$0xff] %vm22_vm1, %v1948_v23 }
  0x3a   :  { %80 = vst.msk [vmem:[#allocation2 + $0x1c8] sm:$0xff] %vm22_vm1, %v1948_v23 }
  0x3b   :  { %81 = vst.msk [vmem:[#allocation2 + $0x1d0] sm:$0xff] %vm22_vm1, %v1948_v23 }
  0x3c   :  { %82 = vst.msk [vmem:[#allocation2 + $0x1d8] sm:$0xff] %vm22_vm1, %v1948_v23 }
  0x3d   :  { %1871 = vmatmul.msk.bf16.gmra.mxu0 %vm399_vm0, %v1903_v11  ;;  %1879 = vmatmul.msk.bf16.gmra.mxu1 %vm399_vm0, %v1911_v12  ;;  %83 = vst.msk [vmem:[#allocation2 + $0x1e0] sm:$0xff] %vm22_vm1, %v1948_v23 }
  0x3e   :  { %1887 = vmatmul.msk.bf16.gmra.mxu2 %vm399_vm0, %v1919_v17  ;;  %1895 = vmatmul.msk.bf16.gmra.mxu3 %vm399_vm0, %v1927_v27  ;;  %84 = vst.msk [vmem:[#allocation2 + $0x1e8] sm:$0xff] %vm22_vm1, %v1948_v23 }
  0x3f   :  { %85 = vst.msk [vmem:[#allocation2 + $0x1f0] sm:$0xff] %vm22_vm1, %v1948_v23 }
  0x40   :  { %86 = vst.msk [vmem:[#allocation2 + $0x1f8] sm:$0xff] %vm22_vm1, %v1948_v23  ;;  %v94_v23 = vld [vmem:[#allocation2 + $0x38] sm:$0xff] }
  0x4d   :  { %1872 = vmatmul.msk.bf16.gmra.mxu0 %vm399_vm0, %v1904_v15  ;;  %1880 = vmatmul.msk.bf16.gmra.mxu1 %vm399_vm0, %v1912_v16 }
  0x4e   :  { %1888 = vmatmul.msk.bf16.gmra.mxu2 %vm399_vm0, %v1920_v21  ;;  %1896 = vmatmul.msk.bf16.gmra.mxu3 %vm399_vm0, %v1928_v31 }
  0x5d   :  { %1873 = vmatmul.msk.bf16.gmra.mxu0 %vm399_vm0, %v1905_v19  ;;  %1881 = vmatmul.msk.bf16.gmra.mxu1 %vm399_vm0, %v1913_v20  ;;  %v109_v19 = vld [vmem:[#allocation2 + $0xb0] sm:$0xff] }
  0x5e   :  { %1889 = vmatmul.msk.bf16.gmra.mxu2 %vm399_vm0, %v1921_v26  ;;  %1897 = vmatmul.msk.bf16.gmra.mxu3 %vm399_vm0, %v1929_v39  ;;  %v121_v20 = vld [vmem:[#allocation2 + $0x110] sm:$0xff]  ;;  %v110_v26 = vld [vmem:[#allocation2 + $0xb8] sm:$0xff]  ;;  %v123_v39 = vld [vmem:[#allocation2 + $0x120] sm:$0xff] }
  0x6d   :  { %1874 = vmatmul.msk.bf16.gmra.mxu0 %vm399_vm0, %v1906_v24  ;;  %1882 = vmatmul.msk.bf16.gmra.mxu1 %vm399_vm0, %v1914_v25 }
  0x6e   :  { %1890 = vmatmul.msk.bf16.gmra.mxu2 %vm399_vm0, %v1922_v30  ;;  %1898 = vmatmul.msk.bf16.gmra.mxu3 %vm399_vm0, %v1930_v58 }
  0x7d   :  { %1875 = vmatmul.msk.bf16.gmra.mxu0 %vm399_vm0, %v1907_v28  ;;  %1883 = vmatmul.msk.bf16.gmra.mxu1 %vm399_vm0, %v1915_v29  ;;  %v122_v28 = vld [vmem:[#allocation2 + $0x118] sm:$0xff] }
  0x7e   :  { %1891 = vmatmul.msk.bf16.gmra.mxu2 %vm399_vm0, %v1923_v38  ;;  %1899 = vmatmul.msk.bf16.gmra.mxu3 %vm399_vm0, %v1931_v13  ;;  %v111_v38 = vld [vmem:[#allocation2 + $0xc0] sm:$0xff]  ;;  %v138_v13 = vld [vmem:[#allocation2 + $0x198] sm:$0xff] }
  0x8a   :  { %v505_v33 = vpop.f32.mrf.mxu0  ;;  %v545_v35 = vpop.f32.mrf.mxu1 }
  0x8b   :  { %v665_v34 = vadd.f32 %v505_v33, %v87_v32  ;;  %v681_v48 = vadd.f32 %v545_v35, %v103_v43  ;;  %v95_v32 = vld [vmem:[#allocation2 + $0x40] sm:$0xff]  ;;  %v96_v43 = vld [vmem:[#allocation2 + $0x48] sm:$0xff] }
  0x8d   :  { %730 = vst.msk [vmem:[#allocation2] sm:$0xff] %vm22_vm1, %v665_v34 }
  0x8e   :  { %746 = vst.msk [vmem:[#allocation2 + $0x80] sm:$0xff] %vm22_vm1, %v681_v48 }
  0x91   :  { %v585_v63 = vpop.f32.mrf.mxu2 }
  0x92   :  { %v507_v36 = vpop.f32.mrf.mxu0  ;;  %v547_v37 = vpop.f32.mrf.mxu1  ;;  %v697_v3 = vadd.f32 %v585_v63, %v119_v1  ;;  %v125_v63 = vld [vmem:[#allocation2 + $0x130] sm:$0xff] }
  0x93   :  { %v666_v44 = vadd.f32 %v507_v36, %v88_v40  ;;  %v682_v49 = vadd.f32 %v547_v37, %v104_v45  ;;  %v625_v37 = vpop.f32.mrf.mxu3 }
  0x94   :  { %762 = vst.msk [vmem:[#allocation2 + $0x100] sm:$0xff] %vm22_vm1, %v697_v3  ;;  %v98_v3 = vld [vmem:[#allocation2 + $0x58] sm:$0xff] }
  0x95   :  { %731 = vst.msk [vmem:[#allocation2 + $0x8] sm:$0xff] %vm22_vm1, %v666_v44 }
  0x96   :  { %747 = vst.msk [vmem:[#allocation2 + $0x88] sm:$0xff] %vm22_vm1, %v682_v49  ;;  %v124_v49 = vld [vmem:[#allocation2 + $0x128] sm:$0xff] }
  0x99   :  { %v587_v10 = vpop.f32.mrf.mxu2 }
  0x9a   :  { %v510_v42 = vpop.f32.mrf.mxu0  ;;  %v550_v47 = vpop.f32.mrf.mxu1  ;;  %v698_v12 = vadd.f32 %v587_v10, %v120_v9  ;;  %v126_v9 = vld [vmem:[#allocation2 + $0x138] sm:$0xff] }
  0x9b   :  { %v667_v46 = vadd.f32 %v510_v42, %v89_v41  ;;  %v683_v51 = vadd.f32 %v550_v47, %v105_v50  ;;  %v135_v42 = vld [vmem:[#allocation2 + $0x180] sm:$0xff]  ;;  %v112_v47 = vld [vmem:[#allocation2 + $0xc8] sm:$0xff] }
  0x9c   :  { %763 = vst.msk [vmem:[#allocation2 + $0x108] sm:$0xff] %vm22_vm1, %v698_v12  ;;  %v713_v44 = vadd.f32 %v625_v37, %v135_v42  ;;  %v115_v37 = vld [vmem:[#allocation2 + $0xe0] sm:$0xff] }
  0x9d   :  { %732 = vst.msk [vmem:[#allocation2 + $0x10] sm:$0xff] %vm22_vm1, %v667_v46 }
  0x9e   :  { %748 = vst.msk [vmem:[#allocation2 + $0x90] sm:$0xff] %vm22_vm1, %v683_v51 }
  0x9f   :  { %778 = vst.msk [vmem:[#allocation2 + $0x180] sm:$0xff] %vm22_vm1, %v713_v44  ;;  %v139_v44 = vld [vmem:[#allocation2 + $0x1a0] sm:$0xff] }
  0xa1   :  { %v590_v18 = vpop.f32.mrf.mxu2 }
  0xa2   :  { %v512_v53 = vpop.f32.mrf.mxu0  ;;  %v552_v56 = vpop.f32.mrf.mxu1  ;;  %v699_v22 = vadd.f32 %v590_v18, %v121_v20 }
  0xa3   :  { %v668_v54 = vadd.f32 %v512_v53, %v90_v52  ;;  %v684_v57 = vadd.f32 %v552_v56, %v106_v55  ;;  %v136_v53 = vld [vmem:[#allocation2 + $0x188] sm:$0xff]  ;;  %v97_v56 = vld [vmem:[#allocation2 + $0x50] sm:$0xff] }
  0xa4   :  { %764 = vst.msk [vmem:[#allocation2 + $0x110] sm:$0xff] %vm22_vm1, %v699_v22 }
  0xa5   :  { %733 = vst.msk [vmem:[#allocation2 + $0x18] sm:$0xff] %vm22_vm1, %v668_v54  ;;  %v627_v54 = vpop.f32.mrf.mxu3 }
  0xa6   :  { %749 = vst.msk [vmem:[#allocation2 + $0x98] sm:$0xff] %vm22_vm1, %v684_v57  ;;  %v714_v55 = vadd.f32 %v627_v54, %v136_v53 }
  0xa8   :  { %779 = vst.msk [vmem:[#allocation2 + $0x188] sm:$0xff] %vm22_vm1, %v714_v55 }
  0xa9   :  { %v592_v29 = vpop.f32.mrf.mxu2 }
  0xaa   :  { %v515_v60 = vpop.f32.mrf.mxu0  ;;  %v555_v62 = vpop.f32.mrf.mxu1  ;;  %v700_v31 = vadd.f32 %v592_v29, %v122_v28 }
  0xab   :  { %v669_v61 = vadd.f32 %v515_v60, %v91_v59  ;;  %v685_v2 = vadd.f32 %v555_v62, %v107_v0  ;;  %v113_v62 = vld [vmem:[#allocation2 + $0xd0] sm:$0xff] }
  0xac   :  { %765 = vst.msk [vmem:[#allocation2 + $0x118] sm:$0xff] %vm22_vm1, %v700_v31 }
  0xad   :  { %734 = vst.msk [vmem:[#allocation2 + $0x20] sm:$0xff] %vm22_vm1, %v669_v61  ;;  %v630_v61 = vpop.f32.mrf.mxu3 }
  0xae   :  { %750 = vst.msk [vmem:[#allocation2 + $0xa0] sm:$0xff] %vm22_vm1, %v685_v2  ;;  %v137_v2 = vld [vmem:[#allocation2 + $0x190] sm:$0xff] }
  0xb1   :  { %v595_v36 = vpop.f32.mrf.mxu2 }
  0xb2   :  { %v517_v5 = vpop.f32.mrf.mxu0  ;;  %v557_v8 = vpop.f32.mrf.mxu1  ;;  %v701_v41 = vadd.f32 %v595_v36, %v123_v39 }
  0xb3   :  { %v670_v6 = vadd.f32 %v517_v5, %v92_v4  ;;  %v686_v11 = vadd.f32 %v557_v8, %v108_v7  ;;  %v715_v4 = vadd.f32 %v630_v61, %v137_v2  ;;  %v114_v7 = vld [vmem:[#allocation2 + $0xd8] sm:$0xff] }
  0xb4   :  { %766 = vst.msk [vmem:[#allocation2 + $0x120] sm:$0xff] %vm22_vm1, %v701_v41  ;;  %v2290_v31 = vld [vmem:[#allocation2 + $0x20] sm:$0xff] }
  0xb5   :  { %735 = vst.msk [vmem:[#allocation2 + $0x28] sm:$0xff] %vm22_vm1, %v670_v6  ;;  %v868_v41 = vsel %vm22_vm1, %v2290_v31, 0.0 }
  0xb6   :  { %751 = vst.msk [vmem:[#allocation2 + $0xa8] sm:$0xff] %vm22_vm1, %v686_v11 }
  0xb7   :  { %780 = vst.msk [vmem:[#allocation2 + $0x190] sm:$0xff] %vm22_vm1, %v715_v4 }
  0xb9   :  { %v597_v50 = vpop.f32.mrf.mxu2 }
  0xba   :  { %v520_v15 = vpop.f32.mrf.mxu0  ;;  %v560_v17 = vpop.f32.mrf.mxu1  ;;  %v702_v52 = vadd.f32 %v597_v50, %v124_v49 }
  0xbb   :  { %v671_v16 = vadd.f32 %v520_v15, %v93_v14  ;;  %v687_v21 = vadd.f32 %v560_v17, %v109_v19  ;;  %v632_v14 = vpop.f32.mrf.mxu3  ;;  %v2275_v19 = vld [vmem:[#allocation2 + $0x8] sm:$0xff] }
  0xbc   :  { %767 = vst.msk [vmem:[#allocation2 + $0x128] sm:$0xff] %vm22_vm1, %v702_v52  ;;  %v716_v15 = vadd.f32 %v632_v14, %v138_v13  ;;  %v2294_v36 = vld [vmem:[#allocation2 + $0x28] sm:$0xff] }
  0xbd   :  { %736 = vst.msk [vmem:[#allocation2 + $0x30] sm:$0xff] %vm22_vm1, %v671_v16  ;;  %v99_v16 = vld [vmem:[#allocation2 + $0x60] sm:$0xff]  ;;  %v140_v52 = vld [vmem:[#allocation2 + $0x1a8] sm:$0xff]  ;;  %v870_v53 = vsel %vm22_vm1, %v2294_v36, 0.0 }
  0xbe   :  { %752 = vst.msk [vmem:[#allocation2 + $0xb0] sm:$0xff] %vm22_vm1, %v687_v21 }
  0xbf   :  { %781 = vst.msk [vmem:[#allocation2 + $0x198] sm:$0xff] %vm22_vm1, %v716_v15 }
  0xc1   :  { %v600_v60 = vpop.f32.mrf.mxu2 }
  0xc2   :  { %v522_v24 = vpop.f32.mrf.mxu0  ;;  %v562_v27 = vpop.f32.mrf.mxu1  ;;  %v703_v1 = vadd.f32 %v600_v60, %v125_v63 }
  0xc3   :  { %v672_v25 = vadd.f32 %v522_v24, %v94_v23  ;;  %v688_v30 = vadd.f32 %v562_v27, %v110_v26  ;;  %v635_v22 = vpop.f32.mrf.mxu3  ;;  %v2278_v23 = vld [vmem:[#allocation2] sm:$0xff]  ;;  %v2280_v24 = vld [vmem:[#allocation2 + $0x10] sm:$0xff]  ;;  %v2284_v26 = vld [vmem:[#allocation2 + $0x18] sm:$0xff] }
  0xc4   :  { %768 = vst.msk [vmem:[#allocation2 + $0x130] sm:$0xff] %vm22_vm1, %v703_v1  ;;  %v100_v27 = vld [vmem:[#allocation2 + $0x68] sm:$0xff]  ;;  %v861_v28 = vsel %vm22_vm1, %v2278_v23, 0.0  ;;  %v864_v29 = vsel %vm22_vm1, %v2280_v24, 0.0  ;;  %v2299_v49 = vld [vmem:[#allocation2 + $0x30] sm:$0xff]  ;;  %v717_v50 = vadd.f32 %v635_v22, %v139_v44 }
  0xc5   :  { %737 = vst.msk [vmem:[#allocation2 + $0x38] sm:$0xff] %vm22_vm1, %v672_v25  ;;  %v862_v25 = vsel %vm22_vm1, %v2275_v19, 0.0  ;;  %v117_v22 = vld [vmem:[#allocation2 + $0xf0] sm:$0xff] }
  0xc6   :  { %753 = vst.msk [vmem:[#allocation2 + $0xb8] sm:$0xff] %vm22_vm1, %v688_v30  ;;  %v863_v30 = vadd.f32 %v862_v25, %v861_v28  ;;  %v129_v25 = vld [vmem:[#allocation2 + $0x150] sm:$0xff] }
  0xc7   :  { %782 = vst.msk [vmem:[#allocation2 + $0x1a0] sm:$0xff] %vm22_vm1, %v717_v50  ;;  %v2350_v50 = vld [vmem:[#allocation2 + $0x80] sm:$0xff] }
  0xc9   :  { %v602_v10 = vpop.f32.mrf.mxu2 }
  0xca   :  { %v525_v33 = vpop.f32.mrf.mxu0  ;;  %v565_v35 = vpop.f32.mrf.mxu1  ;;  %v704_v12 = vadd.f32 %v602_v10, %v126_v9 }
  0xcb   :  { %v673_v34 = vadd.f32 %v525_v33, %v95_v32  ;;  %v689_v40 = vadd.f32 %v565_v35, %v111_v38  ;;  %v866_v33 = vsel %vm22_vm1, %v2284_v26, 0.0  ;;  %v865_v35 = vadd.f32 %v864_v29, %v863_v30  ;;  %v127_v38 = vld [vmem:[#allocation2 + $0x140] sm:$0xff] }
  0xcc   :  { %769 = vst.msk [vmem:[#allocation2 + $0x138] sm:$0xff] %vm22_vm1, %v704_v12  ;;  %v102_v12 = vld [vmem:[#allocation2 + $0x78] sm:$0xff] }
  0xcd   :  { %738 = vst.msk [vmem:[#allocation2 + $0x40] sm:$0xff] %vm22_vm1, %v673_v34 }
  0xce   :  { %754 = vst.msk [vmem:[#allocation2 + $0xc0] sm:$0xff] %vm22_vm1, %v689_v40 }
  0xd1   :  { %v605_v21 = vpop.f32.mrf.mxu2 }
  0xd2   :  { %v527_v45 = vpop.f32.mrf.mxu0  ;;  %v567_v48 = vpop.f32.mrf.mxu1 }
  0xd3   :  { %v674_v46 = vadd.f32 %v527_v45, %v96_v43  ;;  %v690_v51 = vadd.f32 %v567_v48, %v112_v47  ;;  %v705_v43 = vadd.f32 %v605_v21, %v127_v38  ;;  %v116_v45 = vld [vmem:[#allocation2 + $0xe8] sm:$0xff]  ;;  %v637_v47 = vpop.f32.mrf.mxu3  ;;  %v867_v48 = vadd.f32 %v866_v33, %v865_v35  ;;  %v141_v33 = vld [vmem:[#allocation2 + $0x1b0] sm:$0xff]  ;;  %v130_v35 = vld [vmem:[#allocation2 + $0x158] sm:$0xff] }
  0xd4   :  { %v2310_v61 = vld [vmem:[#allocation2 + $0x40] sm:$0xff] }
  0xd5   :  { %739 = vst.msk [vmem:[#allocation2 + $0x48] sm:$0xff] %vm22_vm1, %v674_v46  ;;  %v128_v46 = vld [vmem:[#allocation2 + $0x148] sm:$0xff]  ;;  %v869_v55 = vadd.f32 %v868_v41, %v867_v48 }
  0xd6   :  { %755 = vst.msk [vmem:[#allocation2 + $0xc8] sm:$0xff] %vm22_vm1, %v690_v51 }
  0xd7   :  { %770 = vst.msk [vmem:[#allocation2 + $0x140] sm:$0xff] %vm22_vm1, %v705_v43  ;;  %v871_v60 = vadd.f32 %v870_v53, %v869_v55 }
  0xd9   :  { %v607_v40 = vpop.f32.mrf.mxu2 }
  0xda   :  { %v530_v57 = vpop.f32.mrf.mxu0  ;;  %v570_v59 = vpop.f32.mrf.mxu1  ;;  %v706_v54 = vadd.f32 %v607_v40, %v128_v46 }
  0xdb   :  { %v675_v58 = vadd.f32 %v530_v57, %v97_v56  ;;  %v691_v0 = vadd.f32 %v570_v59, %v113_v62  ;;  %v2304_v56 = vld [vmem:[#allocation2 + $0x38] sm:$0xff]  ;;  %v101_v57 = vld [vmem:[#allocation2 + $0x70] sm:$0xff]  ;;  %v872_v59 = vsel %vm22_vm1, %v2299_v49, 0.0 }
  0xdc   :  { %v874_v63 = vsel %vm22_vm1, %v2304_v56, 0.0  ;;  %771 = vst.msk [vmem:[#allocation2 + $0x148] sm:$0xff] %vm22_vm1, %v706_v54  ;;  %v873_v1 = vadd.f32 %v872_v59, %v871_v60  ;;  %v2316_v2 = vld [vmem:[#allocation2 + $0x48] sm:$0xff]  ;;  %v892_v59 = vsel %vm22_vm1, %v2350_v50, 0.0  ;;  %v2361_v60 = vld [vmem:[#allocation2 + $0x90] sm:$0xff] }
  0xdd   :  { %740 = vst.msk [vmem:[#allocation2 + $0x50] sm:$0xff] %vm22_vm1, %v675_v58  ;;  %v718_v58 = vadd.f32 %v637_v47, %v140_v52  ;;  %v878_v9 = vsel %vm22_vm1, %v2316_v2, 0.0 }
  0xde   :  { %756 = vst.msk [vmem:[#allocation2 + $0xd0] sm:$0xff] %vm22_vm1, %v691_v0 }
  0xdf   :  { %783 = vst.msk [vmem:[#allocation2 + $0x1a8] sm:$0xff] %vm22_vm1, %v718_v58 }
  0xe1   :  { %v610_v4 = vpop.f32.mrf.mxu2 }
  0xe2   :  { %v532_v5 = vpop.f32.mrf.mxu0  ;;  %v572_v8 = vpop.f32.mrf.mxu1 }
  0xe3   :  { %v676_v6 = vadd.f32 %v532_v5, %v98_v3  ;;  %v692_v11 = vadd.f32 %v572_v8, %v114_v7  ;;  %v876_v5 = vsel %vm22_vm1, %v2310_v61, 0.0  ;;  %v875_v7 = vadd.f32 %v874_v63, %v873_v1 }
  0xe4   :  { %v2322_v8 = vld [vmem:[#allocation2 + $0x50] sm:$0xff] }
  0xe5   :  { %741 = vst.msk [vmem:[#allocation2 + $0x58] sm:$0xff] %vm22_vm1, %v676_v6  ;;  %v640_v6 = vpop.f32.mrf.mxu3  ;;  %v877_v10 = vadd.f32 %v876_v5, %v875_v7  ;;  %v880_v13 = vsel %vm22_vm1, %v2322_v8, 0.0  ;;  %v143_v7 = vld [vmem:[#allocation2 + $0x1c0] sm:$0xff] }
  0xe6   :  { %757 = vst.msk [vmem:[#allocation2 + $0xd8] sm:$0xff] %vm22_vm1, %v692_v11  ;;  %v719_v40 = vadd.f32 %v640_v6, %v141_v33  ;;  %v131_v6 = vld [vmem:[#allocation2 + $0x160] sm:$0xff] }
  0xe7   :  { %v879_v14 = vadd.f32 %v878_v9, %v877_v10  ;;  %v132_v9 = vld [vmem:[#allocation2 + $0x168] sm:$0xff] }
  0xe8   :  { %784 = vst.msk [vmem:[#allocation2 + $0x1b0] sm:$0xff] %vm22_vm1, %v719_v40 }
  0xe9   :  { %v612_v28 = vpop.f32.mrf.mxu2 }
  0xea   :  { %v535_v17 = vpop.f32.mrf.mxu0  ;;  %v575_v20 = vpop.f32.mrf.mxu1  ;;  %v708_v44 = vadd.f32 %v612_v28, %v130_v35  ;;  %v2378_v28 = vld [vmem:[#allocation2 + $0xb0] sm:$0xff]  ;;  %v2389_v35 = vld [vmem:[#allocation2 + $0xc0] sm:$0xff] }
  0xeb   :  { %v677_v18 = vadd.f32 %v535_v17, %v99_v16  ;;  %v693_v42 = vadd.f32 %v575_v20, %v115_v37  ;;  %v881_v20 = vadd.f32 %v880_v13, %v879_v14 }
  0xec   :  { %v2326_v11 = vld [vmem:[#allocation2 + $0x58] sm:$0xff]  ;;  %773 = vst.msk [vmem:[#allocation2 + $0x158] sm:$0xff] %vm22_vm1, %v708_v44  ;;  %v908_v44 = vsel %vm22_vm1, %v2389_v35, 0.0 }
  0xed   :  { %742 = vst.msk [vmem:[#allocation2 + $0x60] sm:$0xff] %vm22_vm1, %v677_v18  ;;  %v882_v17 = vsel %vm22_vm1, %v2326_v11, 0.0  ;;  %v642_v37 = vpop.f32.mrf.mxu3 }
  0xee   :  { %758 = vst.msk [vmem:[#allocation2 + $0xe0] sm:$0xff] %vm22_vm1, %v693_v42  ;;  %v883_v38 = vadd.f32 %v882_v17, %v881_v20  ;;  %v142_v42 = vld [vmem:[#allocation2 + $0x1b8] sm:$0xff]  ;;  %v144_v17 = vld [vmem:[#allocation2 + $0x1c8] sm:$0xff] }
  0xef   :  { %v720_v46 = vadd.f32 %v642_v37, %v142_v42  ;;  %v2373_v20 = vld [vmem:[#allocation2 + $0xa8] sm:$0xff] }
  0xf0   :  { %v2393_v42 = vld [vmem:[#allocation2 + $0xc8] sm:$0xff] }
  0xf1   :  { %785 = vst.msk [vmem:[#allocation2 + $0x1b8] sm:$0xff] %vm22_vm1, %v720_v46  ;;  %v615_v53 = vpop.f32.mrf.mxu2 }
  0xf2   :  { %v537_v32 = vpop.f32.mrf.mxu0  ;;  %v577_v39 = vpop.f32.mrf.mxu1  ;;  %v709_v13 = vadd.f32 %v615_v53, %v131_v6 }
  0xf3   :  { %v678_v34 = vadd.f32 %v537_v32, %v100_v27  ;;  %v694_v51 = vadd.f32 %v577_v39, %v116_v45  ;;  %v707_v32 = vadd.f32 %v610_v4, %v129_v25  ;;  %v2369_v4 = vld [vmem:[#allocation2 + $0xa0] sm:$0xff] }
  0xf4   :  { %v2330_v15 = vld [vmem:[#allocation2 + $0x60] sm:$0xff]  ;;  %774 = vst.msk [vmem:[#allocation2 + $0x160] sm:$0xff] %vm22_vm1, %v709_v13 }
  0xf5   :  { %743 = vst.msk [vmem:[#allocation2 + $0x68] sm:$0xff] %vm22_vm1, %v678_v34  ;;  %v884_v29 = vsel %vm22_vm1, %v2330_v15, 0.0  ;;  %v118_v34 = vld [vmem:[#allocation2 + $0xf8] sm:$0xff]  ;;  %v645_v55 = vpop.f32.mrf.mxu3 }
  0xf6   :  { %759 = vst.msk [vmem:[#allocation2 + $0xe8] sm:$0xff] %vm22_vm1, %v694_v51  ;;  %v885_v45 = vadd.f32 %v884_v29, %v883_v38  ;;  %v721_v14 = vadd.f32 %v645_v55, %v143_v7  ;;  %v146_v7 = vld [vmem:[#allocation2 + $0x1d8] sm:$0xff] }
  0xf7   :  { %772 = vst.msk [vmem:[#allocation2 + $0x150] sm:$0xff] %vm22_vm1, %v707_v32  ;;  %v2384_v32 = vld [vmem:[#allocation2 + $0xb8] sm:$0xff] }
  0xf8   :  { %786 = vst.msk [vmem:[#allocation2 + $0x1c0] sm:$0xff] %vm22_vm1, %v721_v14  ;;  %v906_v40 = vsel %vm22_vm1, %v2384_v32, 0.0 }
  0xf9   :  { %v617_v10 = vpop.f32.mrf.mxu2 }
  0xfa   :  { %v540_v62 = vpop.f32.mrf.mxu0  ;;  %v580_v3 = vpop.f32.mrf.mxu1 }
  0xfb   :  { %v679_v0 = vadd.f32 %v540_v62, %v101_v57  ;;  %v695_v30 = vadd.f32 %v580_v3, %v117_v22  ;;  %v2357_v57 = vld [vmem:[#allocation2 + $0x88] sm:$0xff]  ;;  %v896_v3 = vsel %vm22_vm1, %v2361_v60, 0.0 }
  0xfc   :  { %v2334_v21 = vld [vmem:[#allocation2 + $0x68] sm:$0xff]  ;;  %v894_v63 = vsel %vm22_vm1, %v2357_v57, 0.0 }
  0xfd   :  { %744 = vst.msk [vmem:[#allocation2 + $0x70] sm:$0xff] %vm22_vm1, %v679_v0  ;;  %v886_v43 = vsel %vm22_vm1, %v2334_v21, 0.0  ;;  %v2365_v0 = vld [vmem:[#allocation2 + $0x98] sm:$0xff] }
  0xfe   :  { %760 = vst.msk [vmem:[#allocation2 + $0xf0] sm:$0xff] %vm22_vm1, %v695_v30  ;;  %v887_v48 = vadd.f32 %v886_v43, %v885_v45  ;;  %v902_v30 = vsel %vm22_vm1, %v2373_v20, 0.0  ;;  %v2397_v45 = vld [vmem:[#allocation2 + $0xd0] sm:$0xff] }
  0xff   :  { %v912_v53 = vsel %vm22_vm1, %v2397_v45, 0.0 }
 0x101   :  { %v620_v38 = vpop.f32.mrf.mxu2 }
 0x102   :  { %v542_v16 = vpop.f32.mrf.mxu0  ;;  %v582_v27 = vpop.f32.mrf.mxu1 }
 0x103   :  { %v680_v18 = vadd.f32 %v542_v16, %v102_v12  ;;  %v696_v41 = vadd.f32 %v582_v27, %v118_v34  ;;  %v898_v12 = vsel %vm22_vm1, %v2365_v0, 0.0  ;;  %v710_v16 = vadd.f32 %v617_v10, %v132_v9 }
 0x104   :  { %v2339_v39 = vld [vmem:[#allocation2 + $0x70] sm:$0xff]  ;;  %v900_v27 = vsel %vm22_vm1, %v2369_v4, 0.0  ;;  %v904_v34 = vsel %vm22_vm1, %v2378_v28, 0.0 }
 0x105   :  { %745 = vst.msk [vmem:[#allocation2 + $0x78] sm:$0xff] %vm22_vm1, %v680_v18  ;;  %v888_v47 = vsel %vm22_vm1, %v2339_v39, 0.0  ;;  %v647_v18 = vpop.f32.mrf.mxu3 }
 0x106   :  { %761 = vst.msk [vmem:[#allocation2 + $0xf8] sm:$0xff] %vm22_vm1, %v696_v41  ;;  %v889_v51 = vadd.f32 %v888_v47, %v887_v48  ;;  %v722_v25 = vadd.f32 %v647_v18, %v144_v17  ;;  %v910_v47 = vsel %vm22_vm1, %v2393_v42, 0.0  ;;  %v2401_v48 = vld [vmem:[#allocation2 + $0xd8] sm:$0xff]  ;;  %v2414_v17 = vld [vmem:[#allocation2 + $0xf0] sm:$0xff] }
 0x107   :  { %775 = vst.msk [vmem:[#allocation2 + $0x168] sm:$0xff] %vm22_vm1, %v710_v16 }
 0x108   :  { %787 = vst.msk [vmem:[#allocation2 + $0x1c8] sm:$0xff] %vm22_vm1, %v722_v25 }
 0x10c   :  { %v2352_v52 = vld [vmem:[#allocation2 + $0x78] sm:$0xff] }
 0x10d   :  { %v890_v54 = vsel %vm22_vm1, %v2352_v52, 0.0  ;;  %v650_v41 = vpop.f32.mrf.mxu3  ;;  %v2420_v25 = vld [vmem:[#allocation2 + $0xf8] sm:$0xff] }
 0x10e   :  { %v891_v58 = vadd.f32 %v890_v54, %v889_v51  ;;  %v2405_v54 = vld [vmem:[#allocation2 + $0xe0] sm:$0xff] }
 0x10f   :  { %v916_v14 = vsel %vm22_vm1, %v2405_v54, 0.0 }
 0x110   :  { %v893_v62 = vadd.f32 %v892_v59, %v891_v58  ;;  %v133_v58 = vld [vmem:[#allocation2 + $0x170] sm:$0xff] }
 0x111   :  { %v145_v59 = vld [vmem:[#allocation2 + $0x1d0] sm:$0xff] }
 0x112   :  { %v895_v1 = vadd.f32 %v894_v63, %v893_v62  ;;  %v134_v62 = vld [vmem:[#allocation2 + $0x178] sm:$0xff]  ;;  %v622_v63 = vpop.f32.mrf.mxu2 }
 0x113   :  { %v712_v6 = vadd.f32 %v622_v63, %v134_v62 }
 0x114   :  { %v897_v5 = vadd.f32 %v896_v3, %v895_v1  ;;  %v914_v1 = vsel %vm22_vm1, %v2401_v48, 0.0  ;;  %v711_v3 = vadd.f32 %v620_v38, %v133_v58  ;;  %v147_v58 = vld [vmem:[#allocation2 + $0x1e0] sm:$0xff] }
 0x115   :  { %v652_v9 = vpop.f32.mrf.mxu3  ;;  %777 = vst.msk [vmem:[#allocation2 + $0x178] sm:$0xff] %vm22_vm1, %v712_v6 }
 0x116   :  { %v899_v22 = vadd.f32 %v898_v12, %v897_v5  ;;  %v723_v5 = vadd.f32 %v650_v41, %v145_v59  ;;  %v2409_v12 = vld [vmem:[#allocation2 + $0xe8] sm:$0xff]  ;;  %v724_v13 = vadd.f32 %v652_v9, %v146_v7  ;;  %776 = vst.msk [vmem:[#allocation2 + $0x170] sm:$0xff] %vm22_vm1, %v711_v3  ;;  %v2433_v41 = vld [vmem:[#allocation2 + $0x110] sm:$0xff] }
 0x117   :  { %v918_v18 = vsel %vm22_vm1, %v2409_v12, 0.0  ;;  %v148_v59 = vld [vmem:[#allocation2 + $0x1e8] sm:$0xff]  ;;  %v2450_v9 = vld [vmem:[#allocation2 + $0x130] sm:$0xff] }
 0x118   :  { %v901_v29 = vadd.f32 %v900_v27, %v899_v22  ;;  %788 = vst.msk [vmem:[#allocation2 + $0x1d0] sm:$0xff] %vm22_vm1, %v723_v5  ;;  %v920_v27 = vsel %vm22_vm1, %v2414_v17, 0.0  ;;  %v2445_v3 = vld [vmem:[#allocation2 + $0x128] sm:$0xff] }
 0x119   :  { %789 = vst.msk [vmem:[#allocation2 + $0x1d8] sm:$0xff] %vm22_vm1, %v724_v13  ;;  %v934_v13 = vsel %vm22_vm1, %v2445_v3, 0.0 }
 0x11a   :  { %v903_v33 = vadd.f32 %v902_v30, %v901_v29  ;;  %v2425_v29 = vld [vmem:[#allocation2 + $0x100] sm:$0xff] }
 0x11c   :  { %v905_v37 = vadd.f32 %v904_v34, %v903_v33  ;;  %v922_v33 = vsel %vm22_vm1, %v2420_v25, 0.0 }
 0x11d   :  { %v655_v34 = vpop.f32.mrf.mxu3 }
 0x11e   :  { %v907_v43 = vadd.f32 %v906_v40, %v905_v37  ;;  %v2429_v37 = vld [vmem:[#allocation2 + $0x108] sm:$0xff]  ;;  %v924_v40 = vsel %vm22_vm1, %v2425_v29, 0.0  ;;  %v725_v63 = vadd.f32 %v655_v34, %v147_v58 }
 0x11f   :  { %v2463_v34 = vld [vmem:[#allocation2 + $0x148] sm:$0xff] }
 0x120   :  { %v909_v46 = vadd.f32 %v908_v44, %v907_v43  ;;  %v926_v44 = vsel %vm22_vm1, %v2429_v37, 0.0  ;;  %790 = vst.msk [vmem:[#allocation2 + $0x1e0] sm:$0xff] %vm22_vm1, %v725_v63  ;;  %v149_v63 = vld [vmem:[#allocation2 + $0x1f0] sm:$0xff] }
 0x122   :  { %v911_v51 = vadd.f32 %v910_v47, %v909_v46  ;;  %v2437_v46 = vld [vmem:[#allocation2 + $0x118] sm:$0xff] }
 0x123   :  { %v930_v62 = vsel %vm22_vm1, %v2437_v46, 0.0 }
 0x124   :  { %v913_v55 = vadd.f32 %v912_v53, %v911_v51  ;;  %v928_v51 = vsel %vm22_vm1, %v2433_v41, 0.0  ;;  %v2441_v53 = vld [vmem:[#allocation2 + $0x120] sm:$0xff] }
 0x125   :  { %v932_v7 = vsel %vm22_vm1, %v2441_v53, 0.0 }
 0x126   :  { %v915_v10 = vadd.f32 %v914_v1, %v913_v55  ;;  %v657_v1 = vpop.f32.mrf.mxu3 }
 0x127   :  { %v726_v6 = vadd.f32 %v657_v1, %v148_v59  ;;  %v150_v1 = vld [vmem:[#allocation2 + $0x1f8] sm:$0xff] }
 0x128   :  { %v917_v16 = vadd.f32 %v916_v14, %v915_v10  ;;  %v2455_v14 = vld [vmem:[#allocation2 + $0x138] sm:$0xff] }
 0x129   :  { %791 = vst.msk [vmem:[#allocation2 + $0x1e8] sm:$0xff] %vm22_vm1, %v726_v6 }
 0x12a   :  { %v919_v22 = vadd.f32 %v918_v18, %v917_v16  ;;  %v936_v18 = vsel %vm22_vm1, %v2450_v9, 0.0 }
 0x12c   :  { %v921_v30 = vadd.f32 %v920_v27, %v919_v22  ;;  %v2459_v22 = vld [vmem:[#allocation2 + $0x140] sm:$0xff] }
 0x12e   :  { %v923_v38 = vadd.f32 %v922_v33, %v921_v30  ;;  %v938_v30 = vsel %vm22_vm1, %v2455_v14, 0.0  ;;  %v660_v33 = vpop.f32.mrf.mxu3 }
 0x12f   :  { %v727_v6 = vadd.f32 %v660_v33, %v149_v63  ;;  %v2489_v33 = vld [vmem:[#allocation2 + $0x178] sm:$0xff] }
 0x130   :  { %v925_v43 = vadd.f32 %v924_v40, %v923_v38  ;;  %v940_v40 = vsel %vm22_vm1, %v2459_v22, 0.0  ;;  %4136 = vst [vmem:[#allocation5_spill] sm:$0xff] %v2489_v33 }
 0x131   :  { %792 = vst.msk [vmem:[#allocation2 + $0x1f0] sm:$0xff] %vm22_vm1, %v727_v6 }
 0x132   :  { %v927_v47 = vadd.f32 %v926_v44, %v925_v43  ;;  %v2467_v43 = vld [vmem:[#allocation2 + $0x150] sm:$0xff] }
 0x133   :  { %v944_v58 = vsel %vm22_vm1, %v2467_v43, 0.0 }
 0x134   :  { %v929_v55 = vadd.f32 %v928_v51, %v927_v47  ;;  %v942_v47 = vsel %vm22_vm1, %v2463_v34, 0.0  ;;  %v2471_v51 = vld [vmem:[#allocation2 + $0x158] sm:$0xff] }
 0x136   :  { %v931_v5 = vadd.f32 %v930_v62, %v929_v55  ;;  %v2475_v62 = vld [vmem:[#allocation2 + $0x160] sm:$0xff] }
 0x138   :  { %v933_v10 = vadd.f32 %v932_v7, %v931_v5  ;;  %v946_v5 = vsel %vm22_vm1, %v2471_v51, 0.0  ;;  %v662_v7 = vpop.f32.mrf.mxu3 }
 0x13a   :  { %v935_v16 = vadd.f32 %v934_v13, %v933_v10  ;;  %v2479_v13 = vld [vmem:[#allocation2 + $0x168] sm:$0xff] }
 0x13b   :  { %4134 = vst [vmem:[#allocation3_spill] sm:$0xff] %v2479_v13 }
 0x13c   :  { %v937_v27 = vadd.f32 %v936_v18, %v935_v16  ;;  %v728_v16 = vadd.f32 %v662_v7, %v150_v1  ;;  %v948_v18 = vsel %vm22_vm1, %v2475_v62, 0.0 }
 0x13e   :  { %v939_v38 = vadd.f32 %v938_v30, %v937_v27  ;;  %v2484_v30 = vld [vmem:[#allocation2 + $0x170] sm:$0xff]  ;;  %793 = vst.msk [vmem:[#allocation2 + $0x1f8] sm:$0xff] %vm22_vm1, %v728_v16 }
 0x13f   :  { %4135 = vst [vmem:[#allocation4_spill] sm:$0xff] %v2484_v30 }
 0x140   :  { %v941_v44 = vadd.f32 %v940_v40, %v939_v38  ;;  %v950_v38 = vsel %vm22_vm1, %v2479_v13, 0.0 }
 0x142   :  { %v943_v55 = vadd.f32 %v942_v47, %v941_v44  ;;  %v952_v44 = vsel %vm22_vm1, %v2484_v30, 0.0  ;;  %v2493_v47 = vld [vmem:[#allocation2 + $0x180] sm:$0xff] }
 0x143   :  { %4137 = vst [vmem:[#allocation6_spill] sm:$0xff] %v2493_v47  ;;  %v956_v1 = vsel %vm22_vm1, %v2493_v47, 0.0 }
 0x144   :  { %v945_v59 = vadd.f32 %v944_v58, %v943_v55  ;;  %v954_v58 = vsel %vm22_vm1, %v2489_v33, 0.0 }
 0x146   :  { %v947_v10 = vadd.f32 %v946_v5, %v945_v59  ;;  %v2497_v59 = vld [vmem:[#allocation2 + $0x188] sm:$0xff]  ;;  %v2501_v5 = vld [vmem:[#allocation2 + $0x190] sm:$0xff] }
 0x147   :  { %4138 = vst [vmem:[#allocation7_spill] sm:$0xff] %v2497_v59  ;;  %v958_v7 = vsel %vm22_vm1, %v2497_v59, 0.0  ;;  %v860_v59 = vld [vmem:[#allocation2 + $0x1f8] sm:$0xff] }
 0x148   :  { %v949_v27 = vadd.f32 %v948_v18, %v947_v10  ;;  %4139 = vst [vmem:[#allocation8_spill] sm:$0xff] %v2501_v5  ;;  %v2505_v10 = vld [vmem:[#allocation2 + $0x198] sm:$0xff]  ;;  %v960_v18 = vsel %vm22_vm1, %v2501_v5, 0.0 }
 0x149   :  { %4140 = vst [vmem:[#allocation9_spill] sm:$0xff] %v2505_v10 }
 0x14a   :  { %v951_v40 = vadd.f32 %v950_v38, %v949_v27  ;;  %v2509_v27 = vld [vmem:[#allocation2 + $0x1a0] sm:$0xff] }
 0x14b   :  { %4141 = vst [vmem:[#allocation10_spill] sm:$0xff] %v2509_v27 }
 0x14c   :  { %v953_v55 = vadd.f32 %v952_v44, %v951_v40  ;;  %v962_v40 = vsel %vm22_vm1, %v2505_v10, 0.0  ;;  %v2513_v44 = vld [vmem:[#allocation2 + $0x1a8] sm:$0xff] }
 0x14d   :  { %4142 = vst [vmem:[#allocation11_spill] sm:$0xff] %v2513_v44 }
 0x14e   :  { %v955_v63 = vadd.f32 %v954_v58, %v953_v55  ;;  %v964_v58 = vsel %vm22_vm1, %v2509_v27, 0.0 }
 0x150   :  { %v957_v6 = vadd.f32 %v956_v1, %v955_v63  ;;  %v2517_v63 = vld [vmem:[#allocation2 + $0x1b0] sm:$0xff] }
 0x151   :  { %4143 = vst [vmem:[#allocation12_spill] sm:$0xff] %v2517_v63 }
 0x152   :  { %v959_v16 = vadd.f32 %v958_v7, %v957_v6  ;;  %v966_v6 = vsel %vm22_vm1, %v2513_v44, 0.0  ;;  %v2521_v7 = vld [vmem:[#allocation2 + $0x1b8] sm:$0xff] }
 0x153   :  { %4144 = vst [vmem:[#allocation13_spill] sm:$0xff] %v2521_v7 }
 0x154   :  { %v961_v38 = vadd.f32 %v960_v18, %v959_v16  ;;  %v968_v16 = vsel %vm22_vm1, %v2517_v63, 0.0  ;;  %v2525_v18 = vld [vmem:[#allocation2 + $0x1c0] sm:$0xff] }
 0x155   :  { %4145 = vst [vmem:[#allocation14_spill] sm:$0xff] %v2525_v18 }
 0x156   :  { %v963_v55 = vadd.f32 %v962_v40, %v961_v38  ;;  %v970_v38 = vsel %vm22_vm1, %v2521_v7, 0.0  ;;  %v2529_v40 = vld [vmem:[#allocation2 + $0x1c8] sm:$0xff]  ;;  %v2541_v7 = vld [vmem:[#allocation2 + $0x1e0] sm:$0xff] }
 0x157   :  { %4146 = vst [vmem:[#allocation15_spill] sm:$0xff] %v2529_v40 }
 0x158   :  { %v965_v1 = vadd.f32 %v964_v58, %v963_v55  ;;  %v972_v55 = vsel %vm22_vm1, %v2525_v18, 0.0  ;;  %v2533_v58 = vld [vmem:[#allocation2 + $0x1d0] sm:$0xff]  ;;  %4149 = vst [vmem:[#allocation18_spill] sm:$0xff] %v2541_v7  ;;  %v2545_v18 = vld [vmem:[#allocation2 + $0x1e8] sm:$0xff] }
 0x159   :  { %4147 = vst [vmem:[#allocation16_spill] sm:$0xff] %v2533_v58 }
 0x15a   :  { %v967_v5 = vadd.f32 %v966_v6, %v965_v1  ;;  %v974_v1 = vsel %vm22_vm1, %v2529_v40, 0.0  ;;  %v2537_v6 = vld [vmem:[#allocation2 + $0x1d8] sm:$0xff]  ;;  %v859_v40 = vld [vmem:[#allocation2 + $0x1f0] sm:$0xff] }
 0x15b   :  { %4148 = vst [vmem:[#allocation17_spill] sm:$0xff] %v2537_v6 }
 0x15c   :  { %v969_v10 = vadd.f32 %v968_v16, %v967_v5  ;;  %v976_v5 = vsel %vm22_vm1, %v2533_v58, 0.0  ;;  %v986_v58 = vsel %vm22_vm1, %v860_v59, 0.0 }
 0x15e   :  { %v971_v27 = vadd.f32 %v970_v38, %v969_v10  ;;  %v978_v10 = vsel %vm22_vm1, %v2537_v6, 0.0 }
 0x160   :  { %v973_v44 = vadd.f32 %v972_v55, %v971_v27  ;;  %v980_v27 = vsel %vm22_vm1, %v2541_v7, 0.0 }
 0x162   :  { %v975_v63 = vadd.f32 %v974_v1, %v973_v44  ;;  %v982_v44 = vsel %vm22_vm1, %v2545_v18, 0.0 }
 0x164   :  { %v977_v16 = vadd.f32 %v976_v5, %v975_v63  ;;  %v984_v63 = vsel %vm22_vm1, %v859_v40, 0.0 }
 0x166   :  { %v979_v38 = vadd.f32 %v978_v10, %v977_v16 }
 0x168   :  { %v981_v55 = vadd.f32 %v980_v27, %v979_v38 }
 0x16a   :  { %v983_v1 = vadd.f32 %v982_v44, %v981_v55 }
 0x16c   :  { %v985_v5 = vadd.f32 %v984_v63, %v983_v1 }
 0x16e   :  { %v987_v47 = vadd.f32 %v986_v58, %v985_v5 }
 0x170   :  { %v988_v6 = vrot.slane %v987_v47, 4 }
 0x172   :  { %v989_v16 = vadd.f32 %v988_v6, %v987_v47 }
 0x174   :  { %v990_v10 = vrot.slane %v989_v16, 2 }
 0x176   :  { %v991_v33 = vadd.f32 %v990_v10, %v989_v16 }
 0x178   :  { %v992_v30 = vrot.slane %v991_v33, 1 }
 0x17a   :  { %v993_v13 = vadd.f32 %v992_v30, %v991_v33 }
 0x17c   :  { %v2553_v7 = vmul.f32 0.001953125, %v993_v13 }
 0x17e   :  { %v2556_v38 = vsub.f32 %v859_v40, %v2553_v7  ;;  %v2559_v27 = vsub.f32 %v860_v59, %v2553_v7  ;;  %v2563_v55 = vsub.f32 %v2278_v23, %v2553_v7  ;;  %v2567_v58 = vsub.f32 %v2275_v19, %v2553_v7 }
 0x17f   :  { %v2571_v47 = vsub.f32 %v2280_v24, %v2553_v7  ;;  %v2575_v13 = vsub.f32 %v2284_v26, %v2553_v7  ;;  %v2583_v23 = vsub.f32 %v2290_v31, %v2553_v7  ;;  %v2589_v24 = vsub.f32 %v2294_v36, %v2553_v7 }
 0x180   :  { %4150 = vst [vmem:[#allocation19_spill] sm:$0xff] %v2556_v38  ;;  %v1059_v30 = vmul.f32 %v2563_v55, %v2563_v55  ;;  %v1060_v33 = vmul.f32 %v2567_v58, %v2567_v58  ;;  %v2597_v44 = vsub.f32 %v2299_v49, %v2553_v7  ;;  %v2604_v36 = vsub.f32 %v2304_v56, %v2553_v7 }
 0x181   :  { %v1061_v19 = vmul.f32 %v2571_v47, %v2571_v47  ;;  %v1062_v26 = vmul.f32 %v2575_v13, %v2575_v13  ;;  %v1063_v31 = vmul.f32 %v2583_v23, %v2583_v23  ;;  %v1064_v5 = vmul.f32 %v2589_v24, %v2589_v24 }
 0x182   :  { %v1123_v59 = vsel %vm22_vm1, %v1059_v30, 0.0  ;;  %v1124_v40 = vsel %vm22_vm1, %v1060_v33, 0.0  ;;  %v2611_v49 = vsub.f32 %v2310_v61, %v2553_v7  ;;  %v1065_v30 = vmul.f32 %v2597_v44, %v2597_v44 }
 0x183   :  { %v1125_v6 = vadd.f32 %v1124_v40, %v1123_v59  ;;  %v1126_v1 = vsel %vm22_vm1, %v1061_v19, 0.0  ;;  %v1128_v16 = vsel %vm22_vm1, %v1062_v26, 0.0  ;;  %v1130_v33 = vsel %vm22_vm1, %v1063_v31, 0.0 }
 0x184   :  { %v2618_v56 = vsub.f32 %v2316_v2, %v2553_v7  ;;  %v1066_v59 = vmul.f32 %v2604_v36, %v2604_v36  ;;  %v1132_v26 = vsel %vm22_vm1, %v1064_v5, 0.0  ;;  %v2625_v61 = vsub.f32 %v2322_v8, %v2553_v7 }
 0x185   :  { %v1127_v63 = vadd.f32 %v1126_v1, %v1125_v6  ;;  %v1067_v6 = vmul.f32 %v2611_v49, %v2611_v49  ;;  %v1134_v31 = vsel %vm22_vm1, %v1065_v30, 0.0  ;;  %v2632_v2 = vsub.f32 %v2326_v11, %v2553_v7 }
 0x186   :  { %v1136_v5 = vsel %vm22_vm1, %v1066_v59, 0.0  ;;  %v2639_v8 = vsub.f32 %v2330_v15, %v2553_v7  ;;  %v2646_v11 = vsub.f32 %v2334_v21, %v2553_v7  ;;  %v2653_v15 = vsub.f32 %v2339_v39, %v2553_v7 }
 0x187   :  { %v1129_v10 = vadd.f32 %v1128_v16, %v1127_v63  ;;  %v1068_v63 = vmul.f32 %v2618_v56, %v2618_v56  ;;  %v1138_v30 = vsel %vm22_vm1, %v1067_v6, 0.0  ;;  %v2660_v21 = vsub.f32 %v2352_v52, %v2553_v7 }
 0x188   :  { %v2667_v39 = vsub.f32 %v2350_v50, %v2553_v7  ;;  %v2674_v52 = vsub.f32 %v2357_v57, %v2553_v7  ;;  %v2681_v50 = vsub.f32 %v2361_v60, %v2553_v7  ;;  %v2688_v57 = vsub.f32 %v2365_v0, %v2553_v7 }
 0x189   :  { %v1131_v19 = vadd.f32 %v1130_v33, %v1129_v10  ;;  %v1069_v10 = vmul.f32 %v2625_v61, %v2625_v61  ;;  %v1140_v59 = vsel %vm22_vm1, %v1068_v63, 0.0  ;;  %v2695_v60 = vsub.f32 %v2369_v4, %v2553_v7 }
 0x18a   :  { %v2702_v0 = vsub.f32 %v2373_v20, %v2553_v7  ;;  %v2709_v4 = vsub.f32 %v2378_v28, %v2553_v7  ;;  %v2716_v20 = vsub.f32 %v2384_v32, %v2553_v7  ;;  %v2723_v28 = vsub.f32 %v2389_v35, %v2553_v7 }
 0x18b   :  { %v1133_v40 = vadd.f32 %v1132_v26, %v1131_v19  ;;  %v1070_v19 = vmul.f32 %v2632_v2, %v2632_v2  ;;  %v1142_v6 = vsel %vm22_vm1, %v1069_v10, 0.0  ;;  %v2730_v32 = vsub.f32 %v2393_v42, %v2553_v7 }
 0x18c   :  { %v2737_v35 = vsub.f32 %v2397_v45, %v2553_v7  ;;  %v2744_v42 = vsub.f32 %v2401_v48, %v2553_v7  ;;  %v2751_v45 = vsub.f32 %v2405_v54, %v2553_v7  ;;  %v2758_v48 = vsub.f32 %v2409_v12, %v2553_v7 }
 0x18d   :  { %v1135_v1 = vadd.f32 %v1134_v31, %v1133_v40  ;;  %v1071_v40 = vmul.f32 %v2639_v8, %v2639_v8  ;;  %v1144_v63 = vsel %vm22_vm1, %v1070_v19, 0.0  ;;  %v2765_v54 = vsub.f32 %v2414_v17, %v2553_v7 }
 0x18e   :  { %v2772_v12 = vsub.f32 %v2420_v25, %v2553_v7  ;;  %v2779_v17 = vsub.f32 %v2425_v29, %v2553_v7  ;;  %v2786_v25 = vsub.f32 %v2429_v37, %v2553_v7  ;;  %v2793_v29 = vsub.f32 %v2433_v41, %v2553_v7 }
 0x18f   :  { %v1137_v16 = vadd.f32 %v1136_v5, %v1135_v1  ;;  %v1072_v1 = vmul.f32 %v2646_v11, %v2646_v11  ;;  %v1146_v10 = vsel %vm22_vm1, %v1071_v40, 0.0  ;;  %v2800_v37 = vsub.f32 %v2437_v46, %v2553_v7 }
 0x190   :  { %v2807_v41 = vsub.f32 %v2441_v53, %v2553_v7  ;;  %v2814_v46 = vsub.f32 %v2445_v3, %v2553_v7  ;;  %v2821_v53 = vsub.f32 %v2450_v9, %v2553_v7  ;;  %v2828_v3 = vsub.f32 %v2455_v14, %v2553_v7 }
 0x191   :  { %v1139_v33 = vadd.f32 %v1138_v30, %v1137_v16  ;;  %v1073_v16 = vmul.f32 %v2653_v15, %v2653_v15  ;;  %v1148_v19 = vsel %vm22_vm1, %v1072_v1, 0.0  ;;  %v2835_v9 = vsub.f32 %v2459_v22, %v2553_v7 }
 0x192   :  { %v2842_v14 = vsub.f32 %v2463_v34, %v2553_v7  ;;  %v2849_v22 = vsub.f32 %v2467_v43, %v2553_v7  ;;  %v2856_v34 = vsub.f32 %v2471_v51, %v2553_v7  ;;  %v2863_v43 = vsub.f32 %v2475_v62, %v2553_v7 }
 0x193   :  { %v1141_v26 = vadd.f32 %v1140_v59, %v1139_v33  ;;  %v1074_v33 = vmul.f32 %v2660_v21, %v2660_v21  ;;  %v1150_v40 = vsel %vm22_vm1, %v1073_v16, 0.0 }
 0x194   :  { %4151 = vst [vmem:[#allocation20_spill] sm:$0xff] %v2849_v22 }
 0x195   :  { %v1143_v31 = vadd.f32 %v1142_v6, %v1141_v26  ;;  %v1075_v26 = vmul.f32 %v2667_v39, %v2667_v39  ;;  %v1152_v1 = vsel %vm22_vm1, %v1074_v33, 0.0  ;;  %4152 = vst [vmem:[#allocation21_spill] sm:$0xff] %v2856_v34 }
 0x196   :  { %4153 = vst [vmem:[#allocation22_spill] sm:$0xff] %v2863_v43 }
 0x197   :  { %v1145_v5 = vadd.f32 %v1144_v63, %v1143_v31  ;;  %v1076_v31 = vmul.f32 %v2674_v52, %v2674_v52  ;;  %v1154_v16 = vsel %vm22_vm1, %v1075_v26, 0.0 }
 0x199   :  { %v1147_v30 = vadd.f32 %v1146_v10, %v1145_v5  ;;  %v1077_v5 = vmul.f32 %v2681_v50, %v2681_v50  ;;  %v1156_v33 = vsel %vm22_vm1, %v1076_v31, 0.0 }
 0x19b   :  { %v1149_v59 = vadd.f32 %v1148_v19, %v1147_v30  ;;  %v1078_v30 = vmul.f32 %v2688_v57, %v2688_v57  ;;  %v1158_v26 = vsel %vm22_vm1, %v1077_v5, 0.0 }
 0x19d   :  { %v1151_v6 = vadd.f32 %v1150_v40, %v1149_v59  ;;  %v1079_v59 = vmul.f32 %v2695_v60, %v2695_v60  ;;  %v1160_v31 = vsel %vm22_vm1, %v1078_v30, 0.0 }
 0x19f   :  { %v1153_v63 = vadd.f32 %v1152_v1, %v1151_v6  ;;  %v1080_v6 = vmul.f32 %v2702_v0, %v2702_v0  ;;  %v1162_v5 = vsel %vm22_vm1, %v1079_v59, 0.0 }
 0x1a1   :  { %v1155_v10 = vadd.f32 %v1154_v16, %v1153_v63  ;;  %v1081_v63 = vmul.f32 %v2709_v4, %v2709_v4  ;;  %v1164_v30 = vsel %vm22_vm1, %v1080_v6, 0.0 }
 0x1a3   :  { %v1157_v19 = vadd.f32 %v1156_v33, %v1155_v10  ;;  %v1082_v10 = vmul.f32 %v2716_v20, %v2716_v20  ;;  %v1166_v59 = vsel %vm22_vm1, %v1081_v63, 0.0 }
 0x1a5   :  { %v1159_v40 = vadd.f32 %v1158_v26, %v1157_v19  ;;  %v1083_v19 = vmul.f32 %v2723_v28, %v2723_v28  ;;  %v1168_v6 = vsel %vm22_vm1, %v1082_v10, 0.0 }
 0x1a7   :  { %v1161_v1 = vadd.f32 %v1160_v31, %v1159_v40  ;;  %v1084_v40 = vmul.f32 %v2730_v32, %v2730_v32  ;;  %v1170_v63 = vsel %vm22_vm1, %v1083_v19, 0.0 }
 0x1a9   :  { %v1163_v16 = vadd.f32 %v1162_v5, %v1161_v1  ;;  %v1085_v1 = vmul.f32 %v2737_v35, %v2737_v35  ;;  %v1172_v10 = vsel %vm22_vm1, %v1084_v40, 0.0 }
 0x1ab   :  { %v1165_v33 = vadd.f32 %v1164_v30, %v1163_v16  ;;  %v1086_v16 = vmul.f32 %v2744_v42, %v2744_v42  ;;  %v1174_v19 = vsel %vm22_vm1, %v1085_v1, 0.0 }
 0x1ad   :  { %v1167_v26 = vadd.f32 %v1166_v59, %v1165_v33  ;;  %v1087_v33 = vmul.f32 %v2751_v45, %v2751_v45  ;;  %v1176_v40 = vsel %vm22_vm1, %v1086_v16, 0.0 }
 0x1af   :  { %v1169_v31 = vadd.f32 %v1168_v6, %v1167_v26  ;;  %v1088_v26 = vmul.f32 %v2758_v48, %v2758_v48  ;;  %v1178_v1 = vsel %vm22_vm1, %v1087_v33, 0.0 }
 0x1b1   :  { %v1171_v5 = vadd.f32 %v1170_v63, %v1169_v31  ;;  %v1089_v31 = vmul.f32 %v2765_v54, %v2765_v54  ;;  %v1180_v16 = vsel %vm22_vm1, %v1088_v26, 0.0 }
 0x1b3   :  { %v1173_v30 = vadd.f32 %v1172_v10, %v1171_v5  ;;  %v1090_v5 = vmul.f32 %v2772_v12, %v2772_v12  ;;  %v1182_v33 = vsel %vm22_vm1, %v1089_v31, 0.0 }
 0x1b5   :  { %v1175_v59 = vadd.f32 %v1174_v19, %v1173_v30  ;;  %v1091_v30 = vmul.f32 %v2779_v17, %v2779_v17  ;;  %v1184_v26 = vsel %vm22_vm1, %v1090_v5, 0.0 }
 0x1b7   :  { %v1177_v6 = vadd.f32 %v1176_v40, %v1175_v59  ;;  %v1092_v59 = vmul.f32 %v2786_v25, %v2786_v25  ;;  %v1186_v31 = vsel %vm22_vm1, %v1091_v30, 0.0 }
 0x1b9   :  { %v1179_v63 = vadd.f32 %v1178_v1, %v1177_v6  ;;  %v1093_v6 = vmul.f32 %v2793_v29, %v2793_v29  ;;  %v1188_v5 = vsel %vm22_vm1, %v1092_v59, 0.0 }
 0x1bb   :  { %v1181_v10 = vadd.f32 %v1180_v16, %v1179_v63  ;;  %v1094_v63 = vmul.f32 %v2800_v37, %v2800_v37  ;;  %v1190_v30 = vsel %vm22_vm1, %v1093_v6, 0.0 }
 0x1bd   :  { %v1183_v19 = vadd.f32 %v1182_v33, %v1181_v10  ;;  %v1095_v10 = vmul.f32 %v2807_v41, %v2807_v41  ;;  %v1192_v59 = vsel %vm22_vm1, %v1094_v63, 0.0 }
 0x1bf   :  { %v1185_v40 = vadd.f32 %v1184_v26, %v1183_v19  ;;  %v1096_v19 = vmul.f32 %v2814_v46, %v2814_v46  ;;  %v1194_v6 = vsel %vm22_vm1, %v1095_v10, 0.0 }
 0x1c1   :  { %v1187_v1 = vadd.f32 %v1186_v31, %v1185_v40  ;;  %v1097_v40 = vmul.f32 %v2821_v53, %v2821_v53  ;;  %v1196_v63 = vsel %vm22_vm1, %v1096_v19, 0.0 }
 0x1c3   :  { %v1189_v16 = vadd.f32 %v1188_v5, %v1187_v1  ;;  %v1098_v1 = vmul.f32 %v2828_v3, %v2828_v3  ;;  %v1198_v10 = vsel %vm22_vm1, %v1097_v40, 0.0 }
 0x1c5   :  { %v1191_v33 = vadd.f32 %v1190_v30, %v1189_v16  ;;  %v1099_v16 = vmul.f32 %v2835_v9, %v2835_v9  ;;  %v1200_v19 = vsel %vm22_vm1, %v1098_v1, 0.0 }
 0x1c7   :  { %v1193_v26 = vadd.f32 %v1192_v59, %v1191_v33  ;;  %v1100_v33 = vmul.f32 %v2842_v14, %v2842_v14  ;;  %v1202_v40 = vsel %vm22_vm1, %v1099_v16, 0.0 }
 0x1c9   :  { %v1195_v31 = vadd.f32 %v1194_v6, %v1193_v26  ;;  %v1101_v26 = vmul.f32 %v2849_v22, %v2849_v22  ;;  %v1204_v1 = vsel %vm22_vm1, %v1100_v33, 0.0 }
 0x1cb   :  { %v1197_v5 = vadd.f32 %v1196_v63, %v1195_v31  ;;  %v4154_v31 = vld [vmem:[#allocation3_spill] sm:$0xff]  ;;  %v1102_v63 = vmul.f32 %v2856_v34, %v2856_v34  ;;  %v1206_v16 = vsel %vm22_vm1, %v1101_v26, 0.0 }
 0x1cc   :  { %v2870_v51 = vsub.f32 %v4154_v31, %v2553_v7 }
 0x1cd   :  { %v1199_v30 = vadd.f32 %v1198_v10, %v1197_v5  ;;  %v4156_v10 = vld [vmem:[#allocation4_spill] sm:$0xff]  ;;  %v1208_v33 = vsel %vm22_vm1, %v1102_v63, 0.0 }
 0x1ce   :  { %4155 = vst [vmem:[#allocation3_spill] sm:$0xff] %v2870_v51  ;;  %v2877_v62 = vsub.f32 %v4156_v10, %v2553_v7  ;;  %v1104_v31 = vmul.f32 %v2870_v51, %v2870_v51 }
 0x1cf   :  { %v1201_v59 = vadd.f32 %v1200_v19, %v1199_v30  ;;  %v1103_v30 = vmul.f32 %v2863_v43, %v2863_v43 }
 0x1d0   :  { %4157 = vst [vmem:[#allocation4_spill] sm:$0xff] %v2877_v62  ;;  %v1105_v43 = vmul.f32 %v2877_v62, %v2877_v62  ;;  %v1212_v63 = vsel %vm22_vm1, %v1104_v31, 0.0 }
 0x1d1   :  { %v1203_v6 = vadd.f32 %v1202_v40, %v1201_v59  ;;  %v4158_v59 = vld [vmem:[#allocation5_spill] sm:$0xff]  ;;  %v1210_v26 = vsel %vm22_vm1, %v1103_v30, 0.0 }
 0x1d2   :  { %v2884_v40 = vsub.f32 %v4158_v59, %v2553_v7  ;;  %v1214_v30 = vsel %vm22_vm1, %v1105_v43, 0.0 }
 0x1d3   :  { %v1205_v5 = vadd.f32 %v1204_v1, %v1203_v6  ;;  %v4160_v1 = vld [vmem:[#allocation6_spill] sm:$0xff] }
 0x1d4   :  { %4159 = vst [vmem:[#allocation5_spill] sm:$0xff] %v2884_v40  ;;  %v2891_v10 = vsub.f32 %v4160_v1, %v2553_v7  ;;  %v1106_v51 = vmul.f32 %v2884_v40, %v2884_v40 }
 0x1d5   :  { %v1207_v19 = vadd.f32 %v1206_v16, %v1205_v5  ;;  %v4162_v16 = vld [vmem:[#allocation7_spill] sm:$0xff] }
 0x1d6   :  { %4161 = vst [vmem:[#allocation6_spill] sm:$0xff] %v2891_v10  ;;  %v2898_v59 = vsub.f32 %v4162_v16, %v2553_v7  ;;  %v1107_v62 = vmul.f32 %v2891_v10, %v2891_v10  ;;  %v1216_v31 = vsel %vm22_vm1, %v1106_v51, 0.0 }
 0x1d7   :  { %v1209_v6 = vadd.f32 %v1208_v33, %v1207_v19  ;;  %v4164_v33 = vld [vmem:[#allocation8_spill] sm:$0xff] }
 0x1d8   :  { %4163 = vst [vmem:[#allocation7_spill] sm:$0xff] %v2898_v59  ;;  %v2905_v1 = vsub.f32 %v4164_v33, %v2553_v7  ;;  %v1108_v40 = vmul.f32 %v2898_v59, %v2898_v59  ;;  %v1218_v43 = vsel %vm22_vm1, %v1107_v62, 0.0 }
 0x1d9   :  { %v1211_v5 = vadd.f32 %v1210_v26, %v1209_v6  ;;  %v4166_v26 = vld [vmem:[#allocation9_spill] sm:$0xff] }
 0x1da   :  { %4165 = vst [vmem:[#allocation8_spill] sm:$0xff] %v2905_v1  ;;  %v2912_v16 = vsub.f32 %v4166_v26, %v2553_v7  ;;  %v1109_v10 = vmul.f32 %v2905_v1, %v2905_v1  ;;  %v1220_v51 = vsel %vm22_vm1, %v1108_v40, 0.0 }
 0x1db   :  { %v1213_v19 = vadd.f32 %v1212_v63, %v1211_v5  ;;  %v4168_v63 = vld [vmem:[#allocation10_spill] sm:$0xff] }
 0x1dc   :  { %4167 = vst [vmem:[#allocation9_spill] sm:$0xff] %v2912_v16  ;;  %v2919_v33 = vsub.f32 %v4168_v63, %v2553_v7  ;;  %v1110_v59 = vmul.f32 %v2912_v16, %v2912_v16  ;;  %v1222_v62 = vsel %vm22_vm1, %v1109_v10, 0.0 }
 0x1dd   :  { %v1215_v6 = vadd.f32 %v1214_v30, %v1213_v19  ;;  %v4170_v30 = vld [vmem:[#allocation11_spill] sm:$0xff] }
 0x1de   :  { %4169 = vst [vmem:[#allocation10_spill] sm:$0xff] %v2919_v33  ;;  %v2926_v26 = vsub.f32 %v4170_v30, %v2553_v7  ;;  %v1111_v1 = vmul.f32 %v2919_v33, %v2919_v33  ;;  %v1224_v40 = vsel %vm22_vm1, %v1110_v59, 0.0 }
 0x1df   :  { %v1217_v5 = vadd.f32 %v1216_v31, %v1215_v6  ;;  %v4172_v31 = vld [vmem:[#allocation12_spill] sm:$0xff] }
 0x1e0   :  { %4171 = vst [vmem:[#allocation11_spill] sm:$0xff] %v2926_v26  ;;  %v2933_v63 = vsub.f32 %v4172_v31, %v2553_v7  ;;  %v1112_v16 = vmul.f32 %v2926_v26, %v2926_v26  ;;  %v1226_v10 = vsel %vm22_vm1, %v1111_v1, 0.0 }
 0x1e1   :  { %v1219_v19 = vadd.f32 %v1218_v43, %v1217_v5  ;;  %v4174_v43 = vld [vmem:[#allocation13_spill] sm:$0xff] }
 0x1e2   :  { %4173 = vst [vmem:[#allocation12_spill] sm:$0xff] %v2933_v63  ;;  %v2940_v30 = vsub.f32 %v4174_v43, %v2553_v7  ;;  %v1113_v33 = vmul.f32 %v2933_v63, %v2933_v63  ;;  %v1228_v59 = vsel %vm22_vm1, %v1112_v16, 0.0 }
 0x1e3   :  { %v1221_v6 = vadd.f32 %v1220_v51, %v1219_v19  ;;  %v4176_v51 = vld [vmem:[#allocation14_spill] sm:$0xff] }
 0x1e4   :  { %4175 = vst [vmem:[#allocation13_spill] sm:$0xff] %v2940_v30  ;;  %v2947_v31 = vsub.f32 %v4176_v51, %v2553_v7  ;;  %v1114_v26 = vmul.f32 %v2940_v30, %v2940_v30  ;;  %v1230_v1 = vsel %vm22_vm1, %v1113_v33, 0.0 }
 0x1e5   :  { %v1223_v5 = vadd.f32 %v1222_v62, %v1221_v6  ;;  %v4178_v62 = vld [vmem:[#allocation15_spill] sm:$0xff] }
 0x1e6   :  { %4177 = vst [vmem:[#allocation14_spill] sm:$0xff] %v2947_v31  ;;  %v2954_v43 = vsub.f32 %v4178_v62, %v2553_v7  ;;  %v1115_v63 = vmul.f32 %v2947_v31, %v2947_v31  ;;  %v1232_v16 = vsel %vm22_vm1, %v1114_v26, 0.0 }
 0x1e7   :  { %v1225_v19 = vadd.f32 %v1224_v40, %v1223_v5  ;;  %v4180_v40 = vld [vmem:[#allocation16_spill] sm:$0xff] }
 0x1e8   :  { %4179 = vst [vmem:[#allocation15_spill] sm:$0xff] %v2954_v43  ;;  %v2961_v51 = vsub.f32 %v4180_v40, %v2553_v7  ;;  %v1116_v30 = vmul.f32 %v2954_v43, %v2954_v43  ;;  %v1234_v33 = vsel %vm22_vm1, %v1115_v63, 0.0 }
 0x1e9   :  { %v1227_v6 = vadd.f32 %v1226_v10, %v1225_v19  ;;  %v4182_v10 = vld [vmem:[#allocation17_spill] sm:$0xff] }
 0x1ea   :  { %4181 = vst [vmem:[#allocation16_spill] sm:$0xff] %v2961_v51  ;;  %v2968_v62 = vsub.f32 %v4182_v10, %v2553_v7  ;;  %v1117_v31 = vmul.f32 %v2961_v51, %v2961_v51  ;;  %v1236_v26 = vsel %vm22_vm1, %v1116_v30, 0.0  ;;  %v1122_v30 = vmul.f32 %v2559_v27, %v2559_v27 }
 0x1eb   :  { %v1229_v5 = vadd.f32 %v1228_v59, %v1227_v6  ;;  %v4184_v59 = vld [vmem:[#allocation18_spill] sm:$0xff] }
 0x1ec   :  { %4183 = vst [vmem:[#allocation17_spill] sm:$0xff] %v2968_v62  ;;  %v2975_v40 = vsub.f32 %v4184_v59, %v2553_v7  ;;  %v1118_v10 = vmul.f32 %v2968_v62, %v2968_v62  ;;  %v1238_v59 = vsel %vm22_vm1, %v1117_v31, 0.0 }
 0x1ed   :  { %v1231_v19 = vadd.f32 %v1230_v1, %v1229_v5  ;;  %v2982_v1 = vsub.f32 %v2545_v18, %v2553_v7  ;;  %v1121_v7 = vmul.f32 %v2556_v38, %v2556_v38 }
 0x1ee   :  { %4185 = vst [vmem:[#allocation18_spill] sm:$0xff] %v2975_v40 }
 0x1ef   :  { %v1233_v6 = vadd.f32 %v1232_v16, %v1231_v19  ;;  %4186 = vst [vmem:[#allocation23_spill] sm:$0xff] %v2982_v1  ;;  %v1119_v16 = vmul.f32 %v2975_v40, %v2975_v40  ;;  %v1120_v63 = vmul.f32 %v2982_v1, %v2982_v1  ;;  %v1246_v31 = vsel %vm22_vm1, %v1121_v7, 0.0 }
 0x1f1   :  { %v1235_v5 = vadd.f32 %v1234_v33, %v1233_v6  ;;  %v1240_v6 = vsel %vm22_vm1, %v1118_v10, 0.0  ;;  %v1242_v18 = vsel %vm22_vm1, %v1119_v16, 0.0 }
 0x1f3   :  { %v1237_v19 = vadd.f32 %v1236_v26, %v1235_v5  ;;  %v1244_v5 = vsel %vm22_vm1, %v1120_v63, 0.0 }
 0x1f5   :  { %v1239_v43 = vadd.f32 %v1238_v59, %v1237_v19  ;;  %v1248_v59 = vsel %vm22_vm1, %v1122_v30, 0.0 }
 0x1f7   :  { %v1241_v33 = vadd.f32 %v1240_v6, %v1239_v43 }
 0x1f9   :  { %v1243_v62 = vadd.f32 %v1242_v18, %v1241_v33 }
 0x1fb   :  { %v1245_v26 = vadd.f32 %v1244_v5, %v1243_v62 }
 0x1fd   :  { %v1247_v19 = vadd.f32 %v1246_v31, %v1245_v26 }
 0x1ff   :  { %v1249_v1 = vadd.f32 %v1248_v59, %v1247_v19  ;;  %v4188_v59 = vld [vmem:[#allocation20_spill] sm:$0xff] }
 0x201   :  { %v1250_v10 = vrot.slane %v1249_v1, 4 }
 0x203   :  { %v1251_v43 = vadd.f32 %v1250_v10, %v1249_v1  ;;  %v1268_v1 = vld [vmem:[%s4081_s2] sm:$0x1]  ;;  %v4189_v10 = vld [vmem:[#allocation21_spill] sm:$0xff] }
 0x205   :  { %v1252_v6 = vrot.slane %v1251_v43, 2 }
 0x207   :  { %v1253_v40 = vadd.f32 %v1252_v6, %v1251_v43  ;;  %v4190_v43 = vld [vmem:[#allocation22_spill] sm:$0xff]  ;;  %v4191_v6 = vld [vmem:[#allocation3_spill] sm:$0xff] }
 0x209   :  { %v1254_v38 = vrot.slane %v1253_v40, 1 }
 0x20b   :  { %v1255_v51 = vadd.f32 %v1254_v38, %v1253_v40 }
 0x20d   :  { %v1256_v16 = vmul.f32 0.001953125, %v1255_v51 }
 0x20f   :  { %v1257_v33 = vadd.f32 1e-05, %v1256_v16  ;;  %v4192_v16 = vld [vmem:[#allocation4_spill] sm:$0xff] }
 0x211   :  { %1946 = vrsqrt.f32 %v1257_v33  ;;  %vm1264_vm3 = vweird.f32 %v1257_v33 }
 0x217   :  { %v1947_v18 = vpop.eup %1946 }
 0x218   :  { %v1259_v34 = vmul.f32 %v1947_v18, %v1257_v33  ;;  %vm1265_vm2 = vweird.f32 %v1947_v18  ;;  %v4193_v33 = vld [vmem:[#allocation5_spill] sm:$0xff] }
 0x219   :  { %vm1266_vm4 = vmor %vm1264_vm3, %vm1265_vm2 }
 0x21a   :  { %v1260_v22 = vmul.f32 %v1947_v18, %v1259_v34 }
 0x21c   :  { %v1261_v63 = vmul.f32 0.5, %v1260_v22  ;;  %v3011_v22 = vld [vmem:[%s4080_s3] ss:$0 sm:$0xff] }
 0x21e   :  { %v1262_v62 = vsub.f32 1.5, %v1261_v63  ;;  %v4194_v63 = vld [vmem:[#allocation6_spill] sm:$0xff] }
 0x220   :  { %v1263_v5 = vmul.f32 %v1947_v18, %v1262_v62 }
 0x222   :  { %v1267_v7 = vsel %vm1266_vm4, %v1947_v18, %v1263_v5  ;;  %v4195_v5 = vld [vmem:[#allocation7_spill] sm:$0xff] }
 0x223   :  { %v1269_v30 = vmul.f32 %v1268_v1, %v1267_v7  ;;  %v4196_v1 = vld [vmem:[#allocation8_spill] sm:$0xff] }
 0x225   :  { %v3004_v26 = vperm.slane %v1269_v30, 0 }
 0x227   :  { %v1334_v38 = vmul.f32 %v3004_v26, %v2559_v27  ;;  %v3018_v51 = vmul.f32 %v3004_v26, %v2563_v55  ;;  %v3022_v40 = vmul.f32 %v3004_v26, %v2567_v58  ;;  %v3026_v31 = vmul.f32 %v3004_v26, %v2571_v47 }
 0x228   :  { %v3030_v27 = vmul.f32 %v3004_v26, %v2575_v13  ;;  %v3034_v19 = vmul.f32 %v3004_v26, %v2583_v23  ;;  %v3038_v55 = vmul.f32 %v3004_v26, %v2589_v24  ;;  %v3042_v58 = vmul.f32 %v3004_v26, %v2597_v44 }
 0x229   :  { %v3014_v34 = vadd.f32 %v3011_v22, %v1334_v38  ;;  %v3046_v47 = vmul.f32 %v3004_v26, %v2604_v36  ;;  %v3050_v13 = vmul.f32 %v3004_v26, %v2611_v49  ;;  %v3054_v23 = vmul.f32 %v3004_v26, %v2618_v56  ;;  %v4197_v38 = vld [vmem:[#allocation9_spill] sm:$0xff] }
 0x22a   :  { %v3058_v24 = vmul.f32 %v3004_v26, %v2625_v61  ;;  %v3062_v44 = vmul.f32 %v3004_v26, %v2632_v2  ;;  %v3066_v36 = vmul.f32 %v3004_v26, %v2639_v8  ;;  %v3070_v49 = vmul.f32 %v3004_v26, %v2646_v11 }
 0x22b   :  { %4187 = vst [vmem:[#allocation24_spill] sm:$0xff] %v3014_v34  ;;  %v3074_v56 = vmul.f32 %v3004_v26, %v2653_v15  ;;  %v3078_v61 = vmul.f32 %v3004_v26, %v2660_v21  ;;  %v3082_v2 = vmul.f32 %v3004_v26, %v2667_v39  ;;  %v3086_v8 = vmul.f32 %v3004_v26, %v2674_v52  ;;  %v4207_v34 = vld [vmem:[#allocation14_spill] sm:$0xff] }
 0x22c   :  { %v3090_v11 = vmul.f32 %v3004_v26, %v2681_v50  ;;  %v3094_v15 = vmul.f32 %v3004_v26, %v2688_v57  ;;  %v3098_v21 = vmul.f32 %v3004_v26, %v2695_v60  ;;  %v3102_v39 = vmul.f32 %v3004_v26, %v2702_v0 }
 0x22d   :  { %v3106_v52 = vmul.f32 %v3004_v26, %v2709_v4  ;;  %v3110_v50 = vmul.f32 %v3004_v26, %v2716_v20  ;;  %v3114_v57 = vmul.f32 %v3004_v26, %v2723_v28  ;;  %v3118_v60 = vmul.f32 %v3004_v26, %v2730_v32 }
 0x22e   :  { %v3122_v0 = vmul.f32 %v3004_v26, %v2737_v35  ;;  %v3126_v4 = vmul.f32 %v3004_v26, %v2744_v42  ;;  %v3130_v20 = vmul.f32 %v3004_v26, %v2751_v45  ;;  %v3134_v28 = vmul.f32 %v3004_v26, %v2758_v48 }
 0x22f   :  { %v3138_v32 = vmul.f32 %v3004_v26, %v2765_v54  ;;  %v3142_v35 = vmul.f32 %v3004_v26, %v2772_v12  ;;  %v3146_v42 = vmul.f32 %v3004_v26, %v2779_v17  ;;  %v3150_v45 = vmul.f32 %v3004_v26, %v2786_v25 }
 0x230   :  { %v3154_v48 = vmul.f32 %v3004_v26, %v2793_v29  ;;  %v3158_v54 = vmul.f32 %v3004_v26, %v2800_v37  ;;  %v3162_v12 = vmul.f32 %v3004_v26, %v2807_v41  ;;  %v3166_v17 = vmul.f32 %v3004_v26, %v2814_v46 }
 0x231   :  { %v3170_v25 = vmul.f32 %v3004_v26, %v2821_v53  ;;  %v3174_v29 = vmul.f32 %v3004_v26, %v2828_v3  ;;  %v3178_v37 = vmul.f32 %v3004_v26, %v2835_v9  ;;  %v3182_v41 = vmul.f32 %v3004_v26, %v2842_v14 }
 0x232   :  { %v3186_v46 = vmul.f32 %v3004_v26, %v4188_v59  ;;  %v3190_v53 = vmul.f32 %v3004_v26, %v4189_v10  ;;  %v3194_v3 = vmul.f32 %v3004_v26, %v4190_v43  ;;  %v3198_v9 = vmul.f32 %v3004_v26, %v4191_v6  ;;  %v4199_v10 = vld [vmem:[#allocation10_spill] sm:$0xff]  ;;  %v4201_v6 = vld [vmem:[#allocation11_spill] sm:$0xff] }
 0x233   :  { %v3202_v14 = vmul.f32 %v3004_v26, %v4192_v16  ;;  %v3206_v18 = vmul.f32 %v3004_v26, %v4193_v33  ;;  %v3210_v62 = vmul.f32 %v3004_v26, %v4194_v63  ;;  %v3214_v7 = vmul.f32 %v3004_v26, %v4195_v5  ;;  %v4203_v33 = vld [vmem:[#allocation12_spill] sm:$0xff]  ;;  %v4205_v5 = vld [vmem:[#allocation13_spill] sm:$0xff] }
 0x234   :  { %v3218_v30 = vmul.f32 %v3004_v26, %v4196_v1  ;;  %v3222_v59 = vmul.f32 %v3004_v26, %v4197_v38  ;;  %v3226_v43 = vmul.f32 %v3004_v26, %v4199_v10  ;;  %v3230_v16 = vmul.f32 %v3004_v26, %v4201_v6 }
 0x235   :  { %v3234_v63 = vmul.f32 %v3004_v26, %v4203_v33  ;;  %v3238_v1 = vmul.f32 %v3004_v26, %v4205_v5  ;;  %v3242_v38 = vmul.f32 %v3004_v26, %v4207_v34 }
 0x236   :  { %4198 = vst [vmem:[#allocation20_spill] sm:$0xff] %v3222_v59  ;;  %v4209_v59 = vld [vmem:[#allocation15_spill] sm:$0xff] }
 0x237   :  { %4200 = vst [vmem:[#allocation21_spill] sm:$0xff] %v3226_v43  ;;  %v3246_v10 = vmul.f32 %v3004_v26, %v4209_v59  ;;  %v4210_v43 = vld [vmem:[#allocation16_spill] sm:$0xff] }
 0x238   :  { %4202 = vst [vmem:[#allocation22_spill] sm:$0xff] %v3230_v16  ;;  %v3250_v6 = vmul.f32 %v3004_v26, %v4210_v43  ;;  %v4211_v16 = vld [vmem:[#allocation17_spill] sm:$0xff]  ;;  %v3270_v43 = vadd.f32 %v3011_v22, %v3018_v51  ;;  %v3290_v51 = vadd.f32 %v3011_v22, %v3038_v55  ;;  %v3310_v55 = vadd.f32 %v3011_v22, %v3058_v24 }
 0x239   :  { %4204 = vst [vmem:[#allocation3_spill] sm:$0xff] %v3234_v63  ;;  %v3254_v33 = vmul.f32 %v3004_v26, %v4211_v16  ;;  %v4212_v63 = vld [vmem:[#allocation18_spill] sm:$0xff]  ;;  %v3274_v16 = vadd.f32 %v3011_v22, %v3022_v40  ;;  %v3294_v40 = vadd.f32 %v3011_v22, %v3042_v58  ;;  %v3314_v58 = vadd.f32 %v3011_v22, %v3062_v44 }
 0x23a   :  { %4206 = vst [vmem:[#allocation4_spill] sm:$0xff] %v3238_v1  ;;  %v3258_v5 = vmul.f32 %v3004_v26, %v4212_v63  ;;  %v4213_v1 = vld [vmem:[#allocation23_spill] sm:$0xff]  ;;  %v3278_v63 = vadd.f32 %v3011_v22, %v3026_v31  ;;  %v3298_v31 = vadd.f32 %v3011_v22, %v3046_v47  ;;  %v3318_v47 = vadd.f32 %v3011_v22, %v3066_v36 }
 0x23b   :  { %4208 = vst [vmem:[#allocation5_spill] sm:$0xff] %v3242_v38  ;;  %v3262_v34 = vmul.f32 %v3004_v26, %v4213_v1  ;;  %v4214_v38 = vld [vmem:[#allocation19_spill] sm:$0xff]  ;;  %v3282_v1 = vadd.f32 %v3011_v22, %v3030_v27  ;;  %v3302_v27 = vadd.f32 %v3011_v22, %v3050_v13  ;;  %v3322_v13 = vadd.f32 %v3011_v22, %v3070_v49 }
 0x23c   :  { %v3266_v59 = vmul.f32 %v3004_v26, %v4214_v38  ;;  %v3286_v26 = vadd.f32 %v3011_v22, %v3034_v19  ;;  %v3306_v19 = vadd.f32 %v3011_v22, %v3054_v23  ;;  %v3326_v23 = vadd.f32 %v3011_v22, %v3074_v56 }
 0x23d   :  { %v3330_v24 = vadd.f32 %v3011_v22, %v3078_v61  ;;  %v3334_v44 = vadd.f32 %v3011_v22, %v3082_v2  ;;  %v3338_v36 = vadd.f32 %v3011_v22, %v3086_v8  ;;  %v3342_v49 = vadd.f32 %v3011_v22, %v3090_v11  ;;  %v4220_v38 = vld [vmem:[#allocation20_spill] sm:$0xff] }
 0x23e   :  { %v3346_v56 = vadd.f32 %v3011_v22, %v3094_v15  ;;  %v3350_v61 = vadd.f32 %v3011_v22, %v3098_v21  ;;  %v3354_v2 = vadd.f32 %v3011_v22, %v3102_v39  ;;  %v3358_v8 = vadd.f32 %v3011_v22, %v3106_v52 }
 0x23f   :  { %v3362_v11 = vadd.f32 %v3011_v22, %v3110_v50  ;;  %v3366_v15 = vadd.f32 %v3011_v22, %v3114_v57  ;;  %v3370_v21 = vadd.f32 %v3011_v22, %v3118_v60  ;;  %v3374_v39 = vadd.f32 %v3011_v22, %v3122_v0 }
 0x240   :  { %v3378_v52 = vadd.f32 %v3011_v22, %v3126_v4  ;;  %v3382_v50 = vadd.f32 %v3011_v22, %v3130_v20  ;;  %v3386_v57 = vadd.f32 %v3011_v22, %v3134_v28  ;;  %v3390_v60 = vadd.f32 %v3011_v22, %v3138_v32 }
 0x241   :  { %v3394_v0 = vadd.f32 %v3011_v22, %v3142_v35  ;;  %v3398_v4 = vadd.f32 %v3011_v22, %v3146_v42  ;;  %v3402_v20 = vadd.f32 %v3011_v22, %v3150_v45  ;;  %v3406_v28 = vadd.f32 %v3011_v22, %v3154_v48 }
 0x242   :  { %v3410_v32 = vadd.f32 %v3011_v22, %v3158_v54  ;;  %v3414_v35 = vadd.f32 %v3011_v22, %v3162_v12  ;;  %v3418_v42 = vadd.f32 %v3011_v22, %v3166_v17  ;;  %v3422_v45 = vadd.f32 %v3011_v22, %v3170_v25 }
 0x243   :  { %v3426_v48 = vadd.f32 %v3011_v22, %v3174_v29  ;;  %v3430_v54 = vadd.f32 %v3011_v22, %v3178_v37  ;;  %v3434_v12 = vadd.f32 %v3011_v22, %v3182_v41  ;;  %v3438_v17 = vadd.f32 %v3011_v22, %v3186_v46 }
 0x244   :  { %v3442_v25 = vadd.f32 %v3011_v22, %v3190_v53  ;;  %v3446_v29 = vadd.f32 %v3011_v22, %v3194_v3  ;;  %v3450_v37 = vadd.f32 %v3011_v22, %v3198_v9  ;;  %v3454_v41 = vadd.f32 %v3011_v22, %v3202_v14 }
 0x245   :  { %v3458_v46 = vadd.f32 %v3011_v22, %v3206_v18  ;;  %v3462_v53 = vadd.f32 %v3011_v22, %v3210_v62  ;;  %v3466_v3 = vadd.f32 %v3011_v22, %v3214_v7  ;;  %v3470_v9 = vadd.f32 %v3011_v22, %v3218_v30  ;;  %v4225_v30 = vld [vmem:[#allocation4_spill] sm:$0xff] }
 0x246   :  { %4215 = vst [vmem:[#allocation6_spill] sm:$0xff] %v3454_v41  ;;  %v3474_v14 = vadd.f32 %v3011_v22, %v4220_v38  ;;  %v4222_v41 = vld [vmem:[#allocation21_spill] sm:$0xff]  ;;  %vm1403_vm5 = vcmp.ge.f32.partialorder %v3270_v43, 0.0  ;;  %vm1404_vm6 = vcmp.ge.f32.partialorder %v3274_v16, 0.0  ;;  %vm1405_vm7 = vcmp.ge.f32.partialorder %v3278_v63, 0.0 }
 0x247   :  { %4216 = vst [vmem:[#allocation7_spill] sm:$0xff] %v3458_v46  ;;  %v3478_v18 = vadd.f32 %v3011_v22, %v4222_v41  ;;  %v4223_v46 = vld [vmem:[#allocation22_spill] sm:$0xff]  ;;  %v4226_v38 = vld [vmem:[#allocation5_spill] sm:$0xff]  ;;  %v1468_v41 = vmul.f32 0.01, %v3274_v16  ;;  %vm1406_vm8 = vcmp.ge.f32.partialorder %v3282_v1, 0.0 }
 0x248   :  { %4217 = vst [vmem:[#allocation8_spill] sm:$0xff] %v3462_v53  ;;  %v3482_v62 = vadd.f32 %v3011_v22, %v4223_v46  ;;  %v4224_v53 = vld [vmem:[#allocation3_spill] sm:$0xff]  ;;  %v3501_v46 = vadd.f32 %v3011_v22, %v3246_v10  ;;  %v1470_v10 = vmul.f32 0.01, %v3282_v1  ;;  %vm1407_vm9 = vcmp.ge.f32.partialorder %v3286_v26, 0.0 }
 0x249   :  { %4218 = vst [vmem:[#allocation9_spill] sm:$0xff] %v3466_v3  ;;  %v3486_v7 = vadd.f32 %v3011_v22, %v4224_v53  ;;  %v1467_v3 = vmul.f32 0.01, %v3270_v43  ;;  %v3505_v53 = vadd.f32 %v3011_v22, %v3250_v6  ;;  %v3521_v6 = vadd.f32 %v3011_v22, %v3262_v34 }
 0x24a   :  { %4219 = vst [vmem:[#allocation10_spill] sm:$0xff] %v3470_v9  ;;  %v3491_v9 = vadd.f32 %v3011_v22, %v4225_v30  ;;  %v1469_v30 = vmul.f32 0.01, %v3278_v63  ;;  %vm1408_vm10 = vcmp.ge.f32.partialorder %v3290_v51, 0.0  ;;  %vm1409_vm11 = vcmp.ge.f32.partialorder %v3294_v40, 0.0 }
 0x24b   :  { %4221 = vst [vmem:[#allocation11_spill] sm:$0xff] %v3474_v14  ;;  %v3495_v14 = vadd.f32 %v3011_v22, %v4226_v38  ;;  %v3511_v38 = vadd.f32 %v3011_v22, %v3254_v33  ;;  %v3528_v33 = vadd.f32 %v3011_v22, %v3266_v59  ;;  %v1473_v34 = vmul.f32 0.01, %v3294_v40 }
 0x24c   :  { %4228 = vst [vmem:[#allocation13_spill] sm:$0xff] %v3501_v46  ;;  %v1531_v46 = vsel %vm1403_vm5, %v3270_v43, %v1467_v3  ;;  %vm1410_vm12 = vcmp.ge.f32.partialorder %v3298_v31, 0.0  ;;  %v1474_v43 = vmul.f32 0.01, %v3298_v31  ;;  %vm1411_vm13 = vcmp.ge.f32.partialorder %v3302_v27, 0.0 }
 0x24d   :  { %4227 = vst [vmem:[#allocation12_spill] sm:$0xff] %v3495_v14  ;;  %v3515_v14 = vadd.f32 %v3011_v22, %v3258_v5  ;;  %v1472_v5 = vmul.f32 0.01, %v3290_v51  ;;  %v1534_v22 = vsel %vm1406_vm8, %v3282_v1, %v1470_v10  ;;  %v1595_v59 = vpack.c.bf16 %v1531_v46, %v1531_v46 }
 0x24e   :  { %4229 = vst [vmem:[#allocation14_spill] sm:$0xff] %v3505_v53  ;;  %v1471_v53 = vmul.f32 0.01, %v3286_v26  ;;  %v1475_v3 = vmul.f32 0.01, %v3302_v27  ;;  %vm1412_vm14 = vcmp.ge.f32.partialorder %v3306_v19, 0.0  ;;  %v1537_v1 = vsel %vm1409_vm11, %v3294_v40, %v1473_v34 }
 0x24f   :  { %4230 = vst [vmem:[#allocation15_spill] sm:$0xff] %v3511_v38  ;;  %v1477_v38 = vmul.f32 0.01, %v3310_v55  ;;  %v1598_v46 = vpack.c.bf16 %v1534_v22, %v1534_v22  ;;  %vm1413_vm0 = vcmp.ge.f32.partialorder %v3310_v55, 0.0  ;;  %vm1414_vm1 = vcmp.ge.f32.partialorder %v3314_v58, 0.0 }
 0x250   :  { %4231 = vst [vmem:[#allocation16_spill] sm:$0xff] %v3515_v14  ;;  %v1532_v14 = vsel %vm1404_vm6, %v3274_v16, %v1468_v41  ;;  %v1535_v16 = vsel %vm1407_vm9, %v3286_v26, %v1471_v53  ;;  %v1478_v26 = vmul.f32 0.01, %v3314_v58  ;;  %v1539_v40 = vsel %vm1411_vm13, %v3302_v27, %v1475_v3 }
 0x251   :  { %4232 = vst [vmem:[#allocation17_spill] sm:$0xff] %v3521_v6  ;;  %v1533_v6 = vsel %vm1405_vm7, %v3278_v63, %v1469_v30  ;;  %v1596_v41 = vpack.c.bf16 %v1532_v14, %v1532_v14  ;;  %v1536_v63 = vsel %vm1408_vm10, %v3290_v51, %v1472_v5  ;;  %v1538_v14 = vsel %vm1410_vm12, %v3298_v31, %v1474_v43 }
 0x252   :  { %4233 = vst [vmem:[#allocation18_spill] sm:$0xff] %v3528_v33  ;;  %v1476_v33 = vmul.f32 0.01, %v3306_v19  ;;  %v1597_v30 = vpack.c.bf16 %v1533_v6, %v1533_v6  ;;  %v1599_v53 = vpack.c.bf16 %v1535_v16, %v1535_v16  ;;  %v1479_v51 = vmul.f32 0.01, %v3318_v47 }
 0x253   :  { %1660 = vst.msk [vmem:[%s4082_s4] sm:$0xf] %vm1659_vm15, %v1595_v59  ;;  %v1600_v10 = vpack.c.bf16 %v1536_v63, %v1536_v63  ;;  %vm1415_vm2 = vcmp.ge.f32.partialorder %v3318_v47, 0.0  ;;  %v1480_v31 = vmul.f32 0.01, %v3322_v13  ;;  %v1601_v5 = vpack.c.bf16 %v1537_v1, %v1537_v1 }
 0x254   :  { %1661 = vst.msk [vmem:[%s4082_s4 + $0x4] sm:$0xf] %vm1659_vm15, %v1596_v41  ;;  %v1540_v6 = vsel %vm1412_vm14, %v3306_v19, %v1476_v33  ;;  %vm1416_vm3 = vcmp.ge.f32.partialorder %v3322_v13, 0.0  ;;  %v1481_v27 = vmul.f32 0.01, %v3326_v23  ;;  %v1541_v34 = vsel %vm1413_vm0, %v3310_v55, %v1477_v38 }
 0x255   :  { %1662 = vst.msk [vmem:[%s4082_s4 + $0x8] sm:$0xf] %vm1659_vm15, %v1597_v30  ;;  %v1602_v43 = vpack.c.bf16 %v1538_v14, %v1538_v14  ;;  %vm1417_vm4 = vcmp.ge.f32.partialorder %v3326_v23, 0.0  ;;  %v1482_v19 = vmul.f32 0.01, %v3330_v24  ;;  %v1542_v33 = vsel %vm1414_vm1, %v3314_v58, %v1478_v26 }
 0x256   :  { %1663 = vst.msk [vmem:[%s4082_s4 + $0xc] sm:$0xf] %vm1659_vm15, %v1598_v46  ;;  %v1603_v22 = vpack.c.bf16 %v1539_v40, %v1539_v40  ;;  %vm1418_vm5 = vcmp.ge.f32.partialorder %v3330_v24, 0.0  ;;  %v1483_v55 = vmul.f32 0.01, %v3334_v44  ;;  %v1543_v38 = vsel %vm1415_vm2, %v3318_v47, %v1479_v51 }
 0x257   :  { %1664 = vst.msk [vmem:[%s4082_s4 + $0x10] sm:$0xf] %vm1659_vm15, %v1599_v53  ;;  %v1604_v59 = vpack.c.bf16 %v1540_v6, %v1540_v6  ;;  %vm1419_vm6 = vcmp.ge.f32.partialorder %v3334_v44, 0.0  ;;  %v1484_v58 = vmul.f32 0.01, %v3338_v36  ;;  %v1544_v3 = vsel %vm1416_vm3, %v3322_v13, %v1480_v31 }
 0x258   :  { %1665 = vst.msk [vmem:[%s4082_s4 + $0x14] sm:$0xf] %vm1659_vm15, %v1600_v10  ;;  %v1605_v16 = vpack.c.bf16 %v1541_v34, %v1541_v34  ;;  %vm1420_vm7 = vcmp.ge.f32.partialorder %v3338_v36, 0.0  ;;  %v1485_v47 = vmul.f32 0.01, %v3342_v49  ;;  %v1545_v41 = vsel %vm1417_vm4, %v3326_v23, %v1481_v27 }
 0x259   :  { %1666 = vst.msk [vmem:[%s4082_s4 + $0x18] sm:$0xf] %vm1659_vm15, %v1601_v5  ;;  %v1606_v63 = vpack.c.bf16 %v1542_v33, %v1542_v33  ;;  %vm1421_vm8 = vcmp.ge.f32.partialorder %v3342_v49, 0.0  ;;  %v1486_v13 = vmul.f32 0.01, %v3346_v56  ;;  %v1546_v30 = vsel %vm1418_vm5, %v3330_v24, %v1482_v19 }
 0x25a   :  { %1667 = vst.msk [vmem:[%s4082_s4 + $0x1c] sm:$0xf] %vm1659_vm15, %v1602_v43  ;;  %v1607_v1 = vpack.c.bf16 %v1543_v38, %v1543_v38  ;;  %vm1422_vm9 = vcmp.ge.f32.partialorder %v3346_v56, 0.0  ;;  %v1487_v23 = vmul.f32 0.01, %v3350_v61  ;;  %v1547_v46 = vsel %vm1419_vm6, %v3334_v44, %v1483_v55 }
 0x25b   :  { %1668 = vst.msk [vmem:[%s4082_s4 + $0x20] sm:$0xf] %vm1659_vm15, %v1603_v22  ;;  %v1608_v26 = vpack.c.bf16 %v1544_v3, %v1544_v3  ;;  %vm1423_vm10 = vcmp.ge.f32.partialorder %v3350_v61, 0.0  ;;  %v1488_v24 = vmul.f32 0.01, %v3354_v2  ;;  %v1548_v14 = vsel %vm1420_vm7, %v3338_v36, %v1484_v58 }
 0x25c   :  { %1669 = vst.msk [vmem:[%s4082_s4 + $0x24] sm:$0xf] %vm1659_vm15, %v1604_v59  ;;  %v1609_v53 = vpack.c.bf16 %v1545_v41, %v1545_v41  ;;  %vm1424_vm11 = vcmp.ge.f32.partialorder %v3354_v2, 0.0  ;;  %v1489_v44 = vmul.f32 0.01, %v3358_v8  ;;  %v1549_v51 = vsel %vm1421_vm8, %v3342_v49, %v1485_v47 }
 0x25d   :  { %1670 = vst.msk [vmem:[%s4082_s4 + $0x28] sm:$0xf] %vm1659_vm15, %v1605_v16  ;;  %v1610_v40 = vpack.c.bf16 %v1546_v30, %v1546_v30  ;;  %vm1425_vm12 = vcmp.ge.f32.partialorder %v3358_v8, 0.0  ;;  %v1490_v36 = vmul.f32 0.01, %v3362_v11  ;;  %v1550_v10 = vsel %vm1422_vm9, %v3346_v56, %v1486_v13 }
 0x25e   :  { %1671 = vst.msk [vmem:[%s4082_s4 + $0x2c] sm:$0xf] %vm1659_vm15, %v1606_v63  ;;  %v1611_v31 = vpack.c.bf16 %v1547_v46, %v1547_v46  ;;  %vm1426_vm13 = vcmp.ge.f32.partialorder %v3362_v11, 0.0  ;;  %v1491_v49 = vmul.f32 0.01, %v3366_v15  ;;  %v1551_v6 = vsel %vm1423_vm10, %v3350_v61, %v1487_v23 }
 0x25f   :  { %1672 = vst.msk [vmem:[%s4082_s4 + $0x30] sm:$0xf] %vm1659_vm15, %v1607_v1  ;;  %v1612_v5 = vpack.c.bf16 %v1548_v14, %v1548_v14  ;;  %vm1427_vm14 = vcmp.ge.f32.partialorder %v3366_v15, 0.0  ;;  %v1492_v56 = vmul.f32 0.01, %v3370_v21  ;;  %v1552_v27 = vsel %vm1424_vm11, %v3354_v2, %v1488_v24 }
 0x260   :  { %1673 = vst.msk [vmem:[%s4082_s4 + $0x34] sm:$0xf] %vm1659_vm15, %v1608_v26  ;;  %v1613_v34 = vpack.c.bf16 %v1549_v51, %v1549_v51  ;;  %vm1428_vm0 = vcmp.ge.f32.partialorder %v3370_v21, 0.0  ;;  %v1493_v61 = vmul.f32 0.01, %v3374_v39  ;;  %v1553_v43 = vsel %vm1425_vm12, %v3358_v8, %v1489_v44 }
 0x261   :  { %1674 = vst.msk [vmem:[%s4082_s4 + $0x38] sm:$0xf] %vm1659_vm15, %v1609_v53  ;;  %v1614_v19 = vpack.c.bf16 %v1550_v10, %v1550_v10  ;;  %vm1429_vm1 = vcmp.ge.f32.partialorder %v3374_v39, 0.0  ;;  %v1494_v2 = vmul.f32 0.01, %v3378_v52  ;;  %v1554_v33 = vsel %vm1426_vm13, %v3362_v11, %v1490_v36 }
 0x262   :  { %1675 = vst.msk [vmem:[%s4082_s4 + $0x3c] sm:$0xf] %vm1659_vm15, %v1610_v40  ;;  %v1615_v22 = vpack.c.bf16 %v1551_v6, %v1551_v6  ;;  %vm1430_vm2 = vcmp.ge.f32.partialorder %v3378_v52, 0.0  ;;  %v1495_v8 = vmul.f32 0.01, %v3382_v50  ;;  %v1555_v55 = vsel %vm1427_vm14, %v3366_v15, %v1491_v49 }
 0x263   :  { %1676 = vst.msk [vmem:[%s4082_s4 + $0x40] sm:$0xf] %vm1659_vm15, %v1611_v31  ;;  %v1616_v38 = vpack.c.bf16 %v1552_v27, %v1552_v27  ;;  %vm1431_vm3 = vcmp.ge.f32.partialorder %v3382_v50, 0.0  ;;  %v1496_v11 = vmul.f32 0.01, %v3386_v57  ;;  %v1556_v59 = vsel %vm1428_vm0, %v3370_v21, %v1492_v56 }
 0x264   :  { %1677 = vst.msk [vmem:[%s4082_s4 + $0x44] sm:$0xf] %vm1659_vm15, %v1612_v5  ;;  %v1617_v58 = vpack.c.bf16 %v1553_v43, %v1553_v43  ;;  %vm1432_vm4 = vcmp.ge.f32.partialorder %v3386_v57, 0.0  ;;  %v1497_v15 = vmul.f32 0.01, %v3390_v60  ;;  %v1557_v3 = vsel %vm1429_vm1, %v3374_v39, %v1493_v61 }
 0x265   :  { %1678 = vst.msk [vmem:[%s4082_s4 + $0x48] sm:$0xf] %vm1659_vm15, %v1613_v34  ;;  %v1618_v16 = vpack.c.bf16 %v1554_v33, %v1554_v33  ;;  %vm1433_vm5 = vcmp.ge.f32.partialorder %v3390_v60, 0.0  ;;  %v1498_v21 = vmul.f32 0.01, %v3394_v0  ;;  %v1558_v47 = vsel %vm1430_vm2, %v3378_v52, %v1494_v2 }
 0x266   :  { %1679 = vst.msk [vmem:[%s4082_s4 + $0x4c] sm:$0xf] %vm1659_vm15, %v1614_v19  ;;  %v1619_v41 = vpack.c.bf16 %v1555_v55, %v1555_v55  ;;  %vm1434_vm6 = vcmp.ge.f32.partialorder %v3394_v0, 0.0  ;;  %v1499_v39 = vmul.f32 0.01, %v3398_v4  ;;  %v1559_v63 = vsel %vm1431_vm3, %v3382_v50, %v1495_v8 }
 0x267   :  { %1680 = vst.msk [vmem:[%s4082_s4 + $0x50] sm:$0xf] %vm1659_vm15, %v1615_v22  ;;  %v1620_v13 = vpack.c.bf16 %v1556_v59, %v1556_v59  ;;  %vm1435_vm7 = vcmp.ge.f32.partialorder %v3398_v4, 0.0  ;;  %v1500_v52 = vmul.f32 0.01, %v3402_v20  ;;  %v1560_v30 = vsel %vm1432_vm4, %v3386_v57, %v1496_v11 }
 0x268   :  { %1681 = vst.msk [vmem:[%s4082_s4 + $0x54] sm:$0xf] %vm1659_vm15, %v1616_v38  ;;  %v1621_v1 = vpack.c.bf16 %v1557_v3, %v1557_v3  ;;  %vm1436_vm8 = vcmp.ge.f32.partialorder %v3402_v20, 0.0  ;;  %v1501_v50 = vmul.f32 0.01, %v3406_v28  ;;  %v1561_v23 = vsel %vm1433_vm5, %v3390_v60, %v1497_v15 }
 0x269   :  { %1682 = vst.msk [vmem:[%s4082_s4 + $0x58] sm:$0xf] %vm1659_vm15, %v1617_v58  ;;  %v1622_v46 = vpack.c.bf16 %v1558_v47, %v1558_v47  ;;  %vm1437_vm9 = vcmp.ge.f32.partialorder %v3406_v28, 0.0  ;;  %v1502_v57 = vmul.f32 0.01, %v3410_v32  ;;  %v1562_v26 = vsel %vm1434_vm6, %v3394_v0, %v1498_v21 }
 0x26a   :  { %1683 = vst.msk [vmem:[%s4082_s4 + $0x5c] sm:$0xf] %vm1659_vm15, %v1618_v16  ;;  %v1623_v24 = vpack.c.bf16 %v1559_v63, %v1559_v63  ;;  %vm1438_vm10 = vcmp.ge.f32.partialorder %v3410_v32, 0.0  ;;  %v1503_v60 = vmul.f32 0.01, %v3414_v35  ;;  %v1563_v14 = vsel %vm1435_vm7, %v3398_v4, %v1499_v39 }
 0x26b   :  { %1684 = vst.msk [vmem:[%s4082_s4 + $0x60] sm:$0xf] %vm1659_vm15, %v1619_v41  ;;  %v1624_v53 = vpack.c.bf16 %v1560_v30, %v1560_v30  ;;  %vm1439_vm11 = vcmp.ge.f32.partialorder %v3414_v35, 0.0  ;;  %v1504_v0 = vmul.f32 0.01, %v3418_v42  ;;  %v1564_v44 = vsel %vm1436_vm8, %v3402_v20, %v1500_v52 }
 0x26c   :  { %1685 = vst.msk [vmem:[%s4082_s4 + $0x64] sm:$0xf] %vm1659_vm15, %v1620_v13  ;;  %v1625_v51 = vpack.c.bf16 %v1561_v23, %v1561_v23  ;;  %vm1440_vm12 = vcmp.ge.f32.partialorder %v3418_v42, 0.0  ;;  %v1505_v4 = vmul.f32 0.01, %v3422_v45  ;;  %v1565_v40 = vsel %vm1437_vm9, %v3406_v28, %v1501_v50 }
 0x26d   :  { %1686 = vst.msk [vmem:[%s4082_s4 + $0x68] sm:$0xf] %vm1659_vm15, %v1621_v1  ;;  %v1626_v36 = vpack.c.bf16 %v1562_v26, %v1562_v26  ;;  %vm1441_vm13 = vcmp.ge.f32.partialorder %v3422_v45, 0.0  ;;  %v1506_v20 = vmul.f32 0.01, %v3426_v48  ;;  %v1566_v10 = vsel %vm1438_vm10, %v3410_v32, %v1502_v57 }
 0x26e   :  { %1687 = vst.msk [vmem:[%s4082_s4 + $0x6c] sm:$0xf] %vm1659_vm15, %v1622_v46  ;;  %v1627_v31 = vpack.c.bf16 %v1563_v14, %v1563_v14  ;;  %vm1442_vm14 = vcmp.ge.f32.partialorder %v3426_v48, 0.0  ;;  %v1507_v28 = vmul.f32 0.01, %v3430_v54  ;;  %v1567_v49 = vsel %vm1439_vm11, %v3414_v35, %v1503_v60 }
 0x26f   :  { %1688 = vst.msk [vmem:[%s4082_s4 + $0x70] sm:$0xf] %vm1659_vm15, %v1623_v24  ;;  %v1628_v6 = vpack.c.bf16 %v1564_v44, %v1564_v44  ;;  %vm1443_vm0 = vcmp.ge.f32.partialorder %v3430_v54, 0.0  ;;  %v1508_v32 = vmul.f32 0.01, %v3434_v12  ;;  %v1568_v5 = vsel %vm1440_vm12, %v3418_v42, %v1504_v0 }
 0x270   :  { %1689 = vst.msk [vmem:[%s4082_s4 + $0x74] sm:$0xf] %vm1659_vm15, %v1624_v53  ;;  %v1629_v56 = vpack.c.bf16 %v1565_v40, %v1565_v40  ;;  %vm1444_vm1 = vcmp.ge.f32.partialorder %v3434_v12, 0.0  ;;  %v1509_v35 = vmul.f32 0.01, %v3438_v17  ;;  %v1569_v27 = vsel %vm1441_vm13, %v3422_v45, %v1505_v4  ;;  %v4240_v4 = vld [vmem:[#allocation12_spill] sm:$0xff] }
 0x271   :  { %1690 = vst.msk [vmem:[%s4082_s4 + $0x78] sm:$0xf] %vm1659_vm15, %v1625_v51  ;;  %v1630_v34 = vpack.c.bf16 %v1566_v10, %v1566_v10  ;;  %vm1445_vm2 = vcmp.ge.f32.partialorder %v3438_v17, 0.0  ;;  %v1510_v42 = vmul.f32 0.01, %v3442_v25  ;;  %v1570_v61 = vsel %vm1442_vm14, %v3426_v48, %v1506_v20  ;;  %v4241_v10 = vld [vmem:[#allocation13_spill] sm:$0xff] }
 0x272   :  { %1691 = vst.msk [vmem:[%s4082_s4 + $0x7c] sm:$0xf] %vm1659_vm15, %v1626_v36  ;;  %v1631_v43 = vpack.c.bf16 %v1567_v49, %v1567_v49  ;;  %vm1446_vm3 = vcmp.ge.f32.partialorder %v3442_v25, 0.0  ;;  %v1511_v45 = vmul.f32 0.01, %v3446_v29  ;;  %v1571_v19 = vsel %vm1443_vm0, %v3430_v54, %v1507_v28  ;;  %v4234_v54 = vld [vmem:[#allocation6_spill] sm:$0xff] }
 0x273   :  { %1692 = vst.msk [vmem:[%s4082_s4 + $0x80] sm:$0xf] %vm1659_vm15, %v1627_v31  ;;  %v1632_v2 = vpack.c.bf16 %v1568_v5, %v1568_v5  ;;  %vm1447_vm4 = vcmp.ge.f32.partialorder %v3446_v29, 0.0  ;;  %v1512_v48 = vmul.f32 0.01, %v3450_v37  ;;  %v1572_v33 = vsel %vm1444_vm1, %v3434_v12, %v1508_v32  ;;  %v4235_v12 = vld [vmem:[#allocation7_spill] sm:$0xff] }
 0x274   :  { %1693 = vst.msk [vmem:[%s4082_s4 + $0x84] sm:$0xf] %vm1659_vm15, %v1628_v6  ;;  %v1633_v22 = vpack.c.bf16 %v1569_v27, %v1569_v27  ;;  %vm1448_vm5 = vcmp.ge.f32.partialorder %v3450_v37, 0.0  ;;  %v1513_v8 = vmul.f32 0.01, %v4234_v54  ;;  %v1573_v55 = vsel %vm1445_vm2, %v3438_v17, %v1509_v35  ;;  %v4236_v17 = vld [vmem:[#allocation8_spill] sm:$0xff] }
 0x275   :  { %1694 = vst.msk [vmem:[%s4082_s4 + $0x88] sm:$0xf] %vm1659_vm15, %v1629_v56  ;;  %v1634_v38 = vpack.c.bf16 %v1570_v61, %v1570_v61  ;;  %vm1449_vm6 = vcmp.ge.f32.partialorder %v4234_v54, 0.0  ;;  %v1514_v11 = vmul.f32 0.01, %v4235_v12  ;;  %v1574_v59 = vsel %vm1446_vm3, %v3442_v25, %v1510_v42  ;;  %v4237_v25 = vld [vmem:[#allocation9_spill] sm:$0xff] }
 0x276   :  { %1695 = vst.msk [vmem:[%s4082_s4 + $0x8c] sm:$0xf] %vm1659_vm15, %v1630_v34  ;;  %v1635_v58 = vpack.c.bf16 %v1571_v19, %v1571_v19  ;;  %vm1450_vm7 = vcmp.ge.f32.partialorder %v4235_v12, 0.0  ;;  %v1515_v15 = vmul.f32 0.01, %v4236_v17  ;;  %v1575_v3 = vsel %vm1447_vm4, %v3446_v29, %v1511_v45  ;;  %v4238_v29 = vld [vmem:[#allocation10_spill] sm:$0xff] }
 0x277   :  { %1696 = vst.msk [vmem:[%s4082_s4 + $0x90] sm:$0xf] %vm1659_vm15, %v1631_v43  ;;  %v1636_v16 = vpack.c.bf16 %v1572_v33, %v1572_v33  ;;  %vm1451_vm8 = vcmp.ge.f32.partialorder %v4236_v17, 0.0  ;;  %v1516_v21 = vmul.f32 0.01, %v4237_v25  ;;  %v1576_v47 = vsel %vm1448_vm5, %v3450_v37, %v1512_v48  ;;  %v4239_v37 = vld [vmem:[#allocation11_spill] sm:$0xff] }
 0x278   :  { %1697 = vst.msk [vmem:[%s4082_s4 + $0x94] sm:$0xf] %vm1659_vm15, %v1632_v2  ;;  %v1637_v41 = vpack.c.bf16 %v1573_v55, %v1573_v55  ;;  %vm1452_vm9 = vcmp.ge.f32.partialorder %v4237_v25, 0.0  ;;  %v1517_v39 = vmul.f32 0.01, %v4238_v29  ;;  %v1577_v63 = vsel %vm1449_vm6, %v4234_v54, %v1513_v8  ;;  %v4246_v2 = vld [vmem:[#allocation18_spill] sm:$0xff] }
 0x279   :  { %1698 = vst.msk [vmem:[%s4082_s4 + $0x98] sm:$0xf] %vm1659_vm15, %v1633_v22  ;;  %v1638_v13 = vpack.c.bf16 %v1574_v59, %v1574_v59  ;;  %vm1453_vm10 = vcmp.ge.f32.partialorder %v4238_v29, 0.0  ;;  %v1518_v52 = vmul.f32 0.01, %v4239_v37  ;;  %v1578_v30 = vsel %vm1450_vm7, %v4235_v12, %v1514_v11  ;;  %v4247_v54 = vld [vmem:[#allocation24_spill] sm:$0xff] }
 0x27a   :  { %1699 = vst.msk [vmem:[%s4082_s4 + $0x9c] sm:$0xf] %vm1659_vm15, %v1634_v38  ;;  %v1639_v1 = vpack.c.bf16 %v1575_v3, %v1575_v3  ;;  %vm1454_vm11 = vcmp.ge.f32.partialorder %v4239_v37, 0.0  ;;  %v1519_v50 = vmul.f32 0.01, %v3478_v18  ;;  %v1579_v23 = vsel %vm1451_vm8, %v4236_v17, %v1515_v15 }
 0x27b   :  { %1700 = vst.msk [vmem:[%s4082_s4 + $0xa0] sm:$0xf] %vm1659_vm15, %v1635_v58  ;;  %v1640_v46 = vpack.c.bf16 %v1576_v47, %v1576_v47  ;;  %vm1455_vm12 = vcmp.ge.f32.partialorder %v3478_v18, 0.0  ;;  %v1520_v57 = vmul.f32 0.01, %v3482_v62  ;;  %v1580_v26 = vsel %vm1452_vm9, %v4237_v25, %v1516_v21 }
 0x27c   :  { %1701 = vst.msk [vmem:[%s4082_s4 + $0xa4] sm:$0xf] %vm1659_vm15, %v1636_v16  ;;  %v1641_v24 = vpack.c.bf16 %v1577_v63, %v1577_v63  ;;  %vm1456_vm13 = vcmp.ge.f32.partialorder %v3482_v62, 0.0  ;;  %v1521_v60 = vmul.f32 0.01, %v3486_v7  ;;  %v1581_v14 = vsel %vm1453_vm10, %v4238_v29, %v1517_v39 }
 0x27d   :  { %1702 = vst.msk [vmem:[%s4082_s4 + $0xa8] sm:$0xf] %vm1659_vm15, %v1637_v41  ;;  %v1642_v53 = vpack.c.bf16 %v1578_v30, %v1578_v30  ;;  %vm1457_vm14 = vcmp.ge.f32.partialorder %v3486_v7, 0.0  ;;  %v1522_v0 = vmul.f32 0.01, %v3491_v9  ;;  %v1582_v44 = vsel %vm1454_vm11, %v4239_v37, %v1518_v52 }
 0x27e   :  { %1703 = vst.msk [vmem:[%s4082_s4 + $0xac] sm:$0xf] %vm1659_vm15, %v1638_v13  ;;  %v1643_v51 = vpack.c.bf16 %v1579_v23, %v1579_v23  ;;  %vm1458_vm0 = vcmp.ge.f32.partialorder %v3491_v9, 0.0  ;;  %v1523_v40 = vmul.f32 0.01, %v4240_v4  ;;  %v1583_v36 = vsel %vm1455_vm12, %v3478_v18, %v1519_v50  ;;  %v4242_v18 = vld [vmem:[#allocation14_spill] sm:$0xff] }
 0x27f   :  { %1704 = vst.msk [vmem:[%s4082_s4 + $0xb0] sm:$0xf] %vm1659_vm15, %v1639_v1  ;;  %v1644_v20 = vpack.c.bf16 %v1580_v26, %v1580_v26  ;;  %vm1459_vm1 = vcmp.ge.f32.partialorder %v4240_v4, 0.0  ;;  %v1524_v31 = vmul.f32 0.01, %v4241_v10  ;;  %v1584_v28 = vsel %vm1456_vm13, %v3482_v62, %v1520_v57  ;;  %v4243_v62 = vld [vmem:[#allocation15_spill] sm:$0xff] }
 0x280   :  { %1705 = vst.msk [vmem:[%s4082_s4 + $0xb4] sm:$0xf] %vm1659_vm15, %v1640_v46  ;;  %v1645_v49 = vpack.c.bf16 %v1581_v14, %v1581_v14  ;;  %vm1460_vm2 = vcmp.ge.f32.partialorder %v4241_v10, 0.0  ;;  %v1525_v6 = vmul.f32 0.01, %v4242_v18  ;;  %v1585_v32 = vsel %vm1457_vm14, %v3486_v7, %v1521_v60  ;;  %v4244_v7 = vld [vmem:[#allocation16_spill] sm:$0xff] }
 0x281   :  { %1706 = vst.msk [vmem:[%s4082_s4 + $0xb8] sm:$0xf] %vm1659_vm15, %v1641_v24  ;;  %v1646_v5 = vpack.c.bf16 %v1582_v44, %v1582_v44  ;;  %vm1461_vm3 = vcmp.ge.f32.partialorder %v4242_v18, 0.0  ;;  %v1526_v56 = vmul.f32 0.01, %v4243_v62  ;;  %v1586_v35 = vsel %vm1458_vm0, %v3491_v9, %v1522_v0  ;;  %v4245_v9 = vld [vmem:[#allocation17_spill] sm:$0xff] }
 0x282   :  { %1707 = vst.msk [vmem:[%s4082_s4 + $0xbc] sm:$0xf] %vm1659_vm15, %v1642_v53  ;;  %v1647_v27 = vpack.c.bf16 %v1583_v36, %v1583_v36  ;;  %vm1462_vm4 = vcmp.ge.f32.partialorder %v4243_v62, 0.0  ;;  %v1527_v34 = vmul.f32 0.01, %v4244_v7  ;;  %v1587_v42 = vsel %vm1459_vm1, %v4240_v4, %v1523_v40 }
 0x283   :  { %1708 = vst.msk [vmem:[%s4082_s4 + $0xc0] sm:$0xf] %vm1659_vm15, %v1643_v51  ;;  %v1648_v61 = vpack.c.bf16 %v1584_v28, %v1584_v28  ;;  %vm1463_vm5 = vcmp.ge.f32.partialorder %v4244_v7, 0.0  ;;  %v1528_v43 = vmul.f32 0.01, %v4245_v9  ;;  %v1588_v45 = vsel %vm1460_vm2, %v4241_v10, %v1524_v31 }
 0x284   :  { %1709 = vst.msk [vmem:[%s4082_s4 + $0xc4] sm:$0xf] %vm1659_vm15, %v1644_v20  ;;  %v1649_v19 = vpack.c.bf16 %v1585_v32, %v1585_v32  ;;  %vm1464_vm6 = vcmp.ge.f32.partialorder %v4245_v9, 0.0  ;;  %v1529_v48 = vmul.f32 0.01, %v4246_v2  ;;  %v1589_v33 = vsel %vm1461_vm3, %v4242_v18, %v1525_v6 }
 0x285   :  { %1710 = vst.msk [vmem:[%s4082_s4 + $0xc8] sm:$0xf] %vm1659_vm15, %v1645_v49  ;;  %v1650_v22 = vpack.c.bf16 %v1586_v35, %v1586_v35  ;;  %vm1465_vm7 = vcmp.ge.f32.partialorder %v4246_v2, 0.0  ;;  %v1530_v8 = vmul.f32 0.01, %v4247_v54  ;;  %v1590_v55 = vsel %vm1462_vm4, %v4243_v62, %v1526_v56 }
 0x286   :  { %1711 = vst.msk [vmem:[%s4082_s4 + $0xcc] sm:$0xf] %vm1659_vm15, %v1646_v5  ;;  %v1651_v38 = vpack.c.bf16 %v1587_v42, %v1587_v42  ;;  %vm1466_vm8 = vcmp.ge.f32.partialorder %v4247_v54, 0.0  ;;  %v1591_v12 = vsel %vm1463_vm5, %v4244_v7, %v1527_v34  ;;  %v1652_v11 = vpack.c.bf16 %v1588_v45, %v1588_v45 }
 0x287   :  { %1712 = vst.msk [vmem:[%s4082_s4 + $0xd0] sm:$0xf] %vm1659_vm15, %v1647_v27  ;;  %v1592_v59 = vsel %vm1464_vm6, %v4245_v9, %v1528_v43  ;;  %v1653_v58 = vpack.c.bf16 %v1589_v33, %v1589_v33  ;;  %v1593_v17 = vsel %vm1465_vm7, %v4246_v2, %v1529_v48  ;;  %v1654_v15 = vpack.c.bf16 %v1590_v55, %v1590_v55 }
 0x288   :  { %1713 = vst.msk [vmem:[%s4082_s4 + $0xd4] sm:$0xf] %vm1659_vm15, %v1648_v61  ;;  %v1594_v3 = vsel %vm1466_vm8, %v4247_v54, %v1530_v8  ;;  %v1655_v16 = vpack.c.bf16 %v1591_v12, %v1591_v12  ;;  %v1656_v25 = vpack.c.bf16 %v1592_v59, %v1592_v59  ;;  %v1657_v21 = vpack.c.bf16 %v1593_v17, %v1593_v17 }
 0x289   :  { %1714 = vst.msk [vmem:[%s4082_s4 + $0xd8] sm:$0xf] %vm1659_vm15, %v1649_v19  ;;  %v1658_v47 = vpack.c.bf16 %v1594_v3, %v1594_v3 }
 0x28a   :  { %1715 = vst.msk [vmem:[%s4082_s4 + $0xdc] sm:$0xf] %vm1659_vm15, %v1650_v22 }
 0x28b   :  { %1716 = vst.msk [vmem:[%s4082_s4 + $0xe0] sm:$0xf] %vm1659_vm15, %v1651_v38 }
 0x28c   :  { %1717 = vst.msk [vmem:[%s4082_s4 + $0xe4] sm:$0xf] %vm1659_vm15, %v1652_v11 }
 0x28d   :  { %1718 = vst.msk [vmem:[%s4082_s4 + $0xe8] sm:$0xf] %vm1659_vm15, %v1653_v58 }
 0x28e   :  { %1719 = vst.msk [vmem:[%s4082_s4 + $0xec] sm:$0xf] %vm1659_vm15, %v1654_v15 }
 0x28f   :  { %1720 = vst.msk [vmem:[%s4082_s4 + $0xf0] sm:$0xf] %vm1659_vm15, %v1655_v16 }
 0x290   :  { %1721 = vst.msk [vmem:[%s4082_s4 + $0xf4] sm:$0xf] %vm1659_vm15, %v1656_v25 }
 0x291   :  { %1722 = vst.msk [vmem:[%s4082_s4 + $0xf8] sm:$0xf] %vm1659_vm15, %v1657_v21 }
 0x292   :  { %1723 = vst.msk [vmem:[%s4082_s4 + $0xfc] sm:$0xf] %vm1659_vm15, %v1658_v47 }

// kernel: discriminator_forward.6
= control target key start
LH: loop header
LB: loop body
LE: loop exit
PB: predicated region body
PF: predicated region fallthrough
CT: control target
= control target key end

     0   :  { %s3107_s1 = inlined_call_operand.vmem [shape: bf16[1024,128], index: 1, kind: input, shape index: {}]   ;;  %s3108_s0 = inlined_call_operand.vmem [shape: bf16[128,1024], index: 0, kind: input, shape index: {}]   ;;  %s3109_s3 = inlined_call_operand.vmem [shape: f32[1,128], index: 3, kind: input, shape index: {}]   ;;  %s3110_s2 = inlined_call_operand.vmem [shape: f32[1,128], index: 2, kind: input, shape index: {}]   ;;  %s3111_s4 = inlined_call_operand.vmem [shape: bf16[128,128], index: 4, kind: output, shape index: {}]  }
   0x1   :  { %v2185_v0 = vld [vmem:[%s3107_s1 + $0x38] sm:$0xff]  ;;  %v2184_v4 = vld [vmem:[%s3107_s1 + $0x30] sm:$0xff]  ;;  %v2183_v8 = vld [vmem:[%s3107_s1 + $0x28] sm:$0xff] }
   0x2   :  { %v2193_v1 = vld [vmem:[%s3107_s1 + $0x78] sm:$0xff]  ;;  %949 = vmatpush.bf16.msra.mxu0 %v2185_v0  ;;  %v2192_v5 = vld [vmem:[%s3107_s1 + $0x70] sm:$0xff]  ;;  %v2191_v9 = vld [vmem:[%s3107_s1 + $0x68] sm:$0xff] }
   0x3   :  { %v2201_v2 = vld [vmem:[%s3107_s1 + $0xb8] sm:$0xff]  ;;  %998 = vmatpush.bf16.msra.mxu1 %v2193_v1  ;;  %v2200_v6 = vld [vmem:[%s3107_s1 + $0xb0] sm:$0xff]  ;;  %v2199_v10 = vld [vmem:[%s3107_s1 + $0xa8] sm:$0xff] }
   0x4   :  { %v2209_v3 = vld [vmem:[%s3107_s1 + $0xf8] sm:$0xff]  ;;  %1047 = vmatpush.bf16.msra.mxu2 %v2201_v2  ;;  %v2208_v7 = vld [vmem:[%s3107_s1 + $0xf0] sm:$0xff]  ;;  %v2207_v11 = vld [vmem:[%s3107_s1 + $0xe8] sm:$0xff] }
   0x5   :  { %1096 = vmatpush.bf16.msra.mxu3 %v2209_v3  ;;  %v2182_v12 = vld [vmem:[%s3107_s1 + $0x20] sm:$0xff]  ;;  %v2181_v16 = vld [vmem:[%s3107_s1 + $0x18] sm:$0xff]  ;;  %v2180_v20 = vld [vmem:[%s3107_s1 + $0x10] sm:$0xff] }
   0x6   :  { %950 = vmatpush.bf16.msra.mxu0 %v2184_v4  ;;  %v2190_v13 = vld [vmem:[%s3107_s1 + $0x60] sm:$0xff]  ;;  %v2189_v17 = vld [vmem:[%s3107_s1 + $0x58] sm:$0xff]  ;;  %v2188_v21 = vld [vmem:[%s3107_s1 + $0x50] sm:$0xff] }
   0x7   :  { %999 = vmatpush.bf16.msra.mxu1 %v2192_v5  ;;  %v2198_v14 = vld [vmem:[%s3107_s1 + $0xa0] sm:$0xff]  ;;  %v2197_v18 = vld [vmem:[%s3107_s1 + $0x98] sm:$0xff]  ;;  %v2196_v22 = vld [vmem:[%s3107_s1 + $0x90] sm:$0xff] }
   0x8   :  { %1048 = vmatpush.bf16.msra.mxu2 %v2200_v6  ;;  %v2206_v15 = vld [vmem:[%s3107_s1 + $0xe0] sm:$0xff]  ;;  %v2205_v19 = vld [vmem:[%s3107_s1 + $0xd8] sm:$0xff]  ;;  %v2204_v23 = vld [vmem:[%s3107_s1 + $0xd0] sm:$0xff] }
   0x9   :  { %1097 = vmatpush.bf16.msra.mxu3 %v2208_v7  ;;  %v2179_v24 = vld [vmem:[%s3107_s1 + $0x8] sm:$0xff]  ;;  %v2178_v28 = vld [vmem:[%s3107_s1] sm:$0xff]  ;;  %v2233_v40 = vld [vmem:[%s3107_s1 + $0x1b8] sm:$0xff] }
   0xa   :  { %951 = vmatpush.bf16.msra.mxu0 %v2183_v8  ;;  %v2187_v25 = vld [vmem:[%s3107_s1 + $0x48] sm:$0xff]  ;;  %v2186_v29 = vld [vmem:[%s3107_s1 + $0x40] sm:$0xff]  ;;  %v2217_v41 = vld [vmem:[%s3107_s1 + $0x138] sm:$0xff] }
   0xb   :  { %1000 = vmatpush.bf16.msra.mxu1 %v2191_v9  ;;  %v2195_v26 = vld [vmem:[%s3107_s1 + $0x88] sm:$0xff]  ;;  %v2194_v30 = vld [vmem:[%s3107_s1 + $0x80] sm:$0xff]  ;;  %v2241_v46 = vld [vmem:[%s3107_s1 + $0x1f8] sm:$0xff] }
   0xc   :  { %1049 = vmatpush.bf16.msra.mxu2 %v2199_v10  ;;  %v2203_v27 = vld [vmem:[%s3107_s1 + $0xc8] sm:$0xff]  ;;  %v2202_v31 = vld [vmem:[%s3107_s1 + $0xc0] sm:$0xff]  ;;  %v2225_v47 = vld [vmem:[%s3107_s1 + $0x178] sm:$0xff] }
   0xd   :  { %1098 = vmatpush.bf16.msra.mxu3 %v2207_v11  ;;  %v1604_v32 = vld [vmem:[%s3108_s0] sm:$0xf]  ;;  %v2114_v34 = vld [vmem:[%s3108_s0 + $0x4] sm:$0xf]  ;;  %v1612_v36 = vld [vmem:[%s3108_s0 + $0x8] sm:$0xf] }
   0xe   :  { %952 = vmatpush.bf16.msra.mxu0 %v2182_v12  ;;  %v2118_v33 = vld [vmem:[%s3108_s0 + $0x1c] sm:$0xf0]  ;;  %v1606_v35 = vld [vmem:[%s3108_s0 + $0x20] sm:$0xf0]  ;;  %v2119_v37 = vld [vmem:[%s3108_s0 + $0x24] sm:$0xf0] }
   0xf   :  { %1001 = vmatpush.bf16.msra.mxu1 %v2190_v13  ;;  %v2115_v38 = vld [vmem:[%s3108_s0 + $0xc] sm:$0xf]  ;;  %v1605_v42 = vor.u32 %v2118_v33, %v1604_v32  ;;  %v1609_v43 = vor.u32 %v2114_v34, %v1606_v35  ;;  %v1613_v44 = vor.u32 %v2119_v37, %v1612_v36  ;;  %v2232_v48 = vld [vmem:[%s3107_s1 + $0x1b0] sm:$0xff]  ;;  %v1636_v56 = vld [vmem:[%s3108_s0 + $0x40] sm:$0xf] }
  0x10   :  { %1050 = vmatpush.bf16.msra.mxu2 %v2198_v14  ;;  %v1614_v39 = vld [vmem:[%s3108_s0 + $0x28] sm:$0xf0]  ;;  %v2216_v49 = vld [vmem:[%s3107_s1 + $0x130] sm:$0xff]  ;;  %v2126_v57 = vld [vmem:[%s3108_s0 + $0x5c] sm:$0xf0] }
  0x11   :  { %1099 = vmatpush.bf16.msra.mxu3 %v2206_v15  ;;  %v1617_v45 = vor.u32 %v2115_v38, %v1614_v39  ;;  %v2240_v50 = vld [vmem:[%s3107_s1 + $0x1f0] sm:$0xff]  ;;  %v2231_v52 = vld [vmem:[%s3107_s1 + $0x1a8] sm:$0xff]  ;;  %v2122_v58 = vld [vmem:[%s3108_s0 + $0x44] sm:$0xf]  ;;  %v1637_v0 = vor.u32 %v2126_v57, %v1636_v56 }
  0x12   :  { %953 = vmatpush.bf16.msra.mxu0 %v2181_v16  ;;  %v2224_v51 = vld [vmem:[%s3107_s1 + $0x170] sm:$0xff]  ;;  %v2215_v53 = vld [vmem:[%s3107_s1 + $0x128] sm:$0xff]  ;;  %v1638_v59 = vld [vmem:[%s3108_s0 + $0x60] sm:$0xf0] }
  0x13   :  { %1002 = vmatpush.bf16.msra.mxu1 %v2189_v17  ;;  %v2239_v54 = vld [vmem:[%s3107_s1 + $0x1e8] sm:$0xff]  ;;  %v1641_v1 = vor.u32 %v2122_v58, %v1638_v59  ;;  %v2230_v4 = vld [vmem:[%s3107_s1 + $0x1a0] sm:$0xff]  ;;  %v2228_v36 = vld [vmem:[%s3107_s1 + $0x190] sm:$0xff] }
  0x14   :  { %1051 = vmatpush.bf16.msra.mxu2 %v2197_v18  ;;  %v2223_v55 = vld [vmem:[%s3107_s1 + $0x168] sm:$0xff]  ;;  %v2214_v5 = vld [vmem:[%s3107_s1 + $0x120] sm:$0xff]  ;;  %v2212_v37 = vld [vmem:[%s3107_s1 + $0x110] sm:$0xff] }
  0x15   :  { %1100 = vmatpush.bf16.msra.mxu3 %v2205_v19  ;;  %v1644_v60 = vld [vmem:[%s3108_s0 + $0x48] sm:$0xf]  ;;  %v2123_v62 = vld [vmem:[%s3108_s0 + $0x4c] sm:$0xf]  ;;  %v2238_v6 = vld [vmem:[%s3107_s1 + $0x1e0] sm:$0xff] }
  0x16   :  { %954 = vmatpush.bf16.msra.mxu0 %v2180_v20  ;;  %v2127_v61 = vld [vmem:[%s3108_s0 + $0x64] sm:$0xf0]  ;;  %v1646_v63 = vld [vmem:[%s3108_s0 + $0x68] sm:$0xf0]  ;;  %v2222_v7 = vld [vmem:[%s3107_s1 + $0x160] sm:$0xff] }
  0x17   :  { %1003 = vmatpush.bf16.msra.mxu1 %v2188_v21  ;;  %v1645_v2 = vor.u32 %v2127_v61, %v1644_v60  ;;  %v1649_v3 = vor.u32 %v2123_v62, %v1646_v63  ;;  %v1668_v8 = vld [vmem:[%s3108_s0 + $0x80] sm:$0xf]  ;;  %v2130_v10 = vld [vmem:[%s3108_s0 + $0x84] sm:$0xf]  ;;  %v1676_v12 = vld [vmem:[%s3108_s0 + $0x88] sm:$0xf] }
  0x18   :  { %1052 = vmatpush.bf16.msra.mxu2 %v2196_v22  ;;  %v2134_v9 = vld [vmem:[%s3108_s0 + $0x9c] sm:$0xf0]  ;;  %v1670_v11 = vld [vmem:[%s3108_s0 + $0xa0] sm:$0xf0]  ;;  %v2135_v13 = vld [vmem:[%s3108_s0 + $0xa4] sm:$0xf0] }
  0x19   :  { %1101 = vmatpush.bf16.msra.mxu3 %v2204_v23  ;;  %v2131_v14 = vld [vmem:[%s3108_s0 + $0x8c] sm:$0xf]  ;;  %v1669_v16 = vor.u32 %v2134_v9, %v1668_v8  ;;  %v1673_v17 = vor.u32 %v2130_v10, %v1670_v11  ;;  %v1677_v18 = vor.u32 %v2135_v13, %v1676_v12  ;;  %v2229_v20 = vld [vmem:[%s3107_s1 + $0x198] sm:$0xff]  ;;  %v2236_v38 = vld [vmem:[%s3107_s1 + $0x1d0] sm:$0xff] }
  0x1a   :  { %955 = vmatpush.bf16.msra.mxu0 %v2179_v24  ;;  %v1678_v15 = vld [vmem:[%s3108_s0 + $0xa8] sm:$0xf0]  ;;  %v2213_v21 = vld [vmem:[%s3107_s1 + $0x118] sm:$0xff]  ;;  %v1700_v24 = vld [vmem:[%s3108_s0 + $0xc0] sm:$0xf] }
  0x1b   :  { %1004 = vmatpush.bf16.msra.mxu1 %v2187_v25  ;;  %v1681_v19 = vor.u32 %v2131_v14, %v1678_v15  ;;  %v2237_v22 = vld [vmem:[%s3107_s1 + $0x1d8] sm:$0xff]  ;;  %v2142_v25 = vld [vmem:[%s3108_s0 + $0xdc] sm:$0xf0]  ;;  %v2220_v39 = vld [vmem:[%s3107_s1 + $0x150] sm:$0xff] }
  0x1c   :  { %1053 = vmatpush.bf16.msra.mxu2 %v2195_v26  ;;  %v2221_v23 = vld [vmem:[%s3107_s1 + $0x158] sm:$0xff]  ;;  %v2138_v26 = vld [vmem:[%s3108_s0 + $0xc4] sm:$0xf]  ;;  %v1701_v32 = vor.u32 %v2142_v25, %v1700_v24  ;;  %v1764_v56 = vld [vmem:[%s3108_s0 + $0x140] sm:$0xf] }
  0x1d   :  { %1102 = vmatpush.bf16.msra.mxu3 %v2203_v27  ;;  %v1702_v27 = vld [vmem:[%s3108_s0 + $0xe0] sm:$0xf0]  ;;  %v2158_v57 = vld [vmem:[%s3108_s0 + $0x15c] sm:$0xf0]  ;;  %v1772_v60 = vld [vmem:[%s3108_s0 + $0x148] sm:$0xf] }
  0x1e   :  { %956 = vmatpush.bf16.msra.mxu0 %v2178_v28  ;;  %v1708_v28 = vld [vmem:[%s3108_s0 + $0xc8] sm:$0xf]  ;;  %v1705_v33 = vor.u32 %v2138_v26, %v1702_v27  ;;  %v2154_v58 = vld [vmem:[%s3108_s0 + $0x144] sm:$0xf]  ;;  %v2155_v62 = vld [vmem:[%s3108_s0 + $0x14c] sm:$0xf] }
  0x1f   :  { %1005 = vmatpush.bf16.msra.mxu1 %v2186_v29  ;;  %v2143_v29 = vld [vmem:[%s3108_s0 + $0xe4] sm:$0xf0]  ;;  %v1766_v59 = vld [vmem:[%s3108_s0 + $0x160] sm:$0xf0]  ;;  %v1774_v63 = vld [vmem:[%s3108_s0 + $0x168] sm:$0xf0] }
  0x20   :  { %1054 = vmatpush.bf16.msra.mxu2 %v2194_v30  ;;  %v2139_v30 = vld [vmem:[%s3108_s0 + $0xcc] sm:$0xf]  ;;  %v1709_v34 = vor.u32 %v2143_v29, %v1708_v28  ;;  %v2159_v61 = vld [vmem:[%s3108_s0 + $0x164] sm:$0xf0]  ;;  %v1796_v8 = vld [vmem:[%s3108_s0 + $0x180] sm:$0xf] }
  0x21   :  { %1103 = vmatpush.bf16.msra.mxu3 %v2202_v31  ;;  %957 = vmatmul.bf16.vlgmr.msra.gmra.mxu0 %v1605_v42  ;;  %v1710_v31 = vld [vmem:[%s3108_s0 + $0xe8] sm:$0xf0]  ;;  %v2146_v42 = vld [vmem:[%s3108_s0 + $0x104] sm:$0xf]  ;;  %v2166_v9 = vld [vmem:[%s3108_s0 + $0x19c] sm:$0xf0] }
  0x22   :  { %1145 = vmatpush.bf16.msrb.mxu0 %v2217_v41  ;;  %1006 = vmatmul.bf16.vlgmr.msra.gmra.mxu1 %v1609_v43  ;;  %v1713_v35 = vor.u32 %v2139_v30, %v1710_v31  ;;  %v2150_v41 = vld [vmem:[%s3108_s0 + $0x11c] sm:$0xf0]  ;;  %v1734_v43 = vld [vmem:[%s3108_s0 + $0x120] sm:$0xf0]  ;;  %v1804_v12 = vld [vmem:[%s3108_s0 + $0x188] sm:$0xf] }
  0x23   :  { %1055 = vmatmul.bf16.vlgmr.msra.gmra.mxu2 %v1613_v44  ;;  %1194 = vmatpush.bf16.msrb.mxu1 %v2225_v47  ;;  %v1740_v44 = vld [vmem:[%s3108_s0 + $0x108] sm:$0xf]  ;;  %v1742_v47 = vld [vmem:[%s3108_s0 + $0x128] sm:$0xf0]  ;;  %v2162_v10 = vld [vmem:[%s3108_s0 + $0x184] sm:$0xf] }
  0x24   :  { %1243 = vmatpush.bf16.msrb.mxu2 %v2233_v40  ;;  %1104 = vmatmul.bf16.vlgmr.msra.gmra.mxu3 %v1617_v45  ;;  %v1732_v40 = vld [vmem:[%s3108_s0 + $0x100] sm:$0xf]  ;;  %v2151_v45 = vld [vmem:[%s3108_s0 + $0x124] sm:$0xf0]  ;;  %v1798_v11 = vld [vmem:[%s3108_s0 + $0x1a0] sm:$0xf0] }
  0x25   :  { %1292 = vmatpush.bf16.msrb.mxu3 %v2241_v46  ;;  %v2147_v46 = vld [vmem:[%s3108_s0 + $0x10c] sm:$0xf]  ;;  %v2167_v13 = vld [vmem:[%s3108_s0 + $0x1a4] sm:$0xf0] }
  0x26   :  { %1146 = vmatpush.bf16.msrb.mxu0 %v2216_v49  ;;  %v1737_v49 = vor.u32 %v2146_v42, %v1734_v43  ;;  %v2163_v14 = vld [vmem:[%s3108_s0 + $0x18c] sm:$0xf]  ;;  %v1836_v24 = vld [vmem:[%s3108_s0 + $0x1c8] sm:$0xf] }
  0x27   :  { %1195 = vmatpush.bf16.msrb.mxu1 %v2224_v51  ;;  %v1745_v51 = vor.u32 %v2147_v46, %v1742_v47  ;;  %v1806_v15 = vld [vmem:[%s3108_s0 + $0x1a8] sm:$0xf0]  ;;  %v2175_v25 = vld [vmem:[%s3108_s0 + $0x1e4] sm:$0xf0] }
  0x28   :  { %1244 = vmatpush.bf16.msrb.mxu2 %v2232_v48  ;;  %v1733_v48 = vor.u32 %v2150_v41, %v1732_v40  ;;  %v2171_v26 = vld [vmem:[%s3108_s0 + $0x1cc] sm:$0xf]  ;;  %v1837_v30 = vor.u32 %v2175_v25, %v1836_v24 }
  0x29   :  { %1293 = vmatpush.bf16.msrb.mxu3 %v2240_v50  ;;  %v1741_v50 = vor.u32 %v2151_v45, %v1740_v44  ;;  %v1838_v27 = vld [vmem:[%s3108_s0 + $0x1e8] sm:$0xf0] }
  0x2a   :  { %1147 = vmatpush.bf16.msrb.mxu0 %v2215_v53  ;;  %v2211_v53 = vld [vmem:[%s3107_s1 + $0x108] sm:$0xff]  ;;  %v1841_v31 = vor.u32 %v2171_v26, %v1838_v27 }
  0x2b   :  { %1196 = vmatpush.bf16.msrb.mxu1 %v2223_v55  ;;  %v2219_v55 = vld [vmem:[%s3107_s1 + $0x148] sm:$0xff] }
  0x2c   :  { %1245 = vmatpush.bf16.msrb.mxu2 %v2231_v52  ;;  %v2227_v52 = vld [vmem:[%s3107_s1 + $0x188] sm:$0xff] }
  0x2d   :  { %1294 = vmatpush.bf16.msrb.mxu3 %v2239_v54  ;;  %v2235_v54 = vld [vmem:[%s3107_s1 + $0x1c8] sm:$0xff] }
  0x2e   :  { %1148 = vmatpush.bf16.msrb.mxu0 %v2214_v5  ;;  %v2210_v5 = vld [vmem:[%s3107_s1 + $0x100] sm:$0xff] }
  0x2f   :  { %1197 = vmatpush.bf16.msrb.mxu1 %v2222_v7  ;;  %v2218_v7 = vld [vmem:[%s3107_s1 + $0x140] sm:$0xff] }
  0x30   :  { %1246 = vmatpush.bf16.msrb.mxu2 %v2230_v4  ;;  %v2226_v4 = vld [vmem:[%s3107_s1 + $0x180] sm:$0xff] }
  0x31   :  { %962 = vmatmul.bf16.gmra.mxu0 %v1637_v0  ;;  %1295 = vmatpush.bf16.msrb.mxu3 %v2238_v6  ;;  %v1765_v0 = vor.u32 %v2158_v57, %v1764_v56  ;;  %v2234_v6 = vld [vmem:[%s3107_s1 + $0x1c0] sm:$0xff]  ;;  %v2124_v56 = vld [vmem:[%s3108_s0 + $0x54] sm:$0xf] }
  0x32   :  { %1011 = vmatmul.bf16.gmra.mxu1 %v1641_v1  ;;  %1149 = vmatpush.bf16.msrb.mxu0 %v2213_v21  ;;  %v1769_v1 = vor.u32 %v2154_v58, %v1766_v59  ;;  %v2174_v21 = vld [vmem:[%s3108_s0 + $0x1dc] sm:$0xf0]  ;;  %v1654_v57 = vld [vmem:[%s3108_s0 + $0x70] sm:$0xf0]  ;;  %v1660_v58 = vld [vmem:[%s3108_s0 + $0x58] sm:$0xf] }
  0x33   :  { %1060 = vmatmul.bf16.gmra.mxu2 %v1645_v2  ;;  %1198 = vmatpush.bf16.msrb.mxu1 %v2221_v23  ;;  %v1773_v2 = vor.u32 %v2159_v61, %v1772_v60  ;;  %v1830_v23 = vld [vmem:[%s3108_s0 + $0x1e0] sm:$0xf0]  ;;  %v2129_v59 = vld [vmem:[%s3108_s0 + $0x74] sm:$0xf0]  ;;  %v2125_v60 = vld [vmem:[%s3108_s0 + $0x5c] sm:$0xf] }
  0x34   :  { %1109 = vmatmul.bf16.gmra.mxu3 %v1649_v3  ;;  %1247 = vmatpush.bf16.msrb.mxu2 %v2229_v20  ;;  %v1777_v3 = vor.u32 %v2155_v62, %v1774_v63  ;;  %v1828_v20 = vld [vmem:[%s3108_s0 + $0x1c0] sm:$0xf]  ;;  %v1662_v61 = vld [vmem:[%s3108_s0 + $0x78] sm:$0xf0] }
  0x35   :  { %1296 = vmatpush.bf16.msrb.mxu3 %v2237_v22  ;;  %v2170_v22 = vld [vmem:[%s3108_s0 + $0x1c4] sm:$0xf]  ;;  %v1829_v28 = vor.u32 %v2174_v21, %v1828_v20  ;;  %v1692_v20 = vld [vmem:[%s3108_s0 + $0x98] sm:$0xf] }
  0x36   :  { %1150 = vmatpush.bf16.msrb.mxu0 %v2212_v37  ;;  %v1833_v29 = vor.u32 %v2170_v22, %v1830_v23  ;;  %v2121_v37 = vld [vmem:[%s3108_s0 + $0x34] sm:$0xf0]  ;;  %v2133_v22 = vld [vmem:[%s3108_s0 + $0x9c] sm:$0xf] }
  0x37   :  { %1199 = vmatpush.bf16.msrb.mxu1 %v2220_v39  ;;  %v1630_v39 = vld [vmem:[%s3108_s0 + $0x38] sm:$0xf0]  ;;  %v2137_v21 = vld [vmem:[%s3108_s0 + $0xb4] sm:$0xf0] }
  0x38   :  { %1248 = vmatpush.bf16.msrb.mxu2 %v2228_v36  ;;  %v1628_v36 = vld [vmem:[%s3108_s0 + $0x18] sm:$0xf]  ;;  %v1694_v23 = vld [vmem:[%s3108_s0 + $0xb8] sm:$0xf0] }
  0x39   :  { %1297 = vmatpush.bf16.msrb.mxu3 %v2236_v38  ;;  %v2117_v38 = vld [vmem:[%s3108_s0 + $0x1c] sm:$0xf]  ;;  %v1629_v44 = vor.u32 %v2121_v37, %v1628_v36 }
  0x3a   :  { %1151 = vmatpush.bf16.msrb.mxu0 %v2211_v53  ;;  %v1633_v45 = vor.u32 %v2117_v38, %v1630_v39 }
  0x3b   :  { %1200 = vmatpush.bf16.msrb.mxu1 %v2219_v55  ;;  %v2128_v55 = vld [vmem:[%s3108_s0 + $0x6c] sm:$0xf0] }
  0x3c   :  { %1249 = vmatpush.bf16.msrb.mxu2 %v2227_v52 }
  0x3d   :  { %1298 = vmatpush.bf16.msrb.mxu3 %v2235_v54  ;;  %v1652_v54 = vld [vmem:[%s3108_s0 + $0x50] sm:$0xf] }
  0x3e   :  { %1152 = vmatpush.bf16.msrb.mxu0 %v2210_v5  ;;  %v1661_v5 = vor.u32 %v2129_v59, %v1660_v58 }
  0x3f   :  { %1201 = vmatpush.bf16.msrb.mxu1 %v2218_v7 }
  0x40   :  { %1250 = vmatpush.bf16.msrb.mxu2 %v2226_v4 }
  0x41   :  { %967 = vmatmul.bf16.gmra.mxu0 %v1669_v16  ;;  %1299 = vmatpush.bf16.msrb.mxu3 %v2234_v6  ;;  %v1797_v16 = vor.u32 %v2166_v9, %v1796_v8  ;;  %v1665_v6 = vor.u32 %v2125_v60, %v1662_v61 }
  0x42   :  { %1016 = vmatmul.bf16.gmra.mxu1 %v1673_v17  ;;  %v1801_v17 = vor.u32 %v2162_v10, %v1798_v11 }
  0x43   :  { %1065 = vmatmul.bf16.gmra.mxu2 %v1677_v18  ;;  %v1805_v18 = vor.u32 %v2167_v13, %v1804_v12 }
  0x44   :  { %1114 = vmatmul.bf16.gmra.mxu3 %v1681_v19  ;;  %v1809_v19 = vor.u32 %v2163_v14, %v1806_v15 }
  0x51   :  { %972 = vmatmul.bf16.gmra.mxu0 %v1701_v32  ;;  %v1620_v32 = vld [vmem:[%s3108_s0 + $0x10] sm:$0xf] }
  0x52   :  { %1021 = vmatmul.bf16.gmra.mxu1 %v1705_v33  ;;  %v2120_v33 = vld [vmem:[%s3108_s0 + $0x2c] sm:$0xf0] }
  0x53   :  { %1070 = vmatmul.bf16.gmra.mxu2 %v1709_v34  ;;  %v2116_v34 = vld [vmem:[%s3108_s0 + $0x14] sm:$0xf]  ;;  %v1621_v40 = vor.u32 %v2120_v33, %v1620_v32  ;;  %v1697_v32 = vor.u32 %v2133_v22, %v1694_v23 }
  0x54   :  { %1119 = vmatmul.bf16.gmra.mxu3 %v1713_v35  ;;  %v1622_v35 = vld [vmem:[%s3108_s0 + $0x30] sm:$0xf0] }
  0x55   :  { %v1625_v41 = vor.u32 %v2116_v34, %v1622_v35 }
  0x61   :  { %977 = vmatmul.bf16.gmra.mxu0 %v1733_v48 }
  0x62   :  { %1026 = vmatmul.bf16.gmra.mxu1 %v1737_v49 }
  0x63   :  { %1075 = vmatmul.bf16.gmra.mxu2 %v1741_v50 }
  0x64   :  { %1124 = vmatmul.bf16.gmra.mxu3 %v1745_v51 }
  0x71   :  { %982 = vmatmul.bf16.gmra.mxu0 %v1765_v0  ;;  %v1653_v0 = vor.u32 %v2128_v55, %v1652_v54 }
  0x72   :  { %1031 = vmatmul.bf16.gmra.mxu1 %v1769_v1  ;;  %v1657_v1 = vor.u32 %v2124_v56, %v1654_v57 }
  0x73   :  { %1080 = vmatmul.bf16.gmra.mxu2 %v1773_v2 }
  0x74   :  { %1129 = vmatmul.bf16.gmra.mxu3 %v1777_v3 }
  0x81   :  { %987 = vmatmul.bf16.gmra.mxu0 %v1797_v16  ;;  %v1684_v16 = vld [vmem:[%s3108_s0 + $0x90] sm:$0xf] }
  0x82   :  { %1036 = vmatmul.bf16.gmra.mxu1 %v1801_v17  ;;  %v2136_v17 = vld [vmem:[%s3108_s0 + $0xac] sm:$0xf0] }
  0x83   :  { %1085 = vmatmul.bf16.gmra.mxu2 %v1805_v18  ;;  %v2132_v18 = vld [vmem:[%s3108_s0 + $0x94] sm:$0xf]  ;;  %v1685_v26 = vor.u32 %v2136_v17, %v1684_v16 }
  0x84   :  { %1134 = vmatmul.bf16.gmra.mxu3 %v1809_v19  ;;  %v1686_v19 = vld [vmem:[%s3108_s0 + $0xb0] sm:$0xf0] }
  0x85   :  { %v1689_v27 = vor.u32 %v2132_v18, %v1686_v19 }
  0x91   :  { %992 = vmatmul.bf16.gmra.mxu0 %v1829_v28 }
  0x92   :  { %1041 = vmatmul.bf16.gmra.mxu1 %v1833_v29 }
  0x93   :  { %1090 = vmatmul.bf16.gmra.mxu2 %v1837_v30 }
  0x94   :  { %1139 = vmatmul.bf16.gmra.mxu3 %v1841_v31  ;;  %v1693_v31 = vor.u32 %v2137_v21, %v1692_v20 }
  0x9e   :  { %v958_v42 = vpop.f32.mrf.mxu0 }
  0x9f   :  { %v1007_v43 = vpop.f32.mrf.mxu1 }
  0xa0   :  { %v1008_v46 = vadd.f32 %v1007_v43, %v958_v42  ;;  %v1716_v42 = vld [vmem:[%s3108_s0 + $0xd0] sm:$0xf] }
  0xa1   :  { %1153 = vmatmul.bf16.vlgmr.msrb.gmra.mxu0 %v1621_v40  ;;  %v2144_v43 = vld [vmem:[%s3108_s0 + $0xec] sm:$0xf0] }
  0xa2   :  { %1202 = vmatmul.bf16.vlgmr.msrb.gmra.mxu1 %v1625_v41 }
  0xa3   :  { %1251 = vmatmul.bf16.vlgmr.msrb.gmra.mxu2 %v1629_v44  ;;  %v2140_v44 = vld [vmem:[%s3108_s0 + $0xd4] sm:$0xf] }
  0xa4   :  { %1300 = vmatmul.bf16.vlgmr.msrb.gmra.mxu3 %v1633_v45  ;;  %v1718_v45 = vld [vmem:[%s3108_s0 + $0xf0] sm:$0xf0] }
  0xa5   :  { %v1721_v54 = vor.u32 %v2140_v44, %v1718_v45 }
  0xa6   :  { %v1056_v47 = vpop.f32.mrf.mxu2  ;;  %v960_v50 = vpop.f32.mrf.mxu0 }
  0xa7   :  { %v1105_v48 = vpop.f32.mrf.mxu3  ;;  %v1057_v49 = vadd.f32 %v1056_v47, %v1008_v46  ;;  %v1009_v51 = vpop.f32.mrf.mxu1  ;;  %v1724_v46 = vld [vmem:[%s3108_s0 + $0xd8] sm:$0xf] }
  0xa8   :  { %v1010_v52 = vadd.f32 %v1009_v51, %v960_v50  ;;  %v2145_v47 = vld [vmem:[%s3108_s0 + $0xf4] sm:$0xf0] }
  0xa9   :  { %v2725_v53 = vadd.f32 %v1105_v48, %v1057_v49  ;;  %v2141_v48 = vld [vmem:[%s3108_s0 + $0xdc] sm:$0xf]  ;;  %v1725_v58 = vor.u32 %v2145_v47, %v1724_v46 }
  0xaa   :  { %v1726_v49 = vld [vmem:[%s3108_s0 + $0xf8] sm:$0xf0] }
  0xab   :  { %v1729_v59 = vor.u32 %v2141_v48, %v1726_v49 }
  0xae   :  { %v1058_v62 = vpop.f32.mrf.mxu2  ;;  %v963_v3 = vpop.f32.mrf.mxu0 }
  0xaf   :  { %v1107_v63 = vpop.f32.mrf.mxu3  ;;  %v1059_v2 = vadd.f32 %v1058_v62, %v1010_v52  ;;  %v1012_v4 = vpop.f32.mrf.mxu1  ;;  %v1717_v52 = vor.u32 %v2144_v43, %v1716_v42  ;;  %v1790_v42 = vld [vmem:[%s3108_s0 + $0x178] sm:$0xf0] }
  0xb0   :  { %v1013_v7 = vadd.f32 %v1012_v4, %v963_v3 }
  0xb1   :  { %v2751_v8 = vadd.f32 %v1107_v63, %v1059_v2  ;;  %1158 = vmatmul.bf16.gmra.mxu0 %v1653_v0 }
  0xb2   :  { %1207 = vmatmul.bf16.gmra.mxu1 %v1657_v1 }
  0xb3   :  { %1256 = vmatmul.bf16.gmra.mxu2 %v1661_v5  ;;  %v1748_v5 = vld [vmem:[%s3108_s0 + $0x110] sm:$0xf] }
  0xb4   :  { %1305 = vmatmul.bf16.gmra.mxu3 %v1665_v6  ;;  %v2152_v6 = vld [vmem:[%s3108_s0 + $0x12c] sm:$0xf0] }
  0xb5   :  { %v1749_v17 = vor.u32 %v2152_v6, %v1748_v5  ;;  %v2169_v5 = vld [vmem:[%s3108_s0 + $0x1b4] sm:$0xf0]  ;;  %v2165_v6 = vld [vmem:[%s3108_s0 + $0x19c] sm:$0xf] }
  0xb6   :  { %v1061_v9 = vpop.f32.mrf.mxu2  ;;  %v965_v12 = vpop.f32.mrf.mxu0 }
  0xb7   :  { %v1110_v10 = vpop.f32.mrf.mxu3  ;;  %v1062_v11 = vadd.f32 %v1061_v9, %v1013_v7  ;;  %v1014_v13 = vpop.f32.mrf.mxu1  ;;  %v2148_v7 = vld [vmem:[%s3108_s0 + $0x114] sm:$0xf] }
  0xb8   :  { %v1015_v14 = vadd.f32 %v1014_v13, %v965_v12  ;;  %v1750_v9 = vld [vmem:[%s3108_s0 + $0x130] sm:$0xf0]  ;;  %v2149_v12 = vld [vmem:[%s3108_s0 + $0x11c] sm:$0xf] }
  0xb9   :  { %v2753_v15 = vadd.f32 %v1110_v10, %v1062_v11  ;;  %v1756_v10 = vld [vmem:[%s3108_s0 + $0x118] sm:$0xf]  ;;  %v1758_v13 = vld [vmem:[%s3108_s0 + $0x138] sm:$0xf0]  ;;  %v1753_v18 = vor.u32 %v2148_v7, %v1750_v9 }
  0xba   :  { %v2153_v11 = vld [vmem:[%s3108_s0 + $0x134] sm:$0xf0]  ;;  %v1761_v23 = vor.u32 %v2149_v12, %v1758_v13  ;;  %v1822_v7 = vld [vmem:[%s3108_s0 + $0x1b8] sm:$0xf0] }
  0xbb   :  { %v1757_v22 = vor.u32 %v2153_v11, %v1756_v10 }
  0xbe   :  { %v1063_v24 = vpop.f32.mrf.mxu2  ;;  %v968_v29 = vpop.f32.mrf.mxu0 }
  0xbf   :  { %v1112_v25 = vpop.f32.mrf.mxu3  ;;  %v1064_v28 = vadd.f32 %v1063_v24, %v1015_v14  ;;  %v1017_v30 = vpop.f32.mrf.mxu1 }
  0xc0   :  { %v1018_v33 = vadd.f32 %v1017_v30, %v968_v29 }
  0xc1   :  { %v2779_v34 = vadd.f32 %v1112_v25, %v1064_v28  ;;  %1163 = vmatmul.bf16.gmra.mxu0 %v1685_v26 }
  0xc2   :  { %1212 = vmatmul.bf16.gmra.mxu1 %v1689_v27 }
  0xc3   :  { %1261 = vmatmul.bf16.gmra.mxu2 %v1693_v31 }
  0xc4   :  { %1310 = vmatmul.bf16.gmra.mxu3 %v1697_v32 }
  0xc6   :  { %v1066_v35 = vpop.f32.mrf.mxu2  ;;  %v970_v38 = vpop.f32.mrf.mxu0 }
  0xc7   :  { %v1115_v36 = vpop.f32.mrf.mxu3  ;;  %v1067_v37 = vadd.f32 %v1066_v35, %v1018_v33  ;;  %v1019_v39 = vpop.f32.mrf.mxu1  ;;  %v1780_v33 = vld [vmem:[%s3108_s0 + $0x150] sm:$0xf] }
  0xc8   :  { %v1020_v40 = vadd.f32 %v1019_v39, %v970_v38  ;;  %v2160_v35 = vld [vmem:[%s3108_s0 + $0x16c] sm:$0xf0]  ;;  %v1788_v38 = vld [vmem:[%s3108_s0 + $0x158] sm:$0xf] }
  0xc9   :  { %v2781_v41 = vadd.f32 %v1115_v36, %v1067_v37  ;;  %v2156_v36 = vld [vmem:[%s3108_s0 + $0x154] sm:$0xf]  ;;  %v2161_v39 = vld [vmem:[%s3108_s0 + $0x174] sm:$0xf0]  ;;  %v1781_v45 = vor.u32 %v2160_v35, %v1780_v33 }
  0xca   :  { %v1782_v37 = vld [vmem:[%s3108_s0 + $0x170] sm:$0xf0]  ;;  %v1852_v35 = vld [vmem:[%s3108_s0 + $0x1d8] sm:$0xf] }
  0xcb   :  { %v1785_v46 = vor.u32 %v2156_v36, %v1782_v37  ;;  %v1846_v33 = vld [vmem:[%s3108_s0 + $0x1f0] sm:$0xf0]  ;;  %v2177_v36 = vld [vmem:[%s3108_s0 + $0x1f4] sm:$0xf0]  ;;  %v2173_v37 = vld [vmem:[%s3108_s0 + $0x1dc] sm:$0xf] }
  0xce   :  { %v1068_v50 = vpop.f32.mrf.mxu2  ;;  %v973_v56 = vpop.f32.mrf.mxu0 }
  0xcf   :  { %v1117_v51 = vpop.f32.mrf.mxu3  ;;  %v1069_v55 = vadd.f32 %v1068_v50, %v1020_v40  ;;  %v1022_v57 = vpop.f32.mrf.mxu1  ;;  %v2157_v40 = vld [vmem:[%s3108_s0 + $0x15c] sm:$0xf]  ;;  %v1789_v50 = vor.u32 %v2161_v39, %v1788_v38 }
  0xd0   :  { %v1023_v60 = vadd.f32 %v1022_v57, %v973_v56  ;;  %v1854_v38 = vld [vmem:[%s3108_s0 + $0x1f8] sm:$0xf0] }
  0xd1   :  { %v2807_v61 = vadd.f32 %v1117_v51, %v1069_v55  ;;  %1168 = vmatmul.bf16.gmra.mxu0 %v1717_v52  ;;  %v1793_v51 = vor.u32 %v2157_v40, %v1790_v42 }
  0xd2   :  { %1217 = vmatmul.bf16.gmra.mxu1 %v1721_v54 }
  0xd3   :  { %1266 = vmatmul.bf16.gmra.mxu2 %v1725_v58 }
  0xd4   :  { %1315 = vmatmul.bf16.gmra.mxu3 %v1729_v59 }
  0xd6   :  { %v1071_v62 = vpop.f32.mrf.mxu2  ;;  %v975_v1 = vpop.f32.mrf.mxu0 }
  0xd7   :  { %v1120_v63 = vpop.f32.mrf.mxu3  ;;  %v1072_v0 = vadd.f32 %v1071_v62, %v1023_v60  ;;  %v1024_v2 = vpop.f32.mrf.mxu1 }
  0xd8   :  { %v1025_v3 = vadd.f32 %v1024_v2, %v975_v1  ;;  %v2164_v1 = vld [vmem:[%s3108_s0 + $0x194] sm:$0xf] }
  0xd9   :  { %v2809_v4 = vadd.f32 %v1120_v63, %v1072_v0  ;;  %v1812_v63 = vld [vmem:[%s3108_s0 + $0x190] sm:$0xf]  ;;  %v1814_v2 = vld [vmem:[%s3108_s0 + $0x1b0] sm:$0xf0] }
  0xda   :  { %v2168_v0 = vld [vmem:[%s3108_s0 + $0x1ac] sm:$0xf0]  ;;  %v1817_v12 = vor.u32 %v2164_v1, %v1814_v2 }
  0xdb   :  { %v1813_v11 = vor.u32 %v2168_v0, %v1812_v63 }
  0xde   :  { %v1073_v14 = vpop.f32.mrf.mxu2  ;;  %v978_v20 = vpop.f32.mrf.mxu0 }
  0xdf   :  { %v1122_v16 = vpop.f32.mrf.mxu3  ;;  %v1074_v19 = vadd.f32 %v1073_v14, %v1025_v3  ;;  %v1027_v21 = vpop.f32.mrf.mxu1  ;;  %v1820_v3 = vld [vmem:[%s3108_s0 + $0x198] sm:$0xf] }
  0xe0   :  { %v1028_v24 = vadd.f32 %v1027_v21, %v978_v20 }
  0xe1   :  { %v2835_v25 = vadd.f32 %v1122_v16, %v1074_v19  ;;  %1173 = vmatmul.bf16.gmra.mxu0 %v1749_v17  ;;  %v1821_v17 = vor.u32 %v2169_v5, %v1820_v3 }
  0xe2   :  { %1222 = vmatmul.bf16.gmra.mxu1 %v1753_v18  ;;  %v1825_v18 = vor.u32 %v2165_v6, %v1822_v7 }
  0xe3   :  { %1271 = vmatmul.bf16.gmra.mxu2 %v1757_v22 }
  0xe4   :  { %1320 = vmatmul.bf16.gmra.mxu3 %v1761_v23 }
  0xe6   :  { %v1076_v26 = vpop.f32.mrf.mxu2  ;;  %v980_v29 = vpop.f32.mrf.mxu0 }
  0xe7   :  { %v1125_v27 = vpop.f32.mrf.mxu3  ;;  %v1077_v28 = vadd.f32 %v1076_v26, %v1028_v24  ;;  %v1029_v30 = vpop.f32.mrf.mxu1 }
  0xe8   :  { %v1030_v31 = vadd.f32 %v1029_v30, %v980_v29  ;;  %v1844_v29 = vld [vmem:[%s3108_s0 + $0x1d0] sm:$0xf] }
  0xe9   :  { %v2837_v32 = vadd.f32 %v1125_v27, %v1077_v28  ;;  %v2176_v30 = vld [vmem:[%s3108_s0 + $0x1ec] sm:$0xf0] }
  0xea   :  { %v1845_v42 = vor.u32 %v2176_v30, %v1844_v29 }
  0xee   :  { %v1078_v43 = vpop.f32.mrf.mxu2  ;;  %v983_v48 = vpop.f32.mrf.mxu0 }
  0xef   :  { %v1127_v44 = vpop.f32.mrf.mxu3  ;;  %v1079_v47 = vadd.f32 %v1078_v43, %v1030_v31  ;;  %v1032_v49 = vpop.f32.mrf.mxu1  ;;  %v2172_v31 = vld [vmem:[%s3108_s0 + $0x1d4] sm:$0xf] }
  0xf0   :  { %v1033_v52 = vadd.f32 %v1032_v49, %v983_v48  ;;  %v1849_v43 = vor.u32 %v2172_v31, %v1846_v33  ;;  %v1857_v48 = vor.u32 %v2173_v37, %v1854_v38 }
  0xf1   :  { %v2863_v54 = vadd.f32 %v1127_v44, %v1079_v47  ;;  %1178 = vmatmul.bf16.gmra.mxu0 %v1781_v45  ;;  %v1853_v47 = vor.u32 %v2177_v36, %v1852_v35 }
  0xf2   :  { %1227 = vmatmul.bf16.gmra.mxu1 %v1785_v46 }
  0xf3   :  { %1276 = vmatmul.bf16.gmra.mxu2 %v1789_v50 }
  0xf4   :  { %1325 = vmatmul.bf16.gmra.mxu3 %v1793_v51 }
  0xf6   :  { %v1081_v55 = vpop.f32.mrf.mxu2  ;;  %v985_v58 = vpop.f32.mrf.mxu0 }
  0xf7   :  { %v1130_v56 = vpop.f32.mrf.mxu3  ;;  %v1082_v57 = vadd.f32 %v1081_v55, %v1033_v52  ;;  %v1034_v59 = vpop.f32.mrf.mxu1 }
  0xf8   :  { %v1035_v60 = vadd.f32 %v1034_v59, %v985_v58 }
  0xf9   :  { %v2865_v62 = vadd.f32 %v1130_v56, %v1082_v57 }
  0xfe   :  { %v1083_v9 = vpop.f32.mrf.mxu2  ;;  %v988_v14 = vpop.f32.mrf.mxu0 }
  0xff   :  { %v1132_v10 = vpop.f32.mrf.mxu3  ;;  %v1084_v13 = vadd.f32 %v1083_v9, %v1035_v60  ;;  %v1037_v16 = vpop.f32.mrf.mxu1 }
 0x100   :  { %v1038_v19 = vadd.f32 %v1037_v16, %v988_v14 }
 0x101   :  { %v2891_v20 = vadd.f32 %v1132_v10, %v1084_v13  ;;  %1183 = vmatmul.bf16.gmra.mxu0 %v1813_v11 }
 0x102   :  { %1232 = vmatmul.bf16.gmra.mxu1 %v1817_v12 }
 0x103   :  { %1281 = vmatmul.bf16.gmra.mxu2 %v1821_v17 }
 0x104   :  { %1330 = vmatmul.bf16.gmra.mxu3 %v1825_v18 }
 0x106   :  { %v1086_v21 = vpop.f32.mrf.mxu2  ;;  %v990_v24 = vpop.f32.mrf.mxu0 }
 0x107   :  { %v1135_v22 = vpop.f32.mrf.mxu3  ;;  %v1087_v23 = vadd.f32 %v1086_v21, %v1038_v19  ;;  %v1039_v26 = vpop.f32.mrf.mxu1 }
 0x108   :  { %v1040_v27 = vadd.f32 %v1039_v26, %v990_v24 }
 0x109   :  { %v2893_v28 = vadd.f32 %v1135_v22, %v1087_v23 }
 0x10e   :  { %v1088_v39 = vpop.f32.mrf.mxu2  ;;  %v993_v45 = vpop.f32.mrf.mxu0 }
 0x10f   :  { %v1137_v40 = vpop.f32.mrf.mxu3  ;;  %v1089_v44 = vadd.f32 %v1088_v39, %v1040_v27  ;;  %v1042_v46 = vpop.f32.mrf.mxu1 }
 0x110   :  { %v1043_v49 = vadd.f32 %v1042_v46, %v993_v45 }
 0x111   :  { %v2919_v50 = vadd.f32 %v1137_v40, %v1089_v44  ;;  %1188 = vmatmul.bf16.gmra.mxu0 %v1845_v42 }
 0x112   :  { %1237 = vmatmul.bf16.gmra.mxu1 %v1849_v43 }
 0x113   :  { %1286 = vmatmul.bf16.gmra.mxu2 %v1853_v47 }
 0x114   :  { %1335 = vmatmul.bf16.gmra.mxu3 %v1857_v48 }
 0x116   :  { %v1091_v51 = vpop.f32.mrf.mxu2  ;;  %v995_v56 = vpop.f32.mrf.mxu0 }
 0x117   :  { %v1140_v52 = vpop.f32.mrf.mxu3  ;;  %v1092_v55 = vadd.f32 %v1091_v51, %v1043_v49  ;;  %v1044_v57 = vpop.f32.mrf.mxu1 }
 0x118   :  { %v1045_v58 = vadd.f32 %v1044_v57, %v995_v56 }
 0x119   :  { %v2921_v59 = vadd.f32 %v1140_v52, %v1092_v55 }
 0x11e   :  { %v1093_v60 = vpop.f32.mrf.mxu2  ;;  %v1154_v1 = vpop.f32.mrf.mxu0 }
 0x11f   :  { %v1142_v63 = vpop.f32.mrf.mxu3  ;;  %v1094_v0 = vadd.f32 %v1093_v60, %v1045_v58  ;;  %v1203_v2 = vpop.f32.mrf.mxu1  ;;  %v1155_v3 = vadd.f32 %v1154_v1, %v2725_v53 }
 0x121   :  { %v2924_v5 = vadd.f32 %v1142_v63, %v1094_v0  ;;  %v1204_v6 = vadd.f32 %v1203_v2, %v1155_v3 }
 0x126   :  { %v1252_v7 = vpop.f32.mrf.mxu2  ;;  %v1156_v11 = vpop.f32.mrf.mxu0 }
 0x127   :  { %v1301_v9 = vpop.f32.mrf.mxu3  ;;  %v1253_v10 = vadd.f32 %v1252_v7, %v1204_v6  ;;  %v1205_v12 = vpop.f32.mrf.mxu1  ;;  %v1157_v13 = vadd.f32 %v1156_v11, %v2751_v8 }
 0x129   :  { %v2927_v14 = vadd.f32 %v1301_v9, %v1253_v10  ;;  %v1206_v16 = vadd.f32 %v1205_v12, %v1157_v13 }
 0x12e   :  { %v1254_v17 = vpop.f32.mrf.mxu2  ;;  %v1159_v21 = vpop.f32.mrf.mxu0 }
 0x12f   :  { %v1303_v18 = vpop.f32.mrf.mxu3  ;;  %v1255_v19 = vadd.f32 %v1254_v17, %v1206_v16  ;;  %v1208_v22 = vpop.f32.mrf.mxu1  ;;  %v1160_v53 = vadd.f32 %v1159_v21, %v2753_v15 }
 0x131   :  { %v2930_v23 = vadd.f32 %v1303_v18, %v1255_v19  ;;  %v1209_v24 = vadd.f32 %v1208_v22, %v1160_v53 }
 0x133   :  { %v1392_v26 = vadd.f32 %v2930_v23, %v2927_v14 }
 0x136   :  { %v1257_v27 = vpop.f32.mrf.mxu2  ;;  %v1161_v8 = vpop.f32.mrf.mxu0 }
 0x137   :  { %v1306_v29 = vpop.f32.mrf.mxu3  ;;  %v1258_v30 = vadd.f32 %v1257_v27, %v1209_v24  ;;  %v1210_v31 = vpop.f32.mrf.mxu1  ;;  %v1162_v33 = vadd.f32 %v1161_v8, %v2779_v34 }
 0x139   :  { %v2935_v35 = vadd.f32 %v1306_v29, %v1258_v30  ;;  %v1211_v36 = vadd.f32 %v1210_v31, %v1162_v33 }
 0x13b   :  { %v1393_v37 = vadd.f32 %v1392_v26, %v2935_v35 }
 0x13e   :  { %v1259_v38 = vpop.f32.mrf.mxu2  ;;  %v1164_v40 = vpop.f32.mrf.mxu0 }
 0x13f   :  { %v1308_v15 = vpop.f32.mrf.mxu3  ;;  %v1260_v39 = vadd.f32 %v1259_v38, %v1211_v36  ;;  %v1213_v42 = vpop.f32.mrf.mxu1  ;;  %v1165_v43 = vadd.f32 %v1164_v40, %v2781_v41 }
 0x141   :  { %v2939_v44 = vadd.f32 %v1308_v15, %v1260_v39  ;;  %v1214_v45 = vadd.f32 %v1213_v42, %v1165_v43 }
 0x143   :  { %v1394_v46 = vadd.f32 %v1393_v37, %v2939_v44 }
 0x146   :  { %v1262_v47 = vpop.f32.mrf.mxu2  ;;  %v1166_v49 = vpop.f32.mrf.mxu0 }
 0x147   :  { %v1311_v48 = vpop.f32.mrf.mxu3  ;;  %v1263_v34 = vadd.f32 %v1262_v47, %v1214_v45  ;;  %v1215_v51 = vpop.f32.mrf.mxu1  ;;  %v1167_v55 = vadd.f32 %v1166_v49, %v2807_v61 }
 0x149   :  { %v2942_v52 = vadd.f32 %v1311_v48, %v1263_v34  ;;  %v1216_v57 = vadd.f32 %v1215_v51, %v1167_v55 }
 0x14b   :  { %v1395_v56 = vadd.f32 %v1394_v46, %v2942_v52 }
 0x14e   :  { %v1264_v58 = vpop.f32.mrf.mxu2  ;;  %v1169_v63 = vpop.f32.mrf.mxu0 }
 0x14f   :  { %v1313_v60 = vpop.f32.mrf.mxu3  ;;  %v1265_v41 = vadd.f32 %v1264_v58, %v1216_v57  ;;  %v1218_v0 = vpop.f32.mrf.mxu1  ;;  %v1170_v2 = vadd.f32 %v1169_v63, %v2809_v4 }
 0x151   :  { %v2946_v1 = vadd.f32 %v1313_v60, %v1265_v41  ;;  %v1219_v6 = vadd.f32 %v1218_v0, %v1170_v2 }
 0x153   :  { %v1396_v3 = vadd.f32 %v1395_v56, %v2946_v1 }
 0x156   :  { %v1267_v7 = vpop.f32.mrf.mxu2  ;;  %v1171_v11 = vpop.f32.mrf.mxu0 }
 0x157   :  { %v1316_v9 = vpop.f32.mrf.mxu3  ;;  %v1268_v10 = vadd.f32 %v1267_v7, %v1219_v6  ;;  %v1220_v61 = vpop.f32.mrf.mxu1  ;;  %v1172_v13 = vadd.f32 %v1171_v11, %v2835_v25 }
 0x159   :  { %v2950_v12 = vadd.f32 %v1316_v9, %v1268_v10  ;;  %v1221_v17 = vadd.f32 %v1220_v61, %v1172_v13 }
 0x15b   :  { %v1397_v16 = vadd.f32 %v1396_v3, %v2950_v12 }
 0x15e   :  { %v1269_v18 = vpop.f32.mrf.mxu2  ;;  %v1174_v22 = vpop.f32.mrf.mxu0 }
 0x15f   :  { %v1318_v19 = vpop.f32.mrf.mxu3  ;;  %v1270_v21 = vadd.f32 %v1269_v18, %v1221_v17  ;;  %v1223_v4 = vpop.f32.mrf.mxu1  ;;  %v1175_v24 = vadd.f32 %v1174_v22, %v2837_v32 }
 0x161   :  { %v2954_v53 = vadd.f32 %v1318_v19, %v1270_v21  ;;  %v1224_v27 = vadd.f32 %v1223_v4, %v1175_v24 }
 0x163   :  { %v1398_v26 = vadd.f32 %v1397_v16, %v2954_v53 }
 0x166   :  { %v1272_v29 = vpop.f32.mrf.mxu2  ;;  %v1176_v31 = vpop.f32.mrf.mxu0 }
 0x167   :  { %v1321_v30 = vpop.f32.mrf.mxu3  ;;  %v1273_v8 = vadd.f32 %v1272_v29, %v1224_v27  ;;  %v1225_v25 = vpop.f32.mrf.mxu1  ;;  %v1177_v36 = vadd.f32 %v1176_v31, %v2863_v54 }
 0x169   :  { %v2958_v33 = vadd.f32 %v1321_v30, %v1273_v8  ;;  %v1226_v38 = vadd.f32 %v1225_v25, %v1177_v36 }
 0x16b   :  { %v1399_v37 = vadd.f32 %v1398_v26, %v2958_v33 }
 0x16e   :  { %v1274_v15 = vpop.f32.mrf.mxu2  ;;  %v1179_v42 = vpop.f32.mrf.mxu0 }
 0x16f   :  { %v1323_v39 = vpop.f32.mrf.mxu3  ;;  %v1275_v40 = vadd.f32 %v1274_v15, %v1226_v38  ;;  %v1228_v32 = vpop.f32.mrf.mxu1  ;;  %v1180_v45 = vadd.f32 %v1179_v42, %v2865_v62 }
 0x171   :  { %v2962_v43 = vadd.f32 %v1323_v39, %v1275_v40  ;;  %v1229_v47 = vadd.f32 %v1228_v32, %v1180_v45 }
 0x173   :  { %v1400_v46 = vadd.f32 %v1399_v37, %v2962_v43 }
 0x176   :  { %v1277_v48 = vpop.f32.mrf.mxu2  ;;  %v1181_v51 = vpop.f32.mrf.mxu0 }
 0x177   :  { %v1326_v34 = vpop.f32.mrf.mxu3  ;;  %v1278_v49 = vadd.f32 %v1277_v48, %v1229_v47  ;;  %v1230_v54 = vpop.f32.mrf.mxu1  ;;  %v1182_v56 = vadd.f32 %v1181_v51, %v2891_v20 }
 0x179   :  { %v1327_v55 = vadd.f32 %v1326_v34, %v1278_v49  ;;  %v1231_v58 = vadd.f32 %v1230_v54, %v1182_v56 }
 0x17b   :  { %v1401_v57 = vadd.f32 %v1400_v46, %v1327_v55 }
 0x17e   :  { %v1279_v60 = vpop.f32.mrf.mxu2  ;;  %v1184_v0 = vpop.f32.mrf.mxu0 }
 0x17f   :  { %v1328_v41 = vpop.f32.mrf.mxu3  ;;  %v1280_v63 = vadd.f32 %v1279_v60, %v1231_v58  ;;  %v1233_v2 = vpop.f32.mrf.mxu1  ;;  %v1185_v62 = vadd.f32 %v1184_v0, %v2893_v28 }
 0x181   :  { %v1329_v3 = vadd.f32 %v1328_v41, %v1280_v63  ;;  %v1234_v7 = vadd.f32 %v1233_v2, %v1185_v62 }
 0x183   :  { %v1402_v6 = vadd.f32 %v1401_v57, %v1329_v3 }
 0x186   :  { %v1282_v9 = vpop.f32.mrf.mxu2  ;;  %v1186_v61 = vpop.f32.mrf.mxu0 }
 0x187   :  { %v1331_v10 = vpop.f32.mrf.mxu3  ;;  %v1283_v11 = vadd.f32 %v1282_v9, %v1234_v7  ;;  %v1235_v13 = vpop.f32.mrf.mxu1  ;;  %v1187_v20 = vadd.f32 %v1186_v61, %v2919_v50 }
 0x189   :  { %v1332_v16 = vadd.f32 %v1331_v10, %v1283_v11  ;;  %v1236_v18 = vadd.f32 %v1235_v13, %v1187_v20 }
 0x18b   :  { %v1403_v17 = vadd.f32 %v1402_v6, %v1332_v16 }
 0x18e   :  { %v1284_v19 = vpop.f32.mrf.mxu2  ;;  %v1189_v4 = vpop.f32.mrf.mxu0 }
 0x18f   :  { %v1333_v21 = vpop.f32.mrf.mxu3  ;;  %v1285_v22 = vadd.f32 %v1284_v19, %v1236_v18  ;;  %v1190_v26 = vadd.f32 %v1189_v4, %v2921_v59  ;;  %v1238_v28 = vpop.f32.mrf.mxu1 }
 0x191   :  { %v1334_v24 = vadd.f32 %v1333_v21, %v1285_v22  ;;  %v1239_v29 = vadd.f32 %v1238_v28, %v1190_v26 }
 0x193   :  { %v1404_v27 = vadd.f32 %v1403_v17, %v1334_v24 }
 0x196   :  { %v1287_v30 = vpop.f32.mrf.mxu2  ;;  %v1191_v25 = vpop.f32.mrf.mxu0 }
 0x197   :  { %v1336_v8 = vpop.f32.mrf.mxu3  ;;  %v1288_v31 = vadd.f32 %v1287_v30, %v1239_v29  ;;  %v1192_v37 = vadd.f32 %v1191_v25, %v2924_v5  ;;  %v1240_v38 = vpop.f32.mrf.mxu1 }
 0x199   :  { %v1337_v36 = vadd.f32 %v1336_v8, %v1288_v31  ;;  %v1241_v15 = vadd.f32 %v1240_v38, %v1192_v37 }
 0x19b   :  { %v1405_v50 = vadd.f32 %v1404_v27, %v1337_v36 }
 0x19e   :  { %v1289_v39 = vpop.f32.mrf.mxu2 }
 0x19f   :  { %v1290_v40 = vadd.f32 %v1289_v39, %v1241_v15  ;;  %v1338_v42 = vpop.f32.mrf.mxu3 }
 0x1a1   :  { %v1339_v32 = vadd.f32 %v1338_v42, %v1290_v40 }
 0x1a3   :  { %v1406_v45 = vadd.f32 %v1405_v50, %v1339_v32 }
 0x1a5   :  { %v1407_v46 = vrot.slane %v1406_v45, 4 }
 0x1a7   :  { %v1408_v59 = vadd.f32 %v1407_v46, %v1406_v45 }
 0x1a9   :  { %v1409_v47 = vrot.slane %v1408_v59, 2 }
 0x1ab   :  { %v1410_v48 = vadd.f32 %v1409_v47, %v1408_v59 }
 0x1ad   :  { %v1411_v34 = vrot.slane %v1410_v48, 1 }
 0x1af   :  { %v1412_v49 = vadd.f32 %v1411_v34, %v1410_v48  ;;  %v1479_v34 = vld [vmem:[%s3110_s2] sm:$0x1] }
 0x1b1   :  { %v1413_v51 = vmul.f32 0.0078125, %v1412_v49 }
 0x1b3   :  { %v2972_v54 = vsub.f32 %v2927_v14, %v1413_v51  ;;  %v2975_v5 = vsub.f32 %v2930_v23, %v1413_v51  ;;  %v2978_v56 = vsub.f32 %v2935_v35, %v1413_v51  ;;  %v2981_v57 = vsub.f32 %v2939_v44, %v1413_v51 }
 0x1b4   :  { %v2984_v58 = vsub.f32 %v2942_v52, %v1413_v51  ;;  %v2987_v60 = vsub.f32 %v2946_v1, %v1413_v51  ;;  %v2990_v41 = vsub.f32 %v2950_v12, %v1413_v51  ;;  %v2993_v14 = vsub.f32 %v2954_v53, %v1413_v51 }
 0x1b5   :  { %v2996_v23 = vsub.f32 %v2958_v33, %v1413_v51  ;;  %v2999_v35 = vsub.f32 %v2962_v43, %v1413_v51  ;;  %v3001_v44 = vsub.f32 %v1327_v55, %v1413_v51  ;;  %v3003_v63 = vsub.f32 %v1329_v3, %v1413_v51 }
 0x1b6   :  { %v3005_v52 = vsub.f32 %v1332_v16, %v1413_v51  ;;  %v3007_v1 = vsub.f32 %v1334_v24, %v1413_v51  ;;  %v3009_v0 = vsub.f32 %v1337_v36, %v1413_v51  ;;  %v3011_v12 = vsub.f32 %v1339_v32, %v1413_v51 }
 0x1b7   :  { %v1430_v53 = vmul.f32 %v2972_v54, %v2972_v54  ;;  %v1431_v33 = vmul.f32 %v2975_v5, %v2975_v5  ;;  %v1432_v43 = vmul.f32 %v2978_v56, %v2978_v56  ;;  %v1433_v2 = vmul.f32 %v2981_v57, %v2981_v57 }
 0x1b8   :  { %v1434_v62 = vmul.f32 %v2984_v58, %v2984_v58  ;;  %v1435_v7 = vmul.f32 %v2987_v60, %v2987_v60  ;;  %v1436_v10 = vmul.f32 %v2990_v41, %v2990_v41  ;;  %v1437_v61 = vmul.f32 %v2993_v14, %v2993_v14 }
 0x1b9   :  { %v1446_v55 = vadd.f32 %v1431_v33, %v1430_v53  ;;  %v1438_v16 = vmul.f32 %v2996_v23, %v2996_v23  ;;  %v1439_v17 = vmul.f32 %v2999_v35, %v2999_v35  ;;  %v1440_v19 = vmul.f32 %v3001_v44, %v3001_v44 }
 0x1ba   :  { %v1441_v22 = vmul.f32 %v3003_v63, %v3003_v63  ;;  %v1442_v24 = vmul.f32 %v3005_v52, %v3005_v52  ;;  %v1443_v28 = vmul.f32 %v3007_v1, %v3007_v1  ;;  %v1444_v29 = vmul.f32 %v3009_v0, %v3009_v0 }
 0x1bb   :  { %v1447_v3 = vadd.f32 %v1446_v55, %v1432_v43  ;;  %v1445_v8 = vmul.f32 %v3011_v12, %v3011_v12 }
 0x1bd   :  { %v1448_v6 = vadd.f32 %v1447_v3, %v1433_v2  ;;  %v2289_v3 = vld [vmem:[%s3109_s3] ss:$0 sm:$0xff] }
 0x1bf   :  { %v1449_v9 = vadd.f32 %v1448_v6, %v1434_v62 }
 0x1c1   :  { %v1450_v11 = vadd.f32 %v1449_v9, %v1435_v7 }
 0x1c3   :  { %v1451_v13 = vadd.f32 %v1450_v11, %v1436_v10 }
 0x1c5   :  { %v1452_v20 = vadd.f32 %v1451_v13, %v1437_v61 }
 0x1c7   :  { %v1453_v18 = vadd.f32 %v1452_v20, %v1438_v16 }
 0x1c9   :  { %v1454_v21 = vadd.f32 %v1453_v18, %v1439_v17 }
 0x1cb   :  { %v1455_v4 = vadd.f32 %v1454_v21, %v1440_v19 }
 0x1cd   :  { %v1456_v26 = vadd.f32 %v1455_v4, %v1441_v22 }
 0x1cf   :  { %v1457_v27 = vadd.f32 %v1456_v26, %v1442_v24 }
 0x1d1   :  { %v1458_v30 = vadd.f32 %v1457_v27, %v1443_v28 }
 0x1d3   :  { %v1459_v31 = vadd.f32 %v1458_v30, %v1444_v29 }
 0x1d5   :  { %v1460_v25 = vadd.f32 %v1459_v31, %v1445_v8 }
 0x1d7   :  { %v1461_v36 = vrot.slane %v1460_v25, 4 }
 0x1d9   :  { %v1462_v37 = vadd.f32 %v1461_v36, %v1460_v25 }
 0x1db   :  { %v1463_v50 = vrot.slane %v1462_v37, 2 }
 0x1dd   :  { %v1464_v38 = vadd.f32 %v1463_v50, %v1462_v37 }
 0x1df   :  { %v1465_v15 = vrot.slane %v1464_v38, 1 }
 0x1e1   :  { %v1466_v39 = vadd.f32 %v1465_v15, %v1464_v38 }
 0x1e3   :  { %v1467_v40 = vmul.f32 0.0078125, %v1466_v39 }
 0x1e5   :  { %v1468_v42 = vadd.f32 1e-05, %v1467_v40 }
 0x1e7   :  { %2290 = vrsqrt.f32 %v1468_v42  ;;  %vm1475_vm1 = vweird.f32 %v1468_v42 }
 0x1ed   :  { %v2291_v32 = vpop.eup %2290 }
 0x1ee   :  { %v1470_v45 = vmul.f32 %v2291_v32, %v1468_v42  ;;  %vm1476_vm0 = vweird.f32 %v2291_v32 }
 0x1ef   :  { %vm1477_vm2 = vmor %vm1475_vm1, %vm1476_vm0 }
 0x1f0   :  { %v1471_v46 = vmul.f32 %v2291_v32, %v1470_v45 }
 0x1f2   :  { %v1472_v59 = vmul.f32 0.5, %v1471_v46 }
 0x1f4   :  { %v1473_v47 = vsub.f32 1.5, %v1472_v59 }
 0x1f6   :  { %v1474_v48 = vmul.f32 %v2291_v32, %v1473_v47 }
 0x1f8   :  { %v1478_v49 = vsel %vm1477_vm2, %v2291_v32, %v1474_v48 }
 0x1f9   :  { %v1480_v51 = vmul.f32 %v1479_v34, %v1478_v49 }
 0x1fb   :  { %v1481_v53 = vperm.slane %v1480_v51, 0 }
 0x1fd   :  { %v1482_v33 = vmul.f32 %v1481_v53, %v2972_v54  ;;  %v1483_v43 = vmul.f32 %v1481_v53, %v2975_v5  ;;  %v1484_v55 = vmul.f32 %v1481_v53, %v2978_v56  ;;  %v1485_v2 = vmul.f32 %v1481_v53, %v2981_v57 }
 0x1fe   :  { %v1486_v62 = vmul.f32 %v1481_v53, %v2984_v58  ;;  %v1487_v6 = vmul.f32 %v1481_v53, %v2987_v60  ;;  %v1488_v7 = vmul.f32 %v1481_v53, %v2990_v41  ;;  %v1489_v9 = vmul.f32 %v1481_v53, %v2993_v14 }
 0x1ff   :  { %v1490_v54 = vmul.f32 %v1481_v53, %v2996_v23  ;;  %v1491_v5 = vmul.f32 %v1481_v53, %v2999_v35  ;;  %v1492_v56 = vmul.f32 %v1481_v53, %v3001_v44  ;;  %v1493_v57 = vmul.f32 %v1481_v53, %v3003_v63 }
 0x200   :  { %v1494_v10 = vmul.f32 %v1481_v53, %v3005_v52  ;;  %v1495_v11 = vmul.f32 %v1481_v53, %v3007_v1  ;;  %v1496_v58 = vmul.f32 %v1481_v53, %v3009_v0  ;;  %v1497_v60 = vmul.f32 %v1481_v53, %v3011_v12 }
 0x201   :  { %v1502_v61 = vadd.f32 %v2289_v3, %v1482_v33  ;;  %v1503_v41 = vadd.f32 %v2289_v3, %v1483_v43  ;;  %v1504_v13 = vadd.f32 %v2289_v3, %v1484_v55  ;;  %v1505_v14 = vadd.f32 %v2289_v3, %v1485_v2 }
 0x202   :  { %v1506_v16 = vadd.f32 %v2289_v3, %v1486_v62  ;;  %v1507_v23 = vadd.f32 %v2289_v3, %v1487_v6  ;;  %v1508_v20 = vadd.f32 %v2289_v3, %v1488_v7  ;;  %v1509_v35 = vadd.f32 %v2289_v3, %v1489_v9 }
 0x203   :  { %v1510_v17 = vadd.f32 %v2289_v3, %v1490_v54  ;;  %v1511_v44 = vadd.f32 %v2289_v3, %v1491_v5  ;;  %v1512_v18 = vadd.f32 %v2289_v3, %v1492_v56  ;;  %v1513_v63 = vadd.f32 %v2289_v3, %v1493_v57 }
 0x204   :  { %v1514_v19 = vadd.f32 %v2289_v3, %v1494_v10  ;;  %v1515_v52 = vadd.f32 %v2289_v3, %v1495_v11  ;;  %v1516_v21 = vadd.f32 %v2289_v3, %v1496_v58  ;;  %v1517_v1 = vadd.f32 %v2289_v3, %v1497_v60 }
 0x205   :  { %vm1518_vm3 = vcmp.ge.f32.partialorder %v1502_v61, 0.0  ;;  %vm1519_vm4 = vcmp.ge.f32.partialorder %v1503_v41, 0.0  ;;  %vm1520_vm5 = vcmp.ge.f32.partialorder %v1504_v13, 0.0  ;;  %vm1521_vm6 = vcmp.ge.f32.partialorder %v1505_v14, 0.0 }
 0x206   :  { %vm1522_vm7 = vcmp.ge.f32.partialorder %v1506_v16, 0.0  ;;  %vm1523_vm8 = vcmp.ge.f32.partialorder %v1507_v23, 0.0  ;;  %vm1524_vm9 = vcmp.ge.f32.partialorder %v1508_v20, 0.0  ;;  %vm1525_vm10 = vcmp.ge.f32.partialorder %v1509_v35, 0.0 }
 0x207   :  { %vm1526_vm11 = vcmp.ge.f32.partialorder %v1510_v17, 0.0  ;;  %vm1527_vm12 = vcmp.ge.f32.partialorder %v1511_v44, 0.0  ;;  %vm1528_vm13 = vcmp.ge.f32.partialorder %v1512_v18, 0.0  ;;  %vm1529_vm14 = vcmp.ge.f32.partialorder %v1513_v63, 0.0 }
 0x208   :  { %vm1530_vm15 = vcmp.ge.f32.partialorder %v1514_v19, 0.0  ;;  %vm1531_vm0 = vcmp.ge.f32.partialorder %v1515_v52, 0.0  ;;  %vm1532_vm1 = vcmp.ge.f32.partialorder %v1516_v21, 0.0  ;;  %vm1533_vm2 = vcmp.ge.f32.partialorder %v1517_v1, 0.0 }
 0x209   :  { %v1534_v0 = vmul.f32 0.01, %v1502_v61  ;;  %v1535_v12 = vmul.f32 0.01, %v1503_v41  ;;  %v1536_v22 = vmul.f32 0.01, %v1504_v13 }
 0x20a   :  { %v1537_v4 = vmul.f32 0.01, %v1505_v14  ;;  %v1538_v24 = vmul.f32 0.01, %v1506_v16  ;;  %v1539_v26 = vmul.f32 0.01, %v1507_v23 }
 0x20b   :  { %v1540_v28 = vmul.f32 0.01, %v1508_v20  ;;  %v1541_v27 = vmul.f32 0.01, %v1509_v35  ;;  %v1542_v29 = vmul.f32 0.01, %v1510_v17  ;;  %v1550_v30 = vsel %vm1518_vm3, %v1502_v61, %v1534_v0 }
 0x20c   :  { %v1543_v8 = vmul.f32 0.01, %v1511_v44  ;;  %v1544_v31 = vmul.f32 0.01, %v1512_v18  ;;  %v1545_v25 = vmul.f32 0.01, %v1513_v63  ;;  %v1551_v36 = vsel %vm1519_vm4, %v1503_v41, %v1535_v12 }
 0x20d   :  { %v1546_v37 = vmul.f32 0.01, %v1514_v19  ;;  %v1547_v50 = vmul.f32 0.01, %v1515_v52  ;;  %v1548_v38 = vmul.f32 0.01, %v1516_v21  ;;  %v1552_v15 = vsel %vm1520_vm5, %v1504_v13, %v1536_v22 }
 0x20e   :  { %v1549_v39 = vmul.f32 0.01, %v1517_v1  ;;  %v1553_v40 = vsel %vm1521_vm6, %v1505_v14, %v1537_v4  ;;  %v1554_v42 = vsel %vm1522_vm7, %v1506_v16, %v1538_v24  ;;  %v1555_v32 = vsel %vm1523_vm8, %v1507_v23, %v1539_v26 }
 0x20f   :  { %v1556_v45 = vsel %vm1524_vm9, %v1508_v20, %v1540_v28  ;;  %v1557_v46 = vsel %vm1525_vm10, %v1509_v35, %v1541_v27  ;;  %v1558_v59 = vsel %vm1526_vm11, %v1510_v17, %v1542_v29  ;;  %v1559_v47 = vsel %vm1527_vm12, %v1511_v44, %v1543_v8 }
 0x210   :  { %v1560_v48 = vsel %vm1528_vm13, %v1512_v18, %v1544_v31  ;;  %v1561_v34 = vsel %vm1529_vm14, %v1513_v63, %v1545_v25  ;;  %v1562_v49 = vsel %vm1530_vm15, %v1514_v19, %v1546_v37  ;;  %v1563_v51 = vsel %vm1531_vm0, %v1515_v52, %v1547_v50 }
 0x211   :  { %v1564_v53 = vsel %vm1532_vm1, %v1516_v21, %v1548_v38  ;;  %v1565_v33 = vsel %vm1533_vm2, %v1517_v1, %v1549_v39  ;;  %v2245_v43 = vpack.c.bf16 %v1551_v36, %v1550_v30  ;;  %v2250_v55 = vpack.c.bf16 %v1553_v40, %v1552_v15 }
 0x212   :  { %v2255_v2 = vpack.c.bf16 %v1555_v32, %v1554_v42  ;;  %v2260_v3 = vpack.c.bf16 %v1557_v46, %v1556_v45  ;;  %v2265_v62 = vpack.c.bf16 %v1559_v47, %v1558_v59  ;;  %v2270_v6 = vpack.c.bf16 %v1561_v34, %v1560_v48 }
 0x213   :  { %2246 = vst [vmem:[%s3111_s4] sm:$0xff] %v2245_v43   ;;  %v2275_v7 = vpack.c.bf16 %v1563_v51, %v1562_v49  ;;  %v2280_v9 = vpack.c.bf16 %v1565_v33, %v1564_v53 }
 0x214   :  { %2282 = vst [vmem:[%s3111_s4 + $0x8] sm:$0xff] %v2250_v55  }
 0x215   :  { %2283 = vst [vmem:[%s3111_s4 + $0x10] sm:$0xff] %v2255_v2  }
 0x216   :  { %2284 = vst [vmem:[%s3111_s4 + $0x18] sm:$0xff] %v2260_v3  }
 0x217   :  { %2285 = vst [vmem:[%s3111_s4 + $0x20] sm:$0xff] %v2265_v62  }
 0x218   :  { %2286 = vst [vmem:[%s3111_s4 + $0x28] sm:$0xff] %v2270_v6  }
 0x219   :  { %2287 = vst [vmem:[%s3111_s4 + $0x30] sm:$0xff] %v2275_v7  }
 0x21a   :  { %2288 = vst [vmem:[%s3111_s4 + $0x38] sm:$0xff] %v2280_v9  }

// kernel: discriminator_forward.7
= control target key start
LH: loop header
LB: loop body
LE: loop exit
PB: predicated region body
PF: predicated region fallthrough
CT: control target
= control target key end

     0   :  { %s5097_s15 = smov 0   ;;  %s5099_s16 = smov 0   ;;  %s6028_s0 = inlined_call_operand.vmem [shape: bf16[32,2048], index: 0, kind: input, shape index: {}]   ;;  %s6029_s1 = inlined_call_operand.vmem [shape: bf16[2048,256], index: 1, kind: input, shape index: {}]   ;;  %s6030_s2 = inlined_call_operand.vmem [shape: f32[1,256], index: 2, kind: input, shape index: {}]   ;;  %s6031_s3 = inlined_call_operand.vmem [shape: f32[1,256], index: 3, kind: input, shape index: {}]   ;;  %s6032_s4 = inlined_call_operand.vmem [shape: bf16[32,256], index: 4, kind: output, shape index: {}]  }
   0x1   :  { %s5101_s17 = smov 0   ;;  %s5103_s18 = smov 0  }
   0x2   :  { %s5105_s19 = smov 0  }
   0x3 LB: > { %s26_s20 = sadd.s32 1, %s5066_s18  ;;  %s4164_s21 = sadd.s32 4294967295, %s5070_s19   ;;  %s5070_s19 = sphi %s5105_s19, %s14_s19   ;;  %s5066_s18 = sphi %s5103_s18, %s6037_s18   ;;  %s5062_s17 = sphi %s5101_s17, %s6036_s17   ;;  %s5058_s16 = sphi %s5099_s16, %s6035_s16   ;;  %s5054_s15 = sphi %s5097_s15, %s6034_s15  }
   0x4   : > { %p28_p0 = scmp.ge.s32.totalorder %s26_s20, 2  ;;  %p68_p1 = scmp.ne.s32.totalorder %s5058_s16, %s5054_s15 }
   0x5   : > { %p69_p2 = scmp.eq.s32.totalorder %s5070_s19, 0  ;;  %p150_p4 = scmp.eq.s32.totalorder %s4164_s21, 1 }
   0x6   : > { %s6039_s20 = smov (%p28_p0, %s26_s20), 0  ;;  %s61_s23 = sadd.s32 1, %s5058_s16 }
   0x7   : > { %p70_p3 = por %p69_p2, %p68_p1  ;;  %s57_s22 = ssub.s32 %s5066_s18, %s6039_s20 }
   0x8   : > { %p59_p5 = scmp.eq.s32.totalorder %s57_s22, 0  ;;  %p5132_p6 = por %p150_p4, %p68_p1 }
   0x9   : > { %p4168_p7 = scmp.ge.s32.totalorder %s5070_s19, 2 }
   0xa   : > { %s5137_s25 = scalar_select %p59_p5, %s5058_s16, %s61_s23  }
   0xb   : > { %181 = sbr.rel (%p4168_p7) target bundleno = 276 (0x114), region = 20 }
  0x10   : > { %184 = sbr.rel (!%p70_p3) target bundleno = 276 (0x114), region = 24  ;;  %s186_s26 = sand.u32 (%p70_p3), 1, %s5058_s16  }
  0x11   : > { %s4170_s27 = sshll.u32 (%p70_p3), %s5066_s18, 2  ;;  %s4169_s28 = sshll.u32 (%p70_p3), %s186_s26, 10 }
  0x12   : > { %s5145_s5 = scalar_lea.vmem (%p70_p3), %s6029_s1, %s4170_s27  ;;  %s5149_s6 = scalar_lea.vmem (%p70_p3), [#allocation3], %s4169_s28 }
  0x13   : > { %v210_v0 = vld [vmem:[%s5145_s5] sm:$0xf] (%p70_p3)  ;;  %v212_v1 = vld [vmem:[%s5145_s5 + $0x8] sm:$0xf] (%p70_p3)  ;;  %v214_v2 = vld [vmem:[%s5145_s5 + $0x10] sm:$0xf] (%p70_p3) }
  0x14   : > { %211 = vst [vmem:[%s5149_s6] sm:$0xf] (%p70_p3), %v210_v0  ;;  %v216_v3 = vld [vmem:[%s5145_s5 + $0x18] sm:$0xf] (%p70_p3)  ;;  %v218_v4 = vld [vmem:[%s5145_s5 + $0x20] sm:$0xf] (%p70_p3) }
  0x15   : > { %213 = vst [vmem:[%s5149_s6 + $0x4] sm:$0xf] %v212_v1  ;;  %v220_v5 = vld [vmem:[%s5145_s5 + $0x28] sm:$0xf]  ;;  %v222_v6 = vld [vmem:[%s5145_s5 + $0x30] sm:$0xf] }
  0x16   : > { %215 = vst [vmem:[%s5149_s6 + $0x8] sm:$0xf] %v214_v2  ;;  %v224_v7 = vld [vmem:[%s5145_s5 + $0x38] sm:$0xf]  ;;  %v226_v8 = vld [vmem:[%s5145_s5 + $0x40] sm:$0xf] }
  0x17   : > { %217 = vst [vmem:[%s5149_s6 + $0xc] sm:$0xf] %v216_v3  ;;  %v228_v9 = vld [vmem:[%s5145_s5 + $0x48] sm:$0xf]  ;;  %v230_v10 = vld [vmem:[%s5145_s5 + $0x50] sm:$0xf] }
  0x18   : > { %219 = vst [vmem:[%s5149_s6 + $0x10] sm:$0xf] %v218_v4  ;;  %v232_v11 = vld [vmem:[%s5145_s5 + $0x58] sm:$0xf]  ;;  %v234_v12 = vld [vmem:[%s5145_s5 + $0x60] sm:$0xf] }
  0x19   : > { %221 = vst [vmem:[%s5149_s6 + $0x14] sm:$0xf] %v220_v5  ;;  %v236_v13 = vld [vmem:[%s5145_s5 + $0x68] sm:$0xf]  ;;  %v238_v14 = vld [vmem:[%s5145_s5 + $0x70] sm:$0xf] }
  0x1a   : > { %223 = vst [vmem:[%s5149_s6 + $0x18] sm:$0xf] %v222_v6  ;;  %v240_v15 = vld [vmem:[%s5145_s5 + $0x78] sm:$0xf]  ;;  %v242_v16 = vld [vmem:[%s5145_s5 + $0x80] sm:$0xf] }
  0x1b   : > { %225 = vst [vmem:[%s5149_s6 + $0x1c] sm:$0xf] %v224_v7  ;;  %v244_v17 = vld [vmem:[%s5145_s5 + $0x88] sm:$0xf]  ;;  %v246_v18 = vld [vmem:[%s5145_s5 + $0x90] sm:$0xf] }
  0x1c   : > { %227 = vst [vmem:[%s5149_s6 + $0x20] sm:$0xf] %v226_v8  ;;  %v248_v19 = vld [vmem:[%s5145_s5 + $0x98] sm:$0xf]  ;;  %v250_v20 = vld [vmem:[%s5145_s5 + $0xa0] sm:$0xf] }
  0x1d   : > { %229 = vst [vmem:[%s5149_s6 + $0x24] sm:$0xf] %v228_v9  ;;  %v252_v21 = vld [vmem:[%s5145_s5 + $0xa8] sm:$0xf]  ;;  %v254_v22 = vld [vmem:[%s5145_s5 + $0xb0] sm:$0xf] }
  0x1e   : > { %231 = vst [vmem:[%s5149_s6 + $0x28] sm:$0xf] %v230_v10  ;;  %v256_v23 = vld [vmem:[%s5145_s5 + $0xb8] sm:$0xf]  ;;  %v258_v24 = vld [vmem:[%s5145_s5 + $0xc0] sm:$0xf] }
  0x1f   : > { %233 = vst [vmem:[%s5149_s6 + $0x2c] sm:$0xf] %v232_v11  ;;  %v260_v25 = vld [vmem:[%s5145_s5 + $0xc8] sm:$0xf]  ;;  %v262_v26 = vld [vmem:[%s5145_s5 + $0xd0] sm:$0xf] }
  0x20   : > { %235 = vst [vmem:[%s5149_s6 + $0x30] sm:$0xf] %v234_v12  ;;  %v264_v27 = vld [vmem:[%s5145_s5 + $0xd8] sm:$0xf]  ;;  %v266_v28 = vld [vmem:[%s5145_s5 + $0xe0] sm:$0xf] }
  0x21   : > { %237 = vst [vmem:[%s5149_s6 + $0x34] sm:$0xf] %v236_v13  ;;  %v268_v29 = vld [vmem:[%s5145_s5 + $0xe8] sm:$0xf]  ;;  %v270_v30 = vld [vmem:[%s5145_s5 + $0xf0] sm:$0xf] }
  0x22   : > { %239 = vst [vmem:[%s5149_s6 + $0x38] sm:$0xf] %v238_v14  ;;  %v272_v31 = vld [vmem:[%s5145_s5 + $0xf8] sm:$0xf]  ;;  %v274_v32 = vld [vmem:[%s5145_s5 + $0x100] sm:$0xf] }
  0x23   : > { %241 = vst [vmem:[%s5149_s6 + $0x3c] sm:$0xf] %v240_v15  ;;  %v276_v33 = vld [vmem:[%s5145_s5 + $0x108] sm:$0xf]  ;;  %v278_v34 = vld [vmem:[%s5145_s5 + $0x110] sm:$0xf] }
  0x24   : > { %243 = vst [vmem:[%s5149_s6 + $0x40] sm:$0xf] %v242_v16  ;;  %v280_v35 = vld [vmem:[%s5145_s5 + $0x118] sm:$0xf]  ;;  %v282_v36 = vld [vmem:[%s5145_s5 + $0x120] sm:$0xf] }
  0x25   : > { %245 = vst [vmem:[%s5149_s6 + $0x44] sm:$0xf] %v244_v17  ;;  %v284_v37 = vld [vmem:[%s5145_s5 + $0x128] sm:$0xf]  ;;  %v286_v38 = vld [vmem:[%s5145_s5 + $0x130] sm:$0xf] }
  0x26   : > { %247 = vst [vmem:[%s5149_s6 + $0x48] sm:$0xf] %v246_v18  ;;  %v288_v39 = vld [vmem:[%s5145_s5 + $0x138] sm:$0xf]  ;;  %v290_v40 = vld [vmem:[%s5145_s5 + $0x140] sm:$0xf] }
  0x27   : > { %249 = vst [vmem:[%s5149_s6 + $0x4c] sm:$0xf] %v248_v19  ;;  %v292_v41 = vld [vmem:[%s5145_s5 + $0x148] sm:$0xf]  ;;  %v294_v42 = vld [vmem:[%s5145_s5 + $0x150] sm:$0xf] }
  0x28   : > { %251 = vst [vmem:[%s5149_s6 + $0x50] sm:$0xf] %v250_v20  ;;  %v296_v43 = vld [vmem:[%s5145_s5 + $0x158] sm:$0xf]  ;;  %v298_v44 = vld [vmem:[%s5145_s5 + $0x160] sm:$0xf] }
  0x29   : > { %253 = vst [vmem:[%s5149_s6 + $0x54] sm:$0xf] %v252_v21  ;;  %v300_v45 = vld [vmem:[%s5145_s5 + $0x168] sm:$0xf]  ;;  %v302_v46 = vld [vmem:[%s5145_s5 + $0x170] sm:$0xf] }
  0x2a   : > { %255 = vst [vmem:[%s5149_s6 + $0x58] sm:$0xf] %v254_v22  ;;  %v304_v47 = vld [vmem:[%s5145_s5 + $0x178] sm:$0xf]  ;;  %v306_v48 = vld [vmem:[%s5145_s5 + $0x180] sm:$0xf] }
  0x2b   : > { %257 = vst [vmem:[%s5149_s6 + $0x5c] sm:$0xf] %v256_v23  ;;  %v308_v49 = vld [vmem:[%s5145_s5 + $0x188] sm:$0xf]  ;;  %v310_v50 = vld [vmem:[%s5145_s5 + $0x190] sm:$0xf] }
  0x2c   : > { %259 = vst [vmem:[%s5149_s6 + $0x60] sm:$0xf] %v258_v24  ;;  %v312_v51 = vld [vmem:[%s5145_s5 + $0x198] sm:$0xf]  ;;  %v314_v52 = vld [vmem:[%s5145_s5 + $0x1a0] sm:$0xf] }
  0x2d   : > { %261 = vst [vmem:[%s5149_s6 + $0x64] sm:$0xf] %v260_v25  ;;  %v316_v53 = vld [vmem:[%s5145_s5 + $0x1a8] sm:$0xf]  ;;  %v318_v54 = vld [vmem:[%s5145_s5 + $0x1b0] sm:$0xf] }
  0x2e   : > { %263 = vst [vmem:[%s5149_s6 + $0x68] sm:$0xf] %v262_v26  ;;  %v320_v55 = vld [vmem:[%s5145_s5 + $0x1b8] sm:$0xf]  ;;  %v322_v56 = vld [vmem:[%s5145_s5 + $0x1c0] sm:$0xf] }
  0x2f   : > { %265 = vst [vmem:[%s5149_s6 + $0x6c] sm:$0xf] %v264_v27  ;;  %v324_v57 = vld [vmem:[%s5145_s5 + $0x1c8] sm:$0xf]  ;;  %v326_v58 = vld [vmem:[%s5145_s5 + $0x1d0] sm:$0xf] }
  0x30   : > { %267 = vst [vmem:[%s5149_s6 + $0x70] sm:$0xf] %v266_v28  ;;  %v328_v59 = vld [vmem:[%s5145_s5 + $0x1d8] sm:$0xf]  ;;  %v330_v60 = vld [vmem:[%s5145_s5 + $0x1e0] sm:$0xf] }
  0x31   : > { %269 = vst [vmem:[%s5149_s6 + $0x74] sm:$0xf] %v268_v29  ;;  %v332_v61 = vld [vmem:[%s5145_s5 + $0x1e8] sm:$0xf]  ;;  %v334_v62 = vld [vmem:[%s5145_s5 + $0x1f0] sm:$0xf] }
  0x32   : > { %271 = vst [vmem:[%s5149_s6 + $0x78] sm:$0xf] %v270_v30  ;;  %v336_v63 = vld [vmem:[%s5145_s5 + $0x1f8] sm:$0xf]  ;;  %v338_v0 = vld [vmem:[%s5145_s5 + $0x200] sm:$0xf] }
  0x33   : > { %273 = vst [vmem:[%s5149_s6 + $0x7c] sm:$0xf] %v272_v31  ;;  %v340_v1 = vld [vmem:[%s5145_s5 + $0x208] sm:$0xf]  ;;  %v342_v2 = vld [vmem:[%s5145_s5 + $0x210] sm:$0xf] }
  0x34   : > { %275 = vst [vmem:[%s5149_s6 + $0x80] sm:$0xf] %v274_v32  ;;  %v344_v3 = vld [vmem:[%s5145_s5 + $0x218] sm:$0xf]  ;;  %v346_v4 = vld [vmem:[%s5145_s5 + $0x220] sm:$0xf] }
  0x35   : > { %277 = vst [vmem:[%s5149_s6 + $0x84] sm:$0xf] %v276_v33  ;;  %v348_v5 = vld [vmem:[%s5145_s5 + $0x228] sm:$0xf]  ;;  %v350_v6 = vld [vmem:[%s5145_s5 + $0x230] sm:$0xf] }
  0x36   : > { %279 = vst [vmem:[%s5149_s6 + $0x88] sm:$0xf] %v278_v34  ;;  %v352_v7 = vld [vmem:[%s5145_s5 + $0x238] sm:$0xf]  ;;  %v354_v8 = vld [vmem:[%s5145_s5 + $0x240] sm:$0xf] }
  0x37   : > { %281 = vst [vmem:[%s5149_s6 + $0x8c] sm:$0xf] %v280_v35  ;;  %v356_v9 = vld [vmem:[%s5145_s5 + $0x248] sm:$0xf]  ;;  %v358_v10 = vld [vmem:[%s5145_s5 + $0x250] sm:$0xf] }
  0x38   : > { %283 = vst [vmem:[%s5149_s6 + $0x90] sm:$0xf] %v282_v36  ;;  %v360_v11 = vld [vmem:[%s5145_s5 + $0x258] sm:$0xf]  ;;  %v362_v12 = vld [vmem:[%s5145_s5 + $0x260] sm:$0xf] }
  0x39   : > { %285 = vst [vmem:[%s5149_s6 + $0x94] sm:$0xf] %v284_v37  ;;  %v364_v13 = vld [vmem:[%s5145_s5 + $0x268] sm:$0xf]  ;;  %v366_v14 = vld [vmem:[%s5145_s5 + $0x270] sm:$0xf] }
  0x3a   : > { %287 = vst [vmem:[%s5149_s6 + $0x98] sm:$0xf] %v286_v38  ;;  %v368_v15 = vld [vmem:[%s5145_s5 + $0x278] sm:$0xf]  ;;  %v370_v16 = vld [vmem:[%s5145_s5 + $0x280] sm:$0xf] }
  0x3b   : > { %289 = vst [vmem:[%s5149_s6 + $0x9c] sm:$0xf] %v288_v39  ;;  %v372_v17 = vld [vmem:[%s5145_s5 + $0x288] sm:$0xf]  ;;  %v374_v18 = vld [vmem:[%s5145_s5 + $0x290] sm:$0xf] }
  0x3c   : > { %291 = vst [vmem:[%s5149_s6 + $0xa0] sm:$0xf] %v290_v40  ;;  %v376_v19 = vld [vmem:[%s5145_s5 + $0x298] sm:$0xf]  ;;  %v378_v20 = vld [vmem:[%s5145_s5 + $0x2a0] sm:$0xf] }
  0x3d   : > { %293 = vst [vmem:[%s5149_s6 + $0xa4] sm:$0xf] %v292_v41  ;;  %v380_v21 = vld [vmem:[%s5145_s5 + $0x2a8] sm:$0xf]  ;;  %v382_v22 = vld [vmem:[%s5145_s5 + $0x2b0] sm:$0xf] }
  0x3e   : > { %295 = vst [vmem:[%s5149_s6 + $0xa8] sm:$0xf] %v294_v42  ;;  %v384_v23 = vld [vmem:[%s5145_s5 + $0x2b8] sm:$0xf]  ;;  %v386_v24 = vld [vmem:[%s5145_s5 + $0x2c0] sm:$0xf] }
  0x3f   : > { %297 = vst [vmem:[%s5149_s6 + $0xac] sm:$0xf] %v296_v43  ;;  %v388_v25 = vld [vmem:[%s5145_s5 + $0x2c8] sm:$0xf]  ;;  %v390_v26 = vld [vmem:[%s5145_s5 + $0x2d0] sm:$0xf] }
  0x40   : > { %299 = vst [vmem:[%s5149_s6 + $0xb0] sm:$0xf] %v298_v44  ;;  %v392_v27 = vld [vmem:[%s5145_s5 + $0x2d8] sm:$0xf]  ;;  %v394_v28 = vld [vmem:[%s5145_s5 + $0x2e0] sm:$0xf] }
  0x41   : > { %301 = vst [vmem:[%s5149_s6 + $0xb4] sm:$0xf] %v300_v45  ;;  %v396_v29 = vld [vmem:[%s5145_s5 + $0x2e8] sm:$0xf]  ;;  %v398_v30 = vld [vmem:[%s5145_s5 + $0x2f0] sm:$0xf] }
  0x42   : > { %303 = vst [vmem:[%s5149_s6 + $0xb8] sm:$0xf] %v302_v46  ;;  %v400_v31 = vld [vmem:[%s5145_s5 + $0x2f8] sm:$0xf]  ;;  %v402_v32 = vld [vmem:[%s5145_s5 + $0x300] sm:$0xf] }
  0x43   : > { %305 = vst [vmem:[%s5149_s6 + $0xbc] sm:$0xf] %v304_v47  ;;  %v404_v33 = vld [vmem:[%s5145_s5 + $0x308] sm:$0xf]  ;;  %v406_v34 = vld [vmem:[%s5145_s5 + $0x310] sm:$0xf] }
  0x44   : > { %307 = vst [vmem:[%s5149_s6 + $0xc0] sm:$0xf] %v306_v48  ;;  %v408_v35 = vld [vmem:[%s5145_s5 + $0x318] sm:$0xf]  ;;  %v410_v36 = vld [vmem:[%s5145_s5 + $0x320] sm:$0xf] }
  0x45   : > { %309 = vst [vmem:[%s5149_s6 + $0xc4] sm:$0xf] %v308_v49  ;;  %v412_v37 = vld [vmem:[%s5145_s5 + $0x328] sm:$0xf]  ;;  %v414_v38 = vld [vmem:[%s5145_s5 + $0x330] sm:$0xf] }
  0x46   : > { %311 = vst [vmem:[%s5149_s6 + $0xc8] sm:$0xf] %v310_v50  ;;  %v416_v39 = vld [vmem:[%s5145_s5 + $0x338] sm:$0xf]  ;;  %v418_v40 = vld [vmem:[%s5145_s5 + $0x340] sm:$0xf] }
  0x47   : > { %313 = vst [vmem:[%s5149_s6 + $0xcc] sm:$0xf] %v312_v51  ;;  %v420_v41 = vld [vmem:[%s5145_s5 + $0x348] sm:$0xf]  ;;  %v422_v42 = vld [vmem:[%s5145_s5 + $0x350] sm:$0xf] }
  0x48   : > { %315 = vst [vmem:[%s5149_s6 + $0xd0] sm:$0xf] %v314_v52  ;;  %v424_v43 = vld [vmem:[%s5145_s5 + $0x358] sm:$0xf]  ;;  %v426_v44 = vld [vmem:[%s5145_s5 + $0x360] sm:$0xf] }
  0x49   : > { %317 = vst [vmem:[%s5149_s6 + $0xd4] sm:$0xf] %v316_v53  ;;  %v428_v45 = vld [vmem:[%s5145_s5 + $0x368] sm:$0xf]  ;;  %v430_v46 = vld [vmem:[%s5145_s5 + $0x370] sm:$0xf] }
  0x4a   : > { %319 = vst [vmem:[%s5149_s6 + $0xd8] sm:$0xf] %v318_v54  ;;  %v432_v47 = vld [vmem:[%s5145_s5 + $0x378] sm:$0xf]  ;;  %v434_v48 = vld [vmem:[%s5145_s5 + $0x380] sm:$0xf] }
  0x4b   : > { %321 = vst [vmem:[%s5149_s6 + $0xdc] sm:$0xf] %v320_v55  ;;  %v436_v49 = vld [vmem:[%s5145_s5 + $0x388] sm:$0xf]  ;;  %v438_v50 = vld [vmem:[%s5145_s5 + $0x390] sm:$0xf] }
  0x4c   : > { %323 = vst [vmem:[%s5149_s6 + $0xe0] sm:$0xf] %v322_v56  ;;  %v440_v51 = vld [vmem:[%s5145_s5 + $0x398] sm:$0xf]  ;;  %v442_v52 = vld [vmem:[%s5145_s5 + $0x3a0] sm:$0xf] }
  0x4d   : > { %325 = vst [vmem:[%s5149_s6 + $0xe4] sm:$0xf] %v324_v57  ;;  %v444_v53 = vld [vmem:[%s5145_s5 + $0x3a8] sm:$0xf]  ;;  %v446_v54 = vld [vmem:[%s5145_s5 + $0x3b0] sm:$0xf] }
  0x4e   : > { %327 = vst [vmem:[%s5149_s6 + $0xe8] sm:$0xf] %v326_v58  ;;  %v448_v55 = vld [vmem:[%s5145_s5 + $0x3b8] sm:$0xf]  ;;  %v450_v56 = vld [vmem:[%s5145_s5 + $0x3c0] sm:$0xf] }
  0x4f   : > { %329 = vst [vmem:[%s5149_s6 + $0xec] sm:$0xf] %v328_v59  ;;  %v452_v57 = vld [vmem:[%s5145_s5 + $0x3c8] sm:$0xf]  ;;  %v454_v58 = vld [vmem:[%s5145_s5 + $0x3d0] sm:$0xf] }
  0x50   : > { %331 = vst [vmem:[%s5149_s6 + $0xf0] sm:$0xf] %v330_v60  ;;  %v456_v59 = vld [vmem:[%s5145_s5 + $0x3d8] sm:$0xf]  ;;  %v458_v60 = vld [vmem:[%s5145_s5 + $0x3e0] sm:$0xf] }
  0x51   : > { %333 = vst [vmem:[%s5149_s6 + $0xf4] sm:$0xf] %v332_v61  ;;  %v460_v61 = vld [vmem:[%s5145_s5 + $0x3e8] sm:$0xf] }
  0x52   : > { %335 = vst [vmem:[%s5149_s6 + $0xf8] sm:$0xf] %v334_v62  ;;  %v462_v62 = vld [vmem:[%s5145_s5 + $0x3f0] sm:$0xf] }
  0x53   : > { %337 = vst [vmem:[%s5149_s6 + $0xfc] sm:$0xf] %v336_v63  ;;  %v464_v63 = vld [vmem:[%s5145_s5 + $0x3f8] sm:$0xf] }
  0x54   : > { %339 = vst [vmem:[%s5149_s6 + $0x100] sm:$0xf] %v338_v0  ;;  %v466_v0 = vld [vmem:[%s5145_s5 + $0x400] sm:$0xf] }
  0x55   : > { %341 = vst [vmem:[%s5149_s6 + $0x104] sm:$0xf] %v340_v1  ;;  %v468_v1 = vld [vmem:[%s5145_s5 + $0x408] sm:$0xf] }
  0x56   : > { %343 = vst [vmem:[%s5149_s6 + $0x108] sm:$0xf] %v342_v2  ;;  %v470_v2 = vld [vmem:[%s5145_s5 + $0x410] sm:$0xf] }
  0x57   : > { %345 = vst [vmem:[%s5149_s6 + $0x10c] sm:$0xf] %v344_v3  ;;  %v472_v3 = vld [vmem:[%s5145_s5 + $0x418] sm:$0xf] }
  0x58   : > { %347 = vst [vmem:[%s5149_s6 + $0x110] sm:$0xf] %v346_v4  ;;  %v474_v4 = vld [vmem:[%s5145_s5 + $0x420] sm:$0xf] }
  0x59   : > { %349 = vst [vmem:[%s5149_s6 + $0x114] sm:$0xf] %v348_v5  ;;  %v476_v5 = vld [vmem:[%s5145_s5 + $0x428] sm:$0xf] }
  0x5a   : > { %351 = vst [vmem:[%s5149_s6 + $0x118] sm:$0xf] %v350_v6  ;;  %v478_v6 = vld [vmem:[%s5145_s5 + $0x430] sm:$0xf] }
  0x5b   : > { %353 = vst [vmem:[%s5149_s6 + $0x11c] sm:$0xf] %v352_v7  ;;  %v480_v7 = vld [vmem:[%s5145_s5 + $0x438] sm:$0xf] }
  0x5c   : > { %355 = vst [vmem:[%s5149_s6 + $0x120] sm:$0xf] %v354_v8  ;;  %v482_v8 = vld [vmem:[%s5145_s5 + $0x440] sm:$0xf] }
  0x5d   : > { %357 = vst [vmem:[%s5149_s6 + $0x124] sm:$0xf] %v356_v9  ;;  %v484_v9 = vld [vmem:[%s5145_s5 + $0x448] sm:$0xf] }
  0x5e   : > { %359 = vst [vmem:[%s5149_s6 + $0x128] sm:$0xf] %v358_v10  ;;  %v486_v10 = vld [vmem:[%s5145_s5 + $0x450] sm:$0xf] }
  0x5f   : > { %361 = vst [vmem:[%s5149_s6 + $0x12c] sm:$0xf] %v360_v11  ;;  %v488_v11 = vld [vmem:[%s5145_s5 + $0x458] sm:$0xf] }
  0x60   : > { %363 = vst [vmem:[%s5149_s6 + $0x130] sm:$0xf] %v362_v12  ;;  %v490_v12 = vld [vmem:[%s5145_s5 + $0x460] sm:$0xf] }
  0x61   : > { %365 = vst [vmem:[%s5149_s6 + $0x134] sm:$0xf] %v364_v13  ;;  %v492_v13 = vld [vmem:[%s5145_s5 + $0x468] sm:$0xf] }
  0x62   : > { %367 = vst [vmem:[%s5149_s6 + $0x138] sm:$0xf] %v366_v14  ;;  %v494_v14 = vld [vmem:[%s5145_s5 + $0x470] sm:$0xf] }
  0x63   : > { %369 = vst [vmem:[%s5149_s6 + $0x13c] sm:$0xf] %v368_v15  ;;  %v496_v15 = vld [vmem:[%s5145_s5 + $0x478] sm:$0xf] }
  0x64   : > { %371 = vst [vmem:[%s5149_s6 + $0x140] sm:$0xf] %v370_v16  ;;  %v498_v16 = vld [vmem:[%s5145_s5 + $0x480] sm:$0xf] }
  0x65   : > { %373 = vst [vmem:[%s5149_s6 + $0x144] sm:$0xf] %v372_v17  ;;  %v500_v17 = vld [vmem:[%s5145_s5 + $0x488] sm:$0xf] }
  0x66   : > { %375 = vst [vmem:[%s5149_s6 + $0x148] sm:$0xf] %v374_v18  ;;  %v502_v18 = vld [vmem:[%s5145_s5 + $0x490] sm:$0xf] }
  0x67   : > { %377 = vst [vmem:[%s5149_s6 + $0x14c] sm:$0xf] %v376_v19  ;;  %v504_v19 = vld [vmem:[%s5145_s5 + $0x498] sm:$0xf] }
  0x68   : > { %379 = vst [vmem:[%s5149_s6 + $0x150] sm:$0xf] %v378_v20  ;;  %v506_v20 = vld [vmem:[%s5145_s5 + $0x4a0] sm:$0xf] }
  0x69   : > { %381 = vst [vmem:[%s5149_s6 + $0x154] sm:$0xf] %v380_v21  ;;  %v508_v21 = vld [vmem:[%s5145_s5 + $0x4a8] sm:$0xf] }
  0x6a   : > { %383 = vst [vmem:[%s5149_s6 + $0x158] sm:$0xf] %v382_v22  ;;  %v510_v22 = vld [vmem:[%s5145_s5 + $0x4b0] sm:$0xf] }
  0x6b   : > { %385 = vst [vmem:[%s5149_s6 + $0x15c] sm:$0xf] %v384_v23  ;;  %v512_v23 = vld [vmem:[%s5145_s5 + $0x4b8] sm:$0xf] }
  0x6c   : > { %387 = vst [vmem:[%s5149_s6 + $0x160] sm:$0xf] %v386_v24  ;;  %v514_v24 = vld [vmem:[%s5145_s5 + $0x4c0] sm:$0xf] }
  0x6d   : > { %389 = vst [vmem:[%s5149_s6 + $0x164] sm:$0xf] %v388_v25  ;;  %v516_v25 = vld [vmem:[%s5145_s5 + $0x4c8] sm:$0xf] }
  0x6e   : > { %391 = vst [vmem:[%s5149_s6 + $0x168] sm:$0xf] %v390_v26  ;;  %v518_v26 = vld [vmem:[%s5145_s5 + $0x4d0] sm:$0xf] }
  0x6f   : > { %393 = vst [vmem:[%s5149_s6 + $0x16c] sm:$0xf] %v392_v27  ;;  %v520_v27 = vld [vmem:[%s5145_s5 + $0x4d8] sm:$0xf] }
  0x70   : > { %395 = vst [vmem:[%s5149_s6 + $0x170] sm:$0xf] %v394_v28  ;;  %v522_v28 = vld [vmem:[%s5145_s5 + $0x4e0] sm:$0xf] }
  0x71   : > { %397 = vst [vmem:[%s5149_s6 + $0x174] sm:$0xf] %v396_v29  ;;  %v524_v29 = vld [vmem:[%s5145_s5 + $0x4e8] sm:$0xf] }
  0x72   : > { %399 = vst [vmem:[%s5149_s6 + $0x178] sm:$0xf] %v398_v30  ;;  %v526_v30 = vld [vmem:[%s5145_s5 + $0x4f0] sm:$0xf] }
  0x73   : > { %401 = vst [vmem:[%s5149_s6 + $0x17c] sm:$0xf] %v400_v31  ;;  %v528_v31 = vld [vmem:[%s5145_s5 + $0x4f8] sm:$0xf] }
  0x74   : > { %403 = vst [vmem:[%s5149_s6 + $0x180] sm:$0xf] %v402_v32  ;;  %v530_v32 = vld [vmem:[%s5145_s5 + $0x500] sm:$0xf] }
  0x75   : > { %405 = vst [vmem:[%s5149_s6 + $0x184] sm:$0xf] %v404_v33  ;;  %v532_v33 = vld [vmem:[%s5145_s5 + $0x508] sm:$0xf] }
  0x76   : > { %407 = vst [vmem:[%s5149_s6 + $0x188] sm:$0xf] %v406_v34  ;;  %v534_v34 = vld [vmem:[%s5145_s5 + $0x510] sm:$0xf] }
  0x77   : > { %409 = vst [vmem:[%s5149_s6 + $0x18c] sm:$0xf] %v408_v35  ;;  %v536_v35 = vld [vmem:[%s5145_s5 + $0x518] sm:$0xf] }
  0x78   : > { %411 = vst [vmem:[%s5149_s6 + $0x190] sm:$0xf] %v410_v36  ;;  %v538_v36 = vld [vmem:[%s5145_s5 + $0x520] sm:$0xf] }
  0x79   : > { %413 = vst [vmem:[%s5149_s6 + $0x194] sm:$0xf] %v412_v37  ;;  %v540_v37 = vld [vmem:[%s5145_s5 + $0x528] sm:$0xf] }
  0x7a   : > { %415 = vst [vmem:[%s5149_s6 + $0x198] sm:$0xf] %v414_v38  ;;  %v542_v38 = vld [vmem:[%s5145_s5 + $0x530] sm:$0xf] }
  0x7b   : > { %417 = vst [vmem:[%s5149_s6 + $0x19c] sm:$0xf] %v416_v39  ;;  %v544_v39 = vld [vmem:[%s5145_s5 + $0x538] sm:$0xf] }
  0x7c   : > { %419 = vst [vmem:[%s5149_s6 + $0x1a0] sm:$0xf] %v418_v40  ;;  %v546_v40 = vld [vmem:[%s5145_s5 + $0x540] sm:$0xf] }
  0x7d   : > { %421 = vst [vmem:[%s5149_s6 + $0x1a4] sm:$0xf] %v420_v41  ;;  %v548_v41 = vld [vmem:[%s5145_s5 + $0x548] sm:$0xf] }
  0x7e   : > { %423 = vst [vmem:[%s5149_s6 + $0x1a8] sm:$0xf] %v422_v42  ;;  %v550_v42 = vld [vmem:[%s5145_s5 + $0x550] sm:$0xf] }
  0x7f   : > { %425 = vst [vmem:[%s5149_s6 + $0x1ac] sm:$0xf] %v424_v43  ;;  %v552_v43 = vld [vmem:[%s5145_s5 + $0x558] sm:$0xf] }
  0x80   : > { %427 = vst [vmem:[%s5149_s6 + $0x1b0] sm:$0xf] %v426_v44  ;;  %v554_v44 = vld [vmem:[%s5145_s5 + $0x560] sm:$0xf] }
  0x81   : > { %429 = vst [vmem:[%s5149_s6 + $0x1b4] sm:$0xf] %v428_v45  ;;  %v556_v45 = vld [vmem:[%s5145_s5 + $0x568] sm:$0xf] }
  0x82   : > { %431 = vst [vmem:[%s5149_s6 + $0x1b8] sm:$0xf] %v430_v46  ;;  %v558_v46 = vld [vmem:[%s5145_s5 + $0x570] sm:$0xf] }
  0x83   : > { %433 = vst [vmem:[%s5149_s6 + $0x1bc] sm:$0xf] %v432_v47  ;;  %v560_v47 = vld [vmem:[%s5145_s5 + $0x578] sm:$0xf] }
  0x84   : > { %435 = vst [vmem:[%s5149_s6 + $0x1c0] sm:$0xf] %v434_v48  ;;  %v562_v48 = vld [vmem:[%s5145_s5 + $0x580] sm:$0xf] }
  0x85   : > { %437 = vst [vmem:[%s5149_s6 + $0x1c4] sm:$0xf] %v436_v49  ;;  %v564_v49 = vld [vmem:[%s5145_s5 + $0x588] sm:$0xf] }
  0x86   : > { %439 = vst [vmem:[%s5149_s6 + $0x1c8] sm:$0xf] %v438_v50  ;;  %v566_v50 = vld [vmem:[%s5145_s5 + $0x590] sm:$0xf] }
  0x87   : > { %441 = vst [vmem:[%s5149_s6 + $0x1cc] sm:$0xf] %v440_v51  ;;  %v568_v51 = vld [vmem:[%s5145_s5 + $0x598] sm:$0xf] }
  0x88   : > { %443 = vst [vmem:[%s5149_s6 + $0x1d0] sm:$0xf] %v442_v52  ;;  %v570_v52 = vld [vmem:[%s5145_s5 + $0x5a0] sm:$0xf] }
  0x89   : > { %445 = vst [vmem:[%s5149_s6 + $0x1d4] sm:$0xf] %v444_v53  ;;  %v572_v53 = vld [vmem:[%s5145_s5 + $0x5a8] sm:$0xf] }
  0x8a   : > { %447 = vst [vmem:[%s5149_s6 + $0x1d8] sm:$0xf] %v446_v54  ;;  %v574_v54 = vld [vmem:[%s5145_s5 + $0x5b0] sm:$0xf] }
  0x8b   : > { %449 = vst [vmem:[%s5149_s6 + $0x1dc] sm:$0xf] %v448_v55  ;;  %v576_v55 = vld [vmem:[%s5145_s5 + $0x5b8] sm:$0xf] }
  0x8c   : > { %451 = vst [vmem:[%s5149_s6 + $0x1e0] sm:$0xf] %v450_v56  ;;  %v578_v56 = vld [vmem:[%s5145_s5 + $0x5c0] sm:$0xf] }
  0x8d   : > { %453 = vst [vmem:[%s5149_s6 + $0x1e4] sm:$0xf] %v452_v57  ;;  %v580_v57 = vld [vmem:[%s5145_s5 + $0x5c8] sm:$0xf] }
  0x8e   : > { %455 = vst [vmem:[%s5149_s6 + $0x1e8] sm:$0xf] %v454_v58  ;;  %v582_v58 = vld [vmem:[%s5145_s5 + $0x5d0] sm:$0xf] }
  0x8f   : > { %457 = vst [vmem:[%s5149_s6 + $0x1ec] sm:$0xf] %v456_v59  ;;  %v584_v59 = vld [vmem:[%s5145_s5 + $0x5d8] sm:$0xf] }
  0x90   : > { %459 = vst [vmem:[%s5149_s6 + $0x1f0] sm:$0xf] %v458_v60  ;;  %v586_v60 = vld [vmem:[%s5145_s5 + $0x5e0] sm:$0xf] }
  0x91   : > { %461 = vst [vmem:[%s5149_s6 + $0x1f4] sm:$0xf] %v460_v61  ;;  %v588_v61 = vld [vmem:[%s5145_s5 + $0x5e8] sm:$0xf] }
  0x92   : > { %463 = vst [vmem:[%s5149_s6 + $0x1f8] sm:$0xf] %v462_v62  ;;  %v590_v62 = vld [vmem:[%s5145_s5 + $0x5f0] sm:$0xf] }
  0x93   : > { %465 = vst [vmem:[%s5149_s6 + $0x1fc] sm:$0xf] %v464_v63  ;;  %v592_v63 = vld [vmem:[%s5145_s5 + $0x5f8] sm:$0xf] }
  0x94   : > { %467 = vst [vmem:[%s5149_s6 + $0x200] sm:$0xf] %v466_v0  ;;  %v594_v0 = vld [vmem:[%s5145_s5 + $0x600] sm:$0xf] }
  0x95   : > { %469 = vst [vmem:[%s5149_s6 + $0x204] sm:$0xf] %v468_v1  ;;  %v596_v1 = vld [vmem:[%s5145_s5 + $0x608] sm:$0xf] }
  0x96   : > { %471 = vst [vmem:[%s5149_s6 + $0x208] sm:$0xf] %v470_v2  ;;  %v598_v2 = vld [vmem:[%s5145_s5 + $0x610] sm:$0xf] }
  0x97   : > { %473 = vst [vmem:[%s5149_s6 + $0x20c] sm:$0xf] %v472_v3  ;;  %v600_v3 = vld [vmem:[%s5145_s5 + $0x618] sm:$0xf] }
  0x98   : > { %475 = vst [vmem:[%s5149_s6 + $0x210] sm:$0xf] %v474_v4  ;;  %v602_v4 = vld [vmem:[%s5145_s5 + $0x620] sm:$0xf] }
  0x99   : > { %477 = vst [vmem:[%s5149_s6 + $0x214] sm:$0xf] %v476_v5  ;;  %v604_v5 = vld [vmem:[%s5145_s5 + $0x628] sm:$0xf] }
  0x9a   : > { %479 = vst [vmem:[%s5149_s6 + $0x218] sm:$0xf] %v478_v6  ;;  %v606_v6 = vld [vmem:[%s5145_s5 + $0x630] sm:$0xf] }
  0x9b   : > { %481 = vst [vmem:[%s5149_s6 + $0x21c] sm:$0xf] %v480_v7  ;;  %v608_v7 = vld [vmem:[%s5145_s5 + $0x638] sm:$0xf] }
  0x9c   : > { %483 = vst [vmem:[%s5149_s6 + $0x220] sm:$0xf] %v482_v8  ;;  %v610_v8 = vld [vmem:[%s5145_s5 + $0x640] sm:$0xf] }
  0x9d   : > { %485 = vst [vmem:[%s5149_s6 + $0x224] sm:$0xf] %v484_v9  ;;  %v612_v9 = vld [vmem:[%s5145_s5 + $0x648] sm:$0xf] }
  0x9e   : > { %487 = vst [vmem:[%s5149_s6 + $0x228] sm:$0xf] %v486_v10  ;;  %v614_v10 = vld [vmem:[%s5145_s5 + $0x650] sm:$0xf] }
  0x9f   : > { %489 = vst [vmem:[%s5149_s6 + $0x22c] sm:$0xf] %v488_v11  ;;  %v616_v11 = vld [vmem:[%s5145_s5 + $0x658] sm:$0xf] }
  0xa0   : > { %491 = vst [vmem:[%s5149_s6 + $0x230] sm:$0xf] %v490_v12  ;;  %v618_v12 = vld [vmem:[%s5145_s5 + $0x660] sm:$0xf] }
  0xa1   : > { %493 = vst [vmem:[%s5149_s6 + $0x234] sm:$0xf] %v492_v13  ;;  %v620_v13 = vld [vmem:[%s5145_s5 + $0x668] sm:$0xf] }
  0xa2   : > { %495 = vst [vmem:[%s5149_s6 + $0x238] sm:$0xf] %v494_v14  ;;  %v622_v14 = vld [vmem:[%s5145_s5 + $0x670] sm:$0xf] }
  0xa3   : > { %497 = vst [vmem:[%s5149_s6 + $0x23c] sm:$0xf] %v496_v15  ;;  %v624_v15 = vld [vmem:[%s5145_s5 + $0x678] sm:$0xf] }
  0xa4   : > { %499 = vst [vmem:[%s5149_s6 + $0x240] sm:$0xf] %v498_v16  ;;  %v626_v16 = vld [vmem:[%s5145_s5 + $0x680] sm:$0xf] }
  0xa5   : > { %501 = vst [vmem:[%s5149_s6 + $0x244] sm:$0xf] %v500_v17  ;;  %v628_v17 = vld [vmem:[%s5145_s5 + $0x688] sm:$0xf] }
  0xa6   : > { %503 = vst [vmem:[%s5149_s6 + $0x248] sm:$0xf] %v502_v18  ;;  %v630_v18 = vld [vmem:[%s5145_s5 + $0x690] sm:$0xf] }
  0xa7   : > { %505 = vst [vmem:[%s5149_s6 + $0x24c] sm:$0xf] %v504_v19  ;;  %v632_v19 = vld [vmem:[%s5145_s5 + $0x698] sm:$0xf] }
  0xa8   : > { %507 = vst [vmem:[%s5149_s6 + $0x250] sm:$0xf] %v506_v20  ;;  %v634_v20 = vld [vmem:[%s5145_s5 + $0x6a0] sm:$0xf] }
  0xa9   : > { %509 = vst [vmem:[%s5149_s6 + $0x254] sm:$0xf] %v508_v21  ;;  %v636_v21 = vld [vmem:[%s5145_s5 + $0x6a8] sm:$0xf] }
  0xaa   : > { %511 = vst [vmem:[%s5149_s6 + $0x258] sm:$0xf] %v510_v22  ;;  %v638_v22 = vld [vmem:[%s5145_s5 + $0x6b0] sm:$0xf] }
  0xab   : > { %513 = vst [vmem:[%s5149_s6 + $0x25c] sm:$0xf] %v512_v23  ;;  %v640_v23 = vld [vmem:[%s5145_s5 + $0x6b8] sm:$0xf] }
  0xac   : > { %515 = vst [vmem:[%s5149_s6 + $0x260] sm:$0xf] %v514_v24  ;;  %v642_v24 = vld [vmem:[%s5145_s5 + $0x6c0] sm:$0xf] }
  0xad   : > { %517 = vst [vmem:[%s5149_s6 + $0x264] sm:$0xf] %v516_v25  ;;  %v644_v25 = vld [vmem:[%s5145_s5 + $0x6c8] sm:$0xf] }
  0xae   : > { %519 = vst [vmem:[%s5149_s6 + $0x268] sm:$0xf] %v518_v26  ;;  %v646_v26 = vld [vmem:[%s5145_s5 + $0x6d0] sm:$0xf] }
  0xaf   : > { %521 = vst [vmem:[%s5149_s6 + $0x26c] sm:$0xf] %v520_v27  ;;  %v648_v27 = vld [vmem:[%s5145_s5 + $0x6d8] sm:$0xf] }
  0xb0   : > { %523 = vst [vmem:[%s5149_s6 + $0x270] sm:$0xf] %v522_v28  ;;  %v650_v28 = vld [vmem:[%s5145_s5 + $0x6e0] sm:$0xf] }
  0xb1   : > { %525 = vst [vmem:[%s5149_s6 + $0x274] sm:$0xf] %v524_v29  ;;  %v652_v29 = vld [vmem:[%s5145_s5 + $0x6e8] sm:$0xf] }
  0xb2   : > { %527 = vst [vmem:[%s5149_s6 + $0x278] sm:$0xf] %v526_v30  ;;  %v654_v30 = vld [vmem:[%s5145_s5 + $0x6f0] sm:$0xf] }
  0xb3   : > { %529 = vst [vmem:[%s5149_s6 + $0x27c] sm:$0xf] %v528_v31  ;;  %v656_v31 = vld [vmem:[%s5145_s5 + $0x6f8] sm:$0xf] }
  0xb4   : > { %531 = vst [vmem:[%s5149_s6 + $0x280] sm:$0xf] %v530_v32  ;;  %v658_v32 = vld [vmem:[%s5145_s5 + $0x700] sm:$0xf] }
  0xb5   : > { %533 = vst [vmem:[%s5149_s6 + $0x284] sm:$0xf] %v532_v33  ;;  %v660_v33 = vld [vmem:[%s5145_s5 + $0x708] sm:$0xf] }
  0xb6   : > { %535 = vst [vmem:[%s5149_s6 + $0x288] sm:$0xf] %v534_v34  ;;  %v662_v34 = vld [vmem:[%s5145_s5 + $0x710] sm:$0xf] }
  0xb7   : > { %537 = vst [vmem:[%s5149_s6 + $0x28c] sm:$0xf] %v536_v35  ;;  %v664_v35 = vld [vmem:[%s5145_s5 + $0x718] sm:$0xf] }
  0xb8   : > { %539 = vst [vmem:[%s5149_s6 + $0x290] sm:$0xf] %v538_v36  ;;  %v666_v36 = vld [vmem:[%s5145_s5 + $0x720] sm:$0xf] }
  0xb9   : > { %541 = vst [vmem:[%s5149_s6 + $0x294] sm:$0xf] %v540_v37  ;;  %v668_v37 = vld [vmem:[%s5145_s5 + $0x728] sm:$0xf] }
  0xba   : > { %543 = vst [vmem:[%s5149_s6 + $0x298] sm:$0xf] %v542_v38  ;;  %v670_v38 = vld [vmem:[%s5145_s5 + $0x730] sm:$0xf] }
  0xbb   : > { %545 = vst [vmem:[%s5149_s6 + $0x29c] sm:$0xf] %v544_v39  ;;  %v672_v39 = vld [vmem:[%s5145_s5 + $0x738] sm:$0xf] }
  0xbc   : > { %547 = vst [vmem:[%s5149_s6 + $0x2a0] sm:$0xf] %v546_v40  ;;  %v674_v40 = vld [vmem:[%s5145_s5 + $0x740] sm:$0xf] }
  0xbd   : > { %549 = vst [vmem:[%s5149_s6 + $0x2a4] sm:$0xf] %v548_v41  ;;  %v676_v41 = vld [vmem:[%s5145_s5 + $0x748] sm:$0xf] }
  0xbe   : > { %551 = vst [vmem:[%s5149_s6 + $0x2a8] sm:$0xf] %v550_v42  ;;  %v678_v42 = vld [vmem:[%s5145_s5 + $0x750] sm:$0xf] }
  0xbf   : > { %553 = vst [vmem:[%s5149_s6 + $0x2ac] sm:$0xf] %v552_v43  ;;  %v680_v43 = vld [vmem:[%s5145_s5 + $0x758] sm:$0xf] }
  0xc0   : > { %555 = vst [vmem:[%s5149_s6 + $0x2b0] sm:$0xf] %v554_v44  ;;  %v682_v44 = vld [vmem:[%s5145_s5 + $0x760] sm:$0xf] }
  0xc1   : > { %557 = vst [vmem:[%s5149_s6 + $0x2b4] sm:$0xf] %v556_v45  ;;  %v684_v45 = vld [vmem:[%s5145_s5 + $0x768] sm:$0xf] }
  0xc2   : > { %559 = vst [vmem:[%s5149_s6 + $0x2b8] sm:$0xf] %v558_v46  ;;  %v686_v46 = vld [vmem:[%s5145_s5 + $0x770] sm:$0xf] }
  0xc3   : > { %561 = vst [vmem:[%s5149_s6 + $0x2bc] sm:$0xf] %v560_v47  ;;  %v688_v47 = vld [vmem:[%s5145_s5 + $0x778] sm:$0xf] }
  0xc4   : > { %563 = vst [vmem:[%s5149_s6 + $0x2c0] sm:$0xf] %v562_v48  ;;  %v690_v48 = vld [vmem:[%s5145_s5 + $0x780] sm:$0xf] }
  0xc5   : > { %565 = vst [vmem:[%s5149_s6 + $0x2c4] sm:$0xf] %v564_v49  ;;  %v692_v49 = vld [vmem:[%s5145_s5 + $0x788] sm:$0xf] }
  0xc6   : > { %567 = vst [vmem:[%s5149_s6 + $0x2c8] sm:$0xf] %v566_v50  ;;  %v694_v50 = vld [vmem:[%s5145_s5 + $0x790] sm:$0xf] }
  0xc7   : > { %569 = vst [vmem:[%s5149_s6 + $0x2cc] sm:$0xf] %v568_v51  ;;  %v696_v51 = vld [vmem:[%s5145_s5 + $0x798] sm:$0xf] }
  0xc8   : > { %571 = vst [vmem:[%s5149_s6 + $0x2d0] sm:$0xf] %v570_v52  ;;  %v698_v52 = vld [vmem:[%s5145_s5 + $0x7a0] sm:$0xf] }
  0xc9   : > { %573 = vst [vmem:[%s5149_s6 + $0x2d4] sm:$0xf] %v572_v53  ;;  %v700_v53 = vld [vmem:[%s5145_s5 + $0x7a8] sm:$0xf] }
  0xca   : > { %575 = vst [vmem:[%s5149_s6 + $0x2d8] sm:$0xf] %v574_v54  ;;  %v702_v54 = vld [vmem:[%s5145_s5 + $0x7b0] sm:$0xf] }
  0xcb   : > { %577 = vst [vmem:[%s5149_s6 + $0x2dc] sm:$0xf] %v576_v55  ;;  %v704_v55 = vld [vmem:[%s5145_s5 + $0x7b8] sm:$0xf] }
  0xcc   : > { %579 = vst [vmem:[%s5149_s6 + $0x2e0] sm:$0xf] %v578_v56  ;;  %v706_v56 = vld [vmem:[%s5145_s5 + $0x7c0] sm:$0xf] }
  0xcd   : > { %581 = vst [vmem:[%s5149_s6 + $0x2e4] sm:$0xf] %v580_v57  ;;  %v708_v57 = vld [vmem:[%s5145_s5 + $0x7c8] sm:$0xf] }
  0xce   : > { %583 = vst [vmem:[%s5149_s6 + $0x2e8] sm:$0xf] %v582_v58  ;;  %v710_v58 = vld [vmem:[%s5145_s5 + $0x7d0] sm:$0xf] }
  0xcf   : > { %585 = vst [vmem:[%s5149_s6 + $0x2ec] sm:$0xf] %v584_v59  ;;  %v712_v59 = vld [vmem:[%s5145_s5 + $0x7d8] sm:$0xf] }
  0xd0   : > { %587 = vst [vmem:[%s5149_s6 + $0x2f0] sm:$0xf] %v586_v60  ;;  %v714_v60 = vld [vmem:[%s5145_s5 + $0x7e0] sm:$0xf] }
  0xd1   : > { %589 = vst [vmem:[%s5149_s6 + $0x2f4] sm:$0xf] %v588_v61  ;;  %v716_v61 = vld [vmem:[%s5145_s5 + $0x7e8] sm:$0xf] }
  0xd2   : > { %591 = vst [vmem:[%s5149_s6 + $0x2f8] sm:$0xf] %v590_v62  ;;  %v718_v62 = vld [vmem:[%s5145_s5 + $0x7f0] sm:$0xf] }
  0xd3   : > { %593 = vst [vmem:[%s5149_s6 + $0x2fc] sm:$0xf] %v592_v63  ;;  %v720_v63 = vld [vmem:[%s5145_s5 + $0x7f8] sm:$0xf] }
  0xd4   : > { %595 = vst [vmem:[%s5149_s6 + $0x300] sm:$0xf] %v594_v0 }
  0xd5   : > { %597 = vst [vmem:[%s5149_s6 + $0x304] sm:$0xf] %v596_v1 }
  0xd6   : > { %599 = vst [vmem:[%s5149_s6 + $0x308] sm:$0xf] %v598_v2 }
  0xd7   : > { %601 = vst [vmem:[%s5149_s6 + $0x30c] sm:$0xf] %v600_v3 }
  0xd8   : > { %603 = vst [vmem:[%s5149_s6 + $0x310] sm:$0xf] %v602_v4 }
  0xd9   : > { %605 = vst [vmem:[%s5149_s6 + $0x314] sm:$0xf] %v604_v5 }
  0xda   : > { %607 = vst [vmem:[%s5149_s6 + $0x318] sm:$0xf] %v606_v6 }
  0xdb   : > { %609 = vst [vmem:[%s5149_s6 + $0x31c] sm:$0xf] %v608_v7 }
  0xdc   : > { %611 = vst [vmem:[%s5149_s6 + $0x320] sm:$0xf] %v610_v8 }
  0xdd   : > { %613 = vst [vmem:[%s5149_s6 + $0x324] sm:$0xf] %v612_v9 }
  0xde   : > { %615 = vst [vmem:[%s5149_s6 + $0x328] sm:$0xf] %v614_v10 }
  0xdf   : > { %617 = vst [vmem:[%s5149_s6 + $0x32c] sm:$0xf] %v616_v11 }
  0xe0   : > { %619 = vst [vmem:[%s5149_s6 + $0x330] sm:$0xf] %v618_v12 }
  0xe1   : > { %621 = vst [vmem:[%s5149_s6 + $0x334] sm:$0xf] %v620_v13 }
  0xe2   : > { %623 = vst [vmem:[%s5149_s6 + $0x338] sm:$0xf] %v622_v14 }
  0xe3   : > { %625 = vst [vmem:[%s5149_s6 + $0x33c] sm:$0xf] %v624_v15 }
  0xe4   : > { %627 = vst [vmem:[%s5149_s6 + $0x340] sm:$0xf] %v626_v16 }
  0xe5   : > { %629 = vst [vmem:[%s5149_s6 + $0x344] sm:$0xf] %v628_v17 }
  0xe6   : > { %631 = vst [vmem:[%s5149_s6 + $0x348] sm:$0xf] %v630_v18 }
  0xe7   : > { %633 = vst [vmem:[%s5149_s6 + $0x34c] sm:$0xf] %v632_v19 }
  0xe8   : > { %635 = vst [vmem:[%s5149_s6 + $0x350] sm:$0xf] %v634_v20 }
  0xe9   : > { %637 = vst [vmem:[%s5149_s6 + $0x354] sm:$0xf] %v636_v21 }
  0xea   : > { %639 = vst [vmem:[%s5149_s6 + $0x358] sm:$0xf] %v638_v22 }
  0xeb   : > { %641 = vst [vmem:[%s5149_s6 + $0x35c] sm:$0xf] %v640_v23 }
  0xec   : > { %643 = vst [vmem:[%s5149_s6 + $0x360] sm:$0xf] %v642_v24 }
  0xed   : > { %645 = vst [vmem:[%s5149_s6 + $0x364] sm:$0xf] %v644_v25 }
  0xee   : > { %647 = vst [vmem:[%s5149_s6 + $0x368] sm:$0xf] %v646_v26 }
  0xef   : > { %649 = vst [vmem:[%s5149_s6 + $0x36c] sm:$0xf] %v648_v27 }
  0xf0   : > { %651 = vst [vmem:[%s5149_s6 + $0x370] sm:$0xf] %v650_v28 }
  0xf1   : > { %653 = vst [vmem:[%s5149_s6 + $0x374] sm:$0xf] %v652_v29 }
  0xf2   : > { %655 = vst [vmem:[%s5149_s6 + $0x378] sm:$0xf] %v654_v30 }
  0xf3   : > { %657 = vst [vmem:[%s5149_s6 + $0x37c] sm:$0xf] %v656_v31 }
  0xf4   : > { %659 = vst [vmem:[%s5149_s6 + $0x380] sm:$0xf] %v658_v32 }
  0xf5   : > { %661 = vst [vmem:[%s5149_s6 + $0x384] sm:$0xf] %v660_v33 }
  0xf6   : > { %663 = vst [vmem:[%s5149_s6 + $0x388] sm:$0xf] %v662_v34 }
  0xf7   : > { %665 = vst [vmem:[%s5149_s6 + $0x38c] sm:$0xf] %v664_v35 }
  0xf8   : > { %667 = vst [vmem:[%s5149_s6 + $0x390] sm:$0xf] %v666_v36 }
  0xf9   : > { %669 = vst [vmem:[%s5149_s6 + $0x394] sm:$0xf] %v668_v37 }
  0xfa   : > { %671 = vst [vmem:[%s5149_s6 + $0x398] sm:$0xf] %v670_v38 }
  0xfb   : > { %673 = vst [vmem:[%s5149_s6 + $0x39c] sm:$0xf] %v672_v39 }
  0xfc   : > { %675 = vst [vmem:[%s5149_s6 + $0x3a0] sm:$0xf] %v674_v40 }
  0xfd   : > { %677 = vst [vmem:[%s5149_s6 + $0x3a4] sm:$0xf] %v676_v41 }
  0xfe   : > { %679 = vst [vmem:[%s5149_s6 + $0x3a8] sm:$0xf] %v678_v42 }
  0xff   : > { %681 = vst [vmem:[%s5149_s6 + $0x3ac] sm:$0xf] %v680_v43 }
 0x100   : > { %683 = vst [vmem:[%s5149_s6 + $0x3b0] sm:$0xf] %v682_v44 }
 0x101   : > { %685 = vst [vmem:[%s5149_s6 + $0x3b4] sm:$0xf] %v684_v45 }
 0x102   : > { %687 = vst [vmem:[%s5149_s6 + $0x3b8] sm:$0xf] %v686_v46 }
 0x103   : > { %689 = vst [vmem:[%s5149_s6 + $0x3bc] sm:$0xf] %v688_v47 }
 0x104   : > { %691 = vst [vmem:[%s5149_s6 + $0x3c0] sm:$0xf] %v690_v48 }
 0x105   : > { %693 = vst [vmem:[%s5149_s6 + $0x3c4] sm:$0xf] %v692_v49 }
 0x106   : > { %695 = vst [vmem:[%s5149_s6 + $0x3c8] sm:$0xf] %v694_v50 }
 0x107   : > { %697 = vst [vmem:[%s5149_s6 + $0x3cc] sm:$0xf] %v696_v51 }
 0x108   : > { %699 = vst [vmem:[%s5149_s6 + $0x3d0] sm:$0xf] %v698_v52 }
 0x109   : > { %701 = vst [vmem:[%s5149_s6 + $0x3d4] sm:$0xf] %v700_v53 }
 0x10a   : > { %703 = vst [vmem:[%s5149_s6 + $0x3d8] sm:$0xf] %v702_v54 }
 0x10b   : > { %705 = vst [vmem:[%s5149_s6 + $0x3dc] sm:$0xf] %v704_v55 }
 0x10c   : > { %707 = vst [vmem:[%s5149_s6 + $0x3e0] sm:$0xf] %v706_v56 }
 0x10d   : > { %709 = vst [vmem:[%s5149_s6 + $0x3e4] sm:$0xf] %v708_v57 }
 0x10e   : > { %711 = vst [vmem:[%s5149_s6 + $0x3e8] sm:$0xf] %v710_v58 }
 0x10f   : > { %713 = vst [vmem:[%s5149_s6 + $0x3ec] sm:$0xf] %v712_v59 }
 0x110   : > { %715 = vst [vmem:[%s5149_s6 + $0x3f0] sm:$0xf] %v714_v60 }
 0x111   : > { %717 = vst [vmem:[%s5149_s6 + $0x3f4] sm:$0xf] %v716_v61 }
 0x112   : > { %719 = vst [vmem:[%s5149_s6 + $0x3f8] sm:$0xf] %v718_v62 }
 0x113   : > { %721 = vst [vmem:[%s5149_s6 + $0x3fc] sm:$0xf] %v720_v63 }
 0x114 PF: > { %p4171_p8 = scmp.ge.s32.totalorder %s5070_s19, 1  ;;  %p2318_p9 = scmp.lt.s32.totalorder %s5070_s19, 3 }
 0x116   : > { %p2319_p10 = pnand %p4171_p8, %p2318_p9 }
 0x117   : > { %s2325_s7 = sand.u32 (!%p2319_p10), 1, %s5054_s15   ;;  %p2367_p11 = scmp.lt.s32.totalorder (!%p2319_p10), %s5062_s17, 1 }
 0x118   : > { %2322 = sbr.rel (%p2319_p10) target bundleno = 661 (0x295), region = 84  ;;  %s4172_s8 = sshll.u32 (!%p2319_p10), %s2325_s7, 10 }
 0x119   : > { %s5666_s9 = scalar_lea.vmem (!%p2319_p10), [#allocation3], %s4172_s8  ;;  %s4173_s23 = sshll.u32 (!%p2319_p10), %s2325_s7, 4 }
 0x11a   : > { %s2359_s26 = scalar_lea.vmem (!%p2319_p10), [#allocation4], %s4173_s23 }
 0x11d   : > { %v4857_v0 = vld [vmem:[%s5666_s9 + $0x38] sm:$0xff]  ;;  %v4856_v4 = vld [vmem:[%s5666_s9 + $0x30] sm:$0xff]  ;;  %v4855_v8 = vld [vmem:[%s5666_s9 + $0x28] sm:$0xff]  ;;  %s5990_s6 = scalar_select %p2367_p11, %s5062_s17, 1 }
 0x11e   : > { %v4865_v1 = vld [vmem:[%s5666_s9 + $0x78] sm:$0xff]  ;;  %3601 = vmatpush.bf16.msra.mxu0 %v4857_v0  ;;  %v4864_v5 = vld [vmem:[%s5666_s9 + $0x70] sm:$0xff]  ;;  %v4863_v9 = vld [vmem:[%s5666_s9 + $0x68] sm:$0xff]  ;;  %s4815_s15 = sshll.u32 (%p5132_p6), %s5062_s17, 2 }
 0x11f   : > { %v4873_v2 = vld [vmem:[%s5666_s9 + $0xb8] sm:$0xff]  ;;  %3620 = vmatpush.bf16.msra.mxu1 %v4865_v1  ;;  %v4872_v6 = vld [vmem:[%s5666_s9 + $0xb0] sm:$0xff]  ;;  %v4871_v10 = vld [vmem:[%s5666_s9 + $0xa8] sm:$0xff]  ;;  %s2372_s11 = scalar_lea.vmem %s6031_s3, %s5990_s6  ;;  %s2369_s14 = scalar_lea.vmem %s6030_s2, %s5990_s6 }
 0x120   : > { %v4881_v3 = vld [vmem:[%s5666_s9 + $0xf8] sm:$0xff]  ;;  %3639 = vmatpush.bf16.msra.mxu2 %v4873_v2  ;;  %v4880_v7 = vld [vmem:[%s5666_s9 + $0xf0] sm:$0xff]  ;;  %v4879_v11 = vld [vmem:[%s5666_s9 + $0xe8] sm:$0xff]  ;;  %s4002_s27 = scalar_lea.vmem (%p5132_p6), %s6032_s4, %s4815_s15 }
 0x121   : > { %3658 = vmatpush.bf16.msra.mxu3 %v4881_v3  ;;  %v4854_v12 = vld [vmem:[%s5666_s9 + $0x20] sm:$0xff]  ;;  %v4853_v16 = vld [vmem:[%s5666_s9 + $0x18] sm:$0xff]  ;;  %v4852_v20 = vld [vmem:[%s5666_s9 + $0x10] sm:$0xff] }
 0x122   : > { %3602 = vmatpush.bf16.msra.mxu0 %v4856_v4  ;;  %v4862_v13 = vld [vmem:[%s5666_s9 + $0x60] sm:$0xff]  ;;  %v4861_v17 = vld [vmem:[%s5666_s9 + $0x58] sm:$0xff]  ;;  %v4860_v21 = vld [vmem:[%s5666_s9 + $0x50] sm:$0xff] }
 0x123   : > { %3621 = vmatpush.bf16.msra.mxu1 %v4864_v5  ;;  %v4870_v14 = vld [vmem:[%s5666_s9 + $0xa0] sm:$0xff]  ;;  %v4869_v18 = vld [vmem:[%s5666_s9 + $0x98] sm:$0xff]  ;;  %v4868_v22 = vld [vmem:[%s5666_s9 + $0x90] sm:$0xff] }
 0x124   : > { %3640 = vmatpush.bf16.msra.mxu2 %v4872_v6  ;;  %v4878_v15 = vld [vmem:[%s5666_s9 + $0xe0] sm:$0xff]  ;;  %v4877_v19 = vld [vmem:[%s5666_s9 + $0xd8] sm:$0xff]  ;;  %v4876_v23 = vld [vmem:[%s5666_s9 + $0xd0] sm:$0xff] }
 0x125   : > { %3659 = vmatpush.bf16.msra.mxu3 %v4880_v7  ;;  %v4851_v24 = vld [vmem:[%s5666_s9 + $0x8] sm:$0xff]  ;;  %v4850_v28 = vld [vmem:[%s5666_s9] sm:$0xff]  ;;  %v4905_v40 = vld [vmem:[%s5666_s9 + $0x1b8] sm:$0xff] }
 0x126   : > { %3603 = vmatpush.bf16.msra.mxu0 %v4855_v8  ;;  %v4859_v25 = vld [vmem:[%s5666_s9 + $0x48] sm:$0xff]  ;;  %v4176_v29 = vld [vmem:[%s6028_s0] sm:$0xf]  ;;  %v4818_v34 = vld [vmem:[%s6028_s0 + $0x4] sm:$0xf] }
 0x127   : > { %3622 = vmatpush.bf16.msra.mxu1 %v4863_v9  ;;  %v4867_v26 = vld [vmem:[%s5666_s9 + $0x88] sm:$0xff]  ;;  %v4826_v30 = vld [vmem:[%s6028_s0 + $0x3c] sm:$0xf0]  ;;  %v4178_v35 = vld [vmem:[%s6028_s0 + $0x40] sm:$0xf0] }
 0x128   : > { %3641 = vmatpush.bf16.msra.mxu2 %v4871_v10  ;;  %v4875_v27 = vld [vmem:[%s5666_s9 + $0xc8] sm:$0xff]  ;;  %v4858_v31 = vld [vmem:[%s5666_s9 + $0x40] sm:$0xff]  ;;  %v4889_v41 = vld [vmem:[%s5666_s9 + $0x138] sm:$0xff]  ;;  %v4177_v42 = vor.u32 %v4826_v30, %v4176_v29  ;;  %v4181_v43 = vor.u32 %v4818_v34, %v4178_v35 }
 0x129   : > { %3660 = vmatpush.bf16.msra.mxu3 %v4879_v11  ;;  %v4866_v32 = vld [vmem:[%s5666_s9 + $0x80] sm:$0xff]  ;;  %v4184_v36 = vld [vmem:[%s6028_s0 + $0x8] sm:$0xf]  ;;  %v4819_v38 = vld [vmem:[%s6028_s0 + $0xc] sm:$0xf] }
 0x12a   : > { %3604 = vmatpush.bf16.msra.mxu0 %v4854_v12  ;;  %v4874_v33 = vld [vmem:[%s5666_s9 + $0xc0] sm:$0xff]  ;;  %v4827_v37 = vld [vmem:[%s6028_s0 + $0x44] sm:$0xf0]  ;;  %v4186_v39 = vld [vmem:[%s6028_s0 + $0x48] sm:$0xf0] }
 0x12b   : > { %3623 = vmatpush.bf16.msra.mxu1 %v4862_v13  ;;  %v4185_v44 = vor.u32 %v4827_v37, %v4184_v36  ;;  %v4189_v45 = vor.u32 %v4819_v38, %v4186_v39  ;;  %v4897_v46 = vld [vmem:[%s5666_s9 + $0x178] sm:$0xff]  ;;  %v4904_v48 = vld [vmem:[%s5666_s9 + $0x1b0] sm:$0xff]  ;;  %v4903_v52 = vld [vmem:[%s5666_s9 + $0x1a8] sm:$0xff] }
 0x12c   : > { %3642 = vmatpush.bf16.msra.mxu2 %v4870_v14  ;;  %v4913_v47 = vld [vmem:[%s5666_s9 + $0x1f8] sm:$0xff]  ;;  %v4888_v49 = vld [vmem:[%s5666_s9 + $0x130] sm:$0xff]  ;;  %v4887_v53 = vld [vmem:[%s5666_s9 + $0x128] sm:$0xff] }
 0x12d   : > { %3661 = vmatpush.bf16.msra.mxu3 %v4878_v15  ;;  %v4896_v50 = vld [vmem:[%s5666_s9 + $0x170] sm:$0xff]  ;;  %v4895_v54 = vld [vmem:[%s5666_s9 + $0x168] sm:$0xff]  ;;  %v4902_v56 = vld [vmem:[%s5666_s9 + $0x1a0] sm:$0xff] }
 0x12e   : > { %3605 = vmatpush.bf16.msra.mxu0 %v4853_v16  ;;  %v4912_v51 = vld [vmem:[%s5666_s9 + $0x1f0] sm:$0xff]  ;;  %v4911_v55 = vld [vmem:[%s5666_s9 + $0x1e8] sm:$0xff]  ;;  %v4886_v57 = vld [vmem:[%s5666_s9 + $0x120] sm:$0xff] }
 0x12f   : > { %3624 = vmatpush.bf16.msra.mxu1 %v4861_v17  ;;  %v4894_v58 = vld [vmem:[%s5666_s9 + $0x160] sm:$0xff]  ;;  %v4248_v0 = vld [vmem:[%s6028_s0 + $0x88] sm:$0xf]  ;;  %v4835_v2 = vld [vmem:[%s6028_s0 + $0x8c] sm:$0xf] }
 0x130   : > { %3643 = vmatpush.bf16.msra.mxu2 %v4869_v18  ;;  %v4910_v59 = vld [vmem:[%s5666_s9 + $0x1e0] sm:$0xff]  ;;  %v4843_v1 = vld [vmem:[%s6028_s0 + $0xc4] sm:$0xf0]  ;;  %v4250_v3 = vld [vmem:[%s6028_s0 + $0xc8] sm:$0xf0] }
 0x131   : > { %3662 = vmatpush.bf16.msra.mxu3 %v4877_v19  ;;  %v4240_v60 = vld [vmem:[%s6028_s0 + $0x80] sm:$0xf]  ;;  %v4834_v62 = vld [vmem:[%s6028_s0 + $0x84] sm:$0xf]  ;;  %v4901_v4 = vld [vmem:[%s5666_s9 + $0x198] sm:$0xff]  ;;  %v4249_v8 = vor.u32 %v4843_v1, %v4248_v0  ;;  %v4253_v9 = vor.u32 %v4835_v2, %v4250_v3 }
 0x132   : > { %3606 = vmatpush.bf16.msra.mxu0 %v4852_v20  ;;  %v4842_v61 = vld [vmem:[%s6028_s0 + $0xbc] sm:$0xf0]  ;;  %v4242_v63 = vld [vmem:[%s6028_s0 + $0xc0] sm:$0xf0]  ;;  %v4885_v5 = vld [vmem:[%s5666_s9 + $0x118] sm:$0xff] }
 0x133   : > { %3625 = vmatpush.bf16.msra.mxu1 %v4860_v21  ;;  %v4241_v6 = vor.u32 %v4842_v61, %v4240_v60  ;;  %v4245_v7 = vor.u32 %v4834_v62, %v4242_v63  ;;  %v4893_v10 = vld [vmem:[%s5666_s9 + $0x158] sm:$0xff]  ;;  %v4900_v12 = vld [vmem:[%s5666_s9 + $0x190] sm:$0xff]  ;;  %v4899_v16 = vld [vmem:[%s5666_s9 + $0x188] sm:$0xff] }
 0x134   : > { %3644 = vmatpush.bf16.msra.mxu2 %v4868_v22  ;;  %v4909_v11 = vld [vmem:[%s5666_s9 + $0x1d8] sm:$0xff]  ;;  %v4884_v13 = vld [vmem:[%s5666_s9 + $0x110] sm:$0xff]  ;;  %v4883_v17 = vld [vmem:[%s5666_s9 + $0x108] sm:$0xff] }
 0x135   : > { %3663 = vmatpush.bf16.msra.mxu3 %v4876_v23  ;;  %v4892_v14 = vld [vmem:[%s5666_s9 + $0x150] sm:$0xff]  ;;  %v4891_v18 = vld [vmem:[%s5666_s9 + $0x148] sm:$0xff]  ;;  %v4898_v20 = vld [vmem:[%s5666_s9 + $0x180] sm:$0xff] }
 0x136   : > { %3607 = vmatpush.bf16.msra.mxu0 %v4851_v24  ;;  %v4908_v15 = vld [vmem:[%s5666_s9 + $0x1d0] sm:$0xff]  ;;  %v4907_v19 = vld [vmem:[%s5666_s9 + $0x1c8] sm:$0xff]  ;;  %v4882_v21 = vld [vmem:[%s5666_s9 + $0x100] sm:$0xff] }
 0x137   : > { %3626 = vmatpush.bf16.msra.mxu1 %v4859_v25  ;;  %v4890_v22 = vld [vmem:[%s5666_s9 + $0x140] sm:$0xff]  ;;  %v4192_v24 = vld [vmem:[%s6028_s0 + $0x10] sm:$0xf]  ;;  %v4937_v25 = vld [vmem:[%s5666_s9 + $0x2b8] sm:$0xff] }
 0x138   : > { %3645 = vmatpush.bf16.msra.mxu2 %v4867_v26  ;;  %v4906_v23 = vld [vmem:[%s5666_s9 + $0x1c0] sm:$0xff]  ;;  %v4921_v26 = vld [vmem:[%s5666_s9 + $0x238] sm:$0xff]  ;;  %v4194_v29 = vld [vmem:[%s6028_s0 + $0x50] sm:$0xf0] }
 0x139   : > { %3664 = vmatpush.bf16.msra.mxu3 %v4875_v27  ;;  %v4828_v27 = vld [vmem:[%s6028_s0 + $0x4c] sm:$0xf0]  ;;  %v4200_v30 = vld [vmem:[%s6028_s0 + $0x18] sm:$0xf]  ;;  %v4266_v61 = vld [vmem:[%s6028_s0 + $0xd8] sm:$0xf0] }
 0x13a   : > { %3608 = vmatpush.bf16.msra.mxu0 %v4850_v28  ;;  %v4820_v28 = vld [vmem:[%s6028_s0 + $0x14] sm:$0xf]  ;;  %v4929_v34 = vld [vmem:[%s5666_s9 + $0x278] sm:$0xff]  ;;  %v4193_v36 = vor.u32 %v4828_v27, %v4192_v24  ;;  %v4210_v24 = vld [vmem:[%s6028_s0 + $0x60] sm:$0xf0] }
 0x13b   : > { %3627 = vmatpush.bf16.msra.mxu1 %v4858_v31  ;;  %v4829_v31 = vld [vmem:[%s6028_s0 + $0x54] sm:$0xf0]  ;;  %v4936_v37 = vld [vmem:[%s5666_s9 + $0x2b0] sm:$0xff]  ;;  %v4197_v38 = vor.u32 %v4820_v28, %v4194_v29  ;;  %v4823_v27 = vld [vmem:[%s6028_s0 + $0x2c] sm:$0xf] }
 0x13c   : > { %3646 = vmatpush.bf16.msra.mxu2 %v4866_v32  ;;  %v4821_v32 = vld [vmem:[%s6028_s0 + $0x1c] sm:$0xf]  ;;  %v4201_v39 = vor.u32 %v4829_v31, %v4200_v30  ;;  %v4932_v1 = vld [vmem:[%s5666_s9 + $0x290] sm:$0xff]  ;;  %v4218_v28 = vld [vmem:[%s6028_s0 + $0x68] sm:$0xf0] }
 0x13d   : > { %3665 = vmatpush.bf16.msra.mxu3 %v4874_v33  ;;  %3609 = vmatmul.bf16.vlgmr.msra.gmra.mxu0 %v4177_v42  ;;  %v4202_v33 = vld [vmem:[%s6028_s0 + $0x58] sm:$0xf0]  ;;  %v4928_v42 = vld [vmem:[%s5666_s9 + $0x270] sm:$0xff] }
 0x13e   : > { %3677 = vmatpush.bf16.msrb.mxu0 %v4889_v41  ;;  %3628 = vmatmul.bf16.vlgmr.msra.gmra.mxu1 %v4181_v43  ;;  %v4945_v35 = vld [vmem:[%s5666_s9 + $0x2f8] sm:$0xff]  ;;  %v4920_v41 = vld [vmem:[%s5666_s9 + $0x230] sm:$0xff] }
 0x13f   : > { %3647 = vmatmul.bf16.vlgmr.msra.gmra.mxu2 %v4185_v44  ;;  %3696 = vmatpush.bf16.msrb.mxu1 %v4897_v46  ;;  %v4944_v43 = vld [vmem:[%s5666_s9 + $0x2f0] sm:$0xff]  ;;  %v4935_v44 = vld [vmem:[%s5666_s9 + $0x2a8] sm:$0xff]  ;;  %v4917_v60 = vld [vmem:[%s5666_s9 + $0x218] sm:$0xff] }
 0x140   : > { %3715 = vmatpush.bf16.msrb.mxu2 %v4905_v40  ;;  %3666 = vmatmul.bf16.vlgmr.msra.gmra.mxu3 %v4189_v45  ;;  %v4205_v40 = vor.u32 %v4821_v32, %v4202_v33  ;;  %v4919_v45 = vld [vmem:[%s5666_s9 + $0x228] sm:$0xff]  ;;  %v4925_v62 = vld [vmem:[%s5666_s9 + $0x258] sm:$0xff]  ;;  %v4960_v30 = vld [vmem:[%s5666_s9 + $0x370] sm:$0xff]  ;;  %v4221_v33 = vor.u32 %v4823_v27, %v4218_v28 }
 0x141   : > { %3734 = vmatpush.bf16.msrb.mxu3 %v4913_v47  ;;  %v4927_v46 = vld [vmem:[%s5666_s9 + $0x268] sm:$0xff]  ;;  %v4941_v63 = vld [vmem:[%s5666_s9 + $0x2d8] sm:$0xff] }
 0x142   : > { %3678 = vmatpush.bf16.msrb.mxu0 %v4888_v49  ;;  %v4943_v47 = vld [vmem:[%s5666_s9 + $0x2e8] sm:$0xff]  ;;  %v4918_v49 = vld [vmem:[%s5666_s9 + $0x220] sm:$0xff]  ;;  %v4298_v27 = vld [vmem:[%s6028_s0 + $0xf8] sm:$0xf0] }
 0x143   : > { %3697 = vmatpush.bf16.msrb.mxu1 %v4896_v50  ;;  %v4926_v50 = vld [vmem:[%s5666_s9 + $0x260] sm:$0xff] }
 0x144   : > { %3716 = vmatpush.bf16.msrb.mxu2 %v4904_v48  ;;  %v4934_v48 = vld [vmem:[%s5666_s9 + $0x2a0] sm:$0xff] }
 0x145   : > { %3735 = vmatpush.bf16.msrb.mxu3 %v4912_v51  ;;  %v4942_v51 = vld [vmem:[%s5666_s9 + $0x2e0] sm:$0xff] }
 0x146   : > { %3679 = vmatpush.bf16.msrb.mxu0 %v4887_v53  ;;  %v4844_v53 = vld [vmem:[%s6028_s0 + $0xcc] sm:$0xf0] }
 0x147   : > { %3698 = vmatpush.bf16.msrb.mxu1 %v4895_v54  ;;  %v4933_v54 = vld [vmem:[%s5666_s9 + $0x298] sm:$0xff] }
 0x148   : > { %3717 = vmatpush.bf16.msrb.mxu2 %v4903_v52  ;;  %v4256_v52 = vld [vmem:[%s6028_s0 + $0x90] sm:$0xf] }
 0x149   : > { %3736 = vmatpush.bf16.msrb.mxu3 %v4911_v55  ;;  %v4836_v55 = vld [vmem:[%s6028_s0 + $0x94] sm:$0xf]  ;;  %v4257_v0 = vor.u32 %v4844_v53, %v4256_v52  ;;  %v4839_v52 = vld [vmem:[%s6028_s0 + $0xac] sm:$0xf]  ;;  %v4949_v53 = vld [vmem:[%s5666_s9 + $0x318] sm:$0xff] }
 0x14a   : > { %3680 = vmatpush.bf16.msrb.mxu0 %v4886_v57  ;;  %v4264_v57 = vld [vmem:[%s6028_s0 + $0x98] sm:$0xf] }
 0x14b   : > { %3699 = vmatpush.bf16.msrb.mxu1 %v4894_v58  ;;  %v4845_v58 = vld [vmem:[%s6028_s0 + $0xd4] sm:$0xf0] }
 0x14c   : > { %3718 = vmatpush.bf16.msrb.mxu2 %v4902_v56  ;;  %v4258_v56 = vld [vmem:[%s6028_s0 + $0xd0] sm:$0xf0]  ;;  %v4265_v3 = vor.u32 %v4845_v58, %v4264_v57 }
 0x14d   : > { %3737 = vmatpush.bf16.msrb.mxu3 %v4910_v59  ;;  %3614 = vmatmul.bf16.gmra.mxu0 %v4241_v6  ;;  %v4837_v59 = vld [vmem:[%s6028_s0 + $0x9c] sm:$0xf]  ;;  %v4261_v2 = vor.u32 %v4836_v55, %v4258_v56  ;;  %v4924_v6 = vld [vmem:[%s5666_s9 + $0x250] sm:$0xff] }
 0x14e   : > { %3681 = vmatpush.bf16.msrb.mxu0 %v4885_v5  ;;  %3633 = vmatmul.bf16.gmra.mxu1 %v4245_v7  ;;  %v4916_v5 = vld [vmem:[%s5666_s9 + $0x210] sm:$0xff]  ;;  %v4973_v55 = vld [vmem:[%s5666_s9 + $0x3d8] sm:$0xff] }
 0x14f   : > { %3652 = vmatmul.bf16.gmra.mxu2 %v4249_v8  ;;  %3700 = vmatpush.bf16.msrb.mxu1 %v4893_v10  ;;  %v4940_v7 = vld [vmem:[%s5666_s9 + $0x2d0] sm:$0xff]  ;;  %v4931_v8 = vld [vmem:[%s5666_s9 + $0x288] sm:$0xff] }
 0x150   : > { %3719 = vmatpush.bf16.msrb.mxu2 %v4901_v4  ;;  %3671 = vmatmul.bf16.gmra.mxu3 %v4253_v9  ;;  %v4269_v4 = vor.u32 %v4837_v59, %v4266_v61  ;;  %v4915_v9 = vld [vmem:[%s5666_s9 + $0x208] sm:$0xff]  ;;  %v4964_v56 = vld [vmem:[%s5666_s9 + $0x390] sm:$0xff] }
 0x151   : > { %3738 = vmatpush.bf16.msrb.mxu3 %v4909_v11  ;;  %v4923_v10 = vld [vmem:[%s5666_s9 + $0x248] sm:$0xff]  ;;  %v4956_v58 = vld [vmem:[%s5666_s9 + $0x350] sm:$0xff] }
 0x152   : > { %3682 = vmatpush.bf16.msrb.mxu0 %v4884_v13  ;;  %v4939_v11 = vld [vmem:[%s5666_s9 + $0x2c8] sm:$0xff]  ;;  %v4969_v13 = vld [vmem:[%s5666_s9 + $0x3b8] sm:$0xff] }
 0x153   : > { %3701 = vmatpush.bf16.msrb.mxu1 %v4892_v14  ;;  %v4914_v14 = vld [vmem:[%s5666_s9 + $0x200] sm:$0xff] }
 0x154   : > { %3720 = vmatpush.bf16.msrb.mxu2 %v4900_v12  ;;  %v4930_v12 = vld [vmem:[%s5666_s9 + $0x280] sm:$0xff] }
 0x155   : > { %3739 = vmatpush.bf16.msrb.mxu3 %v4908_v15  ;;  %v4922_v15 = vld [vmem:[%s5666_s9 + $0x240] sm:$0xff] }
 0x156   : > { %3683 = vmatpush.bf16.msrb.mxu0 %v4883_v17  ;;  %v4208_v17 = vld [vmem:[%s6028_s0 + $0x20] sm:$0xf] }
 0x157   : > { %3702 = vmatpush.bf16.msrb.mxu1 %v4891_v18  ;;  %v4830_v18 = vld [vmem:[%s6028_s0 + $0x5c] sm:$0xf0] }
 0x158   : > { %3721 = vmatpush.bf16.msrb.mxu2 %v4899_v16  ;;  %v4938_v16 = vld [vmem:[%s5666_s9 + $0x2c0] sm:$0xff]  ;;  %v4209_v29 = vor.u32 %v4830_v18, %v4208_v17 }
 0x159   : > { %3740 = vmatpush.bf16.msrb.mxu3 %v4907_v19  ;;  %v4953_v19 = vld [vmem:[%s5666_s9 + $0x338] sm:$0xff] }
 0x15a   : > { %3684 = vmatpush.bf16.msrb.mxu0 %v4882_v21  ;;  %v4822_v21 = vld [vmem:[%s6028_s0 + $0x24] sm:$0xf] }
 0x15b   : > { %3703 = vmatpush.bf16.msrb.mxu1 %v4890_v22  ;;  %v4977_v22 = vld [vmem:[%s5666_s9 + $0x3f8] sm:$0xff]  ;;  %v4213_v31 = vor.u32 %v4822_v21, %v4210_v24  ;;  %v4848_v21 = vld [vmem:[%s6028_s0 + $0xec] sm:$0xf0] }
 0x15c   : > { %3722 = vmatpush.bf16.msrb.mxu2 %v4898_v20  ;;  %v4961_v20 = vld [vmem:[%s5666_s9 + $0x378] sm:$0xff] }
 0x15d   : > { %3741 = vmatpush.bf16.msrb.mxu3 %v4906_v23  ;;  %3685 = vmatmul.bf16.vlgmr.msrb.gmra.mxu0 %v4193_v36  ;;  %v4968_v23 = vld [vmem:[%s5666_s9 + $0x3b0] sm:$0xff]  ;;  %v4967_v36 = vld [vmem:[%s5666_s9 + $0x3a8] sm:$0xff]  ;;  %v4296_v24 = vld [vmem:[%s6028_s0 + $0xb8] sm:$0xf] }
 0x15e   : > { %3753 = vmatpush.bf16.msra.mxu0 %v4921_v26  ;;  %3704 = vmatmul.bf16.vlgmr.msrb.gmra.mxu1 %v4197_v38  ;;  %v4831_v26 = vld [vmem:[%s6028_s0 + $0x64] sm:$0xf0] }
 0x15f   : > { %3772 = vmatpush.bf16.msra.mxu1 %v4929_v34  ;;  %3723 = vmatmul.bf16.vlgmr.msrb.gmra.mxu2 %v4201_v39  ;;  %v4952_v34 = vld [vmem:[%s5666_s9 + $0x330] sm:$0xff]  ;;  %v4951_v38 = vld [vmem:[%s5666_s9 + $0x328] sm:$0xff] }
 0x160   : > { %3791 = vmatpush.bf16.msra.mxu2 %v4937_v25  ;;  %3742 = vmatmul.bf16.vlgmr.msrb.gmra.mxu3 %v4205_v40  ;;  %v4216_v25 = vld [vmem:[%s6028_s0 + $0x28] sm:$0xf]  ;;  %v4966_v40 = vld [vmem:[%s5666_s9 + $0x3a0] sm:$0xff] }
 0x161   : > { %3810 = vmatpush.bf16.msra.mxu3 %v4945_v35  ;;  %v4217_v32 = vor.u32 %v4831_v26, %v4216_v25  ;;  %v4976_v35 = vld [vmem:[%s5666_s9 + $0x3f0] sm:$0xff]  ;;  %v4975_v39 = vld [vmem:[%s5666_s9 + $0x3e8] sm:$0xff]  ;;  %v4849_v25 = vld [vmem:[%s6028_s0 + $0xf4] sm:$0xf0] }
 0x162   : > { %3754 = vmatpush.bf16.msra.mxu0 %v4920_v41  ;;  %v4958_v41 = vld [vmem:[%s5666_s9 + $0x360] sm:$0xff]  ;;  %v4841_v26 = vld [vmem:[%s6028_s0 + $0xbc] sm:$0xf] }
 0x163   : > { %3773 = vmatpush.bf16.msra.mxu1 %v4928_v42  ;;  %v4950_v42 = vld [vmem:[%s5666_s9 + $0x320] sm:$0xff] }
 0x164   : > { %3792 = vmatpush.bf16.msra.mxu2 %v4936_v37  ;;  %v4959_v37 = vld [vmem:[%s5666_s9 + $0x368] sm:$0xff] }
 0x165   : > { %3811 = vmatpush.bf16.msra.mxu3 %v4944_v43  ;;  %v4974_v43 = vld [vmem:[%s5666_s9 + $0x3e0] sm:$0xff] }
 0x166   : > { %3755 = vmatpush.bf16.msra.mxu0 %v4919_v45  ;;  %v4272_v45 = vld [vmem:[%s6028_s0 + $0xa0] sm:$0xf] }
 0x167   : > { %3774 = vmatpush.bf16.msra.mxu1 %v4927_v46  ;;  %v4846_v46 = vld [vmem:[%s6028_s0 + $0xdc] sm:$0xf0] }
 0x168   : > { %3793 = vmatpush.bf16.msra.mxu2 %v4935_v44  ;;  %v4965_v44 = vld [vmem:[%s5666_s9 + $0x398] sm:$0xff]  ;;  %v4273_v57 = vor.u32 %v4846_v46, %v4272_v45 }
 0x169   : > { %3812 = vmatpush.bf16.msra.mxu3 %v4943_v47  ;;  %v4957_v47 = vld [vmem:[%s5666_s9 + $0x358] sm:$0xff] }
 0x16a   : > { %3756 = vmatpush.bf16.msra.mxu0 %v4918_v49  ;;  %v4274_v49 = vld [vmem:[%s6028_s0 + $0xe0] sm:$0xf0] }
 0x16b   : > { %3775 = vmatpush.bf16.msra.mxu1 %v4926_v50  ;;  %v4280_v50 = vld [vmem:[%s6028_s0 + $0xa8] sm:$0xf] }
 0x16c   : > { %3794 = vmatpush.bf16.msra.mxu2 %v4934_v48  ;;  %v4838_v48 = vld [vmem:[%s6028_s0 + $0xa4] sm:$0xf] }
 0x16d   : > { %3813 = vmatpush.bf16.msra.mxu3 %v4942_v51  ;;  %3690 = vmatmul.bf16.gmra.mxu0 %v4257_v0  ;;  %v4847_v51 = vld [vmem:[%s6028_s0 + $0xe4] sm:$0xf0]  ;;  %v4277_v59 = vor.u32 %v4838_v48, %v4274_v49 }
 0x16e   : > { %3757 = vmatpush.bf16.msra.mxu0 %v4917_v60  ;;  %3709 = vmatmul.bf16.gmra.mxu1 %v4261_v2  ;;  %v4281_v60 = vor.u32 %v4847_v51, %v4280_v50  ;;  %v4963_v0 = vld [vmem:[%s5666_s9 + $0x388] sm:$0xff] }
 0x16f   : > { %3776 = vmatpush.bf16.msra.mxu1 %v4925_v62  ;;  %3728 = vmatmul.bf16.gmra.mxu2 %v4265_v3  ;;  %v4948_v62 = vld [vmem:[%s5666_s9 + $0x310] sm:$0xff]  ;;  %v4947_v2 = vld [vmem:[%s5666_s9 + $0x308] sm:$0xff] }
 0x170   : > { %3795 = vmatpush.bf16.msra.mxu2 %v4933_v54  ;;  %3747 = vmatmul.bf16.gmra.mxu3 %v4269_v4  ;;  %v4282_v54 = vld [vmem:[%s6028_s0 + $0xe8] sm:$0xf0]  ;;  %v4962_v4 = vld [vmem:[%s5666_s9 + $0x380] sm:$0xff] }
 0x171   : > { %3814 = vmatpush.bf16.msra.mxu3 %v4941_v63  ;;  %v4285_v61 = vor.u32 %v4839_v52, %v4282_v54  ;;  %v4972_v63 = vld [vmem:[%s5666_s9 + $0x3d0] sm:$0xff]  ;;  %v4971_v3 = vld [vmem:[%s5666_s9 + $0x3c8] sm:$0xff] }
 0x172   : > { %3758 = vmatpush.bf16.msra.mxu0 %v4916_v5  ;;  %v4954_v5 = vld [vmem:[%s5666_s9 + $0x340] sm:$0xff] }
 0x173   : > { %3777 = vmatpush.bf16.msra.mxu1 %v4924_v6  ;;  %v4946_v6 = vld [vmem:[%s5666_s9 + $0x300] sm:$0xff] }
 0x174   : > { %3796 = vmatpush.bf16.msra.mxu2 %v4932_v1  ;;  %v4955_v1 = vld [vmem:[%s5666_s9 + $0x348] sm:$0xff] }
 0x175   : > { %3815 = vmatpush.bf16.msra.mxu3 %v4940_v7  ;;  %v4970_v7 = vld [vmem:[%s5666_s9 + $0x3c0] sm:$0xff] }
 0x176   : > { %3759 = vmatpush.bf16.msra.mxu0 %v4915_v9  ;;  %v4832_v9 = vld [vmem:[%s6028_s0 + $0x6c] sm:$0xf0] }
 0x177   : > { %3778 = vmatpush.bf16.msra.mxu1 %v4923_v10  ;;  %v4824_v10 = vld [vmem:[%s6028_s0 + $0x34] sm:$0xf] }
 0x178   : > { %3797 = vmatpush.bf16.msra.mxu2 %v4931_v8  ;;  %v4224_v8 = vld [vmem:[%s6028_s0 + $0x30] sm:$0xf] }
 0x179   : > { %3816 = vmatpush.bf16.msra.mxu3 %v4939_v11  ;;  %v4226_v11 = vld [vmem:[%s6028_s0 + $0x70] sm:$0xf0] }
 0x17a   : > { %3760 = vmatpush.bf16.msra.mxu0 %v4914_v14  ;;  %v4825_v14 = vld [vmem:[%s6028_s0 + $0x3c] sm:$0xf]  ;;  %v4229_v17 = vor.u32 %v4824_v10, %v4226_v11 }
 0x17b   : > { %3779 = vmatpush.bf16.msra.mxu1 %v4922_v15  ;;  %v4234_v15 = vld [vmem:[%s6028_s0 + $0x78] sm:$0xf0] }
 0x17c   : > { %3798 = vmatpush.bf16.msra.mxu2 %v4930_v12  ;;  %v4232_v12 = vld [vmem:[%s6028_s0 + $0x38] sm:$0xf] }
 0x17d   : > { %3817 = vmatpush.bf16.msra.mxu3 %v4938_v16  ;;  %3761 = vmatmul.bf16.vlgmr.msra.gmra.mxu0 %v4209_v29  ;;  %v4225_v16 = vor.u32 %v4832_v9, %v4224_v8 }
 0x17e   : > { %3829 = vmatpush.bf16.msrb.mxu0 %v4953_v19  ;;  %3780 = vmatmul.bf16.vlgmr.msra.gmra.mxu1 %v4213_v31  ;;  %v4237_v19 = vor.u32 %v4825_v14, %v4234_v15  ;;  %v4301_v31 = vor.u32 %v4841_v26, %v4298_v27 }
 0x17f   : > { %3848 = vmatpush.bf16.msrb.mxu1 %v4961_v20  ;;  %3799 = vmatmul.bf16.vlgmr.msra.gmra.mxu2 %v4217_v32  ;;  %v4288_v20 = vld [vmem:[%s6028_s0 + $0xb0] sm:$0xf] }
 0x180   : > { %3867 = vmatpush.bf16.msrb.mxu2 %v4969_v13  ;;  %3818 = vmatmul.bf16.vlgmr.msra.gmra.mxu3 %v4221_v33  ;;  %v4833_v13 = vld [vmem:[%s6028_s0 + $0x74] sm:$0xf0]  ;;  %v4289_v28 = vor.u32 %v4848_v21, %v4288_v20 }
 0x181   : > { %3886 = vmatpush.bf16.msrb.mxu3 %v4977_v22  ;;  %v4233_v18 = vor.u32 %v4833_v13, %v4232_v12  ;;  %v4840_v22 = vld [vmem:[%s6028_s0 + $0xb4] sm:$0xf] }
 0x182   : > { %3830 = vmatpush.bf16.msrb.mxu0 %v4952_v34 }
 0x183   : > { %3849 = vmatpush.bf16.msrb.mxu1 %v4960_v30  ;;  %v4297_v30 = vor.u32 %v4849_v25, %v4296_v24 }
 0x184   : > { %3868 = vmatpush.bf16.msrb.mxu2 %v4968_v23  ;;  %v4290_v23 = vld [vmem:[%s6028_s0 + $0xf0] sm:$0xf0] }
 0x185   : > { %3887 = vmatpush.bf16.msrb.mxu3 %v4976_v35  ;;  %v4293_v29 = vor.u32 %v4840_v22, %v4290_v23 }
 0x186   : > { %3831 = vmatpush.bf16.msrb.mxu0 %v4951_v38 }
 0x187   : > { %3850 = vmatpush.bf16.msrb.mxu1 %v4959_v37 }
 0x188   : > { %3869 = vmatpush.bf16.msrb.mxu2 %v4967_v36 }
 0x189   : > { %3888 = vmatpush.bf16.msrb.mxu3 %v4975_v39 }
 0x18a   : > { %3832 = vmatpush.bf16.msrb.mxu0 %v4950_v42 }
 0x18b   : > { %3851 = vmatpush.bf16.msrb.mxu1 %v4958_v41 }
 0x18c   : > { %3870 = vmatpush.bf16.msrb.mxu2 %v4966_v40 }
 0x18d   : > { %3889 = vmatpush.bf16.msrb.mxu3 %v4974_v43  ;;  %3766 = vmatmul.bf16.gmra.mxu0 %v4273_v57 }
 0x18e   : > { %3833 = vmatpush.bf16.msrb.mxu0 %v4949_v53  ;;  %3785 = vmatmul.bf16.gmra.mxu1 %v4277_v59 }
 0x18f   : > { %3852 = vmatpush.bf16.msrb.mxu1 %v4957_v47  ;;  %3804 = vmatmul.bf16.gmra.mxu2 %v4281_v60 }
 0x190   : > { %3871 = vmatpush.bf16.msrb.mxu2 %v4965_v44  ;;  %3823 = vmatmul.bf16.gmra.mxu3 %v4285_v61 }
 0x191   : > { %3890 = vmatpush.bf16.msrb.mxu3 %v4973_v55 }
 0x192   : > { %3834 = vmatpush.bf16.msrb.mxu0 %v4948_v62 }
 0x193   : > { %3853 = vmatpush.bf16.msrb.mxu1 %v4956_v58 }
 0x194   : > { %3872 = vmatpush.bf16.msrb.mxu2 %v4964_v56 }
 0x195   : > { %3891 = vmatpush.bf16.msrb.mxu3 %v4972_v63 }
 0x196   : > { %3835 = vmatpush.bf16.msrb.mxu0 %v4947_v2 }
 0x197   : > { %3854 = vmatpush.bf16.msrb.mxu1 %v4955_v1 }
 0x198   : > { %3873 = vmatpush.bf16.msrb.mxu2 %v4963_v0 }
 0x199   : > { %3892 = vmatpush.bf16.msrb.mxu3 %v4971_v3 }
 0x19a   : > { %3836 = vmatpush.bf16.msrb.mxu0 %v4946_v6 }
 0x19b   : > { %3855 = vmatpush.bf16.msrb.mxu1 %v4954_v5 }
 0x19c   : > { %3874 = vmatpush.bf16.msrb.mxu2 %v4962_v4 }
 0x19d   : > { %3893 = vmatpush.bf16.msrb.mxu3 %v4970_v7  ;;  %3837 = vmatmul.bf16.vlgmr.msrb.gmra.mxu0 %v4225_v16 }
 0x19e   : > { %3856 = vmatmul.bf16.vlgmr.msrb.gmra.mxu1 %v4229_v17 }
 0x19f   : > { %3875 = vmatmul.bf16.vlgmr.msrb.gmra.mxu2 %v4233_v18 }
 0x1a0   : > { %3894 = vmatmul.bf16.vlgmr.msrb.gmra.mxu3 %v4237_v19 }
 0x1ad   : > { %3842 = vmatmul.bf16.gmra.mxu0 %v4289_v28 }
 0x1ae   : > { %3861 = vmatmul.bf16.gmra.mxu1 %v4293_v29 }
 0x1af   : > { %3880 = vmatmul.bf16.gmra.mxu2 %v4297_v30 }
 0x1b0   : > { %3899 = vmatmul.bf16.gmra.mxu3 %v4301_v31 }
 0x1ba   : > { %v3610_v32 = vpop.f32.mrf.mxu0 }
 0x1bb   : > { %v3629_v33 = vpop.f32.mrf.mxu1 }
 0x1bc   : > { %v3630_v34 = vadd.f32 %v3629_v33, %v3610_v32 }
 0x1c2   : > { %v3648_v35 = vpop.f32.mrf.mxu2  ;;  %v3612_v38 = vpop.f32.mrf.mxu0 }
 0x1c3   : > { %v3667_v36 = vpop.f32.mrf.mxu3  ;;  %v3649_v37 = vadd.f32 %v3648_v35, %v3630_v34  ;;  %v3631_v39 = vpop.f32.mrf.mxu1 }
 0x1c4   : > { %v3632_v40 = vadd.f32 %v3631_v39, %v3612_v38 }
 0x1c5   : > { %v3668_v41 = vadd.f32 %v3667_v36, %v3649_v37 }
 0x1ca   : > { %v3650_v42 = vpop.f32.mrf.mxu2  ;;  %v3615_v45 = vpop.f32.mrf.mxu0 }
 0x1cb   : > { %v3669_v43 = vpop.f32.mrf.mxu3  ;;  %v3651_v44 = vadd.f32 %v3650_v42, %v3632_v40  ;;  %v3634_v46 = vpop.f32.mrf.mxu1 }
 0x1cc   : > { %v3635_v47 = vadd.f32 %v3634_v46, %v3615_v45 }
 0x1cd   : > { %v3670_v48 = vadd.f32 %v3669_v43, %v3651_v44 }
 0x1d2   : > { %v3653_v49 = vpop.f32.mrf.mxu2  ;;  %v3617_v52 = vpop.f32.mrf.mxu0 }
 0x1d3   : > { %v3672_v50 = vpop.f32.mrf.mxu3  ;;  %v3654_v51 = vadd.f32 %v3653_v49, %v3635_v47  ;;  %v3636_v53 = vpop.f32.mrf.mxu1 }
 0x1d4   : > { %v3637_v54 = vadd.f32 %v3636_v53, %v3617_v52 }
 0x1d5   : > { %v3673_v55 = vadd.f32 %v3672_v50, %v3654_v51 }
 0x1da   : > { %v3655_v56 = vpop.f32.mrf.mxu2  ;;  %v3686_v59 = vpop.f32.mrf.mxu0 }
 0x1db   : > { %v3674_v57 = vpop.f32.mrf.mxu3  ;;  %v3656_v58 = vadd.f32 %v3655_v56, %v3637_v54  ;;  %v3687_v60 = vadd.f32 %v3686_v59, %v3668_v41  ;;  %v3705_v61 = vpop.f32.mrf.mxu1 }
 0x1dd   : > { %v3675_v62 = vadd.f32 %v3674_v57, %v3656_v58  ;;  %v3706_v63 = vadd.f32 %v3705_v61, %v3687_v60 }
 0x1e2   : > { %v3724_v0 = vpop.f32.mrf.mxu2  ;;  %v3688_v3 = vpop.f32.mrf.mxu0 }
 0x1e3   : > { %v3725_v1 = vadd.f32 %v3724_v0, %v3706_v63  ;;  %v3743_v2 = vpop.f32.mrf.mxu3  ;;  %v3707_v4 = vpop.f32.mrf.mxu1  ;;  %v3689_v26 = vadd.f32 %v3688_v3, %v3670_v48 }
 0x1e5   : > { %v3744_v5 = vadd.f32 %v3743_v2, %v3725_v1  ;;  %v3708_v27 = vadd.f32 %v3707_v4, %v3689_v26 }
 0x1ea   : > { %v3726_v6 = vpop.f32.mrf.mxu2  ;;  %v3691_v8 = vpop.f32.mrf.mxu0 }
 0x1eb   : > { %v3745_v7 = vpop.f32.mrf.mxu3  ;;  %v3710_v9 = vpop.f32.mrf.mxu1  ;;  %v3727_v29 = vadd.f32 %v3726_v6, %v3708_v27  ;;  %v3692_v33 = vadd.f32 %v3691_v8, %v3673_v55 }
 0x1ed   : > { %v3746_v34 = vadd.f32 %v3745_v7, %v3727_v29  ;;  %v3711_v36 = vadd.f32 %v3710_v9, %v3692_v33 }
 0x1f2   : > { %v3729_v10 = vpop.f32.mrf.mxu2  ;;  %v3693_v12 = vpop.f32.mrf.mxu0 }
 0x1f3   : > { %v3748_v11 = vpop.f32.mrf.mxu3  ;;  %v3712_v13 = vpop.f32.mrf.mxu1  ;;  %v3730_v39 = vadd.f32 %v3729_v10, %v3711_v36  ;;  %v3694_v44 = vadd.f32 %v3693_v12, %v3675_v62 }
 0x1f5   : > { %v3749_v47 = vadd.f32 %v3748_v11, %v3730_v39  ;;  %v3713_v49 = vadd.f32 %v3712_v13, %v3694_v44 }
 0x1fa   : > { %v3731_v14 = vpop.f32.mrf.mxu2  ;;  %v3762_v16 = vpop.f32.mrf.mxu0 }
 0x1fb   : > { %v3750_v15 = vpop.f32.mrf.mxu3  ;;  %v3781_v17 = vpop.f32.mrf.mxu1  ;;  %v3763_v35 = vadd.f32 %v3762_v16, %v3744_v5  ;;  %v3732_v53 = vadd.f32 %v3731_v14, %v3713_v49 }
 0x1fd   : > { %v3782_v40 = vadd.f32 %v3781_v17, %v3763_v35  ;;  %v3751_v61 = vadd.f32 %v3750_v15, %v3732_v53 }
 0x202   : > { %v3800_v18 = vpop.f32.mrf.mxu2  ;;  %v3764_v20 = vpop.f32.mrf.mxu0 }
 0x203   : > { %v3819_v19 = vpop.f32.mrf.mxu3  ;;  %v3783_v21 = vpop.f32.mrf.mxu1  ;;  %v3765_v37 = vadd.f32 %v3764_v20, %v3746_v34  ;;  %v3801_v45 = vadd.f32 %v3800_v18, %v3782_v40 }
 0x205   : > { %v3784_v46 = vadd.f32 %v3783_v21, %v3765_v37  ;;  %v3820_v50 = vadd.f32 %v3819_v19, %v3801_v45 }
 0x20a   : > { %v3802_v22 = vpop.f32.mrf.mxu2  ;;  %v3767_v24 = vpop.f32.mrf.mxu0 }
 0x20b   : > { %v3821_v23 = vpop.f32.mrf.mxu3  ;;  %v3786_v25 = vpop.f32.mrf.mxu1  ;;  %v3803_v48 = vadd.f32 %v3802_v22, %v3784_v46  ;;  %v3768_v51 = vadd.f32 %v3767_v24, %v3749_v47 }
 0x20d   : > { %v3822_v54 = vadd.f32 %v3821_v23, %v3803_v48  ;;  %v3787_v59 = vadd.f32 %v3786_v25, %v3768_v51 }
 0x212   : > { %v3805_v28 = vpop.f32.mrf.mxu2  ;;  %v3769_v31 = vpop.f32.mrf.mxu0 }
 0x213   : > { %v3824_v30 = vpop.f32.mrf.mxu3  ;;  %v3788_v32 = vpop.f32.mrf.mxu1  ;;  %v3806_v63 = vadd.f32 %v3805_v28, %v3787_v59  ;;  %v3770_v62 = vadd.f32 %v3769_v31, %v3751_v61 }
 0x215   : > { %v3825_v4 = vadd.f32 %v3824_v30, %v3806_v63  ;;  %v3789_v8 = vadd.f32 %v3788_v32, %v3770_v62 }
 0x21a   : > { %v3807_v38 = vpop.f32.mrf.mxu2  ;;  %v3838_v42 = vpop.f32.mrf.mxu0 }
 0x21b   : > { %v3826_v41 = vpop.f32.mrf.mxu3  ;;  %v3857_v43 = vpop.f32.mrf.mxu1  ;;  %v3839_v55 = vadd.f32 %v3838_v42, %v3820_v50  ;;  %v3808_v13 = vadd.f32 %v3807_v38, %v3789_v8 }
 0x21d   : > { %v3858_v0 = vadd.f32 %v3857_v43, %v3839_v55  ;;  %v3827_v15 = vadd.f32 %v3826_v41, %v3808_v13 }
 0x222   : > { %v3876_v52 = vpop.f32.mrf.mxu2  ;;  %v3840_v57 = vpop.f32.mrf.mxu0 }
 0x223   : > { %v3895_v56 = vpop.f32.mrf.mxu3  ;;  %v3859_v58 = vpop.f32.mrf.mxu1  ;;  %v3841_v60 = vadd.f32 %v3840_v57, %v3822_v54  ;;  %v3877_v1 = vadd.f32 %v3876_v52, %v3858_v0  ;;  %v3959_v0 = vld [vmem:[%s2369_s14] sm:$0x1] }
 0x225   : > { %v3860_v2 = vadd.f32 %v3859_v58, %v3841_v60  ;;  %v3896_v9 = vadd.f32 %v3895_v56, %v3877_v1 }
 0x22a   : > { %v3878_v3 = vpop.f32.mrf.mxu2  ;;  %v3843_v7 = vpop.f32.mrf.mxu0 }
 0x22b   : > { %v3879_v5 = vadd.f32 %v3878_v3, %v3860_v2  ;;  %v3897_v6 = vpop.f32.mrf.mxu3  ;;  %v3844_v11 = vadd.f32 %v3843_v7, %v3825_v4  ;;  %v3862_v12 = vpop.f32.mrf.mxu1  ;;  %v5029_v3 = vld [vmem:[%s2372_s11] ss:$0 sm:$0xff] }
 0x22d   : > { %v3898_v10 = vadd.f32 %v3897_v6, %v3879_v5  ;;  %v3863_v16 = vadd.f32 %v3862_v12, %v3844_v11 }
 0x22f   : > { %v3920_v14 = vadd.f32 %v3898_v10, %v3896_v9 }
 0x232   : > { %v3881_v17 = vpop.f32.mrf.mxu2  ;;  %v3845_v20 = vpop.f32.mrf.mxu0 }
 0x233   : > { %v3882_v18 = vadd.f32 %v3881_v17, %v3863_v16  ;;  %v3900_v19 = vpop.f32.mrf.mxu3  ;;  %v3846_v22 = vadd.f32 %v3845_v20, %v3827_v15  ;;  %v3864_v24 = vpop.f32.mrf.mxu1 }
 0x235   : > { %v3901_v21 = vadd.f32 %v3900_v19, %v3882_v18  ;;  %v3865_v25 = vadd.f32 %v3864_v24, %v3846_v22 }
 0x237   : > { %v3921_v23 = vadd.f32 %v3920_v14, %v3901_v21 }
 0x23a   : > { %v3883_v26 = vpop.f32.mrf.mxu2 }
 0x23b   : > { %v3884_v27 = vadd.f32 %v3883_v26, %v3865_v25  ;;  %v3902_v28 = vpop.f32.mrf.mxu3 }
 0x23d   : > { %v3903_v29 = vadd.f32 %v3902_v28, %v3884_v27 }
 0x23f   : > { %v3922_v30 = vadd.f32 %v3921_v23, %v3903_v29 }
 0x241   : > { %v3923_v31 = vrot.slane %v3922_v30, 4 }
 0x243   : > { %v3924_v32 = vadd.f32 %v3923_v31, %v3922_v30 }
 0x245   : > { %v3925_v33 = vrot.slane %v3924_v32, 2 }
 0x247   : > { %v3926_v34 = vadd.f32 %v3925_v33, %v3924_v32 }
 0x249   : > { %v3927_v35 = vrot.slane %v3926_v34, 1 }
 0x24b   : > { %v3928_v36 = vadd.f32 %v3927_v35, %v3926_v34 }
 0x24d   : > { %v3929_v37 = vmul.f32 0.03125, %v3928_v36 }
 0x24f   : > { %v3930_v38 = vsub.f32 %v3896_v9, %v3929_v37  ;;  %v3931_v39 = vsub.f32 %v3898_v10, %v3929_v37  ;;  %v3932_v40 = vsub.f32 %v3901_v21, %v3929_v37  ;;  %v3933_v41 = vsub.f32 %v3903_v29, %v3929_v37 }
 0x251   : > { %v3934_v42 = vmul.f32 %v3930_v38, %v3930_v38  ;;  %v3935_v43 = vmul.f32 %v3931_v39, %v3931_v39  ;;  %v3936_v44 = vmul.f32 %v3932_v40, %v3932_v40  ;;  %v3937_v46 = vmul.f32 %v3933_v41, %v3933_v41 }
 0x253   : > { %v3938_v45 = vadd.f32 %v3935_v43, %v3934_v42 }
 0x255   : > { %v3939_v47 = vadd.f32 %v3938_v45, %v3936_v44 }
 0x257   : > { %v3940_v48 = vadd.f32 %v3939_v47, %v3937_v46 }
 0x259   : > { %v3941_v49 = vrot.slane %v3940_v48, 4 }
 0x25b   : > { %v3942_v50 = vadd.f32 %v3941_v49, %v3940_v48 }
 0x25d   : > { %v3943_v51 = vrot.slane %v3942_v50, 2 }
 0x25f   : > { %v3944_v52 = vadd.f32 %v3943_v51, %v3942_v50 }
 0x261   : > { %v3945_v53 = vrot.slane %v3944_v52, 1 }
 0x263   : > { %v3946_v54 = vadd.f32 %v3945_v53, %v3944_v52 }
 0x265   : > { %v3947_v55 = vmul.f32 0.03125, %v3946_v54 }
 0x267   : > { %v3948_v56 = vadd.f32 1e-05, %v3947_v55 }
 0x269   : > { %5030 = vrsqrt.f32 %v3948_v56  ;;  %vm3955_vm1 = vweird.f32 %v3948_v56 }
 0x26f   : > { %v5031_v57 = vpop.eup %5030 }
 0x270   : > { %v3950_v58 = vmul.f32 %v5031_v57, %v3948_v56  ;;  %vm3956_vm0 = vweird.f32 %v5031_v57 }
 0x271   : > { %vm3957_vm2 = vmor %vm3955_vm1, %vm3956_vm0 }
 0x272   : > { %v3951_v59 = vmul.f32 %v5031_v57, %v3950_v58 }
 0x274   : > { %v3952_v60 = vmul.f32 0.5, %v3951_v59 }
 0x276   : > { %v3953_v61 = vsub.f32 1.5, %v3952_v60 }
 0x278   : > { %v3954_v63 = vmul.f32 %v5031_v57, %v3953_v61 }
 0x27a   : > { %v3958_v62 = vsel %vm3957_vm2, %v5031_v57, %v3954_v63 }
 0x27b   : > { %v3960_v1 = vmul.f32 %v3959_v0, %v3958_v62 }
 0x27d   : > { %v3961_v2 = vperm.slane %v3960_v1, 0 }
 0x27f   : > { %v3962_v4 = vmul.f32 %v3961_v2, %v3930_v38  ;;  %v3963_v5 = vmul.f32 %v3961_v2, %v3931_v39  ;;  %v3964_v6 = vmul.f32 %v3961_v2, %v3932_v40  ;;  %v3965_v7 = vmul.f32 %v3961_v2, %v3933_v41 }
 0x281   : > { %v3970_v8 = vadd.f32 %v5029_v3, %v3962_v4  ;;  %v3971_v9 = vadd.f32 %v5029_v3, %v3963_v5  ;;  %v3972_v10 = vadd.f32 %v5029_v3, %v3964_v6  ;;  %v3973_v11 = vadd.f32 %v5029_v3, %v3965_v7 }
 0x283   : > { %vm3974_vm3 = vcmp.ge.f32.partialorder %v3970_v8, 0.0  ;;  %vm3975_vm4 = vcmp.ge.f32.partialorder %v3971_v9, 0.0  ;;  %vm3976_vm5 = vcmp.ge.f32.partialorder %v3972_v10, 0.0  ;;  %vm3977_vm6 = vcmp.ge.f32.partialorder %v3973_v11, 0.0 }
 0x284   : > { %v3978_v12 = vmul.f32 0.01, %v3970_v8  ;;  %v3979_v13 = vmul.f32 0.01, %v3971_v9  ;;  %v3980_v14 = vmul.f32 0.01, %v3972_v10 }
 0x285   : > { %v3981_v16 = vmul.f32 0.01, %v3973_v11 }
 0x286   : > { %v3982_v17 = vsel %vm3974_vm3, %v3970_v8, %v3978_v12  ;;  %v3983_v15 = vsel %vm3975_vm4, %v3971_v9, %v3979_v13  ;;  %v3984_v18 = vsel %vm3976_vm5, %v3972_v10, %v3980_v14  ;;  %4000 = sbr.rel (!%p5132_p6) target bundleno = 661 (0x295), region = 100 }
 0x287   : > { %v3985_v19 = vsel %vm3977_vm6, %v3973_v11, %v3981_v16  ;;  %v4981_v20 = vpack.c.bf16 %v3983_v15, %v3982_v17 }
 0x288   : > { %v4986_v21 = vpack.c.bf16 %v3985_v19, %v3984_v18 }
 0x289   : > { %4982 = vst [vmem:[%s2359_s26] sm:$0xff] %v4981_v20  }
 0x28a   : > { %4988 = vst [vmem:[%s2359_s26 + $0x8] sm:$0xff] %v4986_v21  }
 0x290   : > { %v4019_v22 = vld [vmem:[%s2359_s26] sm:$0xf]  ;;  %v4021_v23 = vld [vmem:[%s2359_s26 + $0x4] sm:$0xf] }
 0x291   : > { %v4023_v24 = vld [vmem:[%s2359_s26 + $0x8] sm:$0xf]  ;;  %4020 = vst [vmem:[%s4002_s27] sm:$0xf] %v4019_v22  ;;  %v4025_v25 = vld [vmem:[%s2359_s26 + $0xc] sm:$0xf] }
 0x292   : > { %4022 = vst [vmem:[%s4002_s27 + $0x8] sm:$0xf] %v4021_v23 }
 0x293   : > { %4024 = vst [vmem:[%s4002_s27 + $0x10] sm:$0xf] %v4023_v24 }
 0x294   : > { %4026 = vst [vmem:[%s4002_s27 + $0x18] sm:$0xf] %v4025_v25 }
 0x295 PF: > { %s14_s19 = sadd.s32 1, %s5070_s19   ;;  %s6034_s15 = smov %s5058_s16 }
 0x296   : > { %p11_p12 = scmp.ge.s32.totalorder %s14_s19, 4   ;;  %s6035_s16 = smov %s5137_s25 }
 0x297   : > { %s6036_s17 = smov %s5066_s18  ;;  %s6037_s18 = smov %s6039_s20 }
 0x298   :  { %13 = sbr.rel (!%p11_p12) target bundleno = 3 (0x3), region = 185 }

// kernel: discriminator_forward.8
= control target key start
LH: loop header
LB: loop body
LE: loop exit
PB: predicated region body
PF: predicated region fallthrough
CT: control target
= control target key end

     0   :  { %s8581_s15 = smov 0   ;;  %s8583_s16 = smov 0   ;;  %s10003_s0 = inlined_call_operand.vmem [shape: bf16[8,4096], index: 0, kind: input, shape index: {}]   ;;  %s10004_s1 = inlined_call_operand.vmem [shape: bf16[4096,512], index: 1, kind: input, shape index: {}]   ;;  %s10005_s2 = inlined_call_operand.vmem [shape: f32[1,512], index: 2, kind: input, shape index: {}]   ;;  %s10006_s3 = inlined_call_operand.vmem [shape: f32[1,512], index: 3, kind: input, shape index: {}]   ;;  %s10007_s4 = inlined_call_operand.vmem [shape: bf16[8,512], index: 4, kind: output, shape index: {}]  }
   0x1   :  { %s8585_s17 = smov 0   ;;  %s8587_s18 = smov 0  }
   0x2   :  { %s8589_s19 = smov 0  }
   0x3 LB: > { %s26_s20 = sadd.s32 1, %s8550_s18  ;;  %p68_p1 = scmp.ne.s32.totalorder %s8542_s16, %s8538_s15  ;;  %s8554_s19 = sphi %s8589_s19, %s14_s19   ;;  %s8550_s18 = sphi %s8587_s18, %s10011_s18   ;;  %s8546_s17 = sphi %s8585_s17, %s10010_s17   ;;  %s8542_s16 = sphi %s8583_s16, %s10009_s16   ;;  %s8538_s15 = sphi %s8581_s15, %s10008_s15  }
   0x4   : > { %p28_p0 = scmp.ge.s32.totalorder %s26_s20, 4  ;;  %p69_p2 = scmp.eq.s32.totalorder %s8554_s19, 0 }
   0x5   : > { %s61_s22 = sadd.s32 1, %s8542_s16  ;;  %p7185_p5 = scmp.ge.s32.totalorder %s8554_s19, 4 }
   0x6   : > { %s10013_s20 = smov (%p28_p0, %s26_s20), 0  ;;  %p70_p3 = por %p69_p2, %p68_p1 }
   0x7   : > { %s57_s21 = ssub.s32 %s8550_s18, %s10013_s20  ;;  %181 = sbr.rel (%p7185_p5) target bundleno = 528 (0x210), region = 20 }
   0x8   : > { %p59_p4 = scmp.eq.s32.totalorder %s57_s21, 0 }
   0xa   : > { %s8616_s23 = scalar_select %p59_p4, %s8542_s16, %s61_s22  }
   0xc   : > { %184 = sbr.rel (!%p70_p3) target bundleno = 528 (0x210), region = 24  ;;  %s186_s24 = sand.u32 (%p70_p3), 1, %s8542_s16  }
   0xd   : > { %s7187_s25 = sshll.u32 (%p70_p3), %s8550_s18, 2  ;;  %s7186_s26 = sshll.u32 (%p70_p3), %s186_s24, 11 }
   0xe   : > { %s8624_s29 = scalar_lea.vmem (%p70_p3), %s10004_s1, %s7187_s25  ;;  %s8628_s30 = scalar_lea.vmem (%p70_p3), [#allocation3], %s7186_s26 }
   0xf   : > { %v210_v0 = vld [vmem:[%s8624_s29] sm:$0xf] (%p70_p3)  ;;  %v212_v1 = vld [vmem:[%s8624_s29 + $0x10] sm:$0xf] (%p70_p3) }
  0x10   : > { %211 = vst [vmem:[%s8628_s30] sm:$0xf] (%p70_p3), %v210_v0  ;;  %v214_v2 = vld [vmem:[%s8624_s29 + $0x20] sm:$0xf] (%p70_p3)  ;;  %v216_v3 = vld [vmem:[%s8624_s29 + $0x30] sm:$0xf] (%p70_p3) }
  0x11   : > { %213 = vst [vmem:[%s8628_s30 + $0x4] sm:$0xf] %v212_v1  ;;  %v218_v4 = vld [vmem:[%s8624_s29 + $0x40] sm:$0xf]  ;;  %v220_v5 = vld [vmem:[%s8624_s29 + $0x50] sm:$0xf] }
  0x12   : > { %215 = vst [vmem:[%s8628_s30 + $0x8] sm:$0xf] %v214_v2  ;;  %v222_v6 = vld [vmem:[%s8624_s29 + $0x60] sm:$0xf]  ;;  %v224_v7 = vld [vmem:[%s8624_s29 + $0x70] sm:$0xf] }
  0x13   : > { %217 = vst [vmem:[%s8628_s30 + $0xc] sm:$0xf] %v216_v3  ;;  %v226_v8 = vld [vmem:[%s8624_s29 + $0x80] sm:$0xf]  ;;  %v228_v9 = vld [vmem:[%s8624_s29 + $0x90] sm:$0xf] }
  0x14   : > { %219 = vst [vmem:[%s8628_s30 + $0x10] sm:$0xf] %v218_v4  ;;  %v230_v10 = vld [vmem:[%s8624_s29 + $0xa0] sm:$0xf]  ;;  %v232_v11 = vld [vmem:[%s8624_s29 + $0xb0] sm:$0xf] }
  0x15   : > { %221 = vst [vmem:[%s8628_s30 + $0x14] sm:$0xf] %v220_v5  ;;  %v234_v12 = vld [vmem:[%s8624_s29 + $0xc0] sm:$0xf]  ;;  %v236_v13 = vld [vmem:[%s8624_s29 + $0xd0] sm:$0xf] }
  0x16   : > { %223 = vst [vmem:[%s8628_s30 + $0x18] sm:$0xf] %v222_v6  ;;  %v238_v14 = vld [vmem:[%s8624_s29 + $0xe0] sm:$0xf]  ;;  %v240_v15 = vld [vmem:[%s8624_s29 + $0xf0] sm:$0xf] }
  0x17   : > { %225 = vst [vmem:[%s8628_s30 + $0x1c] sm:$0xf] %v224_v7  ;;  %v242_v16 = vld [vmem:[%s8624_s29 + $0x100] sm:$0xf]  ;;  %v244_v17 = vld [vmem:[%s8624_s29 + $0x110] sm:$0xf] }
  0x18   : > { %227 = vst [vmem:[%s8628_s30 + $0x20] sm:$0xf] %v226_v8  ;;  %v246_v18 = vld [vmem:[%s8624_s29 + $0x120] sm:$0xf]  ;;  %v248_v19 = vld [vmem:[%s8624_s29 + $0x130] sm:$0xf] }
  0x19   : > { %229 = vst [vmem:[%s8628_s30 + $0x24] sm:$0xf] %v228_v9  ;;  %v250_v20 = vld [vmem:[%s8624_s29 + $0x140] sm:$0xf]  ;;  %v252_v21 = vld [vmem:[%s8624_s29 + $0x150] sm:$0xf] }
  0x1a   : > { %231 = vst [vmem:[%s8628_s30 + $0x28] sm:$0xf] %v230_v10  ;;  %v254_v22 = vld [vmem:[%s8624_s29 + $0x160] sm:$0xf]  ;;  %v256_v23 = vld [vmem:[%s8624_s29 + $0x170] sm:$0xf] }
  0x1b   : > { %233 = vst [vmem:[%s8628_s30 + $0x2c] sm:$0xf] %v232_v11  ;;  %v258_v24 = vld [vmem:[%s8624_s29 + $0x180] sm:$0xf]  ;;  %v260_v25 = vld [vmem:[%s8624_s29 + $0x190] sm:$0xf] }
  0x1c   : > { %235 = vst [vmem:[%s8628_s30 + $0x30] sm:$0xf] %v234_v12  ;;  %v262_v26 = vld [vmem:[%s8624_s29 + $0x1a0] sm:$0xf]  ;;  %v264_v27 = vld [vmem:[%s8624_s29 + $0x1b0] sm:$0xf] }
  0x1d   : > { %237 = vst [vmem:[%s8628_s30 + $0x34] sm:$0xf] %v236_v13  ;;  %v266_v28 = vld [vmem:[%s8624_s29 + $0x1c0] sm:$0xf]  ;;  %v268_v29 = vld [vmem:[%s8624_s29 + $0x1d0] sm:$0xf] }
  0x1e   : > { %239 = vst [vmem:[%s8628_s30 + $0x38] sm:$0xf] %v238_v14  ;;  %v270_v30 = vld [vmem:[%s8624_s29 + $0x1e0] sm:$0xf]  ;;  %v272_v31 = vld [vmem:[%s8624_s29 + $0x1f0] sm:$0xf] }
  0x1f   : > { %241 = vst [vmem:[%s8628_s30 + $0x3c] sm:$0xf] %v240_v15  ;;  %v274_v32 = vld [vmem:[%s8624_s29 + $0x200] sm:$0xf]  ;;  %v276_v33 = vld [vmem:[%s8624_s29 + $0x210] sm:$0xf] }
  0x20   : > { %243 = vst [vmem:[%s8628_s30 + $0x40] sm:$0xf] %v242_v16  ;;  %v278_v34 = vld [vmem:[%s8624_s29 + $0x220] sm:$0xf]  ;;  %v280_v35 = vld [vmem:[%s8624_s29 + $0x230] sm:$0xf] }
  0x21   : > { %245 = vst [vmem:[%s8628_s30 + $0x44] sm:$0xf] %v244_v17  ;;  %v282_v36 = vld [vmem:[%s8624_s29 + $0x240] sm:$0xf]  ;;  %v284_v37 = vld [vmem:[%s8624_s29 + $0x250] sm:$0xf] }
  0x22   : > { %247 = vst [vmem:[%s8628_s30 + $0x48] sm:$0xf] %v246_v18  ;;  %v286_v38 = vld [vmem:[%s8624_s29 + $0x260] sm:$0xf]  ;;  %v288_v39 = vld [vmem:[%s8624_s29 + $0x270] sm:$0xf] }
  0x23   : > { %249 = vst [vmem:[%s8628_s30 + $0x4c] sm:$0xf] %v248_v19  ;;  %v290_v40 = vld [vmem:[%s8624_s29 + $0x280] sm:$0xf]  ;;  %v292_v41 = vld [vmem:[%s8624_s29 + $0x290] sm:$0xf] }
  0x24   : > { %251 = vst [vmem:[%s8628_s30 + $0x50] sm:$0xf] %v250_v20  ;;  %v294_v42 = vld [vmem:[%s8624_s29 + $0x2a0] sm:$0xf]  ;;  %v296_v43 = vld [vmem:[%s8624_s29 + $0x2b0] sm:$0xf] }
  0x25   : > { %253 = vst [vmem:[%s8628_s30 + $0x54] sm:$0xf] %v252_v21  ;;  %v298_v44 = vld [vmem:[%s8624_s29 + $0x2c0] sm:$0xf]  ;;  %v300_v45 = vld [vmem:[%s8624_s29 + $0x2d0] sm:$0xf] }
  0x26   : > { %255 = vst [vmem:[%s8628_s30 + $0x58] sm:$0xf] %v254_v22  ;;  %v302_v46 = vld [vmem:[%s8624_s29 + $0x2e0] sm:$0xf]  ;;  %v304_v47 = vld [vmem:[%s8624_s29 + $0x2f0] sm:$0xf] }
  0x27   : > { %257 = vst [vmem:[%s8628_s30 + $0x5c] sm:$0xf] %v256_v23  ;;  %v306_v48 = vld [vmem:[%s8624_s29 + $0x300] sm:$0xf]  ;;  %v308_v49 = vld [vmem:[%s8624_s29 + $0x310] sm:$0xf] }
  0x28   : > { %259 = vst [vmem:[%s8628_s30 + $0x60] sm:$0xf] %v258_v24  ;;  %v310_v50 = vld [vmem:[%s8624_s29 + $0x320] sm:$0xf]  ;;  %v312_v51 = vld [vmem:[%s8624_s29 + $0x330] sm:$0xf] }
  0x29   : > { %261 = vst [vmem:[%s8628_s30 + $0x64] sm:$0xf] %v260_v25  ;;  %v314_v52 = vld [vmem:[%s8624_s29 + $0x340] sm:$0xf]  ;;  %v316_v53 = vld [vmem:[%s8624_s29 + $0x350] sm:$0xf] }
  0x2a   : > { %263 = vst [vmem:[%s8628_s30 + $0x68] sm:$0xf] %v262_v26  ;;  %v318_v54 = vld [vmem:[%s8624_s29 + $0x360] sm:$0xf]  ;;  %v320_v55 = vld [vmem:[%s8624_s29 + $0x370] sm:$0xf] }
  0x2b   : > { %265 = vst [vmem:[%s8628_s30 + $0x6c] sm:$0xf] %v264_v27  ;;  %v322_v56 = vld [vmem:[%s8624_s29 + $0x380] sm:$0xf]  ;;  %v324_v57 = vld [vmem:[%s8624_s29 + $0x390] sm:$0xf] }
  0x2c   : > { %267 = vst [vmem:[%s8628_s30 + $0x70] sm:$0xf] %v266_v28  ;;  %v326_v58 = vld [vmem:[%s8624_s29 + $0x3a0] sm:$0xf]  ;;  %v328_v59 = vld [vmem:[%s8624_s29 + $0x3b0] sm:$0xf] }
  0x2d   : > { %269 = vst [vmem:[%s8628_s30 + $0x74] sm:$0xf] %v268_v29  ;;  %v330_v60 = vld [vmem:[%s8624_s29 + $0x3c0] sm:$0xf]  ;;  %v332_v61 = vld [vmem:[%s8624_s29 + $0x3d0] sm:$0xf] }
  0x2e   : > { %271 = vst [vmem:[%s8628_s30 + $0x78] sm:$0xf] %v270_v30  ;;  %v334_v62 = vld [vmem:[%s8624_s29 + $0x3e0] sm:$0xf]  ;;  %v336_v63 = vld [vmem:[%s8624_s29 + $0x3f0] sm:$0xf] }
  0x2f   : > { %273 = vst [vmem:[%s8628_s30 + $0x7c] sm:$0xf] %v272_v31  ;;  %v338_v0 = vld [vmem:[%s8624_s29 + $0x400] sm:$0xf]  ;;  %v340_v1 = vld [vmem:[%s8624_s29 + $0x410] sm:$0xf] }
  0x30   : > { %275 = vst [vmem:[%s8628_s30 + $0x80] sm:$0xf] %v274_v32  ;;  %v342_v2 = vld [vmem:[%s8624_s29 + $0x420] sm:$0xf]  ;;  %v344_v3 = vld [vmem:[%s8624_s29 + $0x430] sm:$0xf] }
  0x31   : > { %277 = vst [vmem:[%s8628_s30 + $0x84] sm:$0xf] %v276_v33  ;;  %v346_v4 = vld [vmem:[%s8624_s29 + $0x440] sm:$0xf]  ;;  %v348_v5 = vld [vmem:[%s8624_s29 + $0x450] sm:$0xf] }
  0x32   : > { %279 = vst [vmem:[%s8628_s30 + $0x88] sm:$0xf] %v278_v34  ;;  %v350_v6 = vld [vmem:[%s8624_s29 + $0x460] sm:$0xf]  ;;  %v352_v7 = vld [vmem:[%s8624_s29 + $0x470] sm:$0xf] }
  0x33   : > { %281 = vst [vmem:[%s8628_s30 + $0x8c] sm:$0xf] %v280_v35  ;;  %v354_v8 = vld [vmem:[%s8624_s29 + $0x480] sm:$0xf]  ;;  %v356_v9 = vld [vmem:[%s8624_s29 + $0x490] sm:$0xf] }
  0x34   : > { %283 = vst [vmem:[%s8628_s30 + $0x90] sm:$0xf] %v282_v36  ;;  %v358_v10 = vld [vmem:[%s8624_s29 + $0x4a0] sm:$0xf]  ;;  %v360_v11 = vld [vmem:[%s8624_s29 + $0x4b0] sm:$0xf] }
  0x35   : > { %285 = vst [vmem:[%s8628_s30 + $0x94] sm:$0xf] %v284_v37  ;;  %v362_v12 = vld [vmem:[%s8624_s29 + $0x4c0] sm:$0xf]  ;;  %v364_v13 = vld [vmem:[%s8624_s29 + $0x4d0] sm:$0xf] }
  0x36   : > { %287 = vst [vmem:[%s8628_s30 + $0x98] sm:$0xf] %v286_v38  ;;  %v366_v14 = vld [vmem:[%s8624_s29 + $0x4e0] sm:$0xf]  ;;  %v368_v15 = vld [vmem:[%s8624_s29 + $0x4f0] sm:$0xf] }
  0x37   : > { %289 = vst [vmem:[%s8628_s30 + $0x9c] sm:$0xf] %v288_v39  ;;  %v370_v16 = vld [vmem:[%s8624_s29 + $0x500] sm:$0xf]  ;;  %v372_v17 = vld [vmem:[%s8624_s29 + $0x510] sm:$0xf] }
  0x38   : > { %291 = vst [vmem:[%s8628_s30 + $0xa0] sm:$0xf] %v290_v40  ;;  %v374_v18 = vld [vmem:[%s8624_s29 + $0x520] sm:$0xf]  ;;  %v376_v19 = vld [vmem:[%s8624_s29 + $0x530] sm:$0xf] }
  0x39   : > { %293 = vst [vmem:[%s8628_s30 + $0xa4] sm:$0xf] %v292_v41  ;;  %v378_v20 = vld [vmem:[%s8624_s29 + $0x540] sm:$0xf]  ;;  %v380_v21 = vld [vmem:[%s8624_s29 + $0x550] sm:$0xf] }
  0x3a   : > { %295 = vst [vmem:[%s8628_s30 + $0xa8] sm:$0xf] %v294_v42  ;;  %v382_v22 = vld [vmem:[%s8624_s29 + $0x560] sm:$0xf]  ;;  %v384_v23 = vld [vmem:[%s8624_s29 + $0x570] sm:$0xf] }
  0x3b   : > { %297 = vst [vmem:[%s8628_s30 + $0xac] sm:$0xf] %v296_v43  ;;  %v386_v24 = vld [vmem:[%s8624_s29 + $0x580] sm:$0xf]  ;;  %v388_v25 = vld [vmem:[%s8624_s29 + $0x590] sm:$0xf] }
  0x3c   : > { %299 = vst [vmem:[%s8628_s30 + $0xb0] sm:$0xf] %v298_v44  ;;  %v390_v26 = vld [vmem:[%s8624_s29 + $0x5a0] sm:$0xf]  ;;  %v392_v27 = vld [vmem:[%s8624_s29 + $0x5b0] sm:$0xf] }
  0x3d   : > { %301 = vst [vmem:[%s8628_s30 + $0xb4] sm:$0xf] %v300_v45  ;;  %v394_v28 = vld [vmem:[%s8624_s29 + $0x5c0] sm:$0xf]  ;;  %v396_v29 = vld [vmem:[%s8624_s29 + $0x5d0] sm:$0xf] }
  0x3e   : > { %303 = vst [vmem:[%s8628_s30 + $0xb8] sm:$0xf] %v302_v46  ;;  %v398_v30 = vld [vmem:[%s8624_s29 + $0x5e0] sm:$0xf]  ;;  %v400_v31 = vld [vmem:[%s8624_s29 + $0x5f0] sm:$0xf] }
  0x3f   : > { %305 = vst [vmem:[%s8628_s30 + $0xbc] sm:$0xf] %v304_v47  ;;  %v402_v32 = vld [vmem:[%s8624_s29 + $0x600] sm:$0xf]  ;;  %v404_v33 = vld [vmem:[%s8624_s29 + $0x610] sm:$0xf] }
  0x40   : > { %307 = vst [vmem:[%s8628_s30 + $0xc0] sm:$0xf] %v306_v48  ;;  %v406_v34 = vld [vmem:[%s8624_s29 + $0x620] sm:$0xf]  ;;  %v408_v35 = vld [vmem:[%s8624_s29 + $0x630] sm:$0xf] }
  0x41   : > { %309 = vst [vmem:[%s8628_s30 + $0xc4] sm:$0xf] %v308_v49  ;;  %v410_v36 = vld [vmem:[%s8624_s29 + $0x640] sm:$0xf]  ;;  %v412_v37 = vld [vmem:[%s8624_s29 + $0x650] sm:$0xf] }
  0x42   : > { %311 = vst [vmem:[%s8628_s30 + $0xc8] sm:$0xf] %v310_v50  ;;  %v414_v38 = vld [vmem:[%s8624_s29 + $0x660] sm:$0xf]  ;;  %v416_v39 = vld [vmem:[%s8624_s29 + $0x670] sm:$0xf] }
  0x43   : > { %313 = vst [vmem:[%s8628_s30 + $0xcc] sm:$0xf] %v312_v51  ;;  %v418_v40 = vld [vmem:[%s8624_s29 + $0x680] sm:$0xf]  ;;  %v420_v41 = vld [vmem:[%s8624_s29 + $0x690] sm:$0xf] }
  0x44   : > { %315 = vst [vmem:[%s8628_s30 + $0xd0] sm:$0xf] %v314_v52  ;;  %v422_v42 = vld [vmem:[%s8624_s29 + $0x6a0] sm:$0xf]  ;;  %v424_v43 = vld [vmem:[%s8624_s29 + $0x6b0] sm:$0xf] }
  0x45   : > { %317 = vst [vmem:[%s8628_s30 + $0xd4] sm:$0xf] %v316_v53  ;;  %v426_v44 = vld [vmem:[%s8624_s29 + $0x6c0] sm:$0xf]  ;;  %v428_v45 = vld [vmem:[%s8624_s29 + $0x6d0] sm:$0xf] }
  0x46   : > { %319 = vst [vmem:[%s8628_s30 + $0xd8] sm:$0xf] %v318_v54  ;;  %v430_v46 = vld [vmem:[%s8624_s29 + $0x6e0] sm:$0xf]  ;;  %v432_v47 = vld [vmem:[%s8624_s29 + $0x6f0] sm:$0xf] }
  0x47   : > { %321 = vst [vmem:[%s8628_s30 + $0xdc] sm:$0xf] %v320_v55  ;;  %v434_v48 = vld [vmem:[%s8624_s29 + $0x700] sm:$0xf]  ;;  %v436_v49 = vld [vmem:[%s8624_s29 + $0x710] sm:$0xf] }
  0x48   : > { %323 = vst [vmem:[%s8628_s30 + $0xe0] sm:$0xf] %v322_v56  ;;  %v438_v50 = vld [vmem:[%s8624_s29 + $0x720] sm:$0xf]  ;;  %v440_v51 = vld [vmem:[%s8624_s29 + $0x730] sm:$0xf] }
  0x49   : > { %325 = vst [vmem:[%s8628_s30 + $0xe4] sm:$0xf] %v324_v57  ;;  %v442_v52 = vld [vmem:[%s8624_s29 + $0x740] sm:$0xf]  ;;  %v444_v53 = vld [vmem:[%s8624_s29 + $0x750] sm:$0xf] }
  0x4a   : > { %327 = vst [vmem:[%s8628_s30 + $0xe8] sm:$0xf] %v326_v58  ;;  %v446_v54 = vld [vmem:[%s8624_s29 + $0x760] sm:$0xf]  ;;  %v448_v55 = vld [vmem:[%s8624_s29 + $0x770] sm:$0xf] }
  0x4b   : > { %329 = vst [vmem:[%s8628_s30 + $0xec] sm:$0xf] %v328_v59  ;;  %v450_v56 = vld [vmem:[%s8624_s29 + $0x780] sm:$0xf]  ;;  %v452_v57 = vld [vmem:[%s8624_s29 + $0x790] sm:$0xf] }
  0x4c   : > { %331 = vst [vmem:[%s8628_s30 + $0xf0] sm:$0xf] %v330_v60  ;;  %v454_v58 = vld [vmem:[%s8624_s29 + $0x7a0] sm:$0xf]  ;;  %v456_v59 = vld [vmem:[%s8624_s29 + $0x7b0] sm:$0xf] }
  0x4d   : > { %333 = vst [vmem:[%s8628_s30 + $0xf4] sm:$0xf] %v332_v61  ;;  %v458_v60 = vld [vmem:[%s8624_s29 + $0x7c0] sm:$0xf]  ;;  %v460_v61 = vld [vmem:[%s8624_s29 + $0x7d0] sm:$0xf] }
  0x4e   : > { %335 = vst [vmem:[%s8628_s30 + $0xf8] sm:$0xf] %v334_v62  ;;  %v462_v62 = vld [vmem:[%s8624_s29 + $0x7e0] sm:$0xf] }
  0x4f   : > { %337 = vst [vmem:[%s8628_s30 + $0xfc] sm:$0xf] %v336_v63  ;;  %v464_v63 = vld [vmem:[%s8624_s29 + $0x7f0] sm:$0xf] }
  0x50   : > { %339 = vst [vmem:[%s8628_s30 + $0x100] sm:$0xf] %v338_v0  ;;  %v466_v0 = vld [vmem:[%s8624_s29 + $0x800] sm:$0xf] }
  0x51   : > { %341 = vst [vmem:[%s8628_s30 + $0x104] sm:$0xf] %v340_v1  ;;  %v468_v1 = vld [vmem:[%s8624_s29 + $0x810] sm:$0xf] }
  0x52   : > { %343 = vst [vmem:[%s8628_s30 + $0x108] sm:$0xf] %v342_v2  ;;  %v470_v2 = vld [vmem:[%s8624_s29 + $0x820] sm:$0xf] }
  0x53   : > { %345 = vst [vmem:[%s8628_s30 + $0x10c] sm:$0xf] %v344_v3  ;;  %v472_v3 = vld [vmem:[%s8624_s29 + $0x830] sm:$0xf] }
  0x54   : > { %347 = vst [vmem:[%s8628_s30 + $0x110] sm:$0xf] %v346_v4  ;;  %v474_v4 = vld [vmem:[%s8624_s29 + $0x840] sm:$0xf] }
  0x55   : > { %349 = vst [vmem:[%s8628_s30 + $0x114] sm:$0xf] %v348_v5  ;;  %v476_v5 = vld [vmem:[%s8624_s29 + $0x850] sm:$0xf] }
  0x56   : > { %351 = vst [vmem:[%s8628_s30 + $0x118] sm:$0xf] %v350_v6  ;;  %v478_v6 = vld [vmem:[%s8624_s29 + $0x860] sm:$0xf] }
  0x57   : > { %353 = vst [vmem:[%s8628_s30 + $0x11c] sm:$0xf] %v352_v7  ;;  %v480_v7 = vld [vmem:[%s8624_s29 + $0x870] sm:$0xf] }
  0x58   : > { %355 = vst [vmem:[%s8628_s30 + $0x120] sm:$0xf] %v354_v8  ;;  %v482_v8 = vld [vmem:[%s8624_s29 + $0x880] sm:$0xf] }
  0x59   : > { %357 = vst [vmem:[%s8628_s30 + $0x124] sm:$0xf] %v356_v9  ;;  %v484_v9 = vld [vmem:[%s8624_s29 + $0x890] sm:$0xf] }
  0x5a   : > { %359 = vst [vmem:[%s8628_s30 + $0x128] sm:$0xf] %v358_v10  ;;  %v486_v10 = vld [vmem:[%s8624_s29 + $0x8a0] sm:$0xf] }
  0x5b   : > { %361 = vst [vmem:[%s8628_s30 + $0x12c] sm:$0xf] %v360_v11  ;;  %v488_v11 = vld [vmem:[%s8624_s29 + $0x8b0] sm:$0xf] }
  0x5c   : > { %363 = vst [vmem:[%s8628_s30 + $0x130] sm:$0xf] %v362_v12  ;;  %v490_v12 = vld [vmem:[%s8624_s29 + $0x8c0] sm:$0xf] }
  0x5d   : > { %365 = vst [vmem:[%s8628_s30 + $0x134] sm:$0xf] %v364_v13  ;;  %v492_v13 = vld [vmem:[%s8624_s29 + $0x8d0] sm:$0xf] }
  0x5e   : > { %367 = vst [vmem:[%s8628_s30 + $0x138] sm:$0xf] %v366_v14  ;;  %v494_v14 = vld [vmem:[%s8624_s29 + $0x8e0] sm:$0xf] }
  0x5f   : > { %369 = vst [vmem:[%s8628_s30 + $0x13c] sm:$0xf] %v368_v15  ;;  %v496_v15 = vld [vmem:[%s8624_s29 + $0x8f0] sm:$0xf] }
  0x60   : > { %371 = vst [vmem:[%s8628_s30 + $0x140] sm:$0xf] %v370_v16  ;;  %v498_v16 = vld [vmem:[%s8624_s29 + $0x900] sm:$0xf] }
  0x61   : > { %373 = vst [vmem:[%s8628_s30 + $0x144] sm:$0xf] %v372_v17  ;;  %v500_v17 = vld [vmem:[%s8624_s29 + $0x910] sm:$0xf] }
  0x62   : > { %375 = vst [vmem:[%s8628_s30 + $0x148] sm:$0xf] %v374_v18  ;;  %v502_v18 = vld [vmem:[%s8624_s29 + $0x920] sm:$0xf] }
  0x63   : > { %377 = vst [vmem:[%s8628_s30 + $0x14c] sm:$0xf] %v376_v19  ;;  %v504_v19 = vld [vmem:[%s8624_s29 + $0x930] sm:$0xf] }
  0x64   : > { %379 = vst [vmem:[%s8628_s30 + $0x150] sm:$0xf] %v378_v20  ;;  %v506_v20 = vld [vmem:[%s8624_s29 + $0x940] sm:$0xf] }
  0x65   : > { %381 = vst [vmem:[%s8628_s30 + $0x154] sm:$0xf] %v380_v21  ;;  %v508_v21 = vld [vmem:[%s8624_s29 + $0x950] sm:$0xf] }
  0x66   : > { %383 = vst [vmem:[%s8628_s30 + $0x158] sm:$0xf] %v382_v22  ;;  %v510_v22 = vld [vmem:[%s8624_s29 + $0x960] sm:$0xf] }
  0x67   : > { %385 = vst [vmem:[%s8628_s30 + $0x15c] sm:$0xf] %v384_v23  ;;  %v512_v23 = vld [vmem:[%s8624_s29 + $0x970] sm:$0xf] }
  0x68   : > { %387 = vst [vmem:[%s8628_s30 + $0x160] sm:$0xf] %v386_v24  ;;  %v514_v24 = vld [vmem:[%s8624_s29 + $0x980] sm:$0xf] }
  0x69   : > { %389 = vst [vmem:[%s8628_s30 + $0x164] sm:$0xf] %v388_v25  ;;  %v516_v25 = vld [vmem:[%s8624_s29 + $0x990] sm:$0xf] }
  0x6a   : > { %391 = vst [vmem:[%s8628_s30 + $0x168] sm:$0xf] %v390_v26  ;;  %v518_v26 = vld [vmem:[%s8624_s29 + $0x9a0] sm:$0xf] }
  0x6b   : > { %393 = vst [vmem:[%s8628_s30 + $0x16c] sm:$0xf] %v392_v27  ;;  %v520_v27 = vld [vmem:[%s8624_s29 + $0x9b0] sm:$0xf] }
  0x6c   : > { %395 = vst [vmem:[%s8628_s30 + $0x170] sm:$0xf] %v394_v28  ;;  %v522_v28 = vld [vmem:[%s8624_s29 + $0x9c0] sm:$0xf] }
  0x6d   : > { %397 = vst [vmem:[%s8628_s30 + $0x174] sm:$0xf] %v396_v29  ;;  %v524_v29 = vld [vmem:[%s8624_s29 + $0x9d0] sm:$0xf] }
  0x6e   : > { %399 = vst [vmem:[%s8628_s30 + $0x178] sm:$0xf] %v398_v30  ;;  %v526_v30 = vld [vmem:[%s8624_s29 + $0x9e0] sm:$0xf] }
  0x6f   : > { %401 = vst [vmem:[%s8628_s30 + $0x17c] sm:$0xf] %v400_v31  ;;  %v528_v31 = vld [vmem:[%s8624_s29 + $0x9f0] sm:$0xf] }
  0x70   : > { %403 = vst [vmem:[%s8628_s30 + $0x180] sm:$0xf] %v402_v32  ;;  %v530_v32 = vld [vmem:[%s8624_s29 + $0xa00] sm:$0xf] }
  0x71   : > { %405 = vst [vmem:[%s8628_s30 + $0x184] sm:$0xf] %v404_v33  ;;  %v532_v33 = vld [vmem:[%s8624_s29 + $0xa10] sm:$0xf] }
  0x72   : > { %407 = vst [vmem:[%s8628_s30 + $0x188] sm:$0xf] %v406_v34  ;;  %v534_v34 = vld [vmem:[%s8624_s29 + $0xa20] sm:$0xf] }
  0x73   : > { %409 = vst [vmem:[%s8628_s30 + $0x18c] sm:$0xf] %v408_v35  ;;  %v536_v35 = vld [vmem:[%s8624_s29 + $0xa30] sm:$0xf] }
  0x74   : > { %411 = vst [vmem:[%s8628_s30 + $0x190] sm:$0xf] %v410_v36  ;;  %v538_v36 = vld [vmem:[%s8624_s29 + $0xa40] sm:$0xf] }
  0x75   : > { %413 = vst [vmem:[%s8628_s30 + $0x194] sm:$0xf] %v412_v37  ;;  %v540_v37 = vld [vmem:[%s8624_s29 + $0xa50] sm:$0xf] }
  0x76   : > { %415 = vst [vmem:[%s8628_s30 + $0x198] sm:$0xf] %v414_v38  ;;  %v542_v38 = vld [vmem:[%s8624_s29 + $0xa60] sm:$0xf] }
  0x77   : > { %417 = vst [vmem:[%s8628_s30 + $0x19c] sm:$0xf] %v416_v39  ;;  %v544_v39 = vld [vmem:[%s8624_s29 + $0xa70] sm:$0xf] }
  0x78   : > { %419 = vst [vmem:[%s8628_s30 + $0x1a0] sm:$0xf] %v418_v40  ;;  %v546_v40 = vld [vmem:[%s8624_s29 + $0xa80] sm:$0xf] }
  0x79   : > { %421 = vst [vmem:[%s8628_s30 + $0x1a4] sm:$0xf] %v420_v41  ;;  %v548_v41 = vld [vmem:[%s8624_s29 + $0xa90] sm:$0xf] }
  0x7a   : > { %423 = vst [vmem:[%s8628_s30 + $0x1a8] sm:$0xf] %v422_v42  ;;  %v550_v42 = vld [vmem:[%s8624_s29 + $0xaa0] sm:$0xf] }
  0x7b   : > { %425 = vst [vmem:[%s8628_s30 + $0x1ac] sm:$0xf] %v424_v43  ;;  %v552_v43 = vld [vmem:[%s8624_s29 + $0xab0] sm:$0xf] }
  0x7c   : > { %427 = vst [vmem:[%s8628_s30 + $0x1b0] sm:$0xf] %v426_v44  ;;  %v554_v44 = vld [vmem:[%s8624_s29 + $0xac0] sm:$0xf] }
  0x7d   : > { %429 = vst [vmem:[%s8628_s30 + $0x1b4] sm:$0xf] %v428_v45  ;;  %v556_v45 = vld [vmem:[%s8624_s29 + $0xad0] sm:$0xf] }
  0x7e   : > { %431 = vst [vmem:[%s8628_s30 + $0x1b8] sm:$0xf] %v430_v46  ;;  %v558_v46 = vld [vmem:[%s8624_s29 + $0xae0] sm:$0xf] }
  0x7f   : > { %433 = vst [vmem:[%s8628_s30 + $0x1bc] sm:$0xf] %v432_v47  ;;  %v560_v47 = vld [vmem:[%s8624_s29 + $0xaf0] sm:$0xf] }
  0x80   : > { %435 = vst [vmem:[%s8628_s30 + $0x1c0] sm:$0xf] %v434_v48  ;;  %v562_v48 = vld [vmem:[%s8624_s29 + $0xb00] sm:$0xf] }
  0x81   : > { %437 = vst [vmem:[%s8628_s30 + $0x1c4] sm:$0xf] %v436_v49  ;;  %v564_v49 = vld [vmem:[%s8624_s29 + $0xb10] sm:$0xf] }
  0x82   : > { %439 = vst [vmem:[%s8628_s30 + $0x1c8] sm:$0xf] %v438_v50  ;;  %v566_v50 = vld [vmem:[%s8624_s29 + $0xb20] sm:$0xf] }
  0x83   : > { %441 = vst [vmem:[%s8628_s30 + $0x1cc] sm:$0xf] %v440_v51  ;;  %v568_v51 = vld [vmem:[%s8624_s29 + $0xb30] sm:$0xf] }
  0x84   : > { %443 = vst [vmem:[%s8628_s30 + $0x1d0] sm:$0xf] %v442_v52  ;;  %v570_v52 = vld [vmem:[%s8624_s29 + $0xb40] sm:$0xf] }
  0x85   : > { %445 = vst [vmem:[%s8628_s30 + $0x1d4] sm:$0xf] %v444_v53  ;;  %v572_v53 = vld [vmem:[%s8624_s29 + $0xb50] sm:$0xf] }
  0x86   : > { %447 = vst [vmem:[%s8628_s30 + $0x1d8] sm:$0xf] %v446_v54  ;;  %v574_v54 = vld [vmem:[%s8624_s29 + $0xb60] sm:$0xf] }
  0x87   : > { %449 = vst [vmem:[%s8628_s30 + $0x1dc] sm:$0xf] %v448_v55  ;;  %v576_v55 = vld [vmem:[%s8624_s29 + $0xb70] sm:$0xf] }
  0x88   : > { %451 = vst [vmem:[%s8628_s30 + $0x1e0] sm:$0xf] %v450_v56  ;;  %v578_v56 = vld [vmem:[%s8624_s29 + $0xb80] sm:$0xf] }
  0x89   : > { %453 = vst [vmem:[%s8628_s30 + $0x1e4] sm:$0xf] %v452_v57  ;;  %v580_v57 = vld [vmem:[%s8624_s29 + $0xb90] sm:$0xf] }
  0x8a   : > { %455 = vst [vmem:[%s8628_s30 + $0x1e8] sm:$0xf] %v454_v58  ;;  %v582_v58 = vld [vmem:[%s8624_s29 + $0xba0] sm:$0xf] }
  0x8b   : > { %457 = vst [vmem:[%s8628_s30 + $0x1ec] sm:$0xf] %v456_v59  ;;  %v584_v59 = vld [vmem:[%s8624_s29 + $0xbb0] sm:$0xf] }
  0x8c   : > { %459 = vst [vmem:[%s8628_s30 + $0x1f0] sm:$0xf] %v458_v60  ;;  %v586_v60 = vld [vmem:[%s8624_s29 + $0xbc0] sm:$0xf] }
  0x8d   : > { %461 = vst [vmem:[%s8628_s30 + $0x1f4] sm:$0xf] %v460_v61  ;;  %v588_v61 = vld [vmem:[%s8624_s29 + $0xbd0] sm:$0xf] }
  0x8e   : > { %463 = vst [vmem:[%s8628_s30 + $0x1f8] sm:$0xf] %v462_v62  ;;  %v590_v62 = vld [vmem:[%s8624_s29 + $0xbe0] sm:$0xf] }
  0x8f   : > { %465 = vst [vmem:[%s8628_s30 + $0x1fc] sm:$0xf] %v464_v63  ;;  %v592_v63 = vld [vmem:[%s8624_s29 + $0xbf0] sm:$0xf] }
  0x90   : > { %467 = vst [vmem:[%s8628_s30 + $0x200] sm:$0xf] %v466_v0  ;;  %v594_v0 = vld [vmem:[%s8624_s29 + $0xc00] sm:$0xf] }
  0x91   : > { %469 = vst [vmem:[%s8628_s30 + $0x204] sm:$0xf] %v468_v1  ;;  %v596_v1 = vld [vmem:[%s8624_s29 + $0xc10] sm:$0xf] }
  0x92   : > { %471 = vst [vmem:[%s8628_s30 + $0x208] sm:$0xf] %v470_v2  ;;  %v598_v2 = vld [vmem:[%s8624_s29 + $0xc20] sm:$0xf] }
  0x93   : > { %473 = vst [vmem:[%s8628_s30 + $0x20c] sm:$0xf] %v472_v3  ;;  %v600_v3 = vld [vmem:[%s8624_s29 + $0xc30] sm:$0xf] }
  0x94   : > { %475 = vst [vmem:[%s8628_s30 + $0x210] sm:$0xf] %v474_v4  ;;  %v602_v4 = vld [vmem:[%s8624_s29 + $0xc40] sm:$0xf] }
  0x95   : > { %477 = vst [vmem:[%s8628_s30 + $0x214] sm:$0xf] %v476_v5  ;;  %v604_v5 = vld [vmem:[%s8624_s29 + $0xc50] sm:$0xf] }
  0x96   : > { %479 = vst [vmem:[%s8628_s30 + $0x218] sm:$0xf] %v478_v6  ;;  %v606_v6 = vld [vmem:[%s8624_s29 + $0xc60] sm:$0xf] }
  0x97   : > { %481 = vst [vmem:[%s8628_s30 + $0x21c] sm:$0xf] %v480_v7  ;;  %v608_v7 = vld [vmem:[%s8624_s29 + $0xc70] sm:$0xf] }
  0x98   : > { %483 = vst [vmem:[%s8628_s30 + $0x220] sm:$0xf] %v482_v8  ;;  %v610_v8 = vld [vmem:[%s8624_s29 + $0xc80] sm:$0xf] }
  0x99   : > { %485 = vst [vmem:[%s8628_s30 + $0x224] sm:$0xf] %v484_v9  ;;  %v612_v9 = vld [vmem:[%s8624_s29 + $0xc90] sm:$0xf] }
  0x9a   : > { %487 = vst [vmem:[%s8628_s30 + $0x228] sm:$0xf] %v486_v10  ;;  %v614_v10 = vld [vmem:[%s8624_s29 + $0xca0] sm:$0xf] }
  0x9b   : > { %489 = vst [vmem:[%s8628_s30 + $0x22c] sm:$0xf] %v488_v11  ;;  %v616_v11 = vld [vmem:[%s8624_s29 + $0xcb0] sm:$0xf] }
  0x9c   : > { %491 = vst [vmem:[%s8628_s30 + $0x230] sm:$0xf] %v490_v12  ;;  %v618_v12 = vld [vmem:[%s8624_s29 + $0xcc0] sm:$0xf] }
  0x9d   : > { %493 = vst [vmem:[%s8628_s30 + $0x234] sm:$0xf] %v492_v13  ;;  %v620_v13 = vld [vmem:[%s8624_s29 + $0xcd0] sm:$0xf] }
  0x9e   : > { %495 = vst [vmem:[%s8628_s30 + $0x238] sm:$0xf] %v494_v14  ;;  %v622_v14 = vld [vmem:[%s8624_s29 + $0xce0] sm:$0xf] }
  0x9f   : > { %497 = vst [vmem:[%s8628_s30 + $0x23c] sm:$0xf] %v496_v15  ;;  %v624_v15 = vld [vmem:[%s8624_s29 + $0xcf0] sm:$0xf] }
  0xa0   : > { %499 = vst [vmem:[%s8628_s30 + $0x240] sm:$0xf] %v498_v16  ;;  %v626_v16 = vld [vmem:[%s8624_s29 + $0xd00] sm:$0xf] }
  0xa1   : > { %501 = vst [vmem:[%s8628_s30 + $0x244] sm:$0xf] %v500_v17  ;;  %v628_v17 = vld [vmem:[%s8624_s29 + $0xd10] sm:$0xf] }
  0xa2   : > { %503 = vst [vmem:[%s8628_s30 + $0x248] sm:$0xf] %v502_v18  ;;  %v630_v18 = vld [vmem:[%s8624_s29 + $0xd20] sm:$0xf] }
  0xa3   : > { %505 = vst [vmem:[%s8628_s30 + $0x24c] sm:$0xf] %v504_v19  ;;  %v632_v19 = vld [vmem:[%s8624_s29 + $0xd30] sm:$0xf] }
  0xa4   : > { %507 = vst [vmem:[%s8628_s30 + $0x250] sm:$0xf] %v506_v20  ;;  %v634_v20 = vld [vmem:[%s8624_s29 + $0xd40] sm:$0xf] }
  0xa5   : > { %509 = vst [vmem:[%s8628_s30 + $0x254] sm:$0xf] %v508_v21  ;;  %v636_v21 = vld [vmem:[%s8624_s29 + $0xd50] sm:$0xf] }
  0xa6   : > { %511 = vst [vmem:[%s8628_s30 + $0x258] sm:$0xf] %v510_v22  ;;  %v638_v22 = vld [vmem:[%s8624_s29 + $0xd60] sm:$0xf] }
  0xa7   : > { %513 = vst [vmem:[%s8628_s30 + $0x25c] sm:$0xf] %v512_v23  ;;  %v640_v23 = vld [vmem:[%s8624_s29 + $0xd70] sm:$0xf] }
  0xa8   : > { %515 = vst [vmem:[%s8628_s30 + $0x260] sm:$0xf] %v514_v24  ;;  %v642_v24 = vld [vmem:[%s8624_s29 + $0xd80] sm:$0xf] }
  0xa9   : > { %517 = vst [vmem:[%s8628_s30 + $0x264] sm:$0xf] %v516_v25  ;;  %v644_v25 = vld [vmem:[%s8624_s29 + $0xd90] sm:$0xf] }
  0xaa   : > { %519 = vst [vmem:[%s8628_s30 + $0x268] sm:$0xf] %v518_v26  ;;  %v646_v26 = vld [vmem:[%s8624_s29 + $0xda0] sm:$0xf] }
  0xab   : > { %521 = vst [vmem:[%s8628_s30 + $0x26c] sm:$0xf] %v520_v27  ;;  %v648_v27 = vld [vmem:[%s8624_s29 + $0xdb0] sm:$0xf] }
  0xac   : > { %523 = vst [vmem:[%s8628_s30 + $0x270] sm:$0xf] %v522_v28  ;;  %v650_v28 = vld [vmem:[%s8624_s29 + $0xdc0] sm:$0xf] }
  0xad   : > { %525 = vst [vmem:[%s8628_s30 + $0x274] sm:$0xf] %v524_v29  ;;  %v652_v29 = vld [vmem:[%s8624_s29 + $0xdd0] sm:$0xf] }
  0xae   : > { %527 = vst [vmem:[%s8628_s30 + $0x278] sm:$0xf] %v526_v30  ;;  %v654_v30 = vld [vmem:[%s8624_s29 + $0xde0] sm:$0xf] }
  0xaf   : > { %529 = vst [vmem:[%s8628_s30 + $0x27c] sm:$0xf] %v528_v31  ;;  %v656_v31 = vld [vmem:[%s8624_s29 + $0xdf0] sm:$0xf] }
  0xb0   : > { %531 = vst [vmem:[%s8628_s30 + $0x280] sm:$0xf] %v530_v32  ;;  %v658_v32 = vld [vmem:[%s8624_s29 + $0xe00] sm:$0xf] }
  0xb1   : > { %533 = vst [vmem:[%s8628_s30 + $0x284] sm:$0xf] %v532_v33  ;;  %v660_v33 = vld [vmem:[%s8624_s29 + $0xe10] sm:$0xf] }
  0xb2   : > { %535 = vst [vmem:[%s8628_s30 + $0x288] sm:$0xf] %v534_v34  ;;  %v662_v34 = vld [vmem:[%s8624_s29 + $0xe20] sm:$0xf] }
  0xb3   : > { %537 = vst [vmem:[%s8628_s30 + $0x28c] sm:$0xf] %v536_v35  ;;  %v664_v35 = vld [vmem:[%s8624_s29 + $0xe30] sm:$0xf] }
  0xb4   : > { %539 = vst [vmem:[%s8628_s30 + $0x290] sm:$0xf] %v538_v36  ;;  %v666_v36 = vld [vmem:[%s8624_s29 + $0xe40] sm:$0xf] }
  0xb5   : > { %541 = vst [vmem:[%s8628_s30 + $0x294] sm:$0xf] %v540_v37  ;;  %v668_v37 = vld [vmem:[%s8624_s29 + $0xe50] sm:$0xf] }
  0xb6   : > { %543 = vst [vmem:[%s8628_s30 + $0x298] sm:$0xf] %v542_v38  ;;  %v670_v38 = vld [vmem:[%s8624_s29 + $0xe60] sm:$0xf] }
  0xb7   : > { %545 = vst [vmem:[%s8628_s30 + $0x29c] sm:$0xf] %v544_v39  ;;  %v672_v39 = vld [vmem:[%s8624_s29 + $0xe70] sm:$0xf] }
  0xb8   : > { %547 = vst [vmem:[%s8628_s30 + $0x2a0] sm:$0xf] %v546_v40  ;;  %v674_v40 = vld [vmem:[%s8624_s29 + $0xe80] sm:$0xf] }
  0xb9   : > { %549 = vst [vmem:[%s8628_s30 + $0x2a4] sm:$0xf] %v548_v41  ;;  %v676_v41 = vld [vmem:[%s8624_s29 + $0xe90] sm:$0xf] }
  0xba   : > { %551 = vst [vmem:[%s8628_s30 + $0x2a8] sm:$0xf] %v550_v42  ;;  %v678_v42 = vld [vmem:[%s8624_s29 + $0xea0] sm:$0xf] }
  0xbb   : > { %553 = vst [vmem:[%s8628_s30 + $0x2ac] sm:$0xf] %v552_v43  ;;  %v680_v43 = vld [vmem:[%s8624_s29 + $0xeb0] sm:$0xf] }
  0xbc   : > { %555 = vst [vmem:[%s8628_s30 + $0x2b0] sm:$0xf] %v554_v44  ;;  %v682_v44 = vld [vmem:[%s8624_s29 + $0xec0] sm:$0xf] }
  0xbd   : > { %557 = vst [vmem:[%s8628_s30 + $0x2b4] sm:$0xf] %v556_v45  ;;  %v684_v45 = vld [vmem:[%s8624_s29 + $0xed0] sm:$0xf] }
  0xbe   : > { %559 = vst [vmem:[%s8628_s30 + $0x2b8] sm:$0xf] %v558_v46  ;;  %v686_v46 = vld [vmem:[%s8624_s29 + $0xee0] sm:$0xf] }
  0xbf   : > { %561 = vst [vmem:[%s8628_s30 + $0x2bc] sm:$0xf] %v560_v47  ;;  %v688_v47 = vld [vmem:[%s8624_s29 + $0xef0] sm:$0xf] }
  0xc0   : > { %563 = vst [vmem:[%s8628_s30 + $0x2c0] sm:$0xf] %v562_v48  ;;  %v690_v48 = vld [vmem:[%s8624_s29 + $0xf00] sm:$0xf] }
  0xc1   : > { %565 = vst [vmem:[%s8628_s30 + $0x2c4] sm:$0xf] %v564_v49  ;;  %v692_v49 = vld [vmem:[%s8624_s29 + $0xf10] sm:$0xf] }
  0xc2   : > { %567 = vst [vmem:[%s8628_s30 + $0x2c8] sm:$0xf] %v566_v50  ;;  %v694_v50 = vld [vmem:[%s8624_s29 + $0xf20] sm:$0xf] }
  0xc3   : > { %569 = vst [vmem:[%s8628_s30 + $0x2cc] sm:$0xf] %v568_v51  ;;  %v696_v51 = vld [vmem:[%s8624_s29 + $0xf30] sm:$0xf] }
  0xc4   : > { %571 = vst [vmem:[%s8628_s30 + $0x2d0] sm:$0xf] %v570_v52  ;;  %v698_v52 = vld [vmem:[%s8624_s29 + $0xf40] sm:$0xf] }
  0xc5   : > { %573 = vst [vmem:[%s8628_s30 + $0x2d4] sm:$0xf] %v572_v53  ;;  %v700_v53 = vld [vmem:[%s8624_s29 + $0xf50] sm:$0xf] }
  0xc6   : > { %575 = vst [vmem:[%s8628_s30 + $0x2d8] sm:$0xf] %v574_v54  ;;  %v702_v54 = vld [vmem:[%s8624_s29 + $0xf60] sm:$0xf] }
  0xc7   : > { %577 = vst [vmem:[%s8628_s30 + $0x2dc] sm:$0xf] %v576_v55  ;;  %v704_v55 = vld [vmem:[%s8624_s29 + $0xf70] sm:$0xf] }
  0xc8   : > { %579 = vst [vmem:[%s8628_s30 + $0x2e0] sm:$0xf] %v578_v56  ;;  %v706_v56 = vld [vmem:[%s8624_s29 + $0xf80] sm:$0xf] }
  0xc9   : > { %581 = vst [vmem:[%s8628_s30 + $0x2e4] sm:$0xf] %v580_v57  ;;  %v708_v57 = vld [vmem:[%s8624_s29 + $0xf90] sm:$0xf] }
  0xca   : > { %583 = vst [vmem:[%s8628_s30 + $0x2e8] sm:$0xf] %v582_v58  ;;  %v710_v58 = vld [vmem:[%s8624_s29 + $0xfa0] sm:$0xf] }
  0xcb   : > { %585 = vst [vmem:[%s8628_s30 + $0x2ec] sm:$0xf] %v584_v59  ;;  %v712_v59 = vld [vmem:[%s8624_s29 + $0xfb0] sm:$0xf] }
  0xcc   : > { %587 = vst [vmem:[%s8628_s30 + $0x2f0] sm:$0xf] %v586_v60  ;;  %v714_v60 = vld [vmem:[%s8624_s29 + $0xfc0] sm:$0xf] }
  0xcd   : > { %589 = vst [vmem:[%s8628_s30 + $0x2f4] sm:$0xf] %v588_v61  ;;  %v716_v61 = vld [vmem:[%s8624_s29 + $0xfd0] sm:$0xf] }
  0xce   : > { %591 = vst [vmem:[%s8628_s30 + $0x2f8] sm:$0xf] %v590_v62  ;;  %v718_v62 = vld [vmem:[%s8624_s29 + $0xfe0] sm:$0xf] }
  0xcf   : > { %593 = vst [vmem:[%s8628_s30 + $0x2fc] sm:$0xf] %v592_v63  ;;  %v720_v63 = vld [vmem:[%s8624_s29 + $0xff0] sm:$0xf] }
  0xd0   : > { %595 = vst [vmem:[%s8628_s30 + $0x300] sm:$0xf] %v594_v0  ;;  %v722_v0 = vld [vmem:[%s8624_s29 + $0x1000] sm:$0xf] }
  0xd1   : > { %597 = vst [vmem:[%s8628_s30 + $0x304] sm:$0xf] %v596_v1  ;;  %v724_v1 = vld [vmem:[%s8624_s29 + $0x1010] sm:$0xf] }
  0xd2   : > { %599 = vst [vmem:[%s8628_s30 + $0x308] sm:$0xf] %v598_v2  ;;  %v726_v2 = vld [vmem:[%s8624_s29 + $0x1020] sm:$0xf] }
  0xd3   : > { %601 = vst [vmem:[%s8628_s30 + $0x30c] sm:$0xf] %v600_v3  ;;  %v728_v3 = vld [vmem:[%s8624_s29 + $0x1030] sm:$0xf] }
  0xd4   : > { %603 = vst [vmem:[%s8628_s30 + $0x310] sm:$0xf] %v602_v4  ;;  %v730_v4 = vld [vmem:[%s8624_s29 + $0x1040] sm:$0xf] }
  0xd5   : > { %605 = vst [vmem:[%s8628_s30 + $0x314] sm:$0xf] %v604_v5  ;;  %v732_v5 = vld [vmem:[%s8624_s29 + $0x1050] sm:$0xf] }
  0xd6   : > { %607 = vst [vmem:[%s8628_s30 + $0x318] sm:$0xf] %v606_v6  ;;  %v734_v6 = vld [vmem:[%s8624_s29 + $0x1060] sm:$0xf] }
  0xd7   : > { %609 = vst [vmem:[%s8628_s30 + $0x31c] sm:$0xf] %v608_v7  ;;  %v736_v7 = vld [vmem:[%s8624_s29 + $0x1070] sm:$0xf] }
  0xd8   : > { %611 = vst [vmem:[%s8628_s30 + $0x320] sm:$0xf] %v610_v8  ;;  %v738_v8 = vld [vmem:[%s8624_s29 + $0x1080] sm:$0xf] }
  0xd9   : > { %613 = vst [vmem:[%s8628_s30 + $0x324] sm:$0xf] %v612_v9  ;;  %v740_v9 = vld [vmem:[%s8624_s29 + $0x1090] sm:$0xf] }
  0xda   : > { %615 = vst [vmem:[%s8628_s30 + $0x328] sm:$0xf] %v614_v10  ;;  %v742_v10 = vld [vmem:[%s8624_s29 + $0x10a0] sm:$0xf] }
  0xdb   : > { %617 = vst [vmem:[%s8628_s30 + $0x32c] sm:$0xf] %v616_v11  ;;  %v744_v11 = vld [vmem:[%s8624_s29 + $0x10b0] sm:$0xf] }
  0xdc   : > { %619 = vst [vmem:[%s8628_s30 + $0x330] sm:$0xf] %v618_v12  ;;  %v746_v12 = vld [vmem:[%s8624_s29 + $0x10c0] sm:$0xf] }
  0xdd   : > { %621 = vst [vmem:[%s8628_s30 + $0x334] sm:$0xf] %v620_v13  ;;  %v748_v13 = vld [vmem:[%s8624_s29 + $0x10d0] sm:$0xf] }
  0xde   : > { %623 = vst [vmem:[%s8628_s30 + $0x338] sm:$0xf] %v622_v14  ;;  %v750_v14 = vld [vmem:[%s8624_s29 + $0x10e0] sm:$0xf] }
  0xdf   : > { %625 = vst [vmem:[%s8628_s30 + $0x33c] sm:$0xf] %v624_v15  ;;  %v752_v15 = vld [vmem:[%s8624_s29 + $0x10f0] sm:$0xf] }
  0xe0   : > { %627 = vst [vmem:[%s8628_s30 + $0x340] sm:$0xf] %v626_v16  ;;  %v754_v16 = vld [vmem:[%s8624_s29 + $0x1100] sm:$0xf] }
  0xe1   : > { %629 = vst [vmem:[%s8628_s30 + $0x344] sm:$0xf] %v628_v17  ;;  %v756_v17 = vld [vmem:[%s8624_s29 + $0x1110] sm:$0xf] }
  0xe2   : > { %631 = vst [vmem:[%s8628_s30 + $0x348] sm:$0xf] %v630_v18  ;;  %v758_v18 = vld [vmem:[%s8624_s29 + $0x1120] sm:$0xf] }
  0xe3   : > { %633 = vst [vmem:[%s8628_s30 + $0x34c] sm:$0xf] %v632_v19  ;;  %v760_v19 = vld [vmem:[%s8624_s29 + $0x1130] sm:$0xf] }
  0xe4   : > { %635 = vst [vmem:[%s8628_s30 + $0x350] sm:$0xf] %v634_v20  ;;  %v762_v20 = vld [vmem:[%s8624_s29 + $0x1140] sm:$0xf] }
  0xe5   : > { %637 = vst [vmem:[%s8628_s30 + $0x354] sm:$0xf] %v636_v21  ;;  %v764_v21 = vld [vmem:[%s8624_s29 + $0x1150] sm:$0xf] }
  0xe6   : > { %639 = vst [vmem:[%s8628_s30 + $0x358] sm:$0xf] %v638_v22  ;;  %v766_v22 = vld [vmem:[%s8624_s29 + $0x1160] sm:$0xf] }
  0xe7   : > { %641 = vst [vmem:[%s8628_s30 + $0x35c] sm:$0xf] %v640_v23  ;;  %v768_v23 = vld [vmem:[%s8624_s29 + $0x1170] sm:$0xf] }
  0xe8   : > { %643 = vst [vmem:[%s8628_s30 + $0x360] sm:$0xf] %v642_v24  ;;  %v770_v24 = vld [vmem:[%s8624_s29 + $0x1180] sm:$0xf] }
  0xe9   : > { %645 = vst [vmem:[%s8628_s30 + $0x364] sm:$0xf] %v644_v25  ;;  %v772_v25 = vld [vmem:[%s8624_s29 + $0x1190] sm:$0xf] }
  0xea   : > { %647 = vst [vmem:[%s8628_s30 + $0x368] sm:$0xf] %v646_v26  ;;  %v774_v26 = vld [vmem:[%s8624_s29 + $0x11a0] sm:$0xf] }
  0xeb   : > { %649 = vst [vmem:[%s8628_s30 + $0x36c] sm:$0xf] %v648_v27  ;;  %v776_v27 = vld [vmem:[%s8624_s29 + $0x11b0] sm:$0xf] }
  0xec   : > { %651 = vst [vmem:[%s8628_s30 + $0x370] sm:$0xf] %v650_v28  ;;  %v778_v28 = vld [vmem:[%s8624_s29 + $0x11c0] sm:$0xf] }
  0xed   : > { %653 = vst [vmem:[%s8628_s30 + $0x374] sm:$0xf] %v652_v29  ;;  %v780_v29 = vld [vmem:[%s8624_s29 + $0x11d0] sm:$0xf] }
  0xee   : > { %655 = vst [vmem:[%s8628_s30 + $0x378] sm:$0xf] %v654_v30  ;;  %v782_v30 = vld [vmem:[%s8624_s29 + $0x11e0] sm:$0xf] }
  0xef   : > { %657 = vst [vmem:[%s8628_s30 + $0x37c] sm:$0xf] %v656_v31  ;;  %v784_v31 = vld [vmem:[%s8624_s29 + $0x11f0] sm:$0xf] }
  0xf0   : > { %659 = vst [vmem:[%s8628_s30 + $0x380] sm:$0xf] %v658_v32  ;;  %v786_v32 = vld [vmem:[%s8624_s29 + $0x1200] sm:$0xf] }
  0xf1   : > { %661 = vst [vmem:[%s8628_s30 + $0x384] sm:$0xf] %v660_v33  ;;  %v788_v33 = vld [vmem:[%s8624_s29 + $0x1210] sm:$0xf] }
  0xf2   : > { %663 = vst [vmem:[%s8628_s30 + $0x388] sm:$0xf] %v662_v34  ;;  %v790_v34 = vld [vmem:[%s8624_s29 + $0x1220] sm:$0xf] }
  0xf3   : > { %665 = vst [vmem:[%s8628_s30 + $0x38c] sm:$0xf] %v664_v35  ;;  %v792_v35 = vld [vmem:[%s8624_s29 + $0x1230] sm:$0xf] }
  0xf4   : > { %667 = vst [vmem:[%s8628_s30 + $0x390] sm:$0xf] %v666_v36  ;;  %v794_v36 = vld [vmem:[%s8624_s29 + $0x1240] sm:$0xf] }
  0xf5   : > { %669 = vst [vmem:[%s8628_s30 + $0x394] sm:$0xf] %v668_v37  ;;  %v796_v37 = vld [vmem:[%s8624_s29 + $0x1250] sm:$0xf] }
  0xf6   : > { %671 = vst [vmem:[%s8628_s30 + $0x398] sm:$0xf] %v670_v38  ;;  %v798_v38 = vld [vmem:[%s8624_s29 + $0x1260] sm:$0xf] }
  0xf7   : > { %673 = vst [vmem:[%s8628_s30 + $0x39c] sm:$0xf] %v672_v39  ;;  %v800_v39 = vld [vmem:[%s8624_s29 + $0x1270] sm:$0xf] }
  0xf8   : > { %675 = vst [vmem:[%s8628_s30 + $0x3a0] sm:$0xf] %v674_v40  ;;  %v802_v40 = vld [vmem:[%s8624_s29 + $0x1280] sm:$0xf] }
  0xf9   : > { %677 = vst [vmem:[%s8628_s30 + $0x3a4] sm:$0xf] %v676_v41  ;;  %v804_v41 = vld [vmem:[%s8624_s29 + $0x1290] sm:$0xf] }
  0xfa   : > { %679 = vst [vmem:[%s8628_s30 + $0x3a8] sm:$0xf] %v678_v42  ;;  %v806_v42 = vld [vmem:[%s8624_s29 + $0x12a0] sm:$0xf] }
  0xfb   : > { %681 = vst [vmem:[%s8628_s30 + $0x3ac] sm:$0xf] %v680_v43  ;;  %v808_v43 = vld [vmem:[%s8624_s29 + $0x12b0] sm:$0xf] }
  0xfc   : > { %683 = vst [vmem:[%s8628_s30 + $0x3b0] sm:$0xf] %v682_v44  ;;  %v810_v44 = vld [vmem:[%s8624_s29 + $0x12c0] sm:$0xf] }
  0xfd   : > { %685 = vst [vmem:[%s8628_s30 + $0x3b4] sm:$0xf] %v684_v45  ;;  %v812_v45 = vld [vmem:[%s8624_s29 + $0x12d0] sm:$0xf] }
  0xfe   : > { %687 = vst [vmem:[%s8628_s30 + $0x3b8] sm:$0xf] %v686_v46  ;;  %v814_v46 = vld [vmem:[%s8624_s29 + $0x12e0] sm:$0xf] }
  0xff   : > { %689 = vst [vmem:[%s8628_s30 + $0x3bc] sm:$0xf] %v688_v47  ;;  %v816_v47 = vld [vmem:[%s8624_s29 + $0x12f0] sm:$0xf] }
 0x100   : > { %691 = vst [vmem:[%s8628_s30 + $0x3c0] sm:$0xf] %v690_v48  ;;  %v818_v48 = vld [vmem:[%s8624_s29 + $0x1300] sm:$0xf] }
 0x101   : > { %693 = vst [vmem:[%s8628_s30 + $0x3c4] sm:$0xf] %v692_v49  ;;  %v820_v49 = vld [vmem:[%s8624_s29 + $0x1310] sm:$0xf] }
 0x102   : > { %695 = vst [vmem:[%s8628_s30 + $0x3c8] sm:$0xf] %v694_v50  ;;  %v822_v50 = vld [vmem:[%s8624_s29 + $0x1320] sm:$0xf] }
 0x103   : > { %697 = vst [vmem:[%s8628_s30 + $0x3cc] sm:$0xf] %v696_v51  ;;  %v824_v51 = vld [vmem:[%s8624_s29 + $0x1330] sm:$0xf] }
 0x104   : > { %699 = vst [vmem:[%s8628_s30 + $0x3d0] sm:$0xf] %v698_v52  ;;  %v826_v52 = vld [vmem:[%s8624_s29 + $0x1340] sm:$0xf] }
 0x105   : > { %701 = vst [vmem:[%s8628_s30 + $0x3d4] sm:$0xf] %v700_v53  ;;  %v828_v53 = vld [vmem:[%s8624_s29 + $0x1350] sm:$0xf] }
 0x106   : > { %703 = vst [vmem:[%s8628_s30 + $0x3d8] sm:$0xf] %v702_v54  ;;  %v830_v54 = vld [vmem:[%s8624_s29 + $0x1360] sm:$0xf] }
 0x107   : > { %705 = vst [vmem:[%s8628_s30 + $0x3dc] sm:$0xf] %v704_v55  ;;  %v832_v55 = vld [vmem:[%s8624_s29 + $0x1370] sm:$0xf] }
 0x108   : > { %707 = vst [vmem:[%s8628_s30 + $0x3e0] sm:$0xf] %v706_v56  ;;  %v834_v56 = vld [vmem:[%s8624_s29 + $0x1380] sm:$0xf] }
 0x109   : > { %709 = vst [vmem:[%s8628_s30 + $0x3e4] sm:$0xf] %v708_v57  ;;  %v836_v57 = vld [vmem:[%s8624_s29 + $0x1390] sm:$0xf] }
 0x10a   : > { %711 = vst [vmem:[%s8628_s30 + $0x3e8] sm:$0xf] %v710_v58  ;;  %v838_v58 = vld [vmem:[%s8624_s29 + $0x13a0] sm:$0xf] }
 0x10b   : > { %713 = vst [vmem:[%s8628_s30 + $0x3ec] sm:$0xf] %v712_v59  ;;  %v840_v59 = vld [vmem:[%s8624_s29 + $0x13b0] sm:$0xf] }
 0x10c   : > { %715 = vst [vmem:[%s8628_s30 + $0x3f0] sm:$0xf] %v714_v60  ;;  %v842_v60 = vld [vmem:[%s8624_s29 + $0x13c0] sm:$0xf] }
 0x10d   : > { %717 = vst [vmem:[%s8628_s30 + $0x3f4] sm:$0xf] %v716_v61  ;;  %v844_v61 = vld [vmem:[%s8624_s29 + $0x13d0] sm:$0xf] }
 0x10e   : > { %719 = vst [vmem:[%s8628_s30 + $0x3f8] sm:$0xf] %v718_v62  ;;  %v846_v62 = vld [vmem:[%s8624_s29 + $0x13e0] sm:$0xf] }
 0x10f   : > { %721 = vst [vmem:[%s8628_s30 + $0x3fc] sm:$0xf] %v720_v63  ;;  %v848_v63 = vld [vmem:[%s8624_s29 + $0x13f0] sm:$0xf] }
 0x110   : > { %723 = vst [vmem:[%s8628_s30 + $0x400] sm:$0xf] %v722_v0  ;;  %v850_v0 = vld [vmem:[%s8624_s29 + $0x1400] sm:$0xf] }
 0x111   : > { %725 = vst [vmem:[%s8628_s30 + $0x404] sm:$0xf] %v724_v1  ;;  %v852_v1 = vld [vmem:[%s8624_s29 + $0x1410] sm:$0xf] }
 0x112   : > { %727 = vst [vmem:[%s8628_s30 + $0x408] sm:$0xf] %v726_v2  ;;  %v854_v2 = vld [vmem:[%s8624_s29 + $0x1420] sm:$0xf] }
 0x113   : > { %729 = vst [vmem:[%s8628_s30 + $0x40c] sm:$0xf] %v728_v3  ;;  %v856_v3 = vld [vmem:[%s8624_s29 + $0x1430] sm:$0xf] }
 0x114   : > { %731 = vst [vmem:[%s8628_s30 + $0x410] sm:$0xf] %v730_v4  ;;  %v858_v4 = vld [vmem:[%s8624_s29 + $0x1440] sm:$0xf] }
 0x115   : > { %733 = vst [vmem:[%s8628_s30 + $0x414] sm:$0xf] %v732_v5  ;;  %v860_v5 = vld [vmem:[%s8624_s29 + $0x1450] sm:$0xf] }
 0x116   : > { %735 = vst [vmem:[%s8628_s30 + $0x418] sm:$0xf] %v734_v6  ;;  %v862_v6 = vld [vmem:[%s8624_s29 + $0x1460] sm:$0xf] }
 0x117   : > { %737 = vst [vmem:[%s8628_s30 + $0x41c] sm:$0xf] %v736_v7  ;;  %v864_v7 = vld [vmem:[%s8624_s29 + $0x1470] sm:$0xf] }
 0x118   : > { %739 = vst [vmem:[%s8628_s30 + $0x420] sm:$0xf] %v738_v8  ;;  %v866_v8 = vld [vmem:[%s8624_s29 + $0x1480] sm:$0xf] }
 0x119   : > { %741 = vst [vmem:[%s8628_s30 + $0x424] sm:$0xf] %v740_v9  ;;  %v868_v9 = vld [vmem:[%s8624_s29 + $0x1490] sm:$0xf] }
 0x11a   : > { %743 = vst [vmem:[%s8628_s30 + $0x428] sm:$0xf] %v742_v10  ;;  %v870_v10 = vld [vmem:[%s8624_s29 + $0x14a0] sm:$0xf] }
 0x11b   : > { %745 = vst [vmem:[%s8628_s30 + $0x42c] sm:$0xf] %v744_v11  ;;  %v872_v11 = vld [vmem:[%s8624_s29 + $0x14b0] sm:$0xf] }
 0x11c   : > { %747 = vst [vmem:[%s8628_s30 + $0x430] sm:$0xf] %v746_v12  ;;  %v874_v12 = vld [vmem:[%s8624_s29 + $0x14c0] sm:$0xf] }
 0x11d   : > { %749 = vst [vmem:[%s8628_s30 + $0x434] sm:$0xf] %v748_v13  ;;  %v876_v13 = vld [vmem:[%s8624_s29 + $0x14d0] sm:$0xf] }
 0x11e   : > { %751 = vst [vmem:[%s8628_s30 + $0x438] sm:$0xf] %v750_v14  ;;  %v878_v14 = vld [vmem:[%s8624_s29 + $0x14e0] sm:$0xf] }
 0x11f   : > { %753 = vst [vmem:[%s8628_s30 + $0x43c] sm:$0xf] %v752_v15  ;;  %v880_v15 = vld [vmem:[%s8624_s29 + $0x14f0] sm:$0xf] }
 0x120   : > { %755 = vst [vmem:[%s8628_s30 + $0x440] sm:$0xf] %v754_v16  ;;  %v882_v16 = vld [vmem:[%s8624_s29 + $0x1500] sm:$0xf] }
 0x121   : > { %757 = vst [vmem:[%s8628_s30 + $0x444] sm:$0xf] %v756_v17  ;;  %v884_v17 = vld [vmem:[%s8624_s29 + $0x1510] sm:$0xf] }
 0x122   : > { %759 = vst [vmem:[%s8628_s30 + $0x448] sm:$0xf] %v758_v18  ;;  %v886_v18 = vld [vmem:[%s8624_s29 + $0x1520] sm:$0xf] }
 0x123   : > { %761 = vst [vmem:[%s8628_s30 + $0x44c] sm:$0xf] %v760_v19  ;;  %v888_v19 = vld [vmem:[%s8624_s29 + $0x1530] sm:$0xf] }
 0x124   : > { %763 = vst [vmem:[%s8628_s30 + $0x450] sm:$0xf] %v762_v20  ;;  %v890_v20 = vld [vmem:[%s8624_s29 + $0x1540] sm:$0xf] }
 0x125   : > { %765 = vst [vmem:[%s8628_s30 + $0x454] sm:$0xf] %v764_v21  ;;  %v892_v21 = vld [vmem:[%s8624_s29 + $0x1550] sm:$0xf] }
 0x126   : > { %767 = vst [vmem:[%s8628_s30 + $0x458] sm:$0xf] %v766_v22  ;;  %v894_v22 = vld [vmem:[%s8624_s29 + $0x1560] sm:$0xf] }
 0x127   : > { %769 = vst [vmem:[%s8628_s30 + $0x45c] sm:$0xf] %v768_v23  ;;  %v896_v23 = vld [vmem:[%s8624_s29 + $0x1570] sm:$0xf] }
 0x128   : > { %771 = vst [vmem:[%s8628_s30 + $0x460] sm:$0xf] %v770_v24  ;;  %v898_v24 = vld [vmem:[%s8624_s29 + $0x1580] sm:$0xf] }
 0x129   : > { %773 = vst [vmem:[%s8628_s30 + $0x464] sm:$0xf] %v772_v25  ;;  %v900_v25 = vld [vmem:[%s8624_s29 + $0x1590] sm:$0xf] }
 0x12a   : > { %775 = vst [vmem:[%s8628_s30 + $0x468] sm:$0xf] %v774_v26  ;;  %v902_v26 = vld [vmem:[%s8624_s29 + $0x15a0] sm:$0xf] }
 0x12b   : > { %777 = vst [vmem:[%s8628_s30 + $0x46c] sm:$0xf] %v776_v27  ;;  %v904_v27 = vld [vmem:[%s8624_s29 + $0x15b0] sm:$0xf] }
 0x12c   : > { %779 = vst [vmem:[%s8628_s30 + $0x470] sm:$0xf] %v778_v28  ;;  %v906_v28 = vld [vmem:[%s8624_s29 + $0x15c0] sm:$0xf] }
 0x12d   : > { %781 = vst [vmem:[%s8628_s30 + $0x474] sm:$0xf] %v780_v29  ;;  %v908_v29 = vld [vmem:[%s8624_s29 + $0x15d0] sm:$0xf] }
 0x12e   : > { %783 = vst [vmem:[%s8628_s30 + $0x478] sm:$0xf] %v782_v30  ;;  %v910_v30 = vld [vmem:[%s8624_s29 + $0x15e0] sm:$0xf] }
 0x12f   : > { %785 = vst [vmem:[%s8628_s30 + $0x47c] sm:$0xf] %v784_v31  ;;  %v912_v31 = vld [vmem:[%s8624_s29 + $0x15f0] sm:$0xf] }
 0x130   : > { %787 = vst [vmem:[%s8628_s30 + $0x480] sm:$0xf] %v786_v32  ;;  %v914_v32 = vld [vmem:[%s8624_s29 + $0x1600] sm:$0xf] }
 0x131   : > { %789 = vst [vmem:[%s8628_s30 + $0x484] sm:$0xf] %v788_v33  ;;  %v916_v33 = vld [vmem:[%s8624_s29 + $0x1610] sm:$0xf] }
 0x132   : > { %791 = vst [vmem:[%s8628_s30 + $0x488] sm:$0xf] %v790_v34  ;;  %v918_v34 = vld [vmem:[%s8624_s29 + $0x1620] sm:$0xf] }
 0x133   : > { %793 = vst [vmem:[%s8628_s30 + $0x48c] sm:$0xf] %v792_v35  ;;  %v920_v35 = vld [vmem:[%s8624_s29 + $0x1630] sm:$0xf] }
 0x134   : > { %795 = vst [vmem:[%s8628_s30 + $0x490] sm:$0xf] %v794_v36  ;;  %v922_v36 = vld [vmem:[%s8624_s29 + $0x1640] sm:$0xf] }
 0x135   : > { %797 = vst [vmem:[%s8628_s30 + $0x494] sm:$0xf] %v796_v37  ;;  %v924_v37 = vld [vmem:[%s8624_s29 + $0x1650] sm:$0xf] }
 0x136   : > { %799 = vst [vmem:[%s8628_s30 + $0x498] sm:$0xf] %v798_v38  ;;  %v926_v38 = vld [vmem:[%s8624_s29 + $0x1660] sm:$0xf] }
 0x137   : > { %801 = vst [vmem:[%s8628_s30 + $0x49c] sm:$0xf] %v800_v39  ;;  %v928_v39 = vld [vmem:[%s8624_s29 + $0x1670] sm:$0xf] }
 0x138   : > { %803 = vst [vmem:[%s8628_s30 + $0x4a0] sm:$0xf] %v802_v40  ;;  %v930_v40 = vld [vmem:[%s8624_s29 + $0x1680] sm:$0xf] }
 0x139   : > { %805 = vst [vmem:[%s8628_s30 + $0x4a4] sm:$0xf] %v804_v41  ;;  %v932_v41 = vld [vmem:[%s8624_s29 + $0x1690] sm:$0xf] }
 0x13a   : > { %807 = vst [vmem:[%s8628_s30 + $0x4a8] sm:$0xf] %v806_v42  ;;  %v934_v42 = vld [vmem:[%s8624_s29 + $0x16a0] sm:$0xf] }
 0x13b   : > { %809 = vst [vmem:[%s8628_s30 + $0x4ac] sm:$0xf] %v808_v43  ;;  %v936_v43 = vld [vmem:[%s8624_s29 + $0x16b0] sm:$0xf] }
 0x13c   : > { %811 = vst [vmem:[%s8628_s30 + $0x4b0] sm:$0xf] %v810_v44  ;;  %v938_v44 = vld [vmem:[%s8624_s29 + $0x16c0] sm:$0xf] }
 0x13d   : > { %813 = vst [vmem:[%s8628_s30 + $0x4b4] sm:$0xf] %v812_v45  ;;  %v940_v45 = vld [vmem:[%s8624_s29 + $0x16d0] sm:$0xf] }
 0x13e   : > { %815 = vst [vmem:[%s8628_s30 + $0x4b8] sm:$0xf] %v814_v46  ;;  %v942_v46 = vld [vmem:[%s8624_s29 + $0x16e0] sm:$0xf] }
 0x13f   : > { %817 = vst [vmem:[%s8628_s30 + $0x4bc] sm:$0xf] %v816_v47  ;;  %v944_v47 = vld [vmem:[%s8624_s29 + $0x16f0] sm:$0xf] }
 0x140   : > { %819 = vst [vmem:[%s8628_s30 + $0x4c0] sm:$0xf] %v818_v48  ;;  %v946_v48 = vld [vmem:[%s8624_s29 + $0x1700] sm:$0xf] }
 0x141   : > { %821 = vst [vmem:[%s8628_s30 + $0x4c4] sm:$0xf] %v820_v49  ;;  %v948_v49 = vld [vmem:[%s8624_s29 + $0x1710] sm:$0xf] }
 0x142   : > { %823 = vst [vmem:[%s8628_s30 + $0x4c8] sm:$0xf] %v822_v50  ;;  %v950_v50 = vld [vmem:[%s8624_s29 + $0x1720] sm:$0xf] }
 0x143   : > { %825 = vst [vmem:[%s8628_s30 + $0x4cc] sm:$0xf] %v824_v51  ;;  %v952_v51 = vld [vmem:[%s8624_s29 + $0x1730] sm:$0xf] }
 0x144   : > { %827 = vst [vmem:[%s8628_s30 + $0x4d0] sm:$0xf] %v826_v52  ;;  %v954_v52 = vld [vmem:[%s8624_s29 + $0x1740] sm:$0xf] }
 0x145   : > { %829 = vst [vmem:[%s8628_s30 + $0x4d4] sm:$0xf] %v828_v53  ;;  %v956_v53 = vld [vmem:[%s8624_s29 + $0x1750] sm:$0xf] }
 0x146   : > { %831 = vst [vmem:[%s8628_s30 + $0x4d8] sm:$0xf] %v830_v54  ;;  %v958_v54 = vld [vmem:[%s8624_s29 + $0x1760] sm:$0xf] }
 0x147   : > { %833 = vst [vmem:[%s8628_s30 + $0x4dc] sm:$0xf] %v832_v55  ;;  %v960_v55 = vld [vmem:[%s8624_s29 + $0x1770] sm:$0xf] }
 0x148   : > { %835 = vst [vmem:[%s8628_s30 + $0x4e0] sm:$0xf] %v834_v56  ;;  %v962_v56 = vld [vmem:[%s8624_s29 + $0x1780] sm:$0xf] }
 0x149   : > { %837 = vst [vmem:[%s8628_s30 + $0x4e4] sm:$0xf] %v836_v57  ;;  %v964_v57 = vld [vmem:[%s8624_s29 + $0x1790] sm:$0xf] }
 0x14a   : > { %839 = vst [vmem:[%s8628_s30 + $0x4e8] sm:$0xf] %v838_v58  ;;  %v966_v58 = vld [vmem:[%s8624_s29 + $0x17a0] sm:$0xf] }
 0x14b   : > { %841 = vst [vmem:[%s8628_s30 + $0x4ec] sm:$0xf] %v840_v59  ;;  %v968_v59 = vld [vmem:[%s8624_s29 + $0x17b0] sm:$0xf] }
 0x14c   : > { %843 = vst [vmem:[%s8628_s30 + $0x4f0] sm:$0xf] %v842_v60  ;;  %v970_v60 = vld [vmem:[%s8624_s29 + $0x17c0] sm:$0xf] }
 0x14d   : > { %845 = vst [vmem:[%s8628_s30 + $0x4f4] sm:$0xf] %v844_v61  ;;  %v972_v61 = vld [vmem:[%s8624_s29 + $0x17d0] sm:$0xf] }
 0x14e   : > { %847 = vst [vmem:[%s8628_s30 + $0x4f8] sm:$0xf] %v846_v62  ;;  %v974_v62 = vld [vmem:[%s8624_s29 + $0x17e0] sm:$0xf] }
 0x14f   : > { %849 = vst [vmem:[%s8628_s30 + $0x4fc] sm:$0xf] %v848_v63  ;;  %v976_v63 = vld [vmem:[%s8624_s29 + $0x17f0] sm:$0xf] }
 0x150   : > { %851 = vst [vmem:[%s8628_s30 + $0x500] sm:$0xf] %v850_v0  ;;  %v978_v0 = vld [vmem:[%s8624_s29 + $0x1800] sm:$0xf] }
 0x151   : > { %853 = vst [vmem:[%s8628_s30 + $0x504] sm:$0xf] %v852_v1  ;;  %v980_v1 = vld [vmem:[%s8624_s29 + $0x1810] sm:$0xf] }
 0x152   : > { %855 = vst [vmem:[%s8628_s30 + $0x508] sm:$0xf] %v854_v2  ;;  %v982_v2 = vld [vmem:[%s8624_s29 + $0x1820] sm:$0xf] }
 0x153   : > { %857 = vst [vmem:[%s8628_s30 + $0x50c] sm:$0xf] %v856_v3  ;;  %v984_v3 = vld [vmem:[%s8624_s29 + $0x1830] sm:$0xf] }
 0x154   : > { %859 = vst [vmem:[%s8628_s30 + $0x510] sm:$0xf] %v858_v4  ;;  %v986_v4 = vld [vmem:[%s8624_s29 + $0x1840] sm:$0xf] }
 0x155   : > { %861 = vst [vmem:[%s8628_s30 + $0x514] sm:$0xf] %v860_v5  ;;  %v988_v5 = vld [vmem:[%s8624_s29 + $0x1850] sm:$0xf] }
 0x156   : > { %863 = vst [vmem:[%s8628_s30 + $0x518] sm:$0xf] %v862_v6  ;;  %v990_v6 = vld [vmem:[%s8624_s29 + $0x1860] sm:$0xf] }
 0x157   : > { %865 = vst [vmem:[%s8628_s30 + $0x51c] sm:$0xf] %v864_v7  ;;  %v992_v7 = vld [vmem:[%s8624_s29 + $0x1870] sm:$0xf] }
 0x158   : > { %867 = vst [vmem:[%s8628_s30 + $0x520] sm:$0xf] %v866_v8  ;;  %v994_v8 = vld [vmem:[%s8624_s29 + $0x1880] sm:$0xf] }
 0x159   : > { %869 = vst [vmem:[%s8628_s30 + $0x524] sm:$0xf] %v868_v9  ;;  %v996_v9 = vld [vmem:[%s8624_s29 + $0x1890] sm:$0xf] }
 0x15a   : > { %871 = vst [vmem:[%s8628_s30 + $0x528] sm:$0xf] %v870_v10  ;;  %v998_v10 = vld [vmem:[%s8624_s29 + $0x18a0] sm:$0xf] }
 0x15b   : > { %873 = vst [vmem:[%s8628_s30 + $0x52c] sm:$0xf] %v872_v11  ;;  %v1000_v11 = vld [vmem:[%s8624_s29 + $0x18b0] sm:$0xf] }
 0x15c   : > { %875 = vst [vmem:[%s8628_s30 + $0x530] sm:$0xf] %v874_v12  ;;  %v1002_v12 = vld [vmem:[%s8624_s29 + $0x18c0] sm:$0xf] }
 0x15d   : > { %877 = vst [vmem:[%s8628_s30 + $0x534] sm:$0xf] %v876_v13  ;;  %v1004_v13 = vld [vmem:[%s8624_s29 + $0x18d0] sm:$0xf] }
 0x15e   : > { %879 = vst [vmem:[%s8628_s30 + $0x538] sm:$0xf] %v878_v14  ;;  %v1006_v14 = vld [vmem:[%s8624_s29 + $0x18e0] sm:$0xf] }
 0x15f   : > { %881 = vst [vmem:[%s8628_s30 + $0x53c] sm:$0xf] %v880_v15  ;;  %v1008_v15 = vld [vmem:[%s8624_s29 + $0x18f0] sm:$0xf] }
 0x160   : > { %883 = vst [vmem:[%s8628_s30 + $0x540] sm:$0xf] %v882_v16  ;;  %v1010_v16 = vld [vmem:[%s8624_s29 + $0x1900] sm:$0xf] }
 0x161   : > { %885 = vst [vmem:[%s8628_s30 + $0x544] sm:$0xf] %v884_v17  ;;  %v1012_v17 = vld [vmem:[%s8624_s29 + $0x1910] sm:$0xf] }
 0x162   : > { %887 = vst [vmem:[%s8628_s30 + $0x548] sm:$0xf] %v886_v18  ;;  %v1014_v18 = vld [vmem:[%s8624_s29 + $0x1920] sm:$0xf] }
 0x163   : > { %889 = vst [vmem:[%s8628_s30 + $0x54c] sm:$0xf] %v888_v19  ;;  %v1016_v19 = vld [vmem:[%s8624_s29 + $0x1930] sm:$0xf] }
 0x164   : > { %891 = vst [vmem:[%s8628_s30 + $0x550] sm:$0xf] %v890_v20  ;;  %v1018_v20 = vld [vmem:[%s8624_s29 + $0x1940] sm:$0xf] }
 0x165   : > { %893 = vst [vmem:[%s8628_s30 + $0x554] sm:$0xf] %v892_v21  ;;  %v1020_v21 = vld [vmem:[%s8624_s29 + $0x1950] sm:$0xf] }
 0x166   : > { %895 = vst [vmem:[%s8628_s30 + $0x558] sm:$0xf] %v894_v22  ;;  %v1022_v22 = vld [vmem:[%s8624_s29 + $0x1960] sm:$0xf] }
 0x167   : > { %897 = vst [vmem:[%s8628_s30 + $0x55c] sm:$0xf] %v896_v23  ;;  %v1024_v23 = vld [vmem:[%s8624_s29 + $0x1970] sm:$0xf] }
 0x168   : > { %899 = vst [vmem:[%s8628_s30 + $0x560] sm:$0xf] %v898_v24  ;;  %v1026_v24 = vld [vmem:[%s8624_s29 + $0x1980] sm:$0xf] }
 0x169   : > { %901 = vst [vmem:[%s8628_s30 + $0x564] sm:$0xf] %v900_v25  ;;  %v1028_v25 = vld [vmem:[%s8624_s29 + $0x1990] sm:$0xf] }
 0x16a   : > { %903 = vst [vmem:[%s8628_s30 + $0x568] sm:$0xf] %v902_v26  ;;  %v1030_v26 = vld [vmem:[%s8624_s29 + $0x19a0] sm:$0xf] }
 0x16b   : > { %905 = vst [vmem:[%s8628_s30 + $0x56c] sm:$0xf] %v904_v27  ;;  %v1032_v27 = vld [vmem:[%s8624_s29 + $0x19b0] sm:$0xf] }
 0x16c   : > { %907 = vst [vmem:[%s8628_s30 + $0x570] sm:$0xf] %v906_v28  ;;  %v1034_v28 = vld [vmem:[%s8624_s29 + $0x19c0] sm:$0xf] }
 0x16d   : > { %909 = vst [vmem:[%s8628_s30 + $0x574] sm:$0xf] %v908_v29  ;;  %v1036_v29 = vld [vmem:[%s8624_s29 + $0x19d0] sm:$0xf] }
 0x16e   : > { %911 = vst [vmem:[%s8628_s30 + $0x578] sm:$0xf] %v910_v30  ;;  %v1038_v30 = vld [vmem:[%s8624_s29 + $0x19e0] sm:$0xf] }
 0x16f   : > { %913 = vst [vmem:[%s8628_s30 + $0x57c] sm:$0xf] %v912_v31  ;;  %v1040_v31 = vld [vmem:[%s8624_s29 + $0x19f0] sm:$0xf] }
 0x170   : > { %915 = vst [vmem:[%s8628_s30 + $0x580] sm:$0xf] %v914_v32  ;;  %v1042_v32 = vld [vmem:[%s8624_s29 + $0x1a00] sm:$0xf] }
 0x171   : > { %917 = vst [vmem:[%s8628_s30 + $0x584] sm:$0xf] %v916_v33  ;;  %v1044_v33 = vld [vmem:[%s8624_s29 + $0x1a10] sm:$0xf] }
 0x172   : > { %919 = vst [vmem:[%s8628_s30 + $0x588] sm:$0xf] %v918_v34  ;;  %v1046_v34 = vld [vmem:[%s8624_s29 + $0x1a20] sm:$0xf] }
 0x173   : > { %921 = vst [vmem:[%s8628_s30 + $0x58c] sm:$0xf] %v920_v35  ;;  %v1048_v35 = vld [vmem:[%s8624_s29 + $0x1a30] sm:$0xf] }
 0x174   : > { %923 = vst [vmem:[%s8628_s30 + $0x590] sm:$0xf] %v922_v36  ;;  %v1050_v36 = vld [vmem:[%s8624_s29 + $0x1a40] sm:$0xf] }
 0x175   : > { %925 = vst [vmem:[%s8628_s30 + $0x594] sm:$0xf] %v924_v37  ;;  %v1052_v37 = vld [vmem:[%s8624_s29 + $0x1a50] sm:$0xf] }
 0x176   : > { %927 = vst [vmem:[%s8628_s30 + $0x598] sm:$0xf] %v926_v38  ;;  %v1054_v38 = vld [vmem:[%s8624_s29 + $0x1a60] sm:$0xf] }
 0x177   : > { %929 = vst [vmem:[%s8628_s30 + $0x59c] sm:$0xf] %v928_v39  ;;  %v1056_v39 = vld [vmem:[%s8624_s29 + $0x1a70] sm:$0xf] }
 0x178   : > { %931 = vst [vmem:[%s8628_s30 + $0x5a0] sm:$0xf] %v930_v40  ;;  %v1058_v40 = vld [vmem:[%s8624_s29 + $0x1a80] sm:$0xf] }
 0x179   : > { %933 = vst [vmem:[%s8628_s30 + $0x5a4] sm:$0xf] %v932_v41  ;;  %v1060_v41 = vld [vmem:[%s8624_s29 + $0x1a90] sm:$0xf] }
 0x17a   : > { %935 = vst [vmem:[%s8628_s30 + $0x5a8] sm:$0xf] %v934_v42  ;;  %v1062_v42 = vld [vmem:[%s8624_s29 + $0x1aa0] sm:$0xf] }
 0x17b   : > { %937 = vst [vmem:[%s8628_s30 + $0x5ac] sm:$0xf] %v936_v43  ;;  %v1064_v43 = vld [vmem:[%s8624_s29 + $0x1ab0] sm:$0xf] }
 0x17c   : > { %939 = vst [vmem:[%s8628_s30 + $0x5b0] sm:$0xf] %v938_v44  ;;  %v1066_v44 = vld [vmem:[%s8624_s29 + $0x1ac0] sm:$0xf] }
 0x17d   : > { %941 = vst [vmem:[%s8628_s30 + $0x5b4] sm:$0xf] %v940_v45  ;;  %v1068_v45 = vld [vmem:[%s8624_s29 + $0x1ad0] sm:$0xf] }
 0x17e   : > { %943 = vst [vmem:[%s8628_s30 + $0x5b8] sm:$0xf] %v942_v46  ;;  %v1070_v46 = vld [vmem:[%s8624_s29 + $0x1ae0] sm:$0xf] }
 0x17f   : > { %945 = vst [vmem:[%s8628_s30 + $0x5bc] sm:$0xf] %v944_v47  ;;  %v1072_v47 = vld [vmem:[%s8624_s29 + $0x1af0] sm:$0xf] }
 0x180   : > { %947 = vst [vmem:[%s8628_s30 + $0x5c0] sm:$0xf] %v946_v48  ;;  %v1074_v48 = vld [vmem:[%s8624_s29 + $0x1b00] sm:$0xf] }
 0x181   : > { %949 = vst [vmem:[%s8628_s30 + $0x5c4] sm:$0xf] %v948_v49  ;;  %v1076_v49 = vld [vmem:[%s8624_s29 + $0x1b10] sm:$0xf] }
 0x182   : > { %951 = vst [vmem:[%s8628_s30 + $0x5c8] sm:$0xf] %v950_v50  ;;  %v1078_v50 = vld [vmem:[%s8624_s29 + $0x1b20] sm:$0xf] }
 0x183   : > { %953 = vst [vmem:[%s8628_s30 + $0x5cc] sm:$0xf] %v952_v51  ;;  %v1080_v51 = vld [vmem:[%s8624_s29 + $0x1b30] sm:$0xf] }
 0x184   : > { %955 = vst [vmem:[%s8628_s30 + $0x5d0] sm:$0xf] %v954_v52  ;;  %v1082_v52 = vld [vmem:[%s8624_s29 + $0x1b40] sm:$0xf] }
 0x185   : > { %957 = vst [vmem:[%s8628_s30 + $0x5d4] sm:$0xf] %v956_v53  ;;  %v1084_v53 = vld [vmem:[%s8624_s29 + $0x1b50] sm:$0xf] }
 0x186   : > { %959 = vst [vmem:[%s8628_s30 + $0x5d8] sm:$0xf] %v958_v54  ;;  %v1086_v54 = vld [vmem:[%s8624_s29 + $0x1b60] sm:$0xf] }
 0x187   : > { %961 = vst [vmem:[%s8628_s30 + $0x5dc] sm:$0xf] %v960_v55  ;;  %v1088_v55 = vld [vmem:[%s8624_s29 + $0x1b70] sm:$0xf] }
 0x188   : > { %963 = vst [vmem:[%s8628_s30 + $0x5e0] sm:$0xf] %v962_v56  ;;  %v1090_v56 = vld [vmem:[%s8624_s29 + $0x1b80] sm:$0xf] }
 0x189   : > { %965 = vst [vmem:[%s8628_s30 + $0x5e4] sm:$0xf] %v964_v57  ;;  %v1092_v57 = vld [vmem:[%s8624_s29 + $0x1b90] sm:$0xf] }
 0x18a   : > { %967 = vst [vmem:[%s8628_s30 + $0x5e8] sm:$0xf] %v966_v58  ;;  %v1094_v58 = vld [vmem:[%s8624_s29 + $0x1ba0] sm:$0xf] }
 0x18b   : > { %969 = vst [vmem:[%s8628_s30 + $0x5ec] sm:$0xf] %v968_v59  ;;  %v1096_v59 = vld [vmem:[%s8624_s29 + $0x1bb0] sm:$0xf] }
 0x18c   : > { %971 = vst [vmem:[%s8628_s30 + $0x5f0] sm:$0xf] %v970_v60  ;;  %v1098_v60 = vld [vmem:[%s8624_s29 + $0x1bc0] sm:$0xf] }
 0x18d   : > { %973 = vst [vmem:[%s8628_s30 + $0x5f4] sm:$0xf] %v972_v61  ;;  %v1100_v61 = vld [vmem:[%s8624_s29 + $0x1bd0] sm:$0xf] }
 0x18e   : > { %975 = vst [vmem:[%s8628_s30 + $0x5f8] sm:$0xf] %v974_v62  ;;  %v1102_v62 = vld [vmem:[%s8624_s29 + $0x1be0] sm:$0xf] }
 0x18f   : > { %977 = vst [vmem:[%s8628_s30 + $0x5fc] sm:$0xf] %v976_v63  ;;  %v1104_v63 = vld [vmem:[%s8624_s29 + $0x1bf0] sm:$0xf] }
 0x190   : > { %979 = vst [vmem:[%s8628_s30 + $0x600] sm:$0xf] %v978_v0  ;;  %v1106_v0 = vld [vmem:[%s8624_s29 + $0x1c00] sm:$0xf] }
 0x191   : > { %981 = vst [vmem:[%s8628_s30 + $0x604] sm:$0xf] %v980_v1  ;;  %v1108_v1 = vld [vmem:[%s8624_s29 + $0x1c10] sm:$0xf] }
 0x192   : > { %983 = vst [vmem:[%s8628_s30 + $0x608] sm:$0xf] %v982_v2  ;;  %v1110_v2 = vld [vmem:[%s8624_s29 + $0x1c20] sm:$0xf] }
 0x193   : > { %985 = vst [vmem:[%s8628_s30 + $0x60c] sm:$0xf] %v984_v3  ;;  %v1112_v3 = vld [vmem:[%s8624_s29 + $0x1c30] sm:$0xf] }
 0x194   : > { %987 = vst [vmem:[%s8628_s30 + $0x610] sm:$0xf] %v986_v4  ;;  %v1114_v4 = vld [vmem:[%s8624_s29 + $0x1c40] sm:$0xf] }
 0x195   : > { %989 = vst [vmem:[%s8628_s30 + $0x614] sm:$0xf] %v988_v5  ;;  %v1116_v5 = vld [vmem:[%s8624_s29 + $0x1c50] sm:$0xf] }
 0x196   : > { %991 = vst [vmem:[%s8628_s30 + $0x618] sm:$0xf] %v990_v6  ;;  %v1118_v6 = vld [vmem:[%s8624_s29 + $0x1c60] sm:$0xf] }
 0x197   : > { %993 = vst [vmem:[%s8628_s30 + $0x61c] sm:$0xf] %v992_v7  ;;  %v1120_v7 = vld [vmem:[%s8624_s29 + $0x1c70] sm:$0xf] }
 0x198   : > { %995 = vst [vmem:[%s8628_s30 + $0x620] sm:$0xf] %v994_v8  ;;  %v1122_v8 = vld [vmem:[%s8624_s29 + $0x1c80] sm:$0xf] }
 0x199   : > { %997 = vst [vmem:[%s8628_s30 + $0x624] sm:$0xf] %v996_v9  ;;  %v1124_v9 = vld [vmem:[%s8624_s29 + $0x1c90] sm:$0xf] }
 0x19a   : > { %999 = vst [vmem:[%s8628_s30 + $0x628] sm:$0xf] %v998_v10  ;;  %v1126_v10 = vld [vmem:[%s8624_s29 + $0x1ca0] sm:$0xf] }
 0x19b   : > { %1001 = vst [vmem:[%s8628_s30 + $0x62c] sm:$0xf] %v1000_v11  ;;  %v1128_v11 = vld [vmem:[%s8624_s29 + $0x1cb0] sm:$0xf] }
 0x19c   : > { %1003 = vst [vmem:[%s8628_s30 + $0x630] sm:$0xf] %v1002_v12  ;;  %v1130_v12 = vld [vmem:[%s8624_s29 + $0x1cc0] sm:$0xf] }
 0x19d   : > { %1005 = vst [vmem:[%s8628_s30 + $0x634] sm:$0xf] %v1004_v13  ;;  %v1132_v13 = vld [vmem:[%s8624_s29 + $0x1cd0] sm:$0xf] }
 0x19e   : > { %1007 = vst [vmem:[%s8628_s30 + $0x638] sm:$0xf] %v1006_v14  ;;  %v1134_v14 = vld [vmem:[%s8624_s29 + $0x1ce0] sm:$0xf] }
 0x19f   : > { %1009 = vst [vmem:[%s8628_s30 + $0x63c] sm:$0xf] %v1008_v15  ;;  %v1136_v15 = vld [vmem:[%s8624_s29 + $0x1cf0] sm:$0xf] }
 0x1a0   : > { %1011 = vst [vmem:[%s8628_s30 + $0x640] sm:$0xf] %v1010_v16  ;;  %v1138_v16 = vld [vmem:[%s8624_s29 + $0x1d00] sm:$0xf] }
 0x1a1   : > { %1013 = vst [vmem:[%s8628_s30 + $0x644] sm:$0xf] %v1012_v17  ;;  %v1140_v17 = vld [vmem:[%s8624_s29 + $0x1d10] sm:$0xf] }
 0x1a2   : > { %1015 = vst [vmem:[%s8628_s30 + $0x648] sm:$0xf] %v1014_v18  ;;  %v1142_v18 = vld [vmem:[%s8624_s29 + $0x1d20] sm:$0xf] }
 0x1a3   : > { %1017 = vst [vmem:[%s8628_s30 + $0x64c] sm:$0xf] %v1016_v19  ;;  %v1144_v19 = vld [vmem:[%s8624_s29 + $0x1d30] sm:$0xf] }
 0x1a4   : > { %1019 = vst [vmem:[%s8628_s30 + $0x650] sm:$0xf] %v1018_v20  ;;  %v1146_v20 = vld [vmem:[%s8624_s29 + $0x1d40] sm:$0xf] }
 0x1a5   : > { %1021 = vst [vmem:[%s8628_s30 + $0x654] sm:$0xf] %v1020_v21  ;;  %v1148_v21 = vld [vmem:[%s8624_s29 + $0x1d50] sm:$0xf] }
 0x1a6   : > { %1023 = vst [vmem:[%s8628_s30 + $0x658] sm:$0xf] %v1022_v22  ;;  %v1150_v22 = vld [vmem:[%s8624_s29 + $0x1d60] sm:$0xf] }
 0x1a7   : > { %1025 = vst [vmem:[%s8628_s30 + $0x65c] sm:$0xf] %v1024_v23  ;;  %v1152_v23 = vld [vmem:[%s8624_s29 + $0x1d70] sm:$0xf] }
 0x1a8   : > { %1027 = vst [vmem:[%s8628_s30 + $0x660] sm:$0xf] %v1026_v24  ;;  %v1154_v24 = vld [vmem:[%s8624_s29 + $0x1d80] sm:$0xf] }
 0x1a9   : > { %1029 = vst [vmem:[%s8628_s30 + $0x664] sm:$0xf] %v1028_v25  ;;  %v1156_v25 = vld [vmem:[%s8624_s29 + $0x1d90] sm:$0xf] }
 0x1aa   : > { %1031 = vst [vmem:[%s8628_s30 + $0x668] sm:$0xf] %v1030_v26  ;;  %v1158_v26 = vld [vmem:[%s8624_s29 + $0x1da0] sm:$0xf] }
 0x1ab   : > { %1033 = vst [vmem:[%s8628_s30 + $0x66c] sm:$0xf] %v1032_v27  ;;  %v1160_v27 = vld [vmem:[%s8624_s29 + $0x1db0] sm:$0xf] }
 0x1ac   : > { %1035 = vst [vmem:[%s8628_s30 + $0x670] sm:$0xf] %v1034_v28  ;;  %v1162_v28 = vld [vmem:[%s8624_s29 + $0x1dc0] sm:$0xf] }
 0x1ad   : > { %1037 = vst [vmem:[%s8628_s30 + $0x674] sm:$0xf] %v1036_v29  ;;  %v1164_v29 = vld [vmem:[%s8624_s29 + $0x1dd0] sm:$0xf] }
 0x1ae   : > { %1039 = vst [vmem:[%s8628_s30 + $0x678] sm:$0xf] %v1038_v30  ;;  %v1166_v30 = vld [vmem:[%s8624_s29 + $0x1de0] sm:$0xf] }
 0x1af   : > { %1041 = vst [vmem:[%s8628_s30 + $0x67c] sm:$0xf] %v1040_v31  ;;  %v1168_v31 = vld [vmem:[%s8624_s29 + $0x1df0] sm:$0xf] }
 0x1b0   : > { %1043 = vst [vmem:[%s8628_s30 + $0x680] sm:$0xf] %v1042_v32  ;;  %v1170_v32 = vld [vmem:[%s8624_s29 + $0x1e00] sm:$0xf] }
 0x1b1   : > { %1045 = vst [vmem:[%s8628_s30 + $0x684] sm:$0xf] %v1044_v33  ;;  %v1172_v33 = vld [vmem:[%s8624_s29 + $0x1e10] sm:$0xf] }
 0x1b2   : > { %1047 = vst [vmem:[%s8628_s30 + $0x688] sm:$0xf] %v1046_v34  ;;  %v1174_v34 = vld [vmem:[%s8624_s29 + $0x1e20] sm:$0xf] }
 0x1b3   : > { %1049 = vst [vmem:[%s8628_s30 + $0x68c] sm:$0xf] %v1048_v35  ;;  %v1176_v35 = vld [vmem:[%s8624_s29 + $0x1e30] sm:$0xf] }
 0x1b4   : > { %1051 = vst [vmem:[%s8628_s30 + $0x690] sm:$0xf] %v1050_v36  ;;  %v1178_v36 = vld [vmem:[%s8624_s29 + $0x1e40] sm:$0xf] }
 0x1b5   : > { %1053 = vst [vmem:[%s8628_s30 + $0x694] sm:$0xf] %v1052_v37  ;;  %v1180_v37 = vld [vmem:[%s8624_s29 + $0x1e50] sm:$0xf] }
 0x1b6   : > { %1055 = vst [vmem:[%s8628_s30 + $0x698] sm:$0xf] %v1054_v38  ;;  %v1182_v38 = vld [vmem:[%s8624_s29 + $0x1e60] sm:$0xf] }
 0x1b7   : > { %1057 = vst [vmem:[%s8628_s30 + $0x69c] sm:$0xf] %v1056_v39  ;;  %v1184_v39 = vld [vmem:[%s8624_s29 + $0x1e70] sm:$0xf] }
 0x1b8   : > { %1059 = vst [vmem:[%s8628_s30 + $0x6a0] sm:$0xf] %v1058_v40  ;;  %v1186_v40 = vld [vmem:[%s8624_s29 + $0x1e80] sm:$0xf] }
 0x1b9   : > { %1061 = vst [vmem:[%s8628_s30 + $0x6a4] sm:$0xf] %v1060_v41  ;;  %v1188_v41 = vld [vmem:[%s8624_s29 + $0x1e90] sm:$0xf] }
 0x1ba   : > { %1063 = vst [vmem:[%s8628_s30 + $0x6a8] sm:$0xf] %v1062_v42  ;;  %v1190_v42 = vld [vmem:[%s8624_s29 + $0x1ea0] sm:$0xf] }
 0x1bb   : > { %1065 = vst [vmem:[%s8628_s30 + $0x6ac] sm:$0xf] %v1064_v43  ;;  %v1192_v43 = vld [vmem:[%s8624_s29 + $0x1eb0] sm:$0xf] }
 0x1bc   : > { %1067 = vst [vmem:[%s8628_s30 + $0x6b0] sm:$0xf] %v1066_v44  ;;  %v1194_v44 = vld [vmem:[%s8624_s29 + $0x1ec0] sm:$0xf] }
 0x1bd   : > { %1069 = vst [vmem:[%s8628_s30 + $0x6b4] sm:$0xf] %v1068_v45  ;;  %v1196_v45 = vld [vmem:[%s8624_s29 + $0x1ed0] sm:$0xf] }
 0x1be   : > { %1071 = vst [vmem:[%s8628_s30 + $0x6b8] sm:$0xf] %v1070_v46  ;;  %v1198_v46 = vld [vmem:[%s8624_s29 + $0x1ee0] sm:$0xf] }
 0x1bf   : > { %1073 = vst [vmem:[%s8628_s30 + $0x6bc] sm:$0xf] %v1072_v47  ;;  %v1200_v47 = vld [vmem:[%s8624_s29 + $0x1ef0] sm:$0xf] }
 0x1c0   : > { %1075 = vst [vmem:[%s8628_s30 + $0x6c0] sm:$0xf] %v1074_v48  ;;  %v1202_v48 = vld [vmem:[%s8624_s29 + $0x1f00] sm:$0xf] }
 0x1c1   : > { %1077 = vst [vmem:[%s8628_s30 + $0x6c4] sm:$0xf] %v1076_v49  ;;  %v1204_v49 = vld [vmem:[%s8624_s29 + $0x1f10] sm:$0xf] }
 0x1c2   : > { %1079 = vst [vmem:[%s8628_s30 + $0x6c8] sm:$0xf] %v1078_v50  ;;  %v1206_v50 = vld [vmem:[%s8624_s29 + $0x1f20] sm:$0xf] }
 0x1c3   : > { %1081 = vst [vmem:[%s8628_s30 + $0x6cc] sm:$0xf] %v1080_v51  ;;  %v1208_v51 = vld [vmem:[%s8624_s29 + $0x1f30] sm:$0xf] }
 0x1c4   : > { %1083 = vst [vmem:[%s8628_s30 + $0x6d0] sm:$0xf] %v1082_v52  ;;  %v1210_v52 = vld [vmem:[%s8624_s29 + $0x1f40] sm:$0xf] }
 0x1c5   : > { %1085 = vst [vmem:[%s8628_s30 + $0x6d4] sm:$0xf] %v1084_v53  ;;  %v1212_v53 = vld [vmem:[%s8624_s29 + $0x1f50] sm:$0xf] }
 0x1c6   : > { %1087 = vst [vmem:[%s8628_s30 + $0x6d8] sm:$0xf] %v1086_v54  ;;  %v1214_v54 = vld [vmem:[%s8624_s29 + $0x1f60] sm:$0xf] }
 0x1c7   : > { %1089 = vst [vmem:[%s8628_s30 + $0x6dc] sm:$0xf] %v1088_v55  ;;  %v1216_v55 = vld [vmem:[%s8624_s29 + $0x1f70] sm:$0xf] }
 0x1c8   : > { %1091 = vst [vmem:[%s8628_s30 + $0x6e0] sm:$0xf] %v1090_v56  ;;  %v1218_v56 = vld [vmem:[%s8624_s29 + $0x1f80] sm:$0xf] }
 0x1c9   : > { %1093 = vst [vmem:[%s8628_s30 + $0x6e4] sm:$0xf] %v1092_v57  ;;  %v1220_v57 = vld [vmem:[%s8624_s29 + $0x1f90] sm:$0xf] }
 0x1ca   : > { %1095 = vst [vmem:[%s8628_s30 + $0x6e8] sm:$0xf] %v1094_v58  ;;  %v1222_v58 = vld [vmem:[%s8624_s29 + $0x1fa0] sm:$0xf] }
 0x1cb   : > { %1097 = vst [vmem:[%s8628_s30 + $0x6ec] sm:$0xf] %v1096_v59  ;;  %v1224_v59 = vld [vmem:[%s8624_s29 + $0x1fb0] sm:$0xf] }
 0x1cc   : > { %1099 = vst [vmem:[%s8628_s30 + $0x6f0] sm:$0xf] %v1098_v60  ;;  %v1226_v60 = vld [vmem:[%s8624_s29 + $0x1fc0] sm:$0xf] }
 0x1cd   : > { %1101 = vst [vmem:[%s8628_s30 + $0x6f4] sm:$0xf] %v1100_v61  ;;  %v1228_v61 = vld [vmem:[%s8624_s29 + $0x1fd0] sm:$0xf] }
 0x1ce   : > { %1103 = vst [vmem:[%s8628_s30 + $0x6f8] sm:$0xf] %v1102_v62  ;;  %v1230_v62 = vld [vmem:[%s8624_s29 + $0x1fe0] sm:$0xf] }
 0x1cf   : > { %1105 = vst [vmem:[%s8628_s30 + $0x6fc] sm:$0xf] %v1104_v63  ;;  %v1232_v63 = vld [vmem:[%s8624_s29 + $0x1ff0] sm:$0xf] }
 0x1d0   : > { %1107 = vst [vmem:[%s8628_s30 + $0x700] sm:$0xf] %v1106_v0 }
 0x1d1   : > { %1109 = vst [vmem:[%s8628_s30 + $0x704] sm:$0xf] %v1108_v1 }
 0x1d2   : > { %1111 = vst [vmem:[%s8628_s30 + $0x708] sm:$0xf] %v1110_v2 }
 0x1d3   : > { %1113 = vst [vmem:[%s8628_s30 + $0x70c] sm:$0xf] %v1112_v3 }
 0x1d4   : > { %1115 = vst [vmem:[%s8628_s30 + $0x710] sm:$0xf] %v1114_v4 }
 0x1d5   : > { %1117 = vst [vmem:[%s8628_s30 + $0x714] sm:$0xf] %v1116_v5 }
 0x1d6   : > { %1119 = vst [vmem:[%s8628_s30 + $0x718] sm:$0xf] %v1118_v6 }
 0x1d7   : > { %1121 = vst [vmem:[%s8628_s30 + $0x71c] sm:$0xf] %v1120_v7 }
 0x1d8   : > { %1123 = vst [vmem:[%s8628_s30 + $0x720] sm:$0xf] %v1122_v8 }
 0x1d9   : > { %1125 = vst [vmem:[%s8628_s30 + $0x724] sm:$0xf] %v1124_v9 }
 0x1da   : > { %1127 = vst [vmem:[%s8628_s30 + $0x728] sm:$0xf] %v1126_v10 }
 0x1db   : > { %1129 = vst [vmem:[%s8628_s30 + $0x72c] sm:$0xf] %v1128_v11 }
 0x1dc   : > { %1131 = vst [vmem:[%s8628_s30 + $0x730] sm:$0xf] %v1130_v12 }
 0x1dd   : > { %1133 = vst [vmem:[%s8628_s30 + $0x734] sm:$0xf] %v1132_v13 }
 0x1de   : > { %1135 = vst [vmem:[%s8628_s30 + $0x738] sm:$0xf] %v1134_v14 }
 0x1df   : > { %1137 = vst [vmem:[%s8628_s30 + $0x73c] sm:$0xf] %v1136_v15 }
 0x1e0   : > { %1139 = vst [vmem:[%s8628_s30 + $0x740] sm:$0xf] %v1138_v16 }
 0x1e1   : > { %1141 = vst [vmem:[%s8628_s30 + $0x744] sm:$0xf] %v1140_v17 }
 0x1e2   : > { %1143 = vst [vmem:[%s8628_s30 + $0x748] sm:$0xf] %v1142_v18 }
 0x1e3   : > { %1145 = vst [vmem:[%s8628_s30 + $0x74c] sm:$0xf] %v1144_v19 }
 0x1e4   : > { %1147 = vst [vmem:[%s8628_s30 + $0x750] sm:$0xf] %v1146_v20 }
 0x1e5   : > { %1149 = vst [vmem:[%s8628_s30 + $0x754] sm:$0xf] %v1148_v21 }
 0x1e6   : > { %1151 = vst [vmem:[%s8628_s30 + $0x758] sm:$0xf] %v1150_v22 }
 0x1e7   : > { %1153 = vst [vmem:[%s8628_s30 + $0x75c] sm:$0xf] %v1152_v23 }
 0x1e8   : > { %1155 = vst [vmem:[%s8628_s30 + $0x760] sm:$0xf] %v1154_v24 }
 0x1e9   : > { %1157 = vst [vmem:[%s8628_s30 + $0x764] sm:$0xf] %v1156_v25 }
 0x1ea   : > { %1159 = vst [vmem:[%s8628_s30 + $0x768] sm:$0xf] %v1158_v26 }
 0x1eb   : > { %1161 = vst [vmem:[%s8628_s30 + $0x76c] sm:$0xf] %v1160_v27 }
 0x1ec   : > { %1163 = vst [vmem:[%s8628_s30 + $0x770] sm:$0xf] %v1162_v28 }
 0x1ed   : > { %1165 = vst [vmem:[%s8628_s30 + $0x774] sm:$0xf] %v1164_v29 }
 0x1ee   : > { %1167 = vst [vmem:[%s8628_s30 + $0x778] sm:$0xf] %v1166_v30 }
 0x1ef   : > { %1169 = vst [vmem:[%s8628_s30 + $0x77c] sm:$0xf] %v1168_v31 }
 0x1f0   : > { %1171 = vst [vmem:[%s8628_s30 + $0x780] sm:$0xf] %v1170_v32 }
 0x1f1   : > { %1173 = vst [vmem:[%s8628_s30 + $0x784] sm:$0xf] %v1172_v33 }
 0x1f2   : > { %1175 = vst [vmem:[%s8628_s30 + $0x788] sm:$0xf] %v1174_v34 }
 0x1f3   : > { %1177 = vst [vmem:[%s8628_s30 + $0x78c] sm:$0xf] %v1176_v35 }
 0x1f4   : > { %1179 = vst [vmem:[%s8628_s30 + $0x790] sm:$0xf] %v1178_v36 }
 0x1f5   : > { %1181 = vst [vmem:[%s8628_s30 + $0x794] sm:$0xf] %v1180_v37 }
 0x1f6   : > { %1183 = vst [vmem:[%s8628_s30 + $0x798] sm:$0xf] %v1182_v38 }
 0x1f7   : > { %1185 = vst [vmem:[%s8628_s30 + $0x79c] sm:$0xf] %v1184_v39 }
 0x1f8   : > { %1187 = vst [vmem:[%s8628_s30 + $0x7a0] sm:$0xf] %v1186_v40 }
 0x1f9   : > { %1189 = vst [vmem:[%s8628_s30 + $0x7a4] sm:$0xf] %v1188_v41 }
 0x1fa   : > { %1191 = vst [vmem:[%s8628_s30 + $0x7a8] sm:$0xf] %v1190_v42 }
 0x1fb   : > { %1193 = vst [vmem:[%s8628_s30 + $0x7ac] sm:$0xf] %v1192_v43 }
 0x1fc   : > { %1195 = vst [vmem:[%s8628_s30 + $0x7b0] sm:$0xf] %v1194_v44 }
 0x1fd   : > { %1197 = vst [vmem:[%s8628_s30 + $0x7b4] sm:$0xf] %v1196_v45 }
 0x1fe   : > { %1199 = vst [vmem:[%s8628_s30 + $0x7b8] sm:$0xf] %v1198_v46 }
 0x1ff   : > { %1201 = vst [vmem:[%s8628_s30 + $0x7bc] sm:$0xf] %v1200_v47 }
 0x200   : > { %1203 = vst [vmem:[%s8628_s30 + $0x7c0] sm:$0xf] %v1202_v48 }
 0x201   : > { %1205 = vst [vmem:[%s8628_s30 + $0x7c4] sm:$0xf] %v1204_v49 }
 0x202   : > { %1207 = vst [vmem:[%s8628_s30 + $0x7c8] sm:$0xf] %v1206_v50 }
 0x203   : > { %1209 = vst [vmem:[%s8628_s30 + $0x7cc] sm:$0xf] %v1208_v51 }
 0x204   : > { %1211 = vst [vmem:[%s8628_s30 + $0x7d0] sm:$0xf] %v1210_v52 }
 0x205   : > { %1213 = vst [vmem:[%s8628_s30 + $0x7d4] sm:$0xf] %v1212_v53 }
 0x206   : > { %1215 = vst [vmem:[%s8628_s30 + $0x7d8] sm:$0xf] %v1214_v54 }
 0x207   : > { %1217 = vst [vmem:[%s8628_s30 + $0x7dc] sm:$0xf] %v1216_v55 }
 0x208   : > { %1219 = vst [vmem:[%s8628_s30 + $0x7e0] sm:$0xf] %v1218_v56 }
 0x209   : > { %1221 = vst [vmem:[%s8628_s30 + $0x7e4] sm:$0xf] %v1220_v57 }
 0x20a   : > { %1223 = vst [vmem:[%s8628_s30 + $0x7e8] sm:$0xf] %v1222_v58 }
 0x20b   : > { %1225 = vst [vmem:[%s8628_s30 + $0x7ec] sm:$0xf] %v1224_v59 }
 0x20c   : > { %1227 = vst [vmem:[%s8628_s30 + $0x7f0] sm:$0xf] %v1226_v60 }
 0x20d   : > { %1229 = vst [vmem:[%s8628_s30 + $0x7f4] sm:$0xf] %v1228_v61 }
 0x20e   : > { %1231 = vst [vmem:[%s8628_s30 + $0x7f8] sm:$0xf] %v1230_v62 }
 0x20f   : > { %1233 = vst [vmem:[%s8628_s30 + $0x7fc] sm:$0xf] %v1232_v63 }
 0x210 PF: > { %p7188_p6 = scmp.ge.s32.totalorder %s8554_s19, 1  ;;  %p4366_p7 = scmp.lt.s32.totalorder %s8554_s19, 5 }
 0x212   : > { %p4367_p8 = pnand %p7188_p6, %p4366_p7 }
 0x213   : > { %s4373_s5 = sand.u32 (!%p4367_p8), 1, %s8538_s15   ;;  %p4415_p9 = scmp.lt.s32.totalorder (!%p4367_p8), %s8546_s17, 3 }
 0x214   : > { %4370 = sbr.rel (%p4367_p8) target bundleno = 997 (0x3e5), region = 84  ;;  %s7189_s6 = sshll.u32 (!%p4367_p8), %s4373_s5, 11 }
 0x215   : > { %s9655_s7 = scalar_lea.vmem (!%p4367_p8), [#allocation3], %s7189_s6 }
 0x219   : > { %v8224_v0 = vld [vmem:[%s9655_s7 + $0x38] sm:$0xff]  ;;  %v8223_v4 = vld [vmem:[%s9655_s7 + $0x30] sm:$0xff]  ;;  %v8222_v8 = vld [vmem:[%s9655_s7 + $0x28] sm:$0xff]  ;;  %s10015_s17 = smov (!%p4415_p9, %s8546_s17), 3 }
 0x21a   : > { %v8232_v1 = vld [vmem:[%s9655_s7 + $0x78] sm:$0xff]  ;;  %6607 = vmatpush.bf16.msra.mxu0 %v8224_v0  ;;  %v8231_v5 = vld [vmem:[%s9655_s7 + $0x70] sm:$0xff]  ;;  %v8230_v9 = vld [vmem:[%s9655_s7 + $0x68] sm:$0xff]  ;;  %s4420_s28 = scalar_lea.vmem %s10006_s3, %s10015_s17  ;;  %s4417_s5 = scalar_lea.vmem %s10005_s2, %s10015_s17 }
 0x21b   : > { %v8240_v2 = vld [vmem:[%s9655_s7 + $0xb8] sm:$0xff]  ;;  %6620 = vmatpush.bf16.msra.mxu1 %v8232_v1  ;;  %v8239_v6 = vld [vmem:[%s9655_s7 + $0xb0] sm:$0xff]  ;;  %v8238_v10 = vld [vmem:[%s9655_s7 + $0xa8] sm:$0xff]  ;;  %s7190_s9 = sshll.u32 %s10015_s17, 2 }
 0x21c   : > { %v8248_v3 = vld [vmem:[%s9655_s7 + $0xf8] sm:$0xff]  ;;  %6633 = vmatpush.bf16.msra.mxu2 %v8240_v2  ;;  %v8247_v7 = vld [vmem:[%s9655_s7 + $0xf0] sm:$0xff]  ;;  %v8246_v11 = vld [vmem:[%s9655_s7 + $0xe8] sm:$0xff]  ;;  %s4424_s12 = scalar_lea.vmem %s10007_s4, %s7190_s9 }
 0x21d   : > { %6646 = vmatpush.bf16.msra.mxu3 %v8248_v3  ;;  %v8221_v12 = vld [vmem:[%s9655_s7 + $0x20] sm:$0xff]  ;;  %v8220_v16 = vld [vmem:[%s9655_s7 + $0x18] sm:$0xff]  ;;  %v8219_v20 = vld [vmem:[%s9655_s7 + $0x10] sm:$0xff] }
 0x21e   : > { %6608 = vmatpush.bf16.msra.mxu0 %v8223_v4  ;;  %v8229_v13 = vld [vmem:[%s9655_s7 + $0x60] sm:$0xff]  ;;  %v8228_v17 = vld [vmem:[%s9655_s7 + $0x58] sm:$0xff]  ;;  %v8227_v21 = vld [vmem:[%s9655_s7 + $0x50] sm:$0xff] }
 0x21f   : > { %6621 = vmatpush.bf16.msra.mxu1 %v8231_v5  ;;  %v8237_v14 = vld [vmem:[%s9655_s7 + $0xa0] sm:$0xff]  ;;  %v8236_v18 = vld [vmem:[%s9655_s7 + $0x98] sm:$0xff]  ;;  %v8235_v22 = vld [vmem:[%s9655_s7 + $0x90] sm:$0xff] }
 0x220   : > { %6634 = vmatpush.bf16.msra.mxu2 %v8239_v6  ;;  %v8245_v15 = vld [vmem:[%s9655_s7 + $0xe0] sm:$0xff]  ;;  %v8244_v19 = vld [vmem:[%s9655_s7 + $0xd8] sm:$0xff]  ;;  %v8243_v23 = vld [vmem:[%s9655_s7 + $0xd0] sm:$0xff] }
 0x221   : > { %6647 = vmatpush.bf16.msra.mxu3 %v8247_v7  ;;  %v8218_v24 = vld [vmem:[%s9655_s7 + $0x8] sm:$0xff]  ;;  %v4431_v29 = vld [vmem:[%s10003_s0] sm:$0xff]  ;;  %v8256_v38 = vld [vmem:[%s9655_s7 + $0x138] sm:$0xff] }
 0x222   : > { %6609 = vmatpush.bf16.msra.mxu0 %v8222_v8  ;;  %v8226_v25 = vld [vmem:[%s9655_s7 + $0x48] sm:$0xff]  ;;  %v8217_v30 = vld [vmem:[%s9655_s7] sm:$0xff]  ;;  %v4975_v33 = vunpack.c.l.b16 %v4431_v29  ;;  %v4976_v37 = vunpack.c.h.b16 %v4431_v29  ;;  %v8264_v39 = vld [vmem:[%s9655_s7 + $0x178] sm:$0xff] }
 0x223   : > { %6622 = vmatpush.bf16.msra.mxu1 %v8230_v9  ;;  %v8234_v26 = vld [vmem:[%s9655_s7 + $0x88] sm:$0xff]  ;;  %v8225_v31 = vld [vmem:[%s9655_s7 + $0x40] sm:$0xff]  ;;  %v8272_v40 = vld [vmem:[%s9655_s7 + $0x1b8] sm:$0xff] }
 0x224   : > { %6635 = vmatpush.bf16.msra.mxu2 %v8238_v10  ;;  %v8242_v27 = vld [vmem:[%s9655_s7 + $0xc8] sm:$0xff]  ;;  %v8233_v34 = vld [vmem:[%s9655_s7 + $0x80] sm:$0xff]  ;;  %v8280_v41 = vld [vmem:[%s9655_s7 + $0x1f8] sm:$0xff]  ;;  %v5007_v43 = vpack.c.b16 %v4975_v33, %v4975_v33  ;;  %v5008_v45 = vpack.c.b16 %v4976_v37, %v4976_v37 }
 0x225   : > { %6648 = vmatpush.bf16.msra.mxu3 %v8246_v11  ;;  %v4432_v28 = vld [vmem:[%s10003_s0 + $0x8] sm:$0xff]  ;;  %v8241_v35 = vld [vmem:[%s9655_s7 + $0xc0] sm:$0xff]  ;;  %v8255_v46 = vld [vmem:[%s9655_s7 + $0x130] sm:$0xff] }
 0x226   : > { %6610 = vmatpush.bf16.msra.mxu0 %v8221_v12  ;;  %v4977_v32 = vunpack.c.l.b16 %v4432_v28  ;;  %v4978_v36 = vunpack.c.h.b16 %v4432_v28  ;;  %v8263_v47 = vld [vmem:[%s9655_s7 + $0x170] sm:$0xff]  ;;  %v8254_v50 = vld [vmem:[%s9655_s7 + $0x128] sm:$0xff]  ;;  %v8253_v54 = vld [vmem:[%s9655_s7 + $0x120] sm:$0xff] }
 0x227   : > { %6623 = vmatpush.bf16.msra.mxu1 %v8229_v13  ;;  %v8271_v48 = vld [vmem:[%s9655_s7 + $0x1b0] sm:$0xff]  ;;  %v8262_v51 = vld [vmem:[%s9655_s7 + $0x168] sm:$0xff]  ;;  %v8261_v55 = vld [vmem:[%s9655_s7 + $0x160] sm:$0xff] }
 0x228   : > { %6636 = vmatpush.bf16.msra.mxu2 %v8237_v14  ;;  %v5009_v42 = vpack.c.b16 %v4977_v32, %v4977_v32  ;;  %v5010_v44 = vpack.c.b16 %v4978_v36, %v4978_v36  ;;  %v8279_v49 = vld [vmem:[%s9655_s7 + $0x1f0] sm:$0xff]  ;;  %v8270_v52 = vld [vmem:[%s9655_s7 + $0x1a8] sm:$0xff]  ;;  %v8269_v56 = vld [vmem:[%s9655_s7 + $0x1a0] sm:$0xff] }
 0x229   : > { %6649 = vmatpush.bf16.msra.mxu3 %v8245_v15  ;;  %v8278_v53 = vld [vmem:[%s9655_s7 + $0x1e8] sm:$0xff]  ;;  %v8277_v57 = vld [vmem:[%s9655_s7 + $0x1e0] sm:$0xff]  ;;  %v8252_v58 = vld [vmem:[%s9655_s7 + $0x118] sm:$0xff] }
 0x22a   : > { %6611 = vmatpush.bf16.msra.mxu0 %v8220_v16  ;;  %v8260_v59 = vld [vmem:[%s9655_s7 + $0x158] sm:$0xff]  ;;  %v8251_v62 = vld [vmem:[%s9655_s7 + $0x110] sm:$0xff]  ;;  %v8250_v2 = vld [vmem:[%s9655_s7 + $0x108] sm:$0xff] }
 0x22b   : > { %6624 = vmatpush.bf16.msra.mxu1 %v8228_v17  ;;  %v8268_v60 = vld [vmem:[%s9655_s7 + $0x198] sm:$0xff]  ;;  %v8259_v63 = vld [vmem:[%s9655_s7 + $0x150] sm:$0xff]  ;;  %v8258_v3 = vld [vmem:[%s9655_s7 + $0x148] sm:$0xff] }
 0x22c   : > { %6637 = vmatpush.bf16.msra.mxu2 %v8236_v18  ;;  %v8276_v61 = vld [vmem:[%s9655_s7 + $0x1d8] sm:$0xff]  ;;  %v8267_v0 = vld [vmem:[%s9655_s7 + $0x190] sm:$0xff]  ;;  %v8266_v4 = vld [vmem:[%s9655_s7 + $0x188] sm:$0xff] }
 0x22d   : > { %6650 = vmatpush.bf16.msra.mxu3 %v8244_v19  ;;  %v8275_v1 = vld [vmem:[%s9655_s7 + $0x1d0] sm:$0xff]  ;;  %v8274_v5 = vld [vmem:[%s9655_s7 + $0x1c8] sm:$0xff]  ;;  %v4434_v6 = vld [vmem:[%s10003_s0 + $0x18] sm:$0xff] }
 0x22e   : > { %6612 = vmatpush.bf16.msra.mxu0 %v8219_v20  ;;  %v4433_v7 = vld [vmem:[%s10003_s0 + $0x10] sm:$0xff]  ;;  %v8249_v8 = vld [vmem:[%s9655_s7 + $0x100] sm:$0xff]  ;;  %v4981_v10 = vunpack.c.l.b16 %v4434_v6  ;;  %v4982_v14 = vunpack.c.h.b16 %v4434_v6  ;;  %v8288_v16 = vld [vmem:[%s9655_s7 + $0x238] sm:$0xff] }
 0x22f   : > { %6625 = vmatpush.bf16.msra.mxu1 %v8227_v21  ;;  %v8257_v9 = vld [vmem:[%s9655_s7 + $0x140] sm:$0xff]  ;;  %v4979_v11 = vunpack.c.l.b16 %v4433_v7  ;;  %v4980_v15 = vunpack.c.h.b16 %v4433_v7  ;;  %v8296_v17 = vld [vmem:[%s9655_s7 + $0x278] sm:$0xff]  ;;  %v8286_v28 = vld [vmem:[%s9655_s7 + $0x228] sm:$0xff] }
 0x230   : > { %6638 = vmatpush.bf16.msra.mxu2 %v8235_v22  ;;  %v8265_v12 = vld [vmem:[%s9655_s7 + $0x180] sm:$0xff]  ;;  %v8304_v18 = vld [vmem:[%s9655_s7 + $0x2b8] sm:$0xff]  ;;  %v5013_v20 = vpack.c.b16 %v4981_v10, %v4981_v10  ;;  %v5014_v22 = vpack.c.b16 %v4982_v14, %v4982_v14  ;;  %v8294_v29 = vld [vmem:[%s9655_s7 + $0x268] sm:$0xff] }
 0x231   : > { %6651 = vmatpush.bf16.msra.mxu3 %v8243_v23  ;;  %v8273_v13 = vld [vmem:[%s9655_s7 + $0x1c0] sm:$0xff]  ;;  %v8312_v19 = vld [vmem:[%s9655_s7 + $0x2f8] sm:$0xff]  ;;  %v5011_v21 = vpack.c.b16 %v4979_v11, %v4979_v11  ;;  %v5012_v23 = vpack.c.b16 %v4980_v15, %v4980_v15  ;;  %v8318_v6 = vld [vmem:[%s9655_s7 + $0x328] sm:$0xff] }
 0x232   : > { %6613 = vmatpush.bf16.msra.mxu0 %v8218_v24  ;;  %v8287_v24 = vld [vmem:[%s9655_s7 + $0x230] sm:$0xff]  ;;  %v8285_v32 = vld [vmem:[%s9655_s7 + $0x220] sm:$0xff]  ;;  %v8284_v36 = vld [vmem:[%s9655_s7 + $0x218] sm:$0xff] }
 0x233   : > { %6626 = vmatpush.bf16.msra.mxu1 %v8226_v25  ;;  %v8295_v25 = vld [vmem:[%s9655_s7 + $0x270] sm:$0xff]  ;;  %v8293_v33 = vld [vmem:[%s9655_s7 + $0x260] sm:$0xff]  ;;  %v8292_v37 = vld [vmem:[%s9655_s7 + $0x258] sm:$0xff] }
 0x234   : > { %6639 = vmatpush.bf16.msra.mxu2 %v8234_v26  ;;  %v8303_v26 = vld [vmem:[%s9655_s7 + $0x2b0] sm:$0xff]  ;;  %v8326_v7 = vld [vmem:[%s9655_s7 + $0x368] sm:$0xff]  ;;  %v8317_v10 = vld [vmem:[%s9655_s7 + $0x320] sm:$0xff] }
 0x235   : > { %6652 = vmatpush.bf16.msra.mxu3 %v8242_v27  ;;  %v8311_v27 = vld [vmem:[%s9655_s7 + $0x2f0] sm:$0xff]  ;;  %v8325_v11 = vld [vmem:[%s9655_s7 + $0x360] sm:$0xff]  ;;  %v8316_v14 = vld [vmem:[%s9655_s7 + $0x318] sm:$0xff] }
 0x236   : > { %6614 = vmatpush.bf16.msra.mxu0 %v8217_v30  ;;  %v8302_v30 = vld [vmem:[%s9655_s7 + $0x2a8] sm:$0xff]  ;;  %v8324_v15 = vld [vmem:[%s9655_s7 + $0x358] sm:$0xff] }
 0x237   : > { %6627 = vmatpush.bf16.msra.mxu1 %v8225_v31  ;;  %v8310_v31 = vld [vmem:[%s9655_s7 + $0x2e8] sm:$0xff] }
 0x238   : > { %6640 = vmatpush.bf16.msra.mxu2 %v8233_v34  ;;  %v8301_v34 = vld [vmem:[%s9655_s7 + $0x2a0] sm:$0xff] }
 0x239   : > { %6653 = vmatpush.bf16.msra.mxu3 %v8241_v35  ;;  %6615 = vmatmul.bf16.vlgmr.msra.gmra.mxu0 %v5007_v43  ;;  %v8309_v35 = vld [vmem:[%s9655_s7 + $0x2e0] sm:$0xff]  ;;  %v8307_v43 = vld [vmem:[%s9655_s7 + $0x2d0] sm:$0xff] }
 0x23a   : > { %6659 = vmatpush.bf16.msrb.mxu0 %v8256_v38  ;;  %6628 = vmatmul.bf16.vlgmr.msra.gmra.mxu1 %v5008_v45  ;;  %v8300_v38 = vld [vmem:[%s9655_s7 + $0x298] sm:$0xff]  ;;  %v8290_v45 = vld [vmem:[%s9655_s7 + $0x248] sm:$0xff] }
 0x23b   : > { %6672 = vmatpush.bf16.msrb.mxu1 %v8264_v39  ;;  %6641 = vmatmul.bf16.vlgmr.msra.gmra.mxu2 %v5009_v42  ;;  %v8308_v39 = vld [vmem:[%s9655_s7 + $0x2d8] sm:$0xff]  ;;  %v8299_v42 = vld [vmem:[%s9655_s7 + $0x290] sm:$0xff] }
 0x23c   : > { %6685 = vmatpush.bf16.msrb.mxu2 %v8272_v40  ;;  %6654 = vmatmul.bf16.vlgmr.msra.gmra.mxu3 %v5010_v44  ;;  %v8283_v40 = vld [vmem:[%s9655_s7 + $0x210] sm:$0xff]  ;;  %v8282_v44 = vld [vmem:[%s9655_s7 + $0x208] sm:$0xff] }
 0x23d   : > { %6698 = vmatpush.bf16.msrb.mxu3 %v8280_v41  ;;  %v8291_v41 = vld [vmem:[%s9655_s7 + $0x250] sm:$0xff] }
 0x23e   : > { %6660 = vmatpush.bf16.msrb.mxu0 %v8255_v46  ;;  %v8298_v46 = vld [vmem:[%s9655_s7 + $0x288] sm:$0xff] }
 0x23f   : > { %6673 = vmatpush.bf16.msrb.mxu1 %v8263_v47  ;;  %v8306_v47 = vld [vmem:[%s9655_s7 + $0x2c8] sm:$0xff] }
 0x240   : > { %6686 = vmatpush.bf16.msrb.mxu2 %v8271_v48  ;;  %v4435_v48 = vld [vmem:[%s10003_s0 + $0x20] sm:$0xff] }
 0x241   : > { %6699 = vmatpush.bf16.msrb.mxu3 %v8279_v49  ;;  %v4436_v49 = vld [vmem:[%s10003_s0 + $0x28] sm:$0xff] }
 0x242   : > { %6661 = vmatpush.bf16.msrb.mxu0 %v8254_v50  ;;  %v8281_v50 = vld [vmem:[%s9655_s7 + $0x200] sm:$0xff] }
 0x243   : > { %6674 = vmatpush.bf16.msrb.mxu1 %v8262_v51  ;;  %v8289_v51 = vld [vmem:[%s9655_s7 + $0x240] sm:$0xff] }
 0x244   : > { %6687 = vmatpush.bf16.msrb.mxu2 %v8270_v52  ;;  %v4983_v52 = vunpack.c.l.b16 %v4435_v48 }
 0x245   : > { %6700 = vmatpush.bf16.msrb.mxu3 %v8278_v53  ;;  %v4985_v53 = vunpack.c.l.b16 %v4436_v49 }
 0x246   : > { %6662 = vmatpush.bf16.msrb.mxu0 %v8253_v54  ;;  %v8297_v54 = vld [vmem:[%s9655_s7 + $0x280] sm:$0xff] }
 0x247   : > { %6675 = vmatpush.bf16.msrb.mxu1 %v8261_v55  ;;  %v8305_v55 = vld [vmem:[%s9655_s7 + $0x2c0] sm:$0xff] }
 0x248   : > { %6688 = vmatpush.bf16.msrb.mxu2 %v8269_v56  ;;  %v4984_v56 = vunpack.c.h.b16 %v4435_v48  ;;  %v8350_v48 = vld [vmem:[%s9655_s7 + $0x428] sm:$0xff] }
 0x249   : > { %6701 = vmatpush.bf16.msrb.mxu3 %v8277_v57  ;;  %v4986_v57 = vunpack.c.h.b16 %v4436_v49  ;;  %v8358_v49 = vld [vmem:[%s9655_s7 + $0x468] sm:$0xff] }
 0x24a   : > { %6663 = vmatpush.bf16.msrb.mxu0 %v8252_v58  ;;  %v8320_v58 = vld [vmem:[%s9655_s7 + $0x338] sm:$0xff] }
 0x24b   : > { %6676 = vmatpush.bf16.msrb.mxu1 %v8260_v59  ;;  %v8328_v59 = vld [vmem:[%s9655_s7 + $0x378] sm:$0xff] }
 0x24c   : > { %6689 = vmatpush.bf16.msrb.mxu2 %v8268_v60  ;;  %v8336_v60 = vld [vmem:[%s9655_s7 + $0x3b8] sm:$0xff] }
 0x24d   : > { %6702 = vmatpush.bf16.msrb.mxu3 %v8276_v61  ;;  %v8344_v61 = vld [vmem:[%s9655_s7 + $0x3f8] sm:$0xff] }
 0x24e   : > { %6664 = vmatpush.bf16.msrb.mxu0 %v8251_v62  ;;  %v5015_v62 = vpack.c.b16 %v4983_v52, %v4983_v52  ;;  %v8349_v52 = vld [vmem:[%s9655_s7 + $0x420] sm:$0xff] }
 0x24f   : > { %6677 = vmatpush.bf16.msrb.mxu1 %v8259_v63  ;;  %v5017_v63 = vpack.c.b16 %v4985_v53, %v4985_v53  ;;  %v8357_v53 = vld [vmem:[%s9655_s7 + $0x460] sm:$0xff] }
 0x250   : > { %6690 = vmatpush.bf16.msrb.mxu2 %v8267_v0  ;;  %v5016_v0 = vpack.c.b16 %v4984_v56, %v4984_v56  ;;  %v8348_v56 = vld [vmem:[%s9655_s7 + $0x418] sm:$0xff] }
 0x251   : > { %6703 = vmatpush.bf16.msrb.mxu3 %v8275_v1  ;;  %v5018_v1 = vpack.c.b16 %v4986_v57, %v4986_v57  ;;  %v8356_v57 = vld [vmem:[%s9655_s7 + $0x458] sm:$0xff] }
 0x252   : > { %6665 = vmatpush.bf16.msrb.mxu0 %v8250_v2  ;;  %v8319_v2 = vld [vmem:[%s9655_s7 + $0x330] sm:$0xff] }
 0x253   : > { %6678 = vmatpush.bf16.msrb.mxu1 %v8258_v3  ;;  %v8327_v3 = vld [vmem:[%s9655_s7 + $0x370] sm:$0xff] }
 0x254   : > { %6691 = vmatpush.bf16.msrb.mxu2 %v8266_v4  ;;  %v8335_v4 = vld [vmem:[%s9655_s7 + $0x3b0] sm:$0xff] }
 0x255   : > { %6704 = vmatpush.bf16.msrb.mxu3 %v8274_v5  ;;  %v8343_v5 = vld [vmem:[%s9655_s7 + $0x3f0] sm:$0xff] }
 0x256   : > { %6666 = vmatpush.bf16.msrb.mxu0 %v8249_v8  ;;  %v8334_v8 = vld [vmem:[%s9655_s7 + $0x3a8] sm:$0xff] }
 0x257   : > { %6679 = vmatpush.bf16.msrb.mxu1 %v8257_v9  ;;  %v8342_v9 = vld [vmem:[%s9655_s7 + $0x3e8] sm:$0xff] }
 0x258   : > { %6692 = vmatpush.bf16.msrb.mxu2 %v8265_v12  ;;  %v8333_v12 = vld [vmem:[%s9655_s7 + $0x3a0] sm:$0xff] }
 0x259   : > { %6705 = vmatpush.bf16.msrb.mxu3 %v8273_v13  ;;  %6667 = vmatmul.bf16.vlgmr.msrb.gmra.mxu0 %v5011_v21  ;;  %v8341_v13 = vld [vmem:[%s9655_s7 + $0x3e0] sm:$0xff]  ;;  %v8339_v21 = vld [vmem:[%s9655_s7 + $0x3d0] sm:$0xff] }
 0x25a   : > { %6711 = vmatpush.bf16.msra.mxu0 %v8288_v16  ;;  %6680 = vmatmul.bf16.vlgmr.msrb.gmra.mxu1 %v5012_v23  ;;  %v8332_v16 = vld [vmem:[%s9655_s7 + $0x398] sm:$0xff]  ;;  %v8322_v23 = vld [vmem:[%s9655_s7 + $0x348] sm:$0xff] }
 0x25b   : > { %6724 = vmatpush.bf16.msra.mxu1 %v8296_v17  ;;  %6693 = vmatmul.bf16.vlgmr.msrb.gmra.mxu2 %v5013_v20  ;;  %v8340_v17 = vld [vmem:[%s9655_s7 + $0x3d8] sm:$0xff]  ;;  %v8331_v20 = vld [vmem:[%s9655_s7 + $0x390] sm:$0xff] }
 0x25c   : > { %6737 = vmatpush.bf16.msra.mxu2 %v8304_v18  ;;  %6706 = vmatmul.bf16.vlgmr.msrb.gmra.mxu3 %v5014_v22  ;;  %v8315_v18 = vld [vmem:[%s9655_s7 + $0x310] sm:$0xff]  ;;  %v8314_v22 = vld [vmem:[%s9655_s7 + $0x308] sm:$0xff] }
 0x25d   : > { %6750 = vmatpush.bf16.msra.mxu3 %v8312_v19  ;;  %v8323_v19 = vld [vmem:[%s9655_s7 + $0x350] sm:$0xff] }
 0x25e   : > { %6712 = vmatpush.bf16.msra.mxu0 %v8287_v24  ;;  %v8330_v24 = vld [vmem:[%s9655_s7 + $0x388] sm:$0xff] }
 0x25f   : > { %6725 = vmatpush.bf16.msra.mxu1 %v8295_v25  ;;  %v8338_v25 = vld [vmem:[%s9655_s7 + $0x3c8] sm:$0xff] }
 0x260   : > { %6738 = vmatpush.bf16.msra.mxu2 %v8303_v26  ;;  %v4437_v26 = vld [vmem:[%s10003_s0 + $0x30] sm:$0xff] }
 0x261   : > { %6751 = vmatpush.bf16.msra.mxu3 %v8311_v27  ;;  %v4438_v27 = vld [vmem:[%s10003_s0 + $0x38] sm:$0xff] }
 0x262   : > { %6713 = vmatpush.bf16.msra.mxu0 %v8286_v28  ;;  %v8313_v28 = vld [vmem:[%s9655_s7 + $0x300] sm:$0xff] }
 0x263   : > { %6726 = vmatpush.bf16.msra.mxu1 %v8294_v29  ;;  %v8321_v29 = vld [vmem:[%s9655_s7 + $0x340] sm:$0xff] }
 0x264   : > { %6739 = vmatpush.bf16.msra.mxu2 %v8302_v30  ;;  %v4987_v30 = vunpack.c.l.b16 %v4437_v26 }
 0x265   : > { %6752 = vmatpush.bf16.msra.mxu3 %v8310_v31  ;;  %v4989_v31 = vunpack.c.l.b16 %v4438_v27 }
 0x266   : > { %6714 = vmatpush.bf16.msra.mxu0 %v8285_v32  ;;  %v8329_v32 = vld [vmem:[%s9655_s7 + $0x380] sm:$0xff] }
 0x267   : > { %6727 = vmatpush.bf16.msra.mxu1 %v8293_v33  ;;  %v8337_v33 = vld [vmem:[%s9655_s7 + $0x3c0] sm:$0xff] }
 0x268   : > { %6740 = vmatpush.bf16.msra.mxu2 %v8301_v34  ;;  %v4988_v34 = vunpack.c.h.b16 %v4437_v26  ;;  %v8382_v26 = vld [vmem:[%s9655_s7 + $0x528] sm:$0xff] }
 0x269   : > { %6753 = vmatpush.bf16.msra.mxu3 %v8309_v35  ;;  %v4990_v35 = vunpack.c.h.b16 %v4438_v27  ;;  %v8390_v27 = vld [vmem:[%s9655_s7 + $0x568] sm:$0xff] }
 0x26a   : > { %6715 = vmatpush.bf16.msra.mxu0 %v8284_v36  ;;  %v8352_v36 = vld [vmem:[%s9655_s7 + $0x438] sm:$0xff] }
 0x26b   : > { %6728 = vmatpush.bf16.msra.mxu1 %v8292_v37  ;;  %v8360_v37 = vld [vmem:[%s9655_s7 + $0x478] sm:$0xff] }
 0x26c   : > { %6741 = vmatpush.bf16.msra.mxu2 %v8300_v38  ;;  %v8368_v38 = vld [vmem:[%s9655_s7 + $0x4b8] sm:$0xff] }
 0x26d   : > { %6754 = vmatpush.bf16.msra.mxu3 %v8308_v39  ;;  %v8376_v39 = vld [vmem:[%s9655_s7 + $0x4f8] sm:$0xff] }
 0x26e   : > { %6716 = vmatpush.bf16.msra.mxu0 %v8283_v40  ;;  %v5019_v40 = vpack.c.b16 %v4987_v30, %v4987_v30 }
 0x26f   : > { %6729 = vmatpush.bf16.msra.mxu1 %v8291_v41  ;;  %v5021_v41 = vpack.c.b16 %v4989_v31, %v4989_v31  ;;  %v8381_v31 = vld [vmem:[%s9655_s7 + $0x520] sm:$0xff] }
 0x270   : > { %6742 = vmatpush.bf16.msra.mxu2 %v8299_v42  ;;  %v5020_v42 = vpack.c.b16 %v4988_v34, %v4988_v34  ;;  %v8397_v34 = vld [vmem:[%s9655_s7 + $0x5a0] sm:$0xff] }
 0x271   : > { %6755 = vmatpush.bf16.msra.mxu3 %v8307_v43  ;;  %v5022_v43 = vpack.c.b16 %v4990_v35, %v4990_v35  ;;  %v8405_v35 = vld [vmem:[%s9655_s7 + $0x5e0] sm:$0xff] }
 0x272   : > { %6717 = vmatpush.bf16.msra.mxu0 %v8282_v44  ;;  %v8351_v44 = vld [vmem:[%s9655_s7 + $0x430] sm:$0xff] }
 0x273   : > { %6730 = vmatpush.bf16.msra.mxu1 %v8290_v45  ;;  %v8359_v45 = vld [vmem:[%s9655_s7 + $0x470] sm:$0xff] }
 0x274   : > { %6743 = vmatpush.bf16.msra.mxu2 %v8298_v46  ;;  %v8367_v46 = vld [vmem:[%s9655_s7 + $0x4b0] sm:$0xff] }
 0x275   : > { %6756 = vmatpush.bf16.msra.mxu3 %v8306_v47  ;;  %v8375_v47 = vld [vmem:[%s9655_s7 + $0x4f0] sm:$0xff] }
 0x276   : > { %6718 = vmatpush.bf16.msra.mxu0 %v8281_v50  ;;  %v8366_v50 = vld [vmem:[%s9655_s7 + $0x4a8] sm:$0xff] }
 0x277   : > { %6731 = vmatpush.bf16.msra.mxu1 %v8289_v51  ;;  %v8374_v51 = vld [vmem:[%s9655_s7 + $0x4e8] sm:$0xff] }
 0x278   : > { %6744 = vmatpush.bf16.msra.mxu2 %v8297_v54  ;;  %v8365_v54 = vld [vmem:[%s9655_s7 + $0x4a0] sm:$0xff] }
 0x279   : > { %6757 = vmatpush.bf16.msra.mxu3 %v8305_v55  ;;  %6719 = vmatmul.bf16.vlgmr.msra.gmra.mxu0 %v5015_v62  ;;  %v8373_v55 = vld [vmem:[%s9655_s7 + $0x4e0] sm:$0xff]  ;;  %v8363_v62 = vld [vmem:[%s9655_s7 + $0x490] sm:$0xff] }
 0x27a   : > { %6763 = vmatpush.bf16.msrb.mxu0 %v8320_v58  ;;  %6732 = vmatmul.bf16.vlgmr.msra.gmra.mxu1 %v5016_v0  ;;  %v8364_v58 = vld [vmem:[%s9655_s7 + $0x498] sm:$0xff]  ;;  %v8346_v0 = vld [vmem:[%s9655_s7 + $0x408] sm:$0xff] }
 0x27b   : > { %6776 = vmatpush.bf16.msrb.mxu1 %v8328_v59  ;;  %6745 = vmatmul.bf16.vlgmr.msra.gmra.mxu2 %v5017_v63  ;;  %v8372_v59 = vld [vmem:[%s9655_s7 + $0x4d8] sm:$0xff]  ;;  %v8371_v63 = vld [vmem:[%s9655_s7 + $0x4d0] sm:$0xff] }
 0x27c   : > { %6789 = vmatpush.bf16.msrb.mxu2 %v8336_v60  ;;  %6758 = vmatmul.bf16.vlgmr.msra.gmra.mxu3 %v5018_v1  ;;  %v8347_v60 = vld [vmem:[%s9655_s7 + $0x410] sm:$0xff]  ;;  %v8354_v1 = vld [vmem:[%s9655_s7 + $0x448] sm:$0xff] }
 0x27d   : > { %6802 = vmatpush.bf16.msrb.mxu3 %v8344_v61  ;;  %v8355_v61 = vld [vmem:[%s9655_s7 + $0x450] sm:$0xff] }
 0x27e   : > { %6764 = vmatpush.bf16.msrb.mxu0 %v8319_v2  ;;  %v8362_v2 = vld [vmem:[%s9655_s7 + $0x488] sm:$0xff] }
 0x27f   : > { %6777 = vmatpush.bf16.msrb.mxu1 %v8327_v3  ;;  %v8370_v3 = vld [vmem:[%s9655_s7 + $0x4c8] sm:$0xff] }
 0x280   : > { %6790 = vmatpush.bf16.msrb.mxu2 %v8335_v4  ;;  %v4439_v4 = vld [vmem:[%s10003_s0 + $0x40] sm:$0xff] }
 0x281   : > { %6803 = vmatpush.bf16.msrb.mxu3 %v8343_v5  ;;  %v4440_v5 = vld [vmem:[%s10003_s0 + $0x48] sm:$0xff] }
 0x282   : > { %6765 = vmatpush.bf16.msrb.mxu0 %v8318_v6  ;;  %v8345_v6 = vld [vmem:[%s9655_s7 + $0x400] sm:$0xff] }
 0x283   : > { %6778 = vmatpush.bf16.msrb.mxu1 %v8326_v7  ;;  %v8353_v7 = vld [vmem:[%s9655_s7 + $0x440] sm:$0xff] }
 0x284   : > { %6791 = vmatpush.bf16.msrb.mxu2 %v8334_v8  ;;  %v4991_v8 = vunpack.c.l.b16 %v4439_v4 }
 0x285   : > { %6804 = vmatpush.bf16.msrb.mxu3 %v8342_v9  ;;  %v4993_v9 = vunpack.c.l.b16 %v4440_v5 }
 0x286   : > { %6766 = vmatpush.bf16.msrb.mxu0 %v8317_v10  ;;  %v8361_v10 = vld [vmem:[%s9655_s7 + $0x480] sm:$0xff] }
 0x287   : > { %6779 = vmatpush.bf16.msrb.mxu1 %v8325_v11  ;;  %v8369_v11 = vld [vmem:[%s9655_s7 + $0x4c0] sm:$0xff] }
 0x288   : > { %6792 = vmatpush.bf16.msrb.mxu2 %v8333_v12  ;;  %v4992_v12 = vunpack.c.h.b16 %v4439_v4  ;;  %v8424_v4 = vld [vmem:[%s9655_s7 + $0x678] sm:$0xff] }
 0x289   : > { %6805 = vmatpush.bf16.msrb.mxu3 %v8341_v13  ;;  %v4994_v13 = vunpack.c.h.b16 %v4440_v5  ;;  %v8432_v5 = vld [vmem:[%s9655_s7 + $0x6b8] sm:$0xff] }
 0x28a   : > { %6767 = vmatpush.bf16.msrb.mxu0 %v8316_v14  ;;  %v8384_v14 = vld [vmem:[%s9655_s7 + $0x538] sm:$0xff] }
 0x28b   : > { %6780 = vmatpush.bf16.msrb.mxu1 %v8324_v15  ;;  %v8392_v15 = vld [vmem:[%s9655_s7 + $0x578] sm:$0xff] }
 0x28c   : > { %6793 = vmatpush.bf16.msrb.mxu2 %v8332_v16  ;;  %v8400_v16 = vld [vmem:[%s9655_s7 + $0x5b8] sm:$0xff] }
 0x28d   : > { %6806 = vmatpush.bf16.msrb.mxu3 %v8340_v17  ;;  %v8408_v17 = vld [vmem:[%s9655_s7 + $0x5f8] sm:$0xff] }
 0x28e   : > { %6768 = vmatpush.bf16.msrb.mxu0 %v8315_v18  ;;  %v5023_v18 = vpack.c.b16 %v4991_v8, %v4991_v8 }
 0x28f   : > { %6781 = vmatpush.bf16.msrb.mxu1 %v8323_v19  ;;  %v5025_v19 = vpack.c.b16 %v4993_v9, %v4993_v9 }
 0x290   : > { %6794 = vmatpush.bf16.msrb.mxu2 %v8331_v20  ;;  %v5024_v20 = vpack.c.b16 %v4992_v12, %v4992_v12  ;;  %v8423_v12 = vld [vmem:[%s9655_s7 + $0x670] sm:$0xff] }
 0x291   : > { %6807 = vmatpush.bf16.msrb.mxu3 %v8339_v21  ;;  %v5026_v21 = vpack.c.b16 %v4994_v13, %v4994_v13  ;;  %v8431_v13 = vld [vmem:[%s9655_s7 + $0x6b0] sm:$0xff] }
 0x292   : > { %6769 = vmatpush.bf16.msrb.mxu0 %v8314_v22  ;;  %v8383_v22 = vld [vmem:[%s9655_s7 + $0x530] sm:$0xff] }
 0x293   : > { %6782 = vmatpush.bf16.msrb.mxu1 %v8322_v23  ;;  %v8391_v23 = vld [vmem:[%s9655_s7 + $0x570] sm:$0xff] }
 0x294   : > { %6795 = vmatpush.bf16.msrb.mxu2 %v8330_v24  ;;  %v8399_v24 = vld [vmem:[%s9655_s7 + $0x5b0] sm:$0xff] }
 0x295   : > { %6808 = vmatpush.bf16.msrb.mxu3 %v8338_v25  ;;  %v8407_v25 = vld [vmem:[%s9655_s7 + $0x5f0] sm:$0xff] }
 0x296   : > { %6770 = vmatpush.bf16.msrb.mxu0 %v8313_v28  ;;  %v8398_v28 = vld [vmem:[%s9655_s7 + $0x5a8] sm:$0xff] }
 0x297   : > { %6783 = vmatpush.bf16.msrb.mxu1 %v8321_v29  ;;  %v8406_v29 = vld [vmem:[%s9655_s7 + $0x5e8] sm:$0xff] }
 0x298   : > { %6796 = vmatpush.bf16.msrb.mxu2 %v8329_v32  ;;  %v8389_v32 = vld [vmem:[%s9655_s7 + $0x560] sm:$0xff] }
 0x299   : > { %6809 = vmatpush.bf16.msrb.mxu3 %v8337_v33  ;;  %6771 = vmatmul.bf16.vlgmr.msrb.gmra.mxu0 %v5019_v40  ;;  %v8404_v40 = vld [vmem:[%s9655_s7 + $0x5d8] sm:$0xff] }
 0x29a   : > { %6815 = vmatpush.bf16.msra.mxu0 %v8352_v36  ;;  %6784 = vmatmul.bf16.vlgmr.msrb.gmra.mxu1 %v5020_v42 }
 0x29b   : > { %6828 = vmatpush.bf16.msra.mxu1 %v8360_v37  ;;  %6797 = vmatmul.bf16.vlgmr.msrb.gmra.mxu2 %v5021_v41  ;;  %v8380_v37 = vld [vmem:[%s9655_s7 + $0x518] sm:$0xff] }
 0x29c   : > { %6841 = vmatpush.bf16.msra.mxu2 %v8368_v38  ;;  %6810 = vmatmul.bf16.vlgmr.msrb.gmra.mxu3 %v5022_v43  ;;  %v8388_v38 = vld [vmem:[%s9655_s7 + $0x558] sm:$0xff] }
 0x29d   : > { %6854 = vmatpush.bf16.msra.mxu3 %v8376_v39  ;;  %v8396_v39 = vld [vmem:[%s9655_s7 + $0x598] sm:$0xff] }
 0x29e   : > { %6816 = vmatpush.bf16.msra.mxu0 %v8351_v44 }
 0x29f   : > { %6829 = vmatpush.bf16.msra.mxu1 %v8359_v45  ;;  %v8379_v45 = vld [vmem:[%s9655_s7 + $0x510] sm:$0xff] }
 0x2a0   : > { %6842 = vmatpush.bf16.msra.mxu2 %v8367_v46  ;;  %v8387_v46 = vld [vmem:[%s9655_s7 + $0x550] sm:$0xff] }
 0x2a1   : > { %6855 = vmatpush.bf16.msra.mxu3 %v8375_v47 }
 0x2a2   : > { %6817 = vmatpush.bf16.msra.mxu0 %v8350_v48 }
 0x2a3   : > { %6830 = vmatpush.bf16.msra.mxu1 %v8358_v49  ;;  %v8395_v49 = vld [vmem:[%s9655_s7 + $0x590] sm:$0xff] }
 0x2a4   : > { %6843 = vmatpush.bf16.msra.mxu2 %v8366_v50  ;;  %v8403_v50 = vld [vmem:[%s9655_s7 + $0x5d0] sm:$0xff] }
 0x2a5   : > { %6856 = vmatpush.bf16.msra.mxu3 %v8374_v51  ;;  %v8378_v51 = vld [vmem:[%s9655_s7 + $0x508] sm:$0xff] }
 0x2a6   : > { %6818 = vmatpush.bf16.msra.mxu0 %v8349_v52  ;;  %v8386_v52 = vld [vmem:[%s9655_s7 + $0x548] sm:$0xff] }
 0x2a7   : > { %6831 = vmatpush.bf16.msra.mxu1 %v8357_v53  ;;  %v8394_v53 = vld [vmem:[%s9655_s7 + $0x588] sm:$0xff] }
 0x2a8   : > { %6844 = vmatpush.bf16.msra.mxu2 %v8365_v54  ;;  %v8402_v54 = vld [vmem:[%s9655_s7 + $0x5c8] sm:$0xff] }
 0x2a9   : > { %6857 = vmatpush.bf16.msra.mxu3 %v8373_v55  ;;  %v4441_v55 = vld [vmem:[%s10003_s0 + $0x50] sm:$0xff] }
 0x2aa   : > { %6819 = vmatpush.bf16.msra.mxu0 %v8348_v56  ;;  %v4442_v56 = vld [vmem:[%s10003_s0 + $0x58] sm:$0xff] }
 0x2ab   : > { %6832 = vmatpush.bf16.msra.mxu1 %v8356_v57 }
 0x2ac   : > { %6845 = vmatpush.bf16.msra.mxu2 %v8364_v58 }
 0x2ad   : > { %6858 = vmatpush.bf16.msra.mxu3 %v8372_v59  ;;  %v8377_v59 = vld [vmem:[%s9655_s7 + $0x500] sm:$0xff] }
 0x2ae   : > { %6820 = vmatpush.bf16.msra.mxu0 %v8347_v60  ;;  %v8385_v60 = vld [vmem:[%s9655_s7 + $0x540] sm:$0xff] }
 0x2af   : > { %6833 = vmatpush.bf16.msra.mxu1 %v8355_v61  ;;  %v4995_v61 = vunpack.c.l.b16 %v4441_v55 }
 0x2b0   : > { %6846 = vmatpush.bf16.msra.mxu2 %v8363_v62  ;;  %v4997_v62 = vunpack.c.l.b16 %v4442_v56 }
 0x2b1   : > { %6859 = vmatpush.bf16.msra.mxu3 %v8371_v63  ;;  %v8393_v63 = vld [vmem:[%s9655_s7 + $0x580] sm:$0xff] }
 0x2b2   : > { %6821 = vmatpush.bf16.msra.mxu0 %v8346_v0  ;;  %v8401_v0 = vld [vmem:[%s9655_s7 + $0x5c0] sm:$0xff]  ;;  %v5029_v8 = vpack.c.b16 %v4997_v62, %v4997_v62 }
 0x2b3   : > { %6834 = vmatpush.bf16.msra.mxu1 %v8354_v1  ;;  %v4996_v1 = vunpack.c.h.b16 %v4441_v55 }
 0x2b4   : > { %6847 = vmatpush.bf16.msra.mxu2 %v8362_v2  ;;  %v4998_v2 = vunpack.c.h.b16 %v4442_v56 }
 0x2b5   : > { %6860 = vmatpush.bf16.msra.mxu3 %v8370_v3  ;;  %v8416_v3 = vld [vmem:[%s9655_s7 + $0x638] sm:$0xff]  ;;  %v5028_v9 = vpack.c.b16 %v4996_v1, %v4996_v1  ;;  %v8447_v1 = vld [vmem:[%s9655_s7 + $0x730] sm:$0xff] }
 0x2b6   : > { %6822 = vmatpush.bf16.msra.mxu0 %v8345_v6  ;;  %v6616_v30 = vpop.f32.mrf.mxu0  ;;  %v8440_v6 = vld [vmem:[%s9655_s7 + $0x6f8] sm:$0xff] }
 0x2b7   : > { %6835 = vmatpush.bf16.msra.mxu1 %v8353_v7  ;;  %v6629_v33 = vpop.f32.mrf.mxu1  ;;  %v5027_v7 = vpack.c.b16 %v4995_v61, %v4995_v61 }
 0x2b8   : > { %6848 = vmatpush.bf16.msra.mxu2 %v8361_v10  ;;  %v6630_v36 = vadd.f32 %v6629_v33, %v6616_v30  ;;  %v5030_v10 = vpack.c.b16 %v4998_v2, %v4998_v2  ;;  %v8436_v30 = vld [vmem:[%s9655_s7 + $0x6d8] sm:$0xff]  ;;  %v8455_v2 = vld [vmem:[%s9655_s7 + $0x770] sm:$0xff] }
 0x2b9   : > { %6861 = vmatpush.bf16.msra.mxu3 %v8369_v11  ;;  %6823 = vmatmul.bf16.vlgmr.msra.gmra.mxu0 %v5023_v18  ;;  %v8415_v11 = vld [vmem:[%s9655_s7 + $0x630] sm:$0xff]  ;;  %v8438_v18 = vld [vmem:[%s9655_s7 + $0x6e8] sm:$0xff] }
 0x2ba   : > { %6867 = vmatpush.bf16.msrb.mxu0 %v8384_v14  ;;  %6836 = vmatmul.bf16.vlgmr.msra.gmra.mxu1 %v5024_v20  ;;  %v8439_v14 = vld [vmem:[%s9655_s7 + $0x6f0] sm:$0xff]  ;;  %v8413_v20 = vld [vmem:[%s9655_s7 + $0x620] sm:$0xff] }
 0x2bb   : > { %6880 = vmatpush.bf16.msrb.mxu1 %v8392_v15  ;;  %6849 = vmatmul.bf16.vlgmr.msra.gmra.mxu2 %v5025_v19  ;;  %v8414_v15 = vld [vmem:[%s9655_s7 + $0x628] sm:$0xff] }
 0x2bc   : > { %6893 = vmatpush.bf16.msrb.mxu2 %v8400_v16  ;;  %6862 = vmatmul.bf16.vlgmr.msra.gmra.mxu3 %v5026_v21  ;;  %v8422_v16 = vld [vmem:[%s9655_s7 + $0x668] sm:$0xff]  ;;  %v8421_v21 = vld [vmem:[%s9655_s7 + $0x660] sm:$0xff] }
 0x2bd   : > { %6906 = vmatpush.bf16.msrb.mxu3 %v8408_v17  ;;  %v8430_v17 = vld [vmem:[%s9655_s7 + $0x6a8] sm:$0xff] }
 0x2be   : > { %6868 = vmatpush.bf16.msrb.mxu0 %v8383_v22  ;;  %v6642_v41 = vpop.f32.mrf.mxu2  ;;  %v6618_v44 = vpop.f32.mrf.mxu0 }
 0x2bf   : > { %6881 = vmatpush.bf16.msrb.mxu1 %v8391_v23  ;;  %v6643_v42 = vadd.f32 %v6642_v41, %v6630_v36  ;;  %v6655_v43 = vpop.f32.mrf.mxu3  ;;  %v6631_v48 = vpop.f32.mrf.mxu1  ;;  %v8419_v36 = vld [vmem:[%s9655_s7 + $0x650] sm:$0xff]  ;;  %v8410_v41 = vld [vmem:[%s9655_s7 + $0x608] sm:$0xff] }
 0x2c0   : > { %6894 = vmatpush.bf16.msrb.mxu2 %v8399_v24  ;;  %v8429_v24 = vld [vmem:[%s9655_s7 + $0x6a0] sm:$0xff]  ;;  %v8434_v44 = vld [vmem:[%s9655_s7 + $0x6c8] sm:$0xff] }
 0x2c1   : > { %6907 = vmatpush.bf16.msrb.mxu3 %v8407_v25  ;;  %v9869_v47 = vadd.f32 %v6655_v43, %v6643_v42  ;;  %v8437_v25 = vld [vmem:[%s9655_s7 + $0x6e0] sm:$0xff]  ;;  %v8418_v42 = vld [vmem:[%s9655_s7 + $0x648] sm:$0xff] }
 0x2c2   : > { %6869 = vmatpush.bf16.msrb.mxu0 %v8382_v26  ;;  %v8426_v43 = vld [vmem:[%s9655_s7 + $0x688] sm:$0xff] }
 0x2c3   : > { %6882 = vmatpush.bf16.msrb.mxu1 %v8390_v27  ;;  %v8412_v27 = vld [vmem:[%s9655_s7 + $0x618] sm:$0xff] }
 0x2c4   : > { %6895 = vmatpush.bf16.msrb.mxu2 %v8398_v28  ;;  %v8420_v28 = vld [vmem:[%s9655_s7 + $0x658] sm:$0xff] }
 0x2c5   : > { %6908 = vmatpush.bf16.msrb.mxu3 %v8406_v29  ;;  %v8428_v29 = vld [vmem:[%s9655_s7 + $0x698] sm:$0xff] }
 0x2c6   : > { %6870 = vmatpush.bf16.msrb.mxu0 %v8381_v31  ;;  %v6644_v57 = vpop.f32.mrf.mxu2 }
 0x2c7   : > { %6883 = vmatpush.bf16.msrb.mxu1 %v8389_v32  ;;  %v6657_v58 = vpop.f32.mrf.mxu3  ;;  %v8448_v57 = vld [vmem:[%s9655_s7 + $0x738] sm:$0xff] }
 0x2c8   : > { %6896 = vmatpush.bf16.msrb.mxu2 %v8397_v34  ;;  %v8456_v58 = vld [vmem:[%s9655_s7 + $0x778] sm:$0xff] }
 0x2c9   : > { %6909 = vmatpush.bf16.msrb.mxu3 %v8405_v35  ;;  %v8411_v35 = vld [vmem:[%s9655_s7 + $0x610] sm:$0xff] }
 0x2ca   : > { %6871 = vmatpush.bf16.msrb.mxu0 %v8380_v37 }
 0x2cb   : > { %6884 = vmatpush.bf16.msrb.mxu1 %v8388_v38 }
 0x2cc   : > { %6897 = vmatpush.bf16.msrb.mxu2 %v8396_v39  ;;  %v8427_v39 = vld [vmem:[%s9655_s7 + $0x690] sm:$0xff] }
 0x2cd   : > { %6910 = vmatpush.bf16.msrb.mxu3 %v8404_v40  ;;  %v8435_v40 = vld [vmem:[%s9655_s7 + $0x6d0] sm:$0xff] }
 0x2ce   : > { %6872 = vmatpush.bf16.msrb.mxu0 %v8379_v45  ;;  %v4443_v45 = vld [vmem:[%s10003_s0 + $0x60] sm:$0xff] }
 0x2cf   : > { %6885 = vmatpush.bf16.msrb.mxu1 %v8387_v46  ;;  %v4444_v46 = vld [vmem:[%s10003_s0 + $0x68] sm:$0xff]  ;;  %v5000_v55 = vunpack.c.h.b16 %v4443_v45 }
 0x2d0   : > { %6898 = vmatpush.bf16.msrb.mxu2 %v8395_v49  ;;  %v8409_v49 = vld [vmem:[%s9655_s7 + $0x600] sm:$0xff]  ;;  %v5002_v56 = vunpack.c.h.b16 %v4444_v46 }
 0x2d1   : > { %6911 = vmatpush.bf16.msrb.mxu3 %v8403_v50  ;;  %v8417_v50 = vld [vmem:[%s9655_s7 + $0x640] sm:$0xff] }
 0x2d2   : > { %6873 = vmatpush.bf16.msrb.mxu0 %v8378_v51  ;;  %v4999_v51 = vunpack.c.l.b16 %v4443_v45  ;;  %v8457_v45 = vld [vmem:[%s9655_s7 + $0x780] sm:$0xff] }
 0x2d3   : > { %6886 = vmatpush.bf16.msrb.mxu1 %v8386_v52  ;;  %v5001_v52 = vunpack.c.l.b16 %v4444_v46  ;;  %v8465_v46 = vld [vmem:[%s9655_s7 + $0x7c0] sm:$0xff] }
 0x2d4   : > { %6899 = vmatpush.bf16.msrb.mxu2 %v8394_v53  ;;  %v8425_v53 = vld [vmem:[%s9655_s7 + $0x680] sm:$0xff]  ;;  %v5031_v61 = vpack.c.b16 %v4999_v51, %v4999_v51 }
 0x2d5   : > { %6912 = vmatpush.bf16.msrb.mxu3 %v8402_v54  ;;  %v8433_v54 = vld [vmem:[%s9655_s7 + $0x6c0] sm:$0xff]  ;;  %v5033_v62 = vpack.c.b16 %v5001_v52, %v5001_v52 }
 0x2d6   : > { %6874 = vmatpush.bf16.msrb.mxu0 %v8377_v59  ;;  %v6668_v19 = vpop.f32.mrf.mxu0  ;;  %v8464_v59 = vld [vmem:[%s9655_s7 + $0x7b8] sm:$0xff] }
 0x2d7   : > { %6887 = vmatpush.bf16.msrb.mxu1 %v8385_v60  ;;  %v6669_v22 = vadd.f32 %v6668_v19, %v9869_v47  ;;  %v6681_v23 = vpop.f32.mrf.mxu1  ;;  %v8472_v60 = vld [vmem:[%s9655_s7 + $0x7f8] sm:$0xff] }
 0x2d8   : > { %6900 = vmatpush.bf16.msrb.mxu2 %v8393_v63  ;;  %v5032_v63 = vpack.c.b16 %v5000_v55, %v5000_v55  ;;  %v8460_v19 = vld [vmem:[%s9655_s7 + $0x798] sm:$0xff] }
 0x2d9   : > { %6913 = vmatpush.bf16.msrb.mxu3 %v8401_v0  ;;  %6875 = vmatmul.bf16.vlgmr.msrb.gmra.mxu0 %v5027_v7  ;;  %v6682_v26 = vadd.f32 %v6681_v23, %v6669_v22  ;;  %v5034_v0 = vpack.c.b16 %v5002_v56, %v5002_v56  ;;  %v8462_v7 = vld [vmem:[%s9655_s7 + $0x7a8] sm:$0xff] }
 0x2da   : > { %6919 = vmatpush.bf16.msra.mxu0 %v8416_v3  ;;  %6888 = vmatmul.bf16.vlgmr.msrb.gmra.mxu1 %v5028_v9  ;;  %v8463_v3 = vld [vmem:[%s9655_s7 + $0x7b0] sm:$0xff] }
 0x2db   : > { %6932 = vmatpush.bf16.msra.mxu1 %v8424_v4  ;;  %6901 = vmatmul.bf16.vlgmr.msrb.gmra.mxu2 %v5029_v8  ;;  %v8471_v4 = vld [vmem:[%s9655_s7 + $0x7f0] sm:$0xff]  ;;  %v8470_v8 = vld [vmem:[%s9655_s7 + $0x7e8] sm:$0xff] }
 0x2dc   : > { %6945 = vmatpush.bf16.msra.mxu2 %v8432_v5  ;;  %6914 = vmatmul.bf16.vlgmr.msrb.gmra.mxu3 %v5030_v10  ;;  %v8446_v5 = vld [vmem:[%s9655_s7 + $0x728] sm:$0xff] }
 0x2dd   : > { %6958 = vmatpush.bf16.msra.mxu3 %v8440_v6  ;;  %v8454_v6 = vld [vmem:[%s9655_s7 + $0x768] sm:$0xff] }
 0x2de   : > { %6920 = vmatpush.bf16.msra.mxu0 %v8415_v11  ;;  %v6694_v31 = vpop.f32.mrf.mxu2  ;;  %v6670_v34 = vpop.f32.mrf.mxu0  ;;  %v8445_v11 = vld [vmem:[%s9655_s7 + $0x720] sm:$0xff] }
 0x2df   : > { %6933 = vmatpush.bf16.msra.mxu1 %v8423_v12  ;;  %v6695_v32 = vadd.f32 %v6694_v31, %v6682_v26  ;;  %v6707_v33 = vpop.f32.mrf.mxu3  ;;  %v6683_v38 = vpop.f32.mrf.mxu1  ;;  %v8453_v12 = vld [vmem:[%s9655_s7 + $0x760] sm:$0xff]  ;;  %v8443_v26 = vld [vmem:[%s9655_s7 + $0x710] sm:$0xff]  ;;  %v8442_v31 = vld [vmem:[%s9655_s7 + $0x708] sm:$0xff] }
 0x2e0   : > { %6946 = vmatpush.bf16.msra.mxu2 %v8431_v13  ;;  %v8458_v34 = vld [vmem:[%s9655_s7 + $0x788] sm:$0xff] }
 0x2e1   : > { %6959 = vmatpush.bf16.msra.mxu3 %v8439_v14  ;;  %v9910_v37 = vadd.f32 %v6707_v33, %v6695_v32  ;;  %v8461_v14 = vld [vmem:[%s9655_s7 + $0x7a0] sm:$0xff]  ;;  %v8450_v32 = vld [vmem:[%s9655_s7 + $0x748] sm:$0xff]  ;;  %v4445_v33 = vld [vmem:[%s10003_s0 + $0x70] sm:$0xff] }
 0x2e2   : > { %6921 = vmatpush.bf16.msra.mxu0 %v8414_v15  ;;  %v8469_v15 = vld [vmem:[%s9655_s7 + $0x7e0] sm:$0xff] }
 0x2e3   : > { %6934 = vmatpush.bf16.msra.mxu1 %v8422_v16 }
 0x2e4   : > { %6947 = vmatpush.bf16.msra.mxu2 %v8430_v17  ;;  %v8444_v17 = vld [vmem:[%s9655_s7 + $0x718] sm:$0xff] }
 0x2e5   : > { %6960 = vmatpush.bf16.msra.mxu3 %v8438_v18  ;;  %v8452_v18 = vld [vmem:[%s9655_s7 + $0x758] sm:$0xff] }
 0x2e6   : > { %6922 = vmatpush.bf16.msra.mxu0 %v8413_v20  ;;  %v6696_v47 = vpop.f32.mrf.mxu2  ;;  %v8468_v20 = vld [vmem:[%s9655_s7 + $0x7d8] sm:$0xff] }
 0x2e7   : > { %6935 = vmatpush.bf16.msra.mxu1 %v8421_v21  ;;  %v6709_v48 = vpop.f32.mrf.mxu3 }
 0x2e8   : > { %6948 = vmatpush.bf16.msra.mxu2 %v8429_v24 }
 0x2e9   : > { %6961 = vmatpush.bf16.msra.mxu3 %v8437_v25 }
 0x2ea   : > { %6923 = vmatpush.bf16.msra.mxu0 %v8412_v27  ;;  %v8451_v27 = vld [vmem:[%s9655_s7 + $0x750] sm:$0xff] }
 0x2eb   : > { %6936 = vmatpush.bf16.msra.mxu1 %v8420_v28 }
 0x2ec   : > { %6949 = vmatpush.bf16.msra.mxu2 %v8428_v29  ;;  %v8459_v29 = vld [vmem:[%s9655_s7 + $0x790] sm:$0xff] }
 0x2ed   : > { %6962 = vmatpush.bf16.msra.mxu3 %v8436_v30  ;;  %v8467_v30 = vld [vmem:[%s9655_s7 + $0x7d0] sm:$0xff] }
 0x2ee   : > { %6924 = vmatpush.bf16.msra.mxu0 %v8411_v35  ;;  %v8466_v35 = vld [vmem:[%s9655_s7 + $0x7c8] sm:$0xff] }
 0x2ef   : > { %6937 = vmatpush.bf16.msra.mxu1 %v8419_v36  ;;  %v4446_v36 = vld [vmem:[%s10003_s0 + $0x78] sm:$0xff] }
 0x2f0   : > { %6950 = vmatpush.bf16.msra.mxu2 %v8427_v39  ;;  %v5003_v39 = vunpack.c.l.b16 %v4445_v33 }
 0x2f1   : > { %6963 = vmatpush.bf16.msra.mxu3 %v8435_v40  ;;  %v5004_v40 = vunpack.c.h.b16 %v4445_v33 }
 0x2f2   : > { %6925 = vmatpush.bf16.msra.mxu0 %v8410_v41  ;;  %v8441_v41 = vld [vmem:[%s9655_s7 + $0x700] sm:$0xff]  ;;  %v5035_v47 = vpack.c.b16 %v5003_v39, %v5003_v39 }
 0x2f3   : > { %6938 = vmatpush.bf16.msra.mxu1 %v8418_v42  ;;  %v8449_v42 = vld [vmem:[%s9655_s7 + $0x740] sm:$0xff]  ;;  %v5036_v48 = vpack.c.b16 %v5004_v40, %v5004_v40 }
 0x2f4   : > { %6951 = vmatpush.bf16.msra.mxu2 %v8426_v43  ;;  %v5005_v43 = vunpack.c.l.b16 %v4446_v36 }
 0x2f5   : > { %6964 = vmatpush.bf16.msra.mxu3 %v8434_v44  ;;  %v5006_v44 = vunpack.c.h.b16 %v4446_v36 }
 0x2f6   : > { %6926 = vmatpush.bf16.msra.mxu0 %v8409_v49  ;;  %v6720_v9 = vpop.f32.mrf.mxu0  ;;  %v5037_v49 = vpack.c.b16 %v5005_v43, %v5005_v43 }
 0x2f7   : > { %6939 = vmatpush.bf16.msra.mxu1 %v8417_v50  ;;  %v6721_v10 = vadd.f32 %v6720_v9, %v9910_v37  ;;  %v6733_v13 = vpop.f32.mrf.mxu1  ;;  %v5038_v50 = vpack.c.b16 %v5006_v44, %v5006_v44 }
 0x2f8   : > { %6952 = vmatpush.bf16.msra.mxu2 %v8425_v53 }
 0x2f9   : > { %6965 = vmatpush.bf16.msra.mxu3 %v8433_v54  ;;  %6927 = vmatmul.bf16.vlgmr.msra.gmra.mxu0 %v5031_v61  ;;  %v6734_v16 = vadd.f32 %v6733_v13, %v6721_v10 }
 0x2fa   : > { %6971 = vmatpush.bf16.msrb.mxu0 %v8448_v57  ;;  %6940 = vmatmul.bf16.vlgmr.msra.gmra.mxu1 %v5032_v63 }
 0x2fb   : > { %6984 = vmatpush.bf16.msrb.mxu1 %v8456_v58  ;;  %6953 = vmatmul.bf16.vlgmr.msra.gmra.mxu2 %v5033_v62 }
 0x2fc   : > { %6997 = vmatpush.bf16.msrb.mxu2 %v8464_v59  ;;  %6966 = vmatmul.bf16.vlgmr.msra.gmra.mxu3 %v5034_v0 }
 0x2fd   : > { %7010 = vmatpush.bf16.msrb.mxu3 %v8472_v60 }
 0x2fe   : > { %6972 = vmatpush.bf16.msrb.mxu0 %v8447_v1  ;;  %v6746_v21 = vpop.f32.mrf.mxu2  ;;  %v6722_v24 = vpop.f32.mrf.mxu0 }
 0x2ff   : > { %6985 = vmatpush.bf16.msrb.mxu1 %v8455_v2  ;;  %v6747_v22 = vadd.f32 %v6746_v21, %v6734_v16  ;;  %v6759_v23 = vpop.f32.mrf.mxu3  ;;  %v6735_v28 = vpop.f32.mrf.mxu1 }
 0x300   : > { %6998 = vmatpush.bf16.msrb.mxu2 %v8463_v3 }
 0x301   : > { %7011 = vmatpush.bf16.msrb.mxu3 %v8471_v4  ;;  %v6760_v25 = vadd.f32 %v6759_v23, %v6747_v22 }
 0x302   : > { %6973 = vmatpush.bf16.msrb.mxu0 %v8446_v5 }
 0x303   : > { %6986 = vmatpush.bf16.msrb.mxu1 %v8454_v6 }
 0x304   : > { %6999 = vmatpush.bf16.msrb.mxu2 %v8462_v7 }
 0x305   : > { %7012 = vmatpush.bf16.msrb.mxu3 %v8470_v8 }
 0x306   : > { %6974 = vmatpush.bf16.msrb.mxu0 %v8445_v11  ;;  %v6748_v37 = vpop.f32.mrf.mxu2 }
 0x307   : > { %6987 = vmatpush.bf16.msrb.mxu1 %v8453_v12  ;;  %v6761_v38 = vpop.f32.mrf.mxu3 }
 0x308   : > { %7000 = vmatpush.bf16.msrb.mxu2 %v8461_v14 }
 0x309   : > { %7013 = vmatpush.bf16.msrb.mxu3 %v8469_v15 }
 0x30a   : > { %6975 = vmatpush.bf16.msrb.mxu0 %v8444_v17 }
 0x30b   : > { %6988 = vmatpush.bf16.msrb.mxu1 %v8452_v18 }
 0x30c   : > { %7001 = vmatpush.bf16.msrb.mxu2 %v8460_v19 }
 0x30d   : > { %7014 = vmatpush.bf16.msrb.mxu3 %v8468_v20 }
 0x30e   : > { %6976 = vmatpush.bf16.msrb.mxu0 %v8443_v26 }
 0x30f   : > { %6989 = vmatpush.bf16.msrb.mxu1 %v8451_v27 }
 0x310   : > { %7002 = vmatpush.bf16.msrb.mxu2 %v8459_v29 }
 0x311   : > { %7015 = vmatpush.bf16.msrb.mxu3 %v8467_v30 }
 0x312   : > { %6977 = vmatpush.bf16.msrb.mxu0 %v8442_v31 }
 0x313   : > { %6990 = vmatpush.bf16.msrb.mxu1 %v8450_v32 }
 0x314   : > { %7003 = vmatpush.bf16.msrb.mxu2 %v8458_v34 }
 0x315   : > { %7016 = vmatpush.bf16.msrb.mxu3 %v8466_v35 }
 0x316   : > { %6978 = vmatpush.bf16.msrb.mxu0 %v8441_v41  ;;  %v6772_v51 = vpop.f32.mrf.mxu0 }
 0x317   : > { %6991 = vmatpush.bf16.msrb.mxu1 %v8449_v42  ;;  %v6773_v52 = vadd.f32 %v6772_v51, %v6760_v25  ;;  %v6785_v53 = vpop.f32.mrf.mxu1 }
 0x318   : > { %7004 = vmatpush.bf16.msrb.mxu2 %v8457_v45 }
 0x319   : > { %7017 = vmatpush.bf16.msrb.mxu3 %v8465_v46  ;;  %6979 = vmatmul.bf16.vlgmr.msrb.gmra.mxu0 %v5035_v47  ;;  %v6786_v54 = vadd.f32 %v6785_v53, %v6773_v52 }
 0x31a   : > { %6992 = vmatmul.bf16.vlgmr.msrb.gmra.mxu1 %v5036_v48 }
 0x31b   : > { %7005 = vmatmul.bf16.vlgmr.msrb.gmra.mxu2 %v5037_v49 }
 0x31c   : > { %7018 = vmatmul.bf16.vlgmr.msrb.gmra.mxu3 %v5038_v50 }
 0x31e   : > { %v6798_v55 = vpop.f32.mrf.mxu2  ;;  %v6774_v58 = vpop.f32.mrf.mxu0 }
 0x31f   : > { %v6799_v56 = vadd.f32 %v6798_v55, %v6786_v54  ;;  %v6811_v57 = vpop.f32.mrf.mxu3  ;;  %v6787_v60 = vpop.f32.mrf.mxu1 }
 0x321   : > { %v6812_v59 = vadd.f32 %v6811_v57, %v6799_v56 }
 0x326   : > { %v6800_v61 = vpop.f32.mrf.mxu2 }
 0x327   : > { %v6813_v62 = vpop.f32.mrf.mxu3 }
 0x336   : > { %v6824_v63 = vpop.f32.mrf.mxu0 }
 0x337   : > { %v6825_v0 = vadd.f32 %v6824_v63, %v6812_v59  ;;  %v6837_v1 = vpop.f32.mrf.mxu1 }
 0x339   : > { %v6838_v2 = vadd.f32 %v6837_v1, %v6825_v0 }
 0x33e   : > { %v6850_v3 = vpop.f32.mrf.mxu2  ;;  %v6826_v6 = vpop.f32.mrf.mxu0 }
 0x33f   : > { %v6851_v4 = vadd.f32 %v6850_v3, %v6838_v2  ;;  %v6863_v5 = vpop.f32.mrf.mxu3  ;;  %v6839_v8 = vpop.f32.mrf.mxu1  ;;  %v7056_v6 = vld [vmem:[%s4417_s5] sm:$0x1] }
 0x341   : > { %v6864_v7 = vadd.f32 %v6863_v5, %v6851_v4 }
 0x346   : > { %v6852_v9 = vpop.f32.mrf.mxu2 }
 0x347   : > { %v6865_v10 = vpop.f32.mrf.mxu3 }
 0x348   : > { %v8513_v10 = vld [vmem:[%s4420_s28] ss:$0 sm:$0xff] }
 0x356   : > { %v6876_v11 = vpop.f32.mrf.mxu0 }
 0x357   : > { %v6889_v12 = vpop.f32.mrf.mxu1  ;;  %v6877_v22 = vadd.f32 %v6876_v11, %v6864_v7 }
 0x359   : > { %v6890_v26 = vadd.f32 %v6889_v12, %v6877_v22 }
 0x35e   : > { %v6902_v13 = vpop.f32.mrf.mxu2  ;;  %v6878_v15 = vpop.f32.mrf.mxu0 }
 0x35f   : > { %v6915_v14 = vpop.f32.mrf.mxu3  ;;  %v6891_v16 = vpop.f32.mrf.mxu1  ;;  %v6903_v27 = vadd.f32 %v6902_v13, %v6890_v26 }
 0x361   : > { %v6916_v30 = vadd.f32 %v6915_v14, %v6903_v27 }
 0x366   : > { %v6904_v17 = vpop.f32.mrf.mxu2 }
 0x367   : > { %v6917_v18 = vpop.f32.mrf.mxu3 }
 0x376   : > { %v6928_v19 = vpop.f32.mrf.mxu0 }
 0x377   : > { %v6941_v20 = vpop.f32.mrf.mxu1  ;;  %v6929_v31 = vadd.f32 %v6928_v19, %v6916_v30 }
 0x379   : > { %v6942_v32 = vadd.f32 %v6941_v20, %v6929_v31 }
 0x37e   : > { %v6954_v21 = vpop.f32.mrf.mxu2  ;;  %v6930_v24 = vpop.f32.mrf.mxu0 }
 0x37f   : > { %v6967_v23 = vpop.f32.mrf.mxu3  ;;  %v6943_v25 = vpop.f32.mrf.mxu1  ;;  %v6955_v33 = vadd.f32 %v6954_v21, %v6942_v32 }
 0x381   : > { %v6968_v34 = vadd.f32 %v6967_v23, %v6955_v33 }
 0x386   : > { %v6956_v28 = vpop.f32.mrf.mxu2 }
 0x387   : > { %v6969_v29 = vpop.f32.mrf.mxu3 }
 0x396   : > { %v6980_v35 = vpop.f32.mrf.mxu0 }
 0x397   : > { %v6993_v36 = vpop.f32.mrf.mxu1  ;;  %v6981_v37 = vadd.f32 %v6980_v35, %v6968_v34 }
 0x399   : > { %v6994_v38 = vadd.f32 %v6993_v36, %v6981_v37 }
 0x39e   : > { %v7006_v39 = vpop.f32.mrf.mxu2  ;;  %v6982_v42 = vpop.f32.mrf.mxu0 }
 0x39f   : > { %v7019_v40 = vpop.f32.mrf.mxu3  ;;  %v7007_v41 = vadd.f32 %v7006_v39, %v6994_v38  ;;  %v6995_v43 = vpop.f32.mrf.mxu1 }
 0x3a1   : > { %v7020_v44 = vadd.f32 %v7019_v40, %v7007_v41 }
 0x3a3   : > { %v7029_v45 = vrot.slane %v7020_v44, 4 }
 0x3a5   : > { %v7030_v46 = vadd.f32 %v7029_v45, %v7020_v44 }
 0x3a6   : > { %v7008_v47 = vpop.f32.mrf.mxu2 }
 0x3a7   : > { %v7021_v48 = vpop.f32.mrf.mxu3  ;;  %v7031_v49 = vrot.slane %v7030_v46, 2 }
 0x3a9   : > { %v7032_v50 = vadd.f32 %v7031_v49, %v7030_v46 }
 0x3ab   : > { %v7033_v51 = vrot.slane %v7032_v50, 1 }
 0x3ad   : > { %v7034_v52 = vadd.f32 %v7033_v51, %v7032_v50 }
 0x3af   : > { %v7035_v53 = vmul.f32 0.125, %v7034_v52 }
 0x3b1   : > { %v7036_v54 = vsub.f32 %v7020_v44, %v7035_v53 }
 0x3b3   : > { %v7037_v55 = vmul.f32 %v7036_v54, %v7036_v54 }
 0x3b5   : > { %v7038_v56 = vrot.slane %v7037_v55, 4 }
 0x3b7   : > { %v7039_v57 = vadd.f32 %v7038_v56, %v7037_v55 }
 0x3b9   : > { %v7040_v58 = vrot.slane %v7039_v57, 2 }
 0x3bb   : > { %v7041_v59 = vadd.f32 %v7040_v58, %v7039_v57 }
 0x3bd   : > { %v7042_v60 = vrot.slane %v7041_v59, 1 }
 0x3bf   : > { %v7043_v61 = vadd.f32 %v7042_v60, %v7041_v59 }
 0x3c1   : > { %v7044_v62 = vmul.f32 0.125, %v7043_v61 }
 0x3c3   : > { %v7045_v63 = vadd.f32 1e-05, %v7044_v62 }
 0x3c5   : > { %8514 = vrsqrt.f32 %v7045_v63  ;;  %vm7052_vm1 = vweird.f32 %v7045_v63 }
 0x3cb   : > { %v8515_v0 = vpop.eup %8514 }
 0x3cc   : > { %v7047_v1 = vmul.f32 %v8515_v0, %v7045_v63  ;;  %vm7053_vm0 = vweird.f32 %v8515_v0 }
 0x3cd   : > { %vm7054_vm2 = vmor %vm7052_vm1, %vm7053_vm0 }
 0x3ce   : > { %v7048_v2 = vmul.f32 %v8515_v0, %v7047_v1 }
 0x3d0   : > { %v7049_v3 = vmul.f32 0.5, %v7048_v2 }
 0x3d2   : > { %v7050_v4 = vsub.f32 1.5, %v7049_v3 }
 0x3d4   : > { %v7051_v5 = vmul.f32 %v8515_v0, %v7050_v4 }
 0x3d6   : > { %v7055_v7 = vsel %vm7054_vm2, %v8515_v0, %v7051_v5 }
 0x3d7   : > { %v7057_v8 = vmul.f32 %v7056_v6, %v7055_v7 }
 0x3d9   : > { %v7058_v9 = vperm.slane %v7057_v8, 0 }
 0x3db   : > { %v7059_v11 = vmul.f32 %v7058_v9, %v7036_v54 }
 0x3dd   : > { %v7064_v12 = vadd.f32 %v8513_v10, %v7059_v11 }
 0x3df   : > { %vm7065_vm3 = vcmp.ge.f32.partialorder %v7064_v12, 0.0  ;;  %v7066_v13 = vmul.f32 0.01, %v7064_v12 }
 0x3e1   : > { %v7067_v14 = vsel %vm7065_vm3, %v7064_v12, %v7066_v13 }
 0x3e2   : > { %v7068_v15 = vpack.c.bf16 %v7067_v14, %v7067_v14 }
 0x3e4   : > { %7069 = vst [vmem:[%s4424_s12] sm:$0xf] %v7068_v15 }
 0x3e5 PF: > { %s14_s19 = sadd.s32 1, %s8554_s19   ;;  %s10008_s15 = smov %s8542_s16 }
 0x3e6   : > { %p11_p10 = scmp.ge.s32.totalorder %s14_s19, 6   ;;  %s10009_s16 = smov %s8616_s23 }
 0x3e7   : > { %s10010_s17 = smov %s8550_s18  ;;  %s10011_s18 = smov %s10013_s20 }
 0x3e8   :  { %13 = sbr.rel (!%p11_p10) target bundleno = 3 (0x3), region = 144 }

// kernel: discriminator_forward.9
= control target key start
LH: loop header
LB: loop body
LE: loop exit
PB: predicated region body
PF: predicated region fallthrough
CT: control target
= control target key end

     0   :  { %vm25_vm0 = vcmask 1024   ;;  %s9429_s1 = inlined_call_operand.vmem [shape: bf16[8192,1], index: 1, kind: input, shape index: {}]   ;;  %s9430_s0 = inlined_call_operand.vmem [shape: bf16[2,8192], index: 0, kind: input, shape index: {}]   ;;  %s9431_s2 = inlined_call_operand.<no memory space> [shape: f32[1,1], index: 2, kind: input, shape index: {}]   ;;  %s9432_s3 = inlined_call_operand.<no memory space> [shape: f32[1,1], index: 3, kind: input, shape index: {}]   ;;  %s9433_s4 = inlined_call_operand.vmem [shape: f32[2,1], index: 4, kind: output, shape index: {}]  }
   0x1   :  { %v7232_v0 = vld [vmem:[%s9429_s1 + $0x38] sm:$0xff]  ;;  %v7231_v4 = vld [vmem:[%s9429_s1 + $0x30] sm:$0xff]  ;;  %v7230_v8 = vld [vmem:[%s9429_s1 + $0x28] sm:$0xff] }
   0x2   :  { %v7240_v1 = vld [vmem:[%s9429_s1 + $0x78] sm:$0xff]  ;;  %4276 = vmatpush.bf16.msra.mxu0 %v7232_v0  ;;  %v7239_v5 = vld [vmem:[%s9429_s1 + $0x70] sm:$0xff]  ;;  %v7238_v9 = vld [vmem:[%s9429_s1 + $0x68] sm:$0xff] }
   0x3   :  { %v7248_v2 = vld [vmem:[%s9429_s1 + $0xb8] sm:$0xff]  ;;  %4289 = vmatpush.bf16.msra.mxu1 %v7240_v1  ;;  %v7247_v6 = vld [vmem:[%s9429_s1 + $0xb0] sm:$0xff]  ;;  %v7246_v10 = vld [vmem:[%s9429_s1 + $0xa8] sm:$0xff] }
   0x4   :  { %v7256_v3 = vld [vmem:[%s9429_s1 + $0xf8] sm:$0xff]  ;;  %4302 = vmatpush.bf16.msra.mxu2 %v7248_v2  ;;  %v7255_v7 = vld [vmem:[%s9429_s1 + $0xf0] sm:$0xff]  ;;  %v7254_v11 = vld [vmem:[%s9429_s1 + $0xe8] sm:$0xff] }
   0x5   :  { %4315 = vmatpush.bf16.msra.mxu3 %v7256_v3  ;;  %v7229_v12 = vld [vmem:[%s9429_s1 + $0x20] sm:$0xff]  ;;  %v7228_v16 = vld [vmem:[%s9429_s1 + $0x18] sm:$0xff]  ;;  %v7227_v21 = vld [vmem:[%s9429_s1 + $0x10] sm:$0xff] }
   0x6   :  { %4277 = vmatpush.bf16.msra.mxu0 %v7231_v4  ;;  %v7237_v13 = vld [vmem:[%s9429_s1 + $0x60] sm:$0xff]  ;;  %v7236_v17 = vld [vmem:[%s9429_s1 + $0x58] sm:$0xff]  ;;  %v7235_v22 = vld [vmem:[%s9429_s1 + $0x50] sm:$0xff] }
   0x7   :  { %4290 = vmatpush.bf16.msra.mxu1 %v7239_v5  ;;  %v7245_v14 = vld [vmem:[%s9429_s1 + $0xa0] sm:$0xff]  ;;  %v7244_v18 = vld [vmem:[%s9429_s1 + $0x98] sm:$0xff]  ;;  %v7243_v23 = vld [vmem:[%s9429_s1 + $0x90] sm:$0xff] }
   0x8   :  { %4303 = vmatpush.bf16.msra.mxu2 %v7247_v6  ;;  %v7253_v15 = vld [vmem:[%s9429_s1 + $0xe0] sm:$0xff]  ;;  %v7252_v19 = vld [vmem:[%s9429_s1 + $0xd8] sm:$0xff]  ;;  %v7251_v24 = vld [vmem:[%s9429_s1 + $0xd0] sm:$0xff] }
   0x9   :  { %4316 = vmatpush.bf16.msra.mxu3 %v7255_v7  ;;  %v28_v20 = vld [vmem:[%s9430_s0] sm:$0xff]  ;;  %v7226_v25 = vld [vmem:[%s9429_s1 + $0x8] sm:$0xff]  ;;  %v7264_v33 = vld [vmem:[%s9429_s1 + $0x138] sm:$0xff] }
   0xa   :  { %4278 = vmatpush.bf16.msra.mxu0 %v7230_v8  ;;  %1061 = vst [vmem:[#allocation1] ss:$9 sm:$0xff] %v28_v20  ;;  %v7234_v26 = vld [vmem:[%s9429_s1 + $0x48] sm:$0xff]  ;;  %v7225_v29 = vld [vmem:[%s9429_s1] sm:$0xff]  ;;  %v7272_v34 = vld [vmem:[%s9429_s1 + $0x178] sm:$0xff] }
   0xb   :  { %4291 = vmatpush.bf16.msra.mxu1 %v7238_v9  ;;  %v7242_v27 = vld [vmem:[%s9429_s1 + $0x88] sm:$0xff]  ;;  %v7233_v30 = vld [vmem:[%s9429_s1 + $0x40] sm:$0xff]  ;;  %v7280_v35 = vld [vmem:[%s9429_s1 + $0x1b8] sm:$0xff] }
   0xc   :  { %4304 = vmatpush.bf16.msra.mxu2 %v7246_v10  ;;  %v7250_v28 = vld [vmem:[%s9429_s1 + $0xc8] sm:$0xff]  ;;  %v7241_v31 = vld [vmem:[%s9429_s1 + $0x80] sm:$0xff]  ;;  %v7288_v36 = vld [vmem:[%s9429_s1 + $0x1f8] sm:$0xff] }
   0xd   :  { %4317 = vmatpush.bf16.msra.mxu3 %v7254_v11  ;;  %v7249_v32 = vld [vmem:[%s9429_s1 + $0xc0] sm:$0xff]  ;;  %v7263_v37 = vld [vmem:[%s9429_s1 + $0x130] sm:$0xff]  ;;  %v7262_v45 = vld [vmem:[%s9429_s1 + $0x128] sm:$0xff] }
   0xe   :  { %4279 = vmatpush.bf16.msra.mxu0 %v7229_v12  ;;  %v7271_v40 = vld [vmem:[%s9429_s1 + $0x170] sm:$0xff]  ;;  %v7270_v46 = vld [vmem:[%s9429_s1 + $0x168] sm:$0xff]  ;;  %v7261_v54 = vld [vmem:[%s9429_s1 + $0x120] sm:$0xff] }
   0xf   :  { %4292 = vmatpush.bf16.msra.mxu1 %v7237_v13  ;;  %v7279_v43 = vld [vmem:[%s9429_s1 + $0x1b0] sm:$0xff]  ;;  %v7278_v47 = vld [vmem:[%s9429_s1 + $0x1a8] sm:$0xff]  ;;  %v7269_v55 = vld [vmem:[%s9429_s1 + $0x160] sm:$0xff] }
  0x10   :  { %4305 = vmatpush.bf16.msra.mxu2 %v7245_v14  ;;  %v7287_v44 = vld [vmem:[%s9429_s1 + $0x1f0] sm:$0xff]  ;;  %v7286_v48 = vld [vmem:[%s9429_s1 + $0x1e8] sm:$0xff]  ;;  %v7277_v56 = vld [vmem:[%s9429_s1 + $0x1a0] sm:$0xff] }
  0x11   :  { %4318 = vmatpush.bf16.msra.mxu3 %v7253_v15  ;;  %v1064_v38 = vld [vmem:[#allocation1 + $0x12] sm:$0xff]  ;;  %v1062_v39 = vld [vmem:[#allocation1] sm:$0xff]  ;;  %v1063_v42 = vld [vmem:[#allocation1 + $0x9] sm:$0xff] }
  0x12   :  { %4280 = vmatpush.bf16.msra.mxu0 %v7228_v16  ;;  %v1065_v41 = vld [vmem:[#allocation1 + $0x1b] sm:$0xff]  ;;  %v1066_v50 = vld [vmem:[#allocation1 + $0x24] sm:$0xff]  ;;  %v1067_v53 = vld [vmem:[#allocation1 + $0x2d] sm:$0xff] }
  0x13   :  { %4293 = vmatpush.bf16.msra.mxu1 %v7236_v17  ;;  %v1068_v49 = vld [vmem:[#allocation1 + $0x36] sm:$0xff]  ;;  %v1069_v51 = vld [vmem:[#allocation1 + $0x3f] sm:$0xff]  ;;  %v29_v52 = vld [vmem:[%s9430_s0 + $0x8] sm:$0xff] }
  0x14   :  { %4306 = vmatpush.bf16.msra.mxu2 %v7244_v18  ;;  %1071 = vst [vmem:[#allocation1] ss:$9 sm:$0xff] %v29_v52  ;;  %v7285_v57 = vld [vmem:[%s9429_s1 + $0x1e0] sm:$0xff]  ;;  %v7260_v58 = vld [vmem:[%s9429_s1 + $0x118] sm:$0xff]  ;;  %v7259_v62 = vld [vmem:[%s9429_s1 + $0x110] sm:$0xff] }
  0x15   :  { %4319 = vmatpush.bf16.msra.mxu3 %v7252_v19  ;;  %v7268_v59 = vld [vmem:[%s9429_s1 + $0x158] sm:$0xff]  ;;  %v7267_v63 = vld [vmem:[%s9429_s1 + $0x150] sm:$0xff]  ;;  %v7258_v2 = vld [vmem:[%s9429_s1 + $0x108] sm:$0xff] }
  0x16   :  { %4281 = vmatpush.bf16.msra.mxu0 %v7227_v21  ;;  %v7276_v60 = vld [vmem:[%s9429_s1 + $0x198] sm:$0xff]  ;;  %v7275_v0 = vld [vmem:[%s9429_s1 + $0x190] sm:$0xff]  ;;  %v7266_v3 = vld [vmem:[%s9429_s1 + $0x148] sm:$0xff] }
  0x17   :  { %4294 = vmatpush.bf16.msra.mxu1 %v7235_v22  ;;  %v7284_v61 = vld [vmem:[%s9429_s1 + $0x1d8] sm:$0xff]  ;;  %v7283_v1 = vld [vmem:[%s9429_s1 + $0x1d0] sm:$0xff]  ;;  %v7274_v4 = vld [vmem:[%s9429_s1 + $0x188] sm:$0xff] }
  0x18   :  { %4307 = vmatpush.bf16.msra.mxu2 %v7243_v23  ;;  %v7282_v5 = vld [vmem:[%s9429_s1 + $0x1c8] sm:$0xff]  ;;  %v7257_v6 = vld [vmem:[%s9429_s1 + $0x100] sm:$0xff]  ;;  %v7296_v10 = vld [vmem:[%s9429_s1 + $0x238] sm:$0xff] }
  0x19   :  { %4320 = vmatpush.bf16.msra.mxu3 %v7251_v24  ;;  %v7265_v7 = vld [vmem:[%s9429_s1 + $0x140] sm:$0xff]  ;;  %v7304_v11 = vld [vmem:[%s9429_s1 + $0x278] sm:$0xff]  ;;  %v7295_v14 = vld [vmem:[%s9429_s1 + $0x230] sm:$0xff] }
  0x1a   :  { %4282 = vmatpush.bf16.msra.mxu0 %v7226_v25  ;;  %v7273_v8 = vld [vmem:[%s9429_s1 + $0x180] sm:$0xff]  ;;  %v7312_v12 = vld [vmem:[%s9429_s1 + $0x2b8] sm:$0xff]  ;;  %v7303_v15 = vld [vmem:[%s9429_s1 + $0x270] sm:$0xff] }
  0x1b   :  { %4295 = vmatpush.bf16.msra.mxu1 %v7234_v26  ;;  %v7281_v9 = vld [vmem:[%s9429_s1 + $0x1c0] sm:$0xff]  ;;  %v7320_v13 = vld [vmem:[%s9429_s1 + $0x2f8] sm:$0xff]  ;;  %v7311_v16 = vld [vmem:[%s9429_s1 + $0x2b0] sm:$0xff] }
  0x1c   :  { %4308 = vmatpush.bf16.msra.mxu2 %v7242_v27  ;;  %v7319_v17 = vld [vmem:[%s9429_s1 + $0x2f0] sm:$0xff]  ;;  %v7294_v18 = vld [vmem:[%s9429_s1 + $0x228] sm:$0xff]  ;;  %v7293_v22 = vld [vmem:[%s9429_s1 + $0x220] sm:$0xff] }
  0x1d   :  { %4321 = vmatpush.bf16.msra.mxu3 %v7250_v28  ;;  %v7302_v19 = vld [vmem:[%s9429_s1 + $0x268] sm:$0xff]  ;;  %v7301_v23 = vld [vmem:[%s9429_s1 + $0x260] sm:$0xff]  ;;  %v7292_v26 = vld [vmem:[%s9429_s1 + $0x218] sm:$0xff] }
  0x1e   :  { %4283 = vmatpush.bf16.msra.mxu0 %v7225_v29  ;;  %v7310_v20 = vld [vmem:[%s9429_s1 + $0x2a8] sm:$0xff]  ;;  %v7309_v24 = vld [vmem:[%s9429_s1 + $0x2a0] sm:$0xff]  ;;  %v7300_v27 = vld [vmem:[%s9429_s1 + $0x258] sm:$0xff] }
  0x1f   :  { %4296 = vmatpush.bf16.msra.mxu1 %v7233_v30  ;;  %v7318_v21 = vld [vmem:[%s9429_s1 + $0x2e8] sm:$0xff]  ;;  %v7317_v25 = vld [vmem:[%s9429_s1 + $0x2e0] sm:$0xff]  ;;  %v7308_v28 = vld [vmem:[%s9429_s1 + $0x298] sm:$0xff] }
  0x20   :  { %4309 = vmatpush.bf16.msra.mxu2 %v7241_v31  ;;  %v7316_v29 = vld [vmem:[%s9429_s1 + $0x2d8] sm:$0xff]  ;;  %v7291_v30 = vld [vmem:[%s9429_s1 + $0x210] sm:$0xff] }
  0x21   :  { %4322 = vmatpush.bf16.msra.mxu3 %v7249_v32  ;;  %4284 = vmatmul.bf16.vlgmr.msra.gmra.mxu0 %v1062_v39  ;;  %v7299_v31 = vld [vmem:[%s9429_s1 + $0x250] sm:$0xff]  ;;  %v7297_v39 = vld [vmem:[%s9429_s1 + $0x240] sm:$0xff] }
  0x22   :  { %4328 = vmatpush.bf16.msrb.mxu0 %v7264_v33  ;;  %4297 = vmatmul.bf16.vlgmr.msra.gmra.mxu1 %v1063_v42  ;;  %v7307_v32 = vld [vmem:[%s9429_s1 + $0x290] sm:$0xff]  ;;  %v7328_v42 = vld [vmem:[%s9429_s1 + $0x338] sm:$0xff] }
  0x23   :  { %4341 = vmatpush.bf16.msrb.mxu1 %v7272_v34  ;;  %4310 = vmatmul.bf16.vlgmr.msra.gmra.mxu2 %v1064_v38  ;;  %v7315_v33 = vld [vmem:[%s9429_s1 + $0x2d0] sm:$0xff]  ;;  %v7290_v34 = vld [vmem:[%s9429_s1 + $0x208] sm:$0xff]  ;;  %v7289_v38 = vld [vmem:[%s9429_s1 + $0x200] sm:$0xff] }
  0x24   :  { %4354 = vmatpush.bf16.msrb.mxu2 %v7280_v35  ;;  %4323 = vmatmul.bf16.vlgmr.msra.gmra.mxu3 %v1065_v41  ;;  %v7298_v35 = vld [vmem:[%s9429_s1 + $0x248] sm:$0xff]  ;;  %v7313_v41 = vld [vmem:[%s9429_s1 + $0x2c0] sm:$0xff]  ;;  %v7335_v52 = vld [vmem:[%s9429_s1 + $0x370] sm:$0xff] }
  0x25   :  { %4367 = vmatpush.bf16.msrb.mxu3 %v7288_v36  ;;  %v7306_v36 = vld [vmem:[%s9429_s1 + $0x288] sm:$0xff] }
  0x26   :  { %4329 = vmatpush.bf16.msrb.mxu0 %v7263_v37  ;;  %v7314_v37 = vld [vmem:[%s9429_s1 + $0x2c8] sm:$0xff] }
  0x27   :  { %4342 = vmatpush.bf16.msrb.mxu1 %v7271_v40  ;;  %v7305_v40 = vld [vmem:[%s9429_s1 + $0x280] sm:$0xff] }
  0x28   :  { %4355 = vmatpush.bf16.msrb.mxu2 %v7279_v43  ;;  %v7336_v43 = vld [vmem:[%s9429_s1 + $0x378] sm:$0xff] }
  0x29   :  { %4368 = vmatpush.bf16.msrb.mxu3 %v7287_v44  ;;  %v30_v44 = vld [vmem:[%s9430_s0 + $0x10] sm:$0xff] }
  0x2a   :  { %4330 = vmatpush.bf16.msrb.mxu0 %v7262_v45  ;;  %v7344_v45 = vld [vmem:[%s9429_s1 + $0x3b8] sm:$0xff] }
  0x2b   :  { %4343 = vmatpush.bf16.msrb.mxu1 %v7270_v46  ;;  %v7352_v46 = vld [vmem:[%s9429_s1 + $0x3f8] sm:$0xff] }
  0x2c   :  { %4356 = vmatpush.bf16.msrb.mxu2 %v7278_v47  ;;  %v1072_v47 = vld [vmem:[#allocation1] sm:$0xff] }
  0x2d   :  { %4369 = vmatpush.bf16.msrb.mxu3 %v7286_v48  ;;  %v1074_v48 = vld [vmem:[#allocation1 + $0x12] sm:$0xff] }
  0x2e   :  { %4331 = vmatpush.bf16.msrb.mxu0 %v7261_v54  ;;  %v7351_v54 = vld [vmem:[%s9429_s1 + $0x3f0] sm:$0xff] }
  0x2f   :  { %4344 = vmatpush.bf16.msrb.mxu1 %v7269_v55  ;;  %v8092_v55 = vld [vmem:[#allocation1 + $0x24] sm:$0xff] }
  0x30   :  { %4357 = vmatpush.bf16.msrb.mxu2 %v7277_v56  ;;  %v8094_v56 = vld [vmem:[#allocation1 + $0x36] sm:$0xff] }
  0x31   :  { %4370 = vmatpush.bf16.msrb.mxu3 %v7285_v57  ;;  %v8096_v57 = vld [vmem:[#allocation1 + $0x2d] sm:$0xff] }
  0x32   :  { %4332 = vmatpush.bf16.msrb.mxu0 %v7260_v58  ;;  %v8098_v58 = vld [vmem:[#allocation1 + $0x3f] sm:$0xff] }
  0x33   :  { %4345 = vmatpush.bf16.msrb.mxu1 %v7268_v59  ;;  %v7326_v59 = vld [vmem:[%s9429_s1 + $0x328] sm:$0xff] }
  0x34   :  { %4358 = vmatpush.bf16.msrb.mxu2 %v7276_v60  ;;  %v7334_v60 = vld [vmem:[%s9429_s1 + $0x368] sm:$0xff] }
  0x35   :  { %4371 = vmatpush.bf16.msrb.mxu3 %v7284_v61  ;;  %v7342_v61 = vld [vmem:[%s9429_s1 + $0x3a8] sm:$0xff] }
  0x36   :  { %4333 = vmatpush.bf16.msrb.mxu0 %v7259_v62  ;;  %v7350_v62 = vld [vmem:[%s9429_s1 + $0x3e8] sm:$0xff] }
  0x37   :  { %4346 = vmatpush.bf16.msrb.mxu1 %v7267_v63  ;;  %v7325_v63 = vld [vmem:[%s9429_s1 + $0x320] sm:$0xff] }
  0x38   :  { %4359 = vmatpush.bf16.msrb.mxu2 %v7275_v0  ;;  %v7333_v0 = vld [vmem:[%s9429_s1 + $0x360] sm:$0xff] }
  0x39   :  { %4372 = vmatpush.bf16.msrb.mxu3 %v7283_v1  ;;  %v7341_v1 = vld [vmem:[%s9429_s1 + $0x3a0] sm:$0xff] }
  0x3a   :  { %4334 = vmatpush.bf16.msrb.mxu0 %v7258_v2  ;;  %v7349_v2 = vld [vmem:[%s9429_s1 + $0x3e0] sm:$0xff] }
  0x3b   :  { %4347 = vmatpush.bf16.msrb.mxu1 %v7266_v3  ;;  %v7324_v3 = vld [vmem:[%s9429_s1 + $0x318] sm:$0xff] }
  0x3c   :  { %4360 = vmatpush.bf16.msrb.mxu2 %v7274_v4  ;;  %v7332_v4 = vld [vmem:[%s9429_s1 + $0x358] sm:$0xff] }
  0x3d   :  { %4373 = vmatpush.bf16.msrb.mxu3 %v7282_v5  ;;  %v7340_v5 = vld [vmem:[%s9429_s1 + $0x398] sm:$0xff] }
  0x3e   :  { %4335 = vmatpush.bf16.msrb.mxu0 %v7257_v6  ;;  %v7348_v6 = vld [vmem:[%s9429_s1 + $0x3d8] sm:$0xff] }
  0x3f   :  { %4348 = vmatpush.bf16.msrb.mxu1 %v7265_v7  ;;  %v7323_v7 = vld [vmem:[%s9429_s1 + $0x310] sm:$0xff] }
  0x40   :  { %4361 = vmatpush.bf16.msrb.mxu2 %v7273_v8  ;;  %v7331_v8 = vld [vmem:[%s9429_s1 + $0x350] sm:$0xff] }
  0x41   :  { %4374 = vmatpush.bf16.msrb.mxu3 %v7281_v9  ;;  %4336 = vmatmul.bf16.vlgmr.msrb.gmra.mxu0 %v1066_v50  ;;  %v1075_v50 = vld [vmem:[#allocation1 + $0x1b] sm:$0xff]  ;;  %v7339_v9 = vld [vmem:[%s9429_s1 + $0x390] sm:$0xff] }
  0x42   :  { %4380 = vmatpush.bf16.msra.mxu0 %v7296_v10  ;;  %4349 = vmatmul.bf16.vlgmr.msrb.gmra.mxu1 %v1067_v53  ;;  %v7343_v53 = vld [vmem:[%s9429_s1 + $0x3b0] sm:$0xff] }
  0x43   :  { %4393 = vmatpush.bf16.msra.mxu1 %v7304_v11  ;;  %4362 = vmatmul.bf16.vlgmr.msrb.gmra.mxu2 %v1068_v49  ;;  %v1073_v49 = vld [vmem:[#allocation1 + $0x9] sm:$0xff] }
  0x44   :  { %4406 = vmatpush.bf16.msra.mxu2 %v7312_v12  ;;  %4375 = vmatmul.bf16.vlgmr.msrb.gmra.mxu3 %v1069_v51  ;;  %v7327_v51 = vld [vmem:[%s9429_s1 + $0x330] sm:$0xff]  ;;  %1081 = vst [vmem:[#allocation1] ss:$9 sm:$0xff] %v30_v44  ;;  %v7322_v11 = vld [vmem:[%s9429_s1 + $0x308] sm:$0xff] }
  0x45   :  { %4419 = vmatpush.bf16.msra.mxu3 %v7320_v13  ;;  %v7347_v10 = vld [vmem:[%s9429_s1 + $0x3d0] sm:$0xff]  ;;  %v7330_v12 = vld [vmem:[%s9429_s1 + $0x348] sm:$0xff] }
  0x46   :  { %4381 = vmatpush.bf16.msra.mxu0 %v7295_v14  ;;  %v7338_v13 = vld [vmem:[%s9429_s1 + $0x388] sm:$0xff] }
  0x47   :  { %4394 = vmatpush.bf16.msra.mxu1 %v7303_v15  ;;  %v7346_v14 = vld [vmem:[%s9429_s1 + $0x3c8] sm:$0xff]  ;;  %v7321_v15 = vld [vmem:[%s9429_s1 + $0x300] sm:$0xff] }
  0x48   :  { %4407 = vmatpush.bf16.msra.mxu2 %v7311_v16  ;;  %v7329_v16 = vld [vmem:[%s9429_s1 + $0x340] sm:$0xff]  ;;  %v7362_v44 = vld [vmem:[%s9429_s1 + $0x448] sm:$0xff] }
  0x49   :  { %4420 = vmatpush.bf16.msra.mxu3 %v7319_v17  ;;  %v7337_v17 = vld [vmem:[%s9429_s1 + $0x380] sm:$0xff] }
  0x4a   :  { %4382 = vmatpush.bf16.msra.mxu0 %v7294_v18  ;;  %v7345_v18 = vld [vmem:[%s9429_s1 + $0x3c0] sm:$0xff] }
  0x4b   :  { %4395 = vmatpush.bf16.msra.mxu1 %v7302_v19  ;;  %v7360_v19 = vld [vmem:[%s9429_s1 + $0x438] sm:$0xff] }
  0x4c   :  { %4408 = vmatpush.bf16.msra.mxu2 %v7310_v20  ;;  %v7368_v20 = vld [vmem:[%s9429_s1 + $0x478] sm:$0xff] }
  0x4d   :  { %4421 = vmatpush.bf16.msra.mxu3 %v7318_v21  ;;  %v7376_v21 = vld [vmem:[%s9429_s1 + $0x4b8] sm:$0xff] }
  0x4e   :  { %4383 = vmatpush.bf16.msra.mxu0 %v7293_v22  ;;  %v7384_v22 = vld [vmem:[%s9429_s1 + $0x4f8] sm:$0xff] }
  0x4f   :  { %4396 = vmatpush.bf16.msra.mxu1 %v7301_v23  ;;  %v7359_v23 = vld [vmem:[%s9429_s1 + $0x430] sm:$0xff] }
  0x50   :  { %4409 = vmatpush.bf16.msra.mxu2 %v7309_v24  ;;  %v7367_v24 = vld [vmem:[%s9429_s1 + $0x470] sm:$0xff] }
  0x51   :  { %4422 = vmatpush.bf16.msra.mxu3 %v7317_v25  ;;  %v7375_v25 = vld [vmem:[%s9429_s1 + $0x4b0] sm:$0xff] }
  0x52   :  { %4384 = vmatpush.bf16.msra.mxu0 %v7292_v26  ;;  %v7383_v26 = vld [vmem:[%s9429_s1 + $0x4f0] sm:$0xff] }
  0x53   :  { %4397 = vmatpush.bf16.msra.mxu1 %v7300_v27  ;;  %v7358_v27 = vld [vmem:[%s9429_s1 + $0x428] sm:$0xff] }
  0x54   :  { %4410 = vmatpush.bf16.msra.mxu2 %v7308_v28  ;;  %v7366_v28 = vld [vmem:[%s9429_s1 + $0x468] sm:$0xff] }
  0x55   :  { %4423 = vmatpush.bf16.msra.mxu3 %v7316_v29  ;;  %v7374_v29 = vld [vmem:[%s9429_s1 + $0x4a8] sm:$0xff] }
  0x56   :  { %4385 = vmatpush.bf16.msra.mxu0 %v7291_v30  ;;  %v7382_v30 = vld [vmem:[%s9429_s1 + $0x4e8] sm:$0xff] }
  0x57   :  { %4398 = vmatpush.bf16.msra.mxu1 %v7299_v31  ;;  %v7357_v31 = vld [vmem:[%s9429_s1 + $0x420] sm:$0xff] }
  0x58   :  { %4411 = vmatpush.bf16.msra.mxu2 %v7307_v32  ;;  %v7365_v32 = vld [vmem:[%s9429_s1 + $0x460] sm:$0xff] }
  0x59   :  { %4424 = vmatpush.bf16.msra.mxu3 %v7315_v33  ;;  %v7373_v33 = vld [vmem:[%s9429_s1 + $0x4a0] sm:$0xff] }
  0x5a   :  { %4386 = vmatpush.bf16.msra.mxu0 %v7290_v34  ;;  %v7381_v34 = vld [vmem:[%s9429_s1 + $0x4e0] sm:$0xff] }
  0x5b   :  { %4399 = vmatpush.bf16.msra.mxu1 %v7298_v35  ;;  %v7356_v35 = vld [vmem:[%s9429_s1 + $0x418] sm:$0xff] }
  0x5c   :  { %4412 = vmatpush.bf16.msra.mxu2 %v7306_v36  ;;  %v7364_v36 = vld [vmem:[%s9429_s1 + $0x458] sm:$0xff] }
  0x5d   :  { %4425 = vmatpush.bf16.msra.mxu3 %v7314_v37  ;;  %v7372_v37 = vld [vmem:[%s9429_s1 + $0x498] sm:$0xff] }
  0x5e   :  { %4387 = vmatpush.bf16.msra.mxu0 %v7289_v38  ;;  %v7380_v38 = vld [vmem:[%s9429_s1 + $0x4d8] sm:$0xff] }
  0x5f   :  { %4400 = vmatpush.bf16.msra.mxu1 %v7297_v39  ;;  %v7355_v39 = vld [vmem:[%s9429_s1 + $0x410] sm:$0xff] }
  0x60   :  { %4413 = vmatpush.bf16.msra.mxu2 %v7305_v40  ;;  %v7363_v40 = vld [vmem:[%s9429_s1 + $0x450] sm:$0xff] }
  0x61   :  { %4426 = vmatpush.bf16.msra.mxu3 %v7313_v41  ;;  %4388 = vmatmul.bf16.vlgmr.msra.gmra.mxu0 %v1072_v47  ;;  %v7371_v41 = vld [vmem:[%s9429_s1 + $0x490] sm:$0xff]  ;;  %v7353_v47 = vld [vmem:[%s9429_s1 + $0x400] sm:$0xff] }
  0x62   :  { %4432 = vmatpush.bf16.msrb.mxu0 %v7328_v42  ;;  %4401 = vmatmul.bf16.vlgmr.msra.gmra.mxu1 %v1073_v49  ;;  %v7379_v42 = vld [vmem:[%s9429_s1 + $0x4d0] sm:$0xff]  ;;  %v7369_v49 = vld [vmem:[%s9429_s1 + $0x480] sm:$0xff] }
  0x63   :  { %4445 = vmatpush.bf16.msrb.mxu1 %v7336_v43  ;;  %4414 = vmatmul.bf16.vlgmr.msra.gmra.mxu2 %v1074_v48  ;;  %v7354_v43 = vld [vmem:[%s9429_s1 + $0x408] sm:$0xff]  ;;  %v7361_v48 = vld [vmem:[%s9429_s1 + $0x440] sm:$0xff] }
  0x64   :  { %4458 = vmatpush.bf16.msrb.mxu2 %v7344_v45  ;;  %4427 = vmatmul.bf16.vlgmr.msra.gmra.mxu3 %v1075_v50  ;;  %v7370_v45 = vld [vmem:[%s9429_s1 + $0x488] sm:$0xff]  ;;  %v7377_v50 = vld [vmem:[%s9429_s1 + $0x4c0] sm:$0xff] }
  0x65   :  { %4471 = vmatpush.bf16.msrb.mxu3 %v7352_v46  ;;  %v7378_v46 = vld [vmem:[%s9429_s1 + $0x4c8] sm:$0xff] }
  0x66   :  { %4433 = vmatpush.bf16.msrb.mxu0 %v7327_v51  ;;  %v7392_v51 = vld [vmem:[%s9429_s1 + $0x538] sm:$0xff] }
  0x67   :  { %4446 = vmatpush.bf16.msrb.mxu1 %v7335_v52  ;;  %v7400_v52 = vld [vmem:[%s9429_s1 + $0x578] sm:$0xff] }
  0x68   :  { %4459 = vmatpush.bf16.msrb.mxu2 %v7343_v53  ;;  %v31_v53 = vld [vmem:[%s9430_s0 + $0x18] sm:$0xff] }
  0x69   :  { %4472 = vmatpush.bf16.msrb.mxu3 %v7351_v54  ;;  %v7408_v54 = vld [vmem:[%s9429_s1 + $0x5b8] sm:$0xff] }
  0x6a   :  { %4434 = vmatpush.bf16.msrb.mxu0 %v7326_v59  ;;  %v1085_v59 = vld [vmem:[#allocation1 + $0x1b] sm:$0xff] }
  0x6b   :  { %4447 = vmatpush.bf16.msrb.mxu1 %v7334_v60  ;;  %v7391_v60 = vld [vmem:[%s9429_s1 + $0x530] sm:$0xff] }
  0x6c   :  { %4460 = vmatpush.bf16.msrb.mxu2 %v7342_v61  ;;  %v7399_v61 = vld [vmem:[%s9429_s1 + $0x570] sm:$0xff] }
  0x6d   :  { %4473 = vmatpush.bf16.msrb.mxu3 %v7350_v62  ;;  %v7407_v62 = vld [vmem:[%s9429_s1 + $0x5b0] sm:$0xff] }
  0x6e   :  { %4435 = vmatpush.bf16.msrb.mxu0 %v7325_v63  ;;  %v7415_v63 = vld [vmem:[%s9429_s1 + $0x5f0] sm:$0xff] }
  0x6f   :  { %4448 = vmatpush.bf16.msrb.mxu1 %v7333_v0  ;;  %v8299_v0 = vld [vmem:[#allocation1 + $0x24] sm:$0xff] }
  0x70   :  { %4461 = vmatpush.bf16.msrb.mxu2 %v7341_v1  ;;  %v8301_v1 = vld [vmem:[#allocation1 + $0x36] sm:$0xff] }
  0x71   :  { %4474 = vmatpush.bf16.msrb.mxu3 %v7349_v2  ;;  %v8303_v2 = vld [vmem:[#allocation1 + $0x2d] sm:$0xff] }
  0x72   :  { %4436 = vmatpush.bf16.msrb.mxu0 %v7324_v3  ;;  %v8305_v3 = vld [vmem:[#allocation1 + $0x3f] sm:$0xff] }
  0x73   :  { %4449 = vmatpush.bf16.msrb.mxu1 %v7332_v4  ;;  %v7390_v4 = vld [vmem:[%s9429_s1 + $0x528] sm:$0xff] }
  0x74   :  { %4462 = vmatpush.bf16.msrb.mxu2 %v7340_v5  ;;  %v7398_v5 = vld [vmem:[%s9429_s1 + $0x568] sm:$0xff] }
  0x75   :  { %4475 = vmatpush.bf16.msrb.mxu3 %v7348_v6  ;;  %v7406_v6 = vld [vmem:[%s9429_s1 + $0x5a8] sm:$0xff] }
  0x76   :  { %4437 = vmatpush.bf16.msrb.mxu0 %v7323_v7  ;;  %v7414_v7 = vld [vmem:[%s9429_s1 + $0x5e8] sm:$0xff] }
  0x77   :  { %4450 = vmatpush.bf16.msrb.mxu1 %v7331_v8 }
  0x78   :  { %4463 = vmatpush.bf16.msrb.mxu2 %v7339_v9  ;;  %v7389_v9 = vld [vmem:[%s9429_s1 + $0x520] sm:$0xff] }
  0x79   :  { %4476 = vmatpush.bf16.msrb.mxu3 %v7347_v10  ;;  %v7397_v10 = vld [vmem:[%s9429_s1 + $0x560] sm:$0xff] }
  0x7a   :  { %4438 = vmatpush.bf16.msrb.mxu0 %v7322_v11 }
  0x7b   :  { %4451 = vmatpush.bf16.msrb.mxu1 %v7330_v12  ;;  %v7405_v12 = vld [vmem:[%s9429_s1 + $0x5a0] sm:$0xff] }
  0x7c   :  { %4464 = vmatpush.bf16.msrb.mxu2 %v7338_v13  ;;  %v7413_v13 = vld [vmem:[%s9429_s1 + $0x5e0] sm:$0xff] }
  0x7d   :  { %4477 = vmatpush.bf16.msrb.mxu3 %v7346_v14 }
  0x7e   :  { %4439 = vmatpush.bf16.msrb.mxu0 %v7321_v15  ;;  %v7388_v15 = vld [vmem:[%s9429_s1 + $0x518] sm:$0xff] }
  0x7f   :  { %4452 = vmatpush.bf16.msrb.mxu1 %v7329_v16  ;;  %v7396_v16 = vld [vmem:[%s9429_s1 + $0x558] sm:$0xff] }
  0x80   :  { %4465 = vmatpush.bf16.msrb.mxu2 %v7337_v17  ;;  %v7404_v17 = vld [vmem:[%s9429_s1 + $0x598] sm:$0xff] }
  0x81   :  { %4478 = vmatpush.bf16.msrb.mxu3 %v7345_v18  ;;  %4440 = vmatmul.bf16.vlgmr.msrb.gmra.mxu0 %v8092_v55  ;;  %v7416_v55 = vld [vmem:[%s9429_s1 + $0x5f8] sm:$0xff] }
  0x82   :  { %4484 = vmatpush.bf16.msra.mxu0 %v7360_v19  ;;  %4453 = vmatmul.bf16.vlgmr.msrb.gmra.mxu1 %v8096_v57  ;;  %v1084_v57 = vld [vmem:[#allocation1 + $0x12] sm:$0xff] }
  0x83   :  { %4497 = vmatpush.bf16.msra.mxu1 %v7368_v20  ;;  %4466 = vmatmul.bf16.vlgmr.msrb.gmra.mxu2 %v8094_v56  ;;  %v1082_v56 = vld [vmem:[#allocation1] sm:$0xff]  ;;  %v7412_v18 = vld [vmem:[%s9429_s1 + $0x5d8] sm:$0xff] }
  0x84   :  { %4510 = vmatpush.bf16.msra.mxu2 %v7376_v21  ;;  %4479 = vmatmul.bf16.vlgmr.msrb.gmra.mxu3 %v8098_v58  ;;  %v1083_v58 = vld [vmem:[#allocation1 + $0x9] sm:$0xff] }
  0x85   :  { %4523 = vmatpush.bf16.msra.mxu3 %v7384_v22  ;;  %1091 = vst [vmem:[#allocation1] ss:$9 sm:$0xff] %v31_v53  ;;  %v7429_v53 = vld [vmem:[%s9429_s1 + $0x660] sm:$0xff] }
  0x86   :  { %4485 = vmatpush.bf16.msra.mxu0 %v7359_v23  ;;  %v7387_v23 = vld [vmem:[%s9429_s1 + $0x510] sm:$0xff] }
  0x87   :  { %4498 = vmatpush.bf16.msra.mxu1 %v7367_v24  ;;  %v7395_v24 = vld [vmem:[%s9429_s1 + $0x550] sm:$0xff] }
  0x88   :  { %4511 = vmatpush.bf16.msra.mxu2 %v7375_v25 }
  0x89   :  { %4524 = vmatpush.bf16.msra.mxu3 %v7383_v26 }
  0x8a   :  { %4486 = vmatpush.bf16.msra.mxu0 %v7358_v27  ;;  %v7403_v27 = vld [vmem:[%s9429_s1 + $0x590] sm:$0xff] }
  0x8b   :  { %4499 = vmatpush.bf16.msra.mxu1 %v7366_v28  ;;  %v7411_v28 = vld [vmem:[%s9429_s1 + $0x5d0] sm:$0xff] }
  0x8c   :  { %4512 = vmatpush.bf16.msra.mxu2 %v7374_v29  ;;  %v7386_v29 = vld [vmem:[%s9429_s1 + $0x508] sm:$0xff] }
  0x8d   :  { %4525 = vmatpush.bf16.msra.mxu3 %v7382_v30  ;;  %v7394_v30 = vld [vmem:[%s9429_s1 + $0x548] sm:$0xff] }
  0x8e   :  { %4487 = vmatpush.bf16.msra.mxu0 %v7357_v31  ;;  %v7402_v31 = vld [vmem:[%s9429_s1 + $0x588] sm:$0xff] }
  0x8f   :  { %4500 = vmatpush.bf16.msra.mxu1 %v7365_v32  ;;  %v7410_v32 = vld [vmem:[%s9429_s1 + $0x5c8] sm:$0xff] }
  0x90   :  { %4513 = vmatpush.bf16.msra.mxu2 %v7373_v33 }
  0x91   :  { %4526 = vmatpush.bf16.msra.mxu3 %v7381_v34 }
  0x92   :  { %4488 = vmatpush.bf16.msra.mxu0 %v7356_v35  ;;  %v7385_v35 = vld [vmem:[%s9429_s1 + $0x500] sm:$0xff] }
  0x93   :  { %4501 = vmatpush.bf16.msra.mxu1 %v7364_v36  ;;  %v7393_v36 = vld [vmem:[%s9429_s1 + $0x540] sm:$0xff] }
  0x94   :  { %4514 = vmatpush.bf16.msra.mxu2 %v7372_v37  ;;  %v7401_v37 = vld [vmem:[%s9429_s1 + $0x580] sm:$0xff] }
  0x95   :  { %4527 = vmatpush.bf16.msra.mxu3 %v7380_v38  ;;  %v7409_v38 = vld [vmem:[%s9429_s1 + $0x5c0] sm:$0xff] }
  0x96   :  { %4489 = vmatpush.bf16.msra.mxu0 %v7355_v39  ;;  %v7424_v39 = vld [vmem:[%s9429_s1 + $0x638] sm:$0xff] }
  0x97   :  { %4502 = vmatpush.bf16.msra.mxu1 %v7363_v40  ;;  %v7432_v40 = vld [vmem:[%s9429_s1 + $0x678] sm:$0xff] }
  0x98   :  { %4515 = vmatpush.bf16.msra.mxu2 %v7371_v41  ;;  %v7440_v41 = vld [vmem:[%s9429_s1 + $0x6b8] sm:$0xff] }
  0x99   :  { %4528 = vmatpush.bf16.msra.mxu3 %v7379_v42  ;;  %v7448_v42 = vld [vmem:[%s9429_s1 + $0x6f8] sm:$0xff] }
  0x9a   :  { %4490 = vmatpush.bf16.msra.mxu0 %v7354_v43  ;;  %v7423_v43 = vld [vmem:[%s9429_s1 + $0x630] sm:$0xff] }
  0x9b   :  { %4503 = vmatpush.bf16.msra.mxu1 %v7362_v44  ;;  %v7431_v44 = vld [vmem:[%s9429_s1 + $0x670] sm:$0xff] }
  0x9c   :  { %4516 = vmatpush.bf16.msra.mxu2 %v7370_v45  ;;  %v7439_v45 = vld [vmem:[%s9429_s1 + $0x6b0] sm:$0xff] }
  0x9d   :  { %4529 = vmatpush.bf16.msra.mxu3 %v7378_v46  ;;  %v7447_v46 = vld [vmem:[%s9429_s1 + $0x6f0] sm:$0xff] }
  0x9e   :  { %4491 = vmatpush.bf16.msra.mxu0 %v7353_v47  ;;  %v4285_v8 = vpop.f32.mrf.mxu0  ;;  %v7422_v47 = vld [vmem:[%s9429_s1 + $0x628] sm:$0xff] }
  0x9f   :  { %4504 = vmatpush.bf16.msra.mxu1 %v7361_v48  ;;  %v4298_v11 = vpop.f32.mrf.mxu1  ;;  %v7430_v48 = vld [vmem:[%s9429_s1 + $0x668] sm:$0xff] }
  0xa0   :  { %4517 = vmatpush.bf16.msra.mxu2 %v7369_v49  ;;  %v4299_v14 = vadd.f32 %v4298_v11, %v4285_v8  ;;  %v7438_v49 = vld [vmem:[%s9429_s1 + $0x6a8] sm:$0xff]  ;;  %v7443_v8 = vld [vmem:[%s9429_s1 + $0x6d0] sm:$0xff] }
  0xa1   :  { %4530 = vmatpush.bf16.msra.mxu3 %v7377_v50  ;;  %4492 = vmatmul.bf16.vlgmr.msra.gmra.mxu0 %v1082_v56  ;;  %v7446_v50 = vld [vmem:[%s9429_s1 + $0x6e8] sm:$0xff]  ;;  %v7437_v56 = vld [vmem:[%s9429_s1 + $0x6a0] sm:$0xff] }
  0xa2   :  { %4536 = vmatpush.bf16.msrb.mxu0 %v7392_v51  ;;  %4505 = vmatmul.bf16.vlgmr.msra.gmra.mxu1 %v1083_v58  ;;  %v7434_v11 = vld [vmem:[%s9429_s1 + $0x688] sm:$0xff] }
  0xa3   :  { %4549 = vmatpush.bf16.msrb.mxu1 %v7400_v52  ;;  %4518 = vmatmul.bf16.vlgmr.msra.gmra.mxu2 %v1084_v57  ;;  %v7421_v52 = vld [vmem:[%s9429_s1 + $0x620] sm:$0xff] }
  0xa4   :  { %4562 = vmatpush.bf16.msrb.mxu2 %v7408_v54  ;;  %4531 = vmatmul.bf16.vlgmr.msra.gmra.mxu3 %v1085_v59  ;;  %v7445_v57 = vld [vmem:[%s9429_s1 + $0x6e0] sm:$0xff]  ;;  %v7420_v59 = vld [vmem:[%s9429_s1 + $0x618] sm:$0xff] }
  0xa5   :  { %4575 = vmatpush.bf16.msrb.mxu3 %v7416_v55 }
  0xa6   :  { %4537 = vmatpush.bf16.msrb.mxu0 %v7391_v60  ;;  %v4311_v19 = vpop.f32.mrf.mxu2  ;;  %v4287_v22 = vpop.f32.mrf.mxu0  ;;  %v7428_v60 = vld [vmem:[%s9429_s1 + $0x658] sm:$0xff] }
  0xa7   :  { %4550 = vmatpush.bf16.msrb.mxu1 %v7399_v61  ;;  %v4312_v20 = vadd.f32 %v4311_v19, %v4299_v14  ;;  %v4324_v21 = vpop.f32.mrf.mxu3  ;;  %v4300_v26 = vpop.f32.mrf.mxu1  ;;  %v7436_v61 = vld [vmem:[%s9429_s1 + $0x698] sm:$0xff] }
  0xa8   :  { %4563 = vmatpush.bf16.msrb.mxu2 %v7407_v62  ;;  %v7444_v62 = vld [vmem:[%s9429_s1 + $0x6d8] sm:$0xff]  ;;  %v1093_v26 = vld [vmem:[#allocation1 + $0x9] sm:$0xff] }
  0xa9   :  { %4576 = vmatpush.bf16.msrb.mxu3 %v7415_v63  ;;  %v4325_v25 = vadd.f32 %v4324_v21, %v4312_v20  ;;  %v7456_v19 = vld [vmem:[%s9429_s1 + $0x738] sm:$0xff]  ;;  %v32_v21 = vld [vmem:[%s9430_s0 + $0x20] sm:$0xff] }
  0xaa   :  { %4538 = vmatpush.bf16.msrb.mxu0 %v7390_v4  ;;  %v7427_v4 = vld [vmem:[%s9429_s1 + $0x650] sm:$0xff]  ;;  %v7464_v20 = vld [vmem:[%s9429_s1 + $0x778] sm:$0xff] }
  0xab   :  { %4551 = vmatpush.bf16.msrb.mxu1 %v7398_v5  ;;  %v7472_v22 = vld [vmem:[%s9429_s1 + $0x7b8] sm:$0xff] }
  0xac   :  { %4564 = vmatpush.bf16.msrb.mxu2 %v7406_v6 }
  0xad   :  { %4577 = vmatpush.bf16.msrb.mxu3 %v7414_v7  ;;  %v7435_v7 = vld [vmem:[%s9429_s1 + $0x690] sm:$0xff] }
  0xae   :  { %4539 = vmatpush.bf16.msrb.mxu0 %v7389_v9  ;;  %v4313_v33 = vpop.f32.mrf.mxu2  ;;  %v7418_v9 = vld [vmem:[%s9429_s1 + $0x608] sm:$0xff] }
  0xaf   :  { %4552 = vmatpush.bf16.msrb.mxu1 %v7397_v10  ;;  %v4326_v34 = vpop.f32.mrf.mxu3  ;;  %v7426_v10 = vld [vmem:[%s9429_s1 + $0x648] sm:$0xff]  ;;  %v8510_v33 = vld [vmem:[#allocation1 + $0x36] sm:$0xff] }
  0xb0   :  { %4565 = vmatpush.bf16.msrb.mxu2 %v7405_v12  ;;  %v7442_v12 = vld [vmem:[%s9429_s1 + $0x6c8] sm:$0xff] }
  0xb1   :  { %4578 = vmatpush.bf16.msrb.mxu3 %v7413_v13  ;;  %v8512_v34 = vld [vmem:[#allocation1 + $0x2d] sm:$0xff] }
  0xb2   :  { %4540 = vmatpush.bf16.msrb.mxu0 %v7388_v15  ;;  %v7417_v15 = vld [vmem:[%s9429_s1 + $0x600] sm:$0xff] }
  0xb3   :  { %4553 = vmatpush.bf16.msrb.mxu1 %v7396_v16  ;;  %v7425_v16 = vld [vmem:[%s9429_s1 + $0x640] sm:$0xff] }
  0xb4   :  { %4566 = vmatpush.bf16.msrb.mxu2 %v7404_v17  ;;  %v7433_v17 = vld [vmem:[%s9429_s1 + $0x680] sm:$0xff] }
  0xb5   :  { %4579 = vmatpush.bf16.msrb.mxu3 %v7412_v18  ;;  %v7441_v18 = vld [vmem:[%s9429_s1 + $0x6c0] sm:$0xff] }
  0xb6   :  { %4541 = vmatpush.bf16.msrb.mxu0 %v7387_v23  ;;  %v7480_v23 = vld [vmem:[%s9429_s1 + $0x7f8] sm:$0xff] }
  0xb7   :  { %4554 = vmatpush.bf16.msrb.mxu1 %v7395_v24  ;;  %v1092_v24 = vld [vmem:[#allocation1] sm:$0xff] }
  0xb8   :  { %4567 = vmatpush.bf16.msrb.mxu2 %v7403_v27  ;;  %v1095_v27 = vld [vmem:[#allocation1 + $0x1b] sm:$0xff] }
  0xb9   :  { %4580 = vmatpush.bf16.msrb.mxu3 %v7411_v28  ;;  %v7455_v28 = vld [vmem:[%s9429_s1 + $0x730] sm:$0xff] }
  0xba   :  { %4542 = vmatpush.bf16.msrb.mxu0 %v7386_v29  ;;  %v7463_v29 = vld [vmem:[%s9429_s1 + $0x770] sm:$0xff] }
  0xbb   :  { %4555 = vmatpush.bf16.msrb.mxu1 %v7394_v30  ;;  %v7471_v30 = vld [vmem:[%s9429_s1 + $0x7b0] sm:$0xff] }
  0xbc   :  { %4568 = vmatpush.bf16.msrb.mxu2 %v7402_v31  ;;  %v7479_v31 = vld [vmem:[%s9429_s1 + $0x7f0] sm:$0xff] }
  0xbd   :  { %4581 = vmatpush.bf16.msrb.mxu3 %v7410_v32  ;;  %v8508_v32 = vld [vmem:[#allocation1 + $0x24] sm:$0xff] }
  0xbe   :  { %4543 = vmatpush.bf16.msrb.mxu0 %v7385_v35  ;;  %v4337_v51 = vpop.f32.mrf.mxu0  ;;  %v8514_v35 = vld [vmem:[#allocation1 + $0x3f] sm:$0xff] }
  0xbf   :  { %4556 = vmatpush.bf16.msrb.mxu1 %v7393_v36  ;;  %v4338_v54 = vadd.f32 %v4337_v51, %v4325_v25  ;;  %v4350_v55 = vpop.f32.mrf.mxu1  ;;  %v1094_v25 = vld [vmem:[#allocation1 + $0x12] sm:$0xff]  ;;  %v7454_v36 = vld [vmem:[%s9429_s1 + $0x728] sm:$0xff] }
  0xc0   :  { %4569 = vmatpush.bf16.msrb.mxu2 %v7401_v37  ;;  %1101 = vst [vmem:[#allocation1] ss:$9 sm:$0xff] %v32_v21  ;;  %v7462_v37 = vld [vmem:[%s9429_s1 + $0x768] sm:$0xff]  ;;  %v7476_v51 = vld [vmem:[%s9429_s1 + $0x7d8] sm:$0xff] }
  0xc1   :  { %4582 = vmatpush.bf16.msrb.mxu3 %v7409_v38  ;;  %4544 = vmatmul.bf16.vlgmr.msrb.gmra.mxu0 %v8299_v0  ;;  %v4351_v58 = vadd.f32 %v4350_v55, %v4338_v54  ;;  %v7470_v38 = vld [vmem:[%s9429_s1 + $0x7a8] sm:$0xff] }
  0xc2   :  { %4588 = vmatpush.bf16.msra.mxu0 %v7424_v39  ;;  %4557 = vmatmul.bf16.vlgmr.msrb.gmra.mxu1 %v8303_v2  ;;  %v7478_v39 = vld [vmem:[%s9429_s1 + $0x7e8] sm:$0xff] }
  0xc3   :  { %4601 = vmatpush.bf16.msra.mxu1 %v7432_v40  ;;  %4570 = vmatmul.bf16.vlgmr.msrb.gmra.mxu2 %v8301_v1 }
  0xc4   :  { %4614 = vmatpush.bf16.msra.mxu2 %v7440_v41  ;;  %4583 = vmatmul.bf16.vlgmr.msrb.gmra.mxu3 %v8305_v3  ;;  %v7419_v3 = vld [vmem:[%s9429_s1 + $0x610] sm:$0xff] }
  0xc5   :  { %4627 = vmatpush.bf16.msra.mxu3 %v7448_v42  ;;  %v7453_v42 = vld [vmem:[%s9429_s1 + $0x720] sm:$0xff] }
  0xc6   :  { %4589 = vmatpush.bf16.msra.mxu0 %v7423_v43  ;;  %v4363_v63 = vpop.f32.mrf.mxu2  ;;  %v4339_v2 = vpop.f32.mrf.mxu0  ;;  %v7461_v43 = vld [vmem:[%s9429_s1 + $0x760] sm:$0xff] }
  0xc7   :  { %4602 = vmatpush.bf16.msra.mxu1 %v7431_v44  ;;  %v4364_v0 = vadd.f32 %v4363_v63, %v4351_v58  ;;  %v4376_v1 = vpop.f32.mrf.mxu3  ;;  %v4352_v6 = vpop.f32.mrf.mxu1  ;;  %v7459_v58 = vld [vmem:[%s9429_s1 + $0x750] sm:$0xff]  ;;  %v7458_v63 = vld [vmem:[%s9429_s1 + $0x748] sm:$0xff] }
  0xc8   :  { %4615 = vmatpush.bf16.msra.mxu2 %v7439_v45  ;;  %v7469_v45 = vld [vmem:[%s9429_s1 + $0x7a0] sm:$0xff] }
  0xc9   :  { %4628 = vmatpush.bf16.msra.mxu3 %v7447_v46  ;;  %v8449_v5 = vadd.f32 %v4376_v1, %v4364_v0  ;;  %v7477_v46 = vld [vmem:[%s9429_s1 + $0x7e0] sm:$0xff]  ;;  %v7466_v0 = vld [vmem:[%s9429_s1 + $0x788] sm:$0xff] }
  0xca   :  { %4590 = vmatpush.bf16.msra.mxu0 %v7422_v47  ;;  %v7474_v1 = vld [vmem:[%s9429_s1 + $0x7c8] sm:$0xff]  ;;  %v7465_v6 = vld [vmem:[%s9429_s1 + $0x780] sm:$0xff] }
  0xcb   :  { %4603 = vmatpush.bf16.msra.mxu1 %v7430_v48  ;;  %v7452_v48 = vld [vmem:[%s9429_s1 + $0x718] sm:$0xff] }
  0xcc   :  { %4616 = vmatpush.bf16.msra.mxu2 %v7438_v49  ;;  %v7460_v49 = vld [vmem:[%s9429_s1 + $0x758] sm:$0xff] }
  0xcd   :  { %4629 = vmatpush.bf16.msra.mxu3 %v7446_v50  ;;  %v7468_v50 = vld [vmem:[%s9429_s1 + $0x798] sm:$0xff] }
  0xce   :  { %4591 = vmatpush.bf16.msra.mxu0 %v7421_v52  ;;  %v4365_v13 = vpop.f32.mrf.mxu2 }
  0xcf   :  { %4604 = vmatpush.bf16.msra.mxu1 %v7429_v53  ;;  %v4378_v14 = vpop.f32.mrf.mxu3  ;;  %v7495_v13 = vld [vmem:[%s9429_s1 + $0x870] sm:$0xff] }
  0xd0   :  { %4617 = vmatpush.bf16.msra.mxu2 %v7437_v56  ;;  %v7503_v14 = vld [vmem:[%s9429_s1 + $0x8b0] sm:$0xff] }
  0xd1   :  { %4630 = vmatpush.bf16.msra.mxu3 %v7445_v57  ;;  %v7451_v57 = vld [vmem:[%s9429_s1 + $0x710] sm:$0xff] }
  0xd2   :  { %4592 = vmatpush.bf16.msra.mxu0 %v7420_v59 }
  0xd3   :  { %4605 = vmatpush.bf16.msra.mxu1 %v7428_v60  ;;  %v7467_v60 = vld [vmem:[%s9429_s1 + $0x790] sm:$0xff] }
  0xd4   :  { %4618 = vmatpush.bf16.msra.mxu2 %v7436_v61  ;;  %v7475_v61 = vld [vmem:[%s9429_s1 + $0x7d0] sm:$0xff] }
  0xd5   :  { %4631 = vmatpush.bf16.msra.mxu3 %v7444_v62  ;;  %v7450_v62 = vld [vmem:[%s9429_s1 + $0x708] sm:$0xff] }
  0xd6   :  { %4593 = vmatpush.bf16.msra.mxu0 %v7419_v3 }
  0xd7   :  { %4606 = vmatpush.bf16.msra.mxu1 %v7427_v4  ;;  %v7449_v4 = vld [vmem:[%s9429_s1 + $0x700] sm:$0xff] }
  0xd8   :  { %4619 = vmatpush.bf16.msra.mxu2 %v7435_v7  ;;  %v7473_v7 = vld [vmem:[%s9429_s1 + $0x7c0] sm:$0xff] }
  0xd9   :  { %4632 = vmatpush.bf16.msra.mxu3 %v7443_v8  ;;  %v7488_v8 = vld [vmem:[%s9429_s1 + $0x838] sm:$0xff] }
  0xda   :  { %4594 = vmatpush.bf16.msra.mxu0 %v7418_v9  ;;  %v7496_v9 = vld [vmem:[%s9429_s1 + $0x878] sm:$0xff] }
  0xdb   :  { %4607 = vmatpush.bf16.msra.mxu1 %v7426_v10  ;;  %v7504_v10 = vld [vmem:[%s9429_s1 + $0x8b8] sm:$0xff] }
  0xdc   :  { %4620 = vmatpush.bf16.msra.mxu2 %v7434_v11  ;;  %v7512_v11 = vld [vmem:[%s9429_s1 + $0x8f8] sm:$0xff] }
  0xdd   :  { %4633 = vmatpush.bf16.msra.mxu3 %v7442_v12  ;;  %v7487_v12 = vld [vmem:[%s9429_s1 + $0x830] sm:$0xff] }
  0xde   :  { %4595 = vmatpush.bf16.msra.mxu0 %v7417_v15  ;;  %v4389_v40 = vpop.f32.mrf.mxu0  ;;  %v7511_v15 = vld [vmem:[%s9429_s1 + $0x8f0] sm:$0xff] }
  0xdf   :  { %4608 = vmatpush.bf16.msra.mxu1 %v7425_v16  ;;  %v4390_v41 = vadd.f32 %v4389_v40, %v8449_v5  ;;  %v4402_v44 = vpop.f32.mrf.mxu1  ;;  %v7457_v5 = vld [vmem:[%s9429_s1 + $0x740] sm:$0xff]  ;;  %v7486_v16 = vld [vmem:[%s9429_s1 + $0x828] sm:$0xff]  ;;  %v7499_v40 = vld [vmem:[%s9429_s1 + $0x890] sm:$0xff] }
  0xe0   :  { %4621 = vmatpush.bf16.msra.mxu2 %v7433_v17  ;;  %v7494_v17 = vld [vmem:[%s9429_s1 + $0x868] sm:$0xff] }
  0xe1   :  { %4634 = vmatpush.bf16.msra.mxu3 %v7441_v18  ;;  %4596 = vmatmul.bf16.vlgmr.msra.gmra.mxu0 %v1092_v24  ;;  %v4403_v47 = vadd.f32 %v4402_v44, %v4390_v41  ;;  %v7502_v18 = vld [vmem:[%s9429_s1 + $0x8a8] sm:$0xff]  ;;  %v7507_v41 = vld [vmem:[%s9429_s1 + $0x8d0] sm:$0xff] }
  0xe2   :  { %4640 = vmatpush.bf16.msrb.mxu0 %v7456_v19  ;;  %4609 = vmatmul.bf16.vlgmr.msra.gmra.mxu1 %v1093_v26  ;;  %v7510_v19 = vld [vmem:[%s9429_s1 + $0x8e8] sm:$0xff]  ;;  %v7509_v26 = vld [vmem:[%s9429_s1 + $0x8e0] sm:$0xff] }
  0xe3   :  { %4653 = vmatpush.bf16.msrb.mxu1 %v7464_v20  ;;  %4622 = vmatmul.bf16.vlgmr.msra.gmra.mxu2 %v1094_v25  ;;  %v7501_v25 = vld [vmem:[%s9429_s1 + $0x8a0] sm:$0xff]  ;;  %v7498_v44 = vld [vmem:[%s9429_s1 + $0x888] sm:$0xff] }
  0xe4   :  { %4666 = vmatpush.bf16.msrb.mxu2 %v7472_v22  ;;  %4635 = vmatmul.bf16.vlgmr.msra.gmra.mxu3 %v1095_v27  ;;  %v7485_v22 = vld [vmem:[%s9429_s1 + $0x820] sm:$0xff] }
  0xe5   :  { %4679 = vmatpush.bf16.msrb.mxu3 %v7480_v23  ;;  %v7493_v23 = vld [vmem:[%s9429_s1 + $0x860] sm:$0xff] }
  0xe6   :  { %4641 = vmatpush.bf16.msrb.mxu0 %v7455_v28  ;;  %v4415_v52 = vpop.f32.mrf.mxu2  ;;  %v4391_v55 = vpop.f32.mrf.mxu0  ;;  %v7484_v28 = vld [vmem:[%s9429_s1 + $0x818] sm:$0xff] }
  0xe7   :  { %4654 = vmatpush.bf16.msrb.mxu1 %v7463_v29  ;;  %v4416_v53 = vadd.f32 %v4415_v52, %v4403_v47  ;;  %v4428_v54 = vpop.f32.mrf.mxu3  ;;  %v4404_v59 = vpop.f32.mrf.mxu1  ;;  %v7492_v29 = vld [vmem:[%s9429_s1 + $0x858] sm:$0xff] }
  0xe8   :  { %4667 = vmatpush.bf16.msrb.mxu2 %v7471_v30  ;;  %v7500_v30 = vld [vmem:[%s9429_s1 + $0x898] sm:$0xff]  ;;  %v1103_v59 = vld [vmem:[#allocation1 + $0x9] sm:$0xff] }
  0xe9   :  { %4680 = vmatpush.bf16.msrb.mxu3 %v7479_v31  ;;  %v4429_v56 = vadd.f32 %v4428_v54, %v4416_v53  ;;  %v7508_v31 = vld [vmem:[%s9429_s1 + $0x8d8] sm:$0xff]  ;;  %v33_v54 = vld [vmem:[%s9430_s0 + $0x28] sm:$0xff] }
  0xea   :  { %4642 = vmatpush.bf16.msrb.mxu0 %v7454_v36  ;;  %v7520_v52 = vld [vmem:[%s9429_s1 + $0x938] sm:$0xff] }
  0xeb   :  { %4655 = vmatpush.bf16.msrb.mxu1 %v7462_v37  ;;  %v7483_v37 = vld [vmem:[%s9429_s1 + $0x810] sm:$0xff]  ;;  %v7528_v53 = vld [vmem:[%s9429_s1 + $0x978] sm:$0xff] }
  0xec   :  { %4668 = vmatpush.bf16.msrb.mxu2 %v7470_v38  ;;  %v7491_v38 = vld [vmem:[%s9429_s1 + $0x850] sm:$0xff]  ;;  %v7536_v55 = vld [vmem:[%s9429_s1 + $0x9b8] sm:$0xff] }
  0xed   :  { %4681 = vmatpush.bf16.msrb.mxu3 %v7478_v39 }
  0xee   :  { %4643 = vmatpush.bf16.msrb.mxu0 %v7453_v42  ;;  %v4417_v2 = vpop.f32.mrf.mxu2  ;;  %v7482_v42 = vld [vmem:[%s9429_s1 + $0x808] sm:$0xff] }
  0xef   :  { %4656 = vmatpush.bf16.msrb.mxu1 %v7461_v43  ;;  %v4430_v3 = vpop.f32.mrf.mxu3  ;;  %v7490_v43 = vld [vmem:[%s9429_s1 + $0x848] sm:$0xff]  ;;  %v8720_v2 = vld [vmem:[#allocation1 + $0x36] sm:$0xff] }
  0xf0   :  { %4669 = vmatpush.bf16.msrb.mxu2 %v7469_v45  ;;  %v7506_v45 = vld [vmem:[%s9429_s1 + $0x8c8] sm:$0xff] }
  0xf1   :  { %4682 = vmatpush.bf16.msrb.mxu3 %v7477_v46  ;;  %v8722_v3 = vld [vmem:[#allocation1 + $0x2d] sm:$0xff] }
  0xf2   :  { %4644 = vmatpush.bf16.msrb.mxu0 %v7452_v48  ;;  %v7481_v48 = vld [vmem:[%s9429_s1 + $0x800] sm:$0xff] }
  0xf3   :  { %4657 = vmatpush.bf16.msrb.mxu1 %v7460_v49  ;;  %v7489_v49 = vld [vmem:[%s9429_s1 + $0x840] sm:$0xff] }
  0xf4   :  { %4670 = vmatpush.bf16.msrb.mxu2 %v7468_v50  ;;  %v7497_v50 = vld [vmem:[%s9429_s1 + $0x880] sm:$0xff] }
  0xf5   :  { %4683 = vmatpush.bf16.msrb.mxu3 %v7476_v51  ;;  %v7505_v51 = vld [vmem:[%s9429_s1 + $0x8c0] sm:$0xff] }
  0xf6   :  { %4645 = vmatpush.bf16.msrb.mxu0 %v7451_v57  ;;  %v1102_v57 = vld [vmem:[#allocation1] sm:$0xff] }
  0xf7   :  { %4658 = vmatpush.bf16.msrb.mxu1 %v7459_v58  ;;  %v1104_v58 = vld [vmem:[#allocation1 + $0x12] sm:$0xff] }
  0xf8   :  { %4671 = vmatpush.bf16.msrb.mxu2 %v7467_v60  ;;  %v1105_v60 = vld [vmem:[#allocation1 + $0x1b] sm:$0xff] }
  0xf9   :  { %4684 = vmatpush.bf16.msrb.mxu3 %v7475_v61  ;;  %v7519_v61 = vld [vmem:[%s9429_s1 + $0x930] sm:$0xff] }
  0xfa   :  { %4646 = vmatpush.bf16.msrb.mxu0 %v7450_v62  ;;  %v7527_v62 = vld [vmem:[%s9429_s1 + $0x970] sm:$0xff] }
  0xfb   :  { %4659 = vmatpush.bf16.msrb.mxu1 %v7458_v63  ;;  %v7535_v63 = vld [vmem:[%s9429_s1 + $0x9b0] sm:$0xff] }
  0xfc   :  { %4672 = vmatpush.bf16.msrb.mxu2 %v7466_v0  ;;  %v7543_v0 = vld [vmem:[%s9429_s1 + $0x9f0] sm:$0xff] }
  0xfd   :  { %4685 = vmatpush.bf16.msrb.mxu3 %v7474_v1  ;;  %v8718_v1 = vld [vmem:[#allocation1 + $0x24] sm:$0xff] }
  0xfe   :  { %4647 = vmatpush.bf16.msrb.mxu0 %v7449_v4  ;;  %v4441_v20 = vpop.f32.mrf.mxu0  ;;  %v8724_v4 = vld [vmem:[#allocation1 + $0x3f] sm:$0xff] }
  0xff   :  { %4660 = vmatpush.bf16.msrb.mxu1 %v7457_v5  ;;  %v4442_v21 = vadd.f32 %v4441_v20, %v4429_v56  ;;  %v4454_v24 = vpop.f32.mrf.mxu1  ;;  %v7544_v56 = vld [vmem:[%s9429_s1 + $0x9f8] sm:$0xff]  ;;  %1111 = vst [vmem:[#allocation1] ss:$9 sm:$0xff] %v33_v54  ;;  %v7518_v5 = vld [vmem:[%s9429_s1 + $0x928] sm:$0xff] }
 0x100   :  { %4673 = vmatpush.bf16.msrb.mxu2 %v7465_v6  ;;  %v7526_v6 = vld [vmem:[%s9429_s1 + $0x968] sm:$0xff]  ;;  %v7540_v20 = vld [vmem:[%s9429_s1 + $0x9d8] sm:$0xff] }
 0x101   :  { %4686 = vmatpush.bf16.msrb.mxu3 %v7473_v7  ;;  %4648 = vmatmul.bf16.vlgmr.msrb.gmra.mxu0 %v8508_v32  ;;  %v4455_v27 = vadd.f32 %v4454_v24, %v4442_v21  ;;  %v7534_v7 = vld [vmem:[%s9429_s1 + $0x9a8] sm:$0xff] }
 0x102   :  { %4692 = vmatpush.bf16.msra.mxu0 %v7488_v8  ;;  %4661 = vmatmul.bf16.vlgmr.msrb.gmra.mxu1 %v8512_v34  ;;  %v7542_v8 = vld [vmem:[%s9429_s1 + $0x9e8] sm:$0xff] }
 0x103   :  { %4705 = vmatpush.bf16.msra.mxu1 %v7496_v9  ;;  %4674 = vmatmul.bf16.vlgmr.msrb.gmra.mxu2 %v8510_v33 }
 0x104   :  { %4718 = vmatpush.bf16.msra.mxu2 %v7504_v10  ;;  %4687 = vmatmul.bf16.vlgmr.msrb.gmra.mxu3 %v8514_v35 }
 0x105   :  { %4731 = vmatpush.bf16.msra.mxu3 %v7512_v11  ;;  %v7517_v11 = vld [vmem:[%s9429_s1 + $0x920] sm:$0xff] }
 0x106   :  { %4693 = vmatpush.bf16.msra.mxu0 %v7487_v12  ;;  %v4467_v32 = vpop.f32.mrf.mxu2  ;;  %v4443_v35 = vpop.f32.mrf.mxu0  ;;  %v7525_v12 = vld [vmem:[%s9429_s1 + $0x960] sm:$0xff] }
 0x107   :  { %4706 = vmatpush.bf16.msra.mxu1 %v7495_v13  ;;  %v4468_v33 = vadd.f32 %v4467_v32, %v4455_v27  ;;  %v4480_v34 = vpop.f32.mrf.mxu3  ;;  %v4456_v39 = vpop.f32.mrf.mxu1  ;;  %v7523_v27 = vld [vmem:[%s9429_s1 + $0x950] sm:$0xff]  ;;  %v7522_v32 = vld [vmem:[%s9429_s1 + $0x948] sm:$0xff] }
 0x108   :  { %4719 = vmatpush.bf16.msra.mxu2 %v7503_v14  ;;  %v7533_v14 = vld [vmem:[%s9429_s1 + $0x9a0] sm:$0xff] }
 0x109   :  { %4732 = vmatpush.bf16.msra.mxu3 %v7511_v15  ;;  %v8653_v36 = vadd.f32 %v4480_v34, %v4468_v33  ;;  %v7541_v15 = vld [vmem:[%s9429_s1 + $0x9e0] sm:$0xff]  ;;  %v7530_v33 = vld [vmem:[%s9429_s1 + $0x988] sm:$0xff] }
 0x10a   :  { %4694 = vmatpush.bf16.msra.mxu0 %v7486_v16  ;;  %v7538_v34 = vld [vmem:[%s9429_s1 + $0x9c8] sm:$0xff]  ;;  %v7529_v39 = vld [vmem:[%s9429_s1 + $0x980] sm:$0xff] }
 0x10b   :  { %4707 = vmatpush.bf16.msra.mxu1 %v7494_v17  ;;  %v7516_v17 = vld [vmem:[%s9429_s1 + $0x918] sm:$0xff] }
 0x10c   :  { %4720 = vmatpush.bf16.msra.mxu2 %v7502_v18  ;;  %v7524_v18 = vld [vmem:[%s9429_s1 + $0x958] sm:$0xff] }
 0x10d   :  { %4733 = vmatpush.bf16.msra.mxu3 %v7510_v19  ;;  %v7532_v19 = vld [vmem:[%s9429_s1 + $0x998] sm:$0xff] }
 0x10e   :  { %4695 = vmatpush.bf16.msra.mxu0 %v7485_v22  ;;  %v4469_v46 = vpop.f32.mrf.mxu2 }
 0x10f   :  { %4708 = vmatpush.bf16.msra.mxu1 %v7493_v23  ;;  %v4482_v47 = vpop.f32.mrf.mxu3  ;;  %v7559_v46 = vld [vmem:[%s9429_s1 + $0xa70] sm:$0xff] }
 0x110   :  { %4721 = vmatpush.bf16.msra.mxu2 %v7501_v25  ;;  %v7567_v47 = vld [vmem:[%s9429_s1 + $0xab0] sm:$0xff] }
 0x111   :  { %4734 = vmatpush.bf16.msra.mxu3 %v7509_v26  ;;  %v7515_v26 = vld [vmem:[%s9429_s1 + $0x910] sm:$0xff] }
 0x112   :  { %4696 = vmatpush.bf16.msra.mxu0 %v7484_v28 }
 0x113   :  { %4709 = vmatpush.bf16.msra.mxu1 %v7492_v29  ;;  %v7531_v29 = vld [vmem:[%s9429_s1 + $0x990] sm:$0xff] }
 0x114   :  { %4722 = vmatpush.bf16.msra.mxu2 %v7500_v30  ;;  %v7539_v30 = vld [vmem:[%s9429_s1 + $0x9d0] sm:$0xff] }
 0x115   :  { %4735 = vmatpush.bf16.msra.mxu3 %v7508_v31  ;;  %v7514_v31 = vld [vmem:[%s9429_s1 + $0x908] sm:$0xff] }
 0x116   :  { %4697 = vmatpush.bf16.msra.mxu0 %v7483_v37  ;;  %v7513_v37 = vld [vmem:[%s9429_s1 + $0x900] sm:$0xff] }
 0x117   :  { %4710 = vmatpush.bf16.msra.mxu1 %v7491_v38  ;;  %v7521_v38 = vld [vmem:[%s9429_s1 + $0x940] sm:$0xff] }
 0x118   :  { %4723 = vmatpush.bf16.msra.mxu2 %v7499_v40  ;;  %v7537_v40 = vld [vmem:[%s9429_s1 + $0x9c0] sm:$0xff] }
 0x119   :  { %4736 = vmatpush.bf16.msra.mxu3 %v7507_v41  ;;  %v7552_v41 = vld [vmem:[%s9429_s1 + $0xa38] sm:$0xff] }
 0x11a   :  { %4698 = vmatpush.bf16.msra.mxu0 %v7482_v42  ;;  %v7560_v42 = vld [vmem:[%s9429_s1 + $0xa78] sm:$0xff] }
 0x11b   :  { %4711 = vmatpush.bf16.msra.mxu1 %v7490_v43  ;;  %v7568_v43 = vld [vmem:[%s9429_s1 + $0xab8] sm:$0xff] }
 0x11c   :  { %4724 = vmatpush.bf16.msra.mxu2 %v7498_v44  ;;  %v7576_v44 = vld [vmem:[%s9429_s1 + $0xaf8] sm:$0xff] }
 0x11d   :  { %4737 = vmatpush.bf16.msra.mxu3 %v7506_v45  ;;  %v7551_v45 = vld [vmem:[%s9429_s1 + $0xa30] sm:$0xff] }
 0x11e   :  { %4699 = vmatpush.bf16.msra.mxu0 %v7481_v48  ;;  %v4493_v9 = vpop.f32.mrf.mxu0  ;;  %v7575_v48 = vld [vmem:[%s9429_s1 + $0xaf0] sm:$0xff] }
 0x11f   :  { %4712 = vmatpush.bf16.msra.mxu1 %v7489_v49  ;;  %v4494_v10 = vadd.f32 %v4493_v9, %v8653_v36  ;;  %v4506_v13 = vpop.f32.mrf.mxu1  ;;  %v7550_v49 = vld [vmem:[%s9429_s1 + $0xa28] sm:$0xff]  ;;  %v7563_v9 = vld [vmem:[%s9429_s1 + $0xa90] sm:$0xff] }
 0x120   :  { %4725 = vmatpush.bf16.msra.mxu2 %v7497_v50  ;;  %v7558_v50 = vld [vmem:[%s9429_s1 + $0xa68] sm:$0xff] }
 0x121   :  { %4738 = vmatpush.bf16.msra.mxu3 %v7505_v51  ;;  %4700 = vmatmul.bf16.vlgmr.msra.gmra.mxu0 %v1102_v57  ;;  %v4507_v16 = vadd.f32 %v4506_v13, %v4494_v10  ;;  %v7566_v51 = vld [vmem:[%s9429_s1 + $0xaa8] sm:$0xff]  ;;  %v7571_v10 = vld [vmem:[%s9429_s1 + $0xad0] sm:$0xff] }
 0x122   :  { %4744 = vmatpush.bf16.msrb.mxu0 %v7520_v52  ;;  %4713 = vmatmul.bf16.vlgmr.msra.gmra.mxu1 %v1103_v59  ;;  %v7574_v52 = vld [vmem:[%s9429_s1 + $0xae8] sm:$0xff]  ;;  %v7573_v59 = vld [vmem:[%s9429_s1 + $0xae0] sm:$0xff] }
 0x123   :  { %4757 = vmatpush.bf16.msrb.mxu1 %v7528_v53  ;;  %4726 = vmatmul.bf16.vlgmr.msra.gmra.mxu2 %v1104_v58  ;;  %v7565_v58 = vld [vmem:[%s9429_s1 + $0xaa0] sm:$0xff]  ;;  %v7562_v13 = vld [vmem:[%s9429_s1 + $0xa88] sm:$0xff] }
 0x124   :  { %4770 = vmatpush.bf16.msrb.mxu2 %v7536_v55  ;;  %4739 = vmatmul.bf16.vlgmr.msra.gmra.mxu3 %v1105_v60  ;;  %v7549_v55 = vld [vmem:[%s9429_s1 + $0xa20] sm:$0xff] }
 0x125   :  { %4783 = vmatpush.bf16.msrb.mxu3 %v7544_v56  ;;  %v7557_v56 = vld [vmem:[%s9429_s1 + $0xa60] sm:$0xff] }
 0x126   :  { %4745 = vmatpush.bf16.msrb.mxu0 %v7519_v61  ;;  %v4519_v21 = vpop.f32.mrf.mxu2  ;;  %v4495_v24 = vpop.f32.mrf.mxu0  ;;  %v7548_v61 = vld [vmem:[%s9429_s1 + $0xa18] sm:$0xff] }
 0x127   :  { %4758 = vmatpush.bf16.msrb.mxu1 %v7527_v62  ;;  %v4520_v22 = vadd.f32 %v4519_v21, %v4507_v16  ;;  %v4532_v23 = vpop.f32.mrf.mxu3  ;;  %v4508_v28 = vpop.f32.mrf.mxu1  ;;  %v7556_v62 = vld [vmem:[%s9429_s1 + $0xa58] sm:$0xff] }
 0x128   :  { %4771 = vmatpush.bf16.msrb.mxu2 %v7535_v63  ;;  %v7564_v63 = vld [vmem:[%s9429_s1 + $0xa98] sm:$0xff]  ;;  %v1113_v28 = vld [vmem:[#allocation1 + $0x9] sm:$0xff] }
 0x129   :  { %4784 = vmatpush.bf16.msrb.mxu3 %v7543_v0  ;;  %v4533_v25 = vadd.f32 %v4532_v23, %v4520_v22  ;;  %v7572_v0 = vld [vmem:[%s9429_s1 + $0xad8] sm:$0xff]  ;;  %v34_v23 = vld [vmem:[%s9430_s0 + $0x30] sm:$0xff] }
 0x12a   :  { %4746 = vmatpush.bf16.msrb.mxu0 %v7518_v5  ;;  %v7584_v21 = vld [vmem:[%s9429_s1 + $0xb38] sm:$0xff] }
 0x12b   :  { %4759 = vmatpush.bf16.msrb.mxu1 %v7526_v6  ;;  %v7547_v6 = vld [vmem:[%s9429_s1 + $0xa10] sm:$0xff]  ;;  %v7592_v22 = vld [vmem:[%s9429_s1 + $0xb78] sm:$0xff] }
 0x12c   :  { %4772 = vmatpush.bf16.msrb.mxu2 %v7534_v7  ;;  %v7555_v7 = vld [vmem:[%s9429_s1 + $0xa50] sm:$0xff]  ;;  %v7600_v24 = vld [vmem:[%s9429_s1 + $0xbb8] sm:$0xff] }
 0x12d   :  { %4785 = vmatpush.bf16.msrb.mxu3 %v7542_v8 }
 0x12e   :  { %4747 = vmatpush.bf16.msrb.mxu0 %v7517_v11  ;;  %v4521_v35 = vpop.f32.mrf.mxu2  ;;  %v7546_v11 = vld [vmem:[%s9429_s1 + $0xa08] sm:$0xff] }
 0x12f   :  { %4760 = vmatpush.bf16.msrb.mxu1 %v7525_v12  ;;  %v4534_v36 = vpop.f32.mrf.mxu3  ;;  %v7554_v12 = vld [vmem:[%s9429_s1 + $0xa48] sm:$0xff]  ;;  %v8930_v35 = vld [vmem:[#allocation1 + $0x36] sm:$0xff] }
 0x130   :  { %4773 = vmatpush.bf16.msrb.mxu2 %v7533_v14  ;;  %v7570_v14 = vld [vmem:[%s9429_s1 + $0xac8] sm:$0xff] }
 0x131   :  { %4786 = vmatpush.bf16.msrb.mxu3 %v7541_v15  ;;  %v8932_v36 = vld [vmem:[#allocation1 + $0x2d] sm:$0xff] }
 0x132   :  { %4748 = vmatpush.bf16.msrb.mxu0 %v7516_v17  ;;  %v7545_v17 = vld [vmem:[%s9429_s1 + $0xa00] sm:$0xff] }
 0x133   :  { %4761 = vmatpush.bf16.msrb.mxu1 %v7524_v18  ;;  %v7553_v18 = vld [vmem:[%s9429_s1 + $0xa40] sm:$0xff] }
 0x134   :  { %4774 = vmatpush.bf16.msrb.mxu2 %v7532_v19  ;;  %v7561_v19 = vld [vmem:[%s9429_s1 + $0xa80] sm:$0xff] }
 0x135   :  { %4787 = vmatpush.bf16.msrb.mxu3 %v7540_v20  ;;  %v7569_v20 = vld [vmem:[%s9429_s1 + $0xac0] sm:$0xff] }
 0x136   :  { %4749 = vmatpush.bf16.msrb.mxu0 %v7515_v26  ;;  %v1112_v26 = vld [vmem:[#allocation1] sm:$0xff] }
 0x137   :  { %4762 = vmatpush.bf16.msrb.mxu1 %v7523_v27  ;;  %v1114_v27 = vld [vmem:[#allocation1 + $0x12] sm:$0xff] }
 0x138   :  { %4775 = vmatpush.bf16.msrb.mxu2 %v7531_v29  ;;  %v1115_v29 = vld [vmem:[#allocation1 + $0x1b] sm:$0xff] }
 0x139   :  { %4788 = vmatpush.bf16.msrb.mxu3 %v7539_v30  ;;  %v7583_v30 = vld [vmem:[%s9429_s1 + $0xb30] sm:$0xff] }
 0x13a   :  { %4750 = vmatpush.bf16.msrb.mxu0 %v7514_v31  ;;  %v7591_v31 = vld [vmem:[%s9429_s1 + $0xb70] sm:$0xff] }
 0x13b   :  { %4763 = vmatpush.bf16.msrb.mxu1 %v7522_v32  ;;  %v7599_v32 = vld [vmem:[%s9429_s1 + $0xbb0] sm:$0xff] }
 0x13c   :  { %4776 = vmatpush.bf16.msrb.mxu2 %v7530_v33  ;;  %v7607_v33 = vld [vmem:[%s9429_s1 + $0xbf0] sm:$0xff] }
 0x13d   :  { %4789 = vmatpush.bf16.msrb.mxu3 %v7538_v34  ;;  %v8928_v34 = vld [vmem:[#allocation1 + $0x24] sm:$0xff] }
 0x13e   :  { %4751 = vmatpush.bf16.msrb.mxu0 %v7513_v37  ;;  %v4545_v53 = vpop.f32.mrf.mxu0  ;;  %v8934_v37 = vld [vmem:[#allocation1 + $0x3f] sm:$0xff] }
 0x13f   :  { %4764 = vmatpush.bf16.msrb.mxu1 %v7521_v38  ;;  %v4546_v54 = vadd.f32 %v4545_v53, %v4533_v25  ;;  %v4558_v57 = vpop.f32.mrf.mxu1  ;;  %v7608_v25 = vld [vmem:[%s9429_s1 + $0xbf8] sm:$0xff]  ;;  %1121 = vst [vmem:[#allocation1] ss:$9 sm:$0xff] %v34_v23  ;;  %v7582_v38 = vld [vmem:[%s9429_s1 + $0xb28] sm:$0xff] }
 0x140   :  { %4777 = vmatpush.bf16.msrb.mxu2 %v7529_v39  ;;  %v7590_v39 = vld [vmem:[%s9429_s1 + $0xb68] sm:$0xff]  ;;  %v7604_v53 = vld [vmem:[%s9429_s1 + $0xbd8] sm:$0xff] }
 0x141   :  { %4790 = vmatpush.bf16.msrb.mxu3 %v7537_v40  ;;  %4752 = vmatmul.bf16.vlgmr.msrb.gmra.mxu0 %v8718_v1  ;;  %v4559_v60 = vadd.f32 %v4558_v57, %v4546_v54  ;;  %v7598_v40 = vld [vmem:[%s9429_s1 + $0xba8] sm:$0xff] }
 0x142   :  { %4796 = vmatpush.bf16.msra.mxu0 %v7552_v41  ;;  %4765 = vmatmul.bf16.vlgmr.msrb.gmra.mxu1 %v8722_v3  ;;  %v7606_v41 = vld [vmem:[%s9429_s1 + $0xbe8] sm:$0xff] }
 0x143   :  { %4809 = vmatpush.bf16.msra.mxu1 %v7560_v42  ;;  %4778 = vmatmul.bf16.vlgmr.msrb.gmra.mxu2 %v8720_v2 }
 0x144   :  { %4822 = vmatpush.bf16.msra.mxu2 %v7568_v43  ;;  %4791 = vmatmul.bf16.vlgmr.msrb.gmra.mxu3 %v8724_v4 }
 0x145   :  { %4835 = vmatpush.bf16.msra.mxu3 %v7576_v44  ;;  %v7581_v44 = vld [vmem:[%s9429_s1 + $0xb20] sm:$0xff] }
 0x146   :  { %4797 = vmatpush.bf16.msra.mxu0 %v7551_v45  ;;  %v4571_v1 = vpop.f32.mrf.mxu2  ;;  %v4547_v4 = vpop.f32.mrf.mxu0  ;;  %v7589_v45 = vld [vmem:[%s9429_s1 + $0xb60] sm:$0xff] }
 0x147   :  { %4810 = vmatpush.bf16.msra.mxu1 %v7559_v46  ;;  %v4572_v2 = vadd.f32 %v4571_v1, %v4559_v60  ;;  %v4584_v3 = vpop.f32.mrf.mxu3  ;;  %v4560_v8 = vpop.f32.mrf.mxu1  ;;  %v7587_v60 = vld [vmem:[%s9429_s1 + $0xb50] sm:$0xff]  ;;  %v7586_v1 = vld [vmem:[%s9429_s1 + $0xb48] sm:$0xff] }
 0x148   :  { %4823 = vmatpush.bf16.msra.mxu2 %v7567_v47  ;;  %v7597_v47 = vld [vmem:[%s9429_s1 + $0xba0] sm:$0xff] }
 0x149   :  { %4836 = vmatpush.bf16.msra.mxu3 %v7575_v48  ;;  %v8863_v5 = vadd.f32 %v4584_v3, %v4572_v2  ;;  %v7605_v48 = vld [vmem:[%s9429_s1 + $0xbe0] sm:$0xff]  ;;  %v7594_v2 = vld [vmem:[%s9429_s1 + $0xb88] sm:$0xff] }
 0x14a   :  { %4798 = vmatpush.bf16.msra.mxu0 %v7550_v49  ;;  %v7602_v3 = vld [vmem:[%s9429_s1 + $0xbc8] sm:$0xff]  ;;  %v7593_v8 = vld [vmem:[%s9429_s1 + $0xb80] sm:$0xff] }
 0x14b   :  { %4811 = vmatpush.bf16.msra.mxu1 %v7558_v50  ;;  %v7580_v50 = vld [vmem:[%s9429_s1 + $0xb18] sm:$0xff] }
 0x14c   :  { %4824 = vmatpush.bf16.msra.mxu2 %v7566_v51  ;;  %v7588_v51 = vld [vmem:[%s9429_s1 + $0xb58] sm:$0xff] }
 0x14d   :  { %4837 = vmatpush.bf16.msra.mxu3 %v7574_v52  ;;  %v7596_v52 = vld [vmem:[%s9429_s1 + $0xb98] sm:$0xff] }
 0x14e   :  { %4799 = vmatpush.bf16.msra.mxu0 %v7549_v55  ;;  %v4573_v15 = vpop.f32.mrf.mxu2 }
 0x14f   :  { %4812 = vmatpush.bf16.msra.mxu1 %v7557_v56  ;;  %v4586_v16 = vpop.f32.mrf.mxu3  ;;  %v7623_v15 = vld [vmem:[%s9429_s1 + $0xc70] sm:$0xff] }
 0x150   :  { %4825 = vmatpush.bf16.msra.mxu2 %v7565_v58  ;;  %v7631_v16 = vld [vmem:[%s9429_s1 + $0xcb0] sm:$0xff] }
 0x151   :  { %4838 = vmatpush.bf16.msra.mxu3 %v7573_v59  ;;  %v7579_v59 = vld [vmem:[%s9429_s1 + $0xb10] sm:$0xff] }
 0x152   :  { %4800 = vmatpush.bf16.msra.mxu0 %v7548_v61 }
 0x153   :  { %4813 = vmatpush.bf16.msra.mxu1 %v7556_v62  ;;  %v7595_v62 = vld [vmem:[%s9429_s1 + $0xb90] sm:$0xff] }
 0x154   :  { %4826 = vmatpush.bf16.msra.mxu2 %v7564_v63  ;;  %v7603_v63 = vld [vmem:[%s9429_s1 + $0xbd0] sm:$0xff] }
 0x155   :  { %4839 = vmatpush.bf16.msra.mxu3 %v7572_v0  ;;  %v7578_v0 = vld [vmem:[%s9429_s1 + $0xb08] sm:$0xff] }
 0x156   :  { %4801 = vmatpush.bf16.msra.mxu0 %v7547_v6  ;;  %v7577_v6 = vld [vmem:[%s9429_s1 + $0xb00] sm:$0xff] }
 0x157   :  { %4814 = vmatpush.bf16.msra.mxu1 %v7555_v7  ;;  %v7585_v7 = vld [vmem:[%s9429_s1 + $0xb40] sm:$0xff] }
 0x158   :  { %4827 = vmatpush.bf16.msra.mxu2 %v7563_v9  ;;  %v7601_v9 = vld [vmem:[%s9429_s1 + $0xbc0] sm:$0xff] }
 0x159   :  { %4840 = vmatpush.bf16.msra.mxu3 %v7571_v10  ;;  %v7616_v10 = vld [vmem:[%s9429_s1 + $0xc38] sm:$0xff] }
 0x15a   :  { %4802 = vmatpush.bf16.msra.mxu0 %v7546_v11  ;;  %v7624_v11 = vld [vmem:[%s9429_s1 + $0xc78] sm:$0xff] }
 0x15b   :  { %4815 = vmatpush.bf16.msra.mxu1 %v7554_v12  ;;  %v7632_v12 = vld [vmem:[%s9429_s1 + $0xcb8] sm:$0xff] }
 0x15c   :  { %4828 = vmatpush.bf16.msra.mxu2 %v7562_v13  ;;  %v7640_v13 = vld [vmem:[%s9429_s1 + $0xcf8] sm:$0xff] }
 0x15d   :  { %4841 = vmatpush.bf16.msra.mxu3 %v7570_v14  ;;  %v7615_v14 = vld [vmem:[%s9429_s1 + $0xc30] sm:$0xff] }
 0x15e   :  { %4803 = vmatpush.bf16.msra.mxu0 %v7545_v17  ;;  %v4597_v42 = vpop.f32.mrf.mxu0  ;;  %v7639_v17 = vld [vmem:[%s9429_s1 + $0xcf0] sm:$0xff] }
 0x15f   :  { %4816 = vmatpush.bf16.msra.mxu1 %v7553_v18  ;;  %v4598_v43 = vadd.f32 %v4597_v42, %v8863_v5  ;;  %v4610_v46 = vpop.f32.mrf.mxu1  ;;  %v7614_v18 = vld [vmem:[%s9429_s1 + $0xc28] sm:$0xff]  ;;  %v7627_v42 = vld [vmem:[%s9429_s1 + $0xc90] sm:$0xff] }
 0x160   :  { %4829 = vmatpush.bf16.msra.mxu2 %v7561_v19  ;;  %v7622_v19 = vld [vmem:[%s9429_s1 + $0xc68] sm:$0xff] }
 0x161   :  { %4842 = vmatpush.bf16.msra.mxu3 %v7569_v20  ;;  %4804 = vmatmul.bf16.vlgmr.msra.gmra.mxu0 %v1112_v26  ;;  %v4611_v49 = vadd.f32 %v4610_v46, %v4598_v43  ;;  %v7630_v20 = vld [vmem:[%s9429_s1 + $0xca8] sm:$0xff]  ;;  %v7635_v43 = vld [vmem:[%s9429_s1 + $0xcd0] sm:$0xff] }
 0x162   :  { %4848 = vmatpush.bf16.msrb.mxu0 %v7584_v21  ;;  %4817 = vmatmul.bf16.vlgmr.msra.gmra.mxu1 %v1113_v28  ;;  %v7638_v21 = vld [vmem:[%s9429_s1 + $0xce8] sm:$0xff]  ;;  %v7637_v28 = vld [vmem:[%s9429_s1 + $0xce0] sm:$0xff] }
 0x163   :  { %4861 = vmatpush.bf16.msrb.mxu1 %v7592_v22  ;;  %4830 = vmatmul.bf16.vlgmr.msra.gmra.mxu2 %v1114_v27  ;;  %v7629_v27 = vld [vmem:[%s9429_s1 + $0xca0] sm:$0xff]  ;;  %v7626_v46 = vld [vmem:[%s9429_s1 + $0xc88] sm:$0xff] }
 0x164   :  { %4874 = vmatpush.bf16.msrb.mxu2 %v7600_v24  ;;  %4843 = vmatmul.bf16.vlgmr.msra.gmra.mxu3 %v1115_v29  ;;  %v7613_v24 = vld [vmem:[%s9429_s1 + $0xc20] sm:$0xff] }
 0x165   :  { %4887 = vmatpush.bf16.msrb.mxu3 %v7608_v25  ;;  %v7621_v25 = vld [vmem:[%s9429_s1 + $0xc60] sm:$0xff] }
 0x166   :  { %4849 = vmatpush.bf16.msrb.mxu0 %v7583_v30  ;;  %v4623_v54 = vpop.f32.mrf.mxu2  ;;  %v4599_v57 = vpop.f32.mrf.mxu0  ;;  %v7612_v30 = vld [vmem:[%s9429_s1 + $0xc18] sm:$0xff] }
 0x167   :  { %4862 = vmatpush.bf16.msrb.mxu1 %v7591_v31  ;;  %v4624_v55 = vadd.f32 %v4623_v54, %v4611_v49  ;;  %v4636_v56 = vpop.f32.mrf.mxu3  ;;  %v4612_v61 = vpop.f32.mrf.mxu1  ;;  %v7620_v31 = vld [vmem:[%s9429_s1 + $0xc58] sm:$0xff] }
 0x168   :  { %4875 = vmatpush.bf16.msrb.mxu2 %v7599_v32  ;;  %v7628_v32 = vld [vmem:[%s9429_s1 + $0xc98] sm:$0xff]  ;;  %v1123_v61 = vld [vmem:[#allocation1 + $0x9] sm:$0xff] }
 0x169   :  { %4888 = vmatpush.bf16.msrb.mxu3 %v7607_v33  ;;  %v4637_v58 = vadd.f32 %v4636_v56, %v4624_v55  ;;  %v7636_v33 = vld [vmem:[%s9429_s1 + $0xcd8] sm:$0xff] }
 0x16a   :  { %4850 = vmatpush.bf16.msrb.mxu0 %v7582_v38  ;;  %v7648_v54 = vld [vmem:[%s9429_s1 + $0xd38] sm:$0xff] }
 0x16b   :  { %4863 = vmatpush.bf16.msrb.mxu1 %v7590_v39  ;;  %v7611_v39 = vld [vmem:[%s9429_s1 + $0xc10] sm:$0xff]  ;;  %v7656_v55 = vld [vmem:[%s9429_s1 + $0xd78] sm:$0xff] }
 0x16c   :  { %4876 = vmatpush.bf16.msrb.mxu2 %v7598_v40  ;;  %v7619_v40 = vld [vmem:[%s9429_s1 + $0xc50] sm:$0xff]  ;;  %v35_v56 = vld [vmem:[%s9430_s0 + $0x38] sm:$0xff] }
 0x16d   :  { %4889 = vmatpush.bf16.msrb.mxu3 %v7606_v41  ;;  %v7664_v57 = vld [vmem:[%s9429_s1 + $0xdb8] sm:$0xff] }
 0x16e   :  { %4851 = vmatpush.bf16.msrb.mxu0 %v7581_v44  ;;  %v4625_v4 = vpop.f32.mrf.mxu2  ;;  %v7610_v44 = vld [vmem:[%s9429_s1 + $0xc08] sm:$0xff] }
 0x16f   :  { %4864 = vmatpush.bf16.msrb.mxu1 %v7589_v45  ;;  %v4638_v5 = vpop.f32.mrf.mxu3  ;;  %v7618_v45 = vld [vmem:[%s9429_s1 + $0xc48] sm:$0xff]  ;;  %v9140_v4 = vld [vmem:[#allocation1 + $0x36] sm:$0xff] }
 0x170   :  { %4877 = vmatpush.bf16.msrb.mxu2 %v7597_v47  ;;  %v7634_v47 = vld [vmem:[%s9429_s1 + $0xcc8] sm:$0xff] }
 0x171   :  { %4890 = vmatpush.bf16.msrb.mxu3 %v7605_v48  ;;  %v9142_v5 = vld [vmem:[#allocation1 + $0x2d] sm:$0xff] }
 0x172   :  { %4852 = vmatpush.bf16.msrb.mxu0 %v7580_v50  ;;  %v7609_v50 = vld [vmem:[%s9429_s1 + $0xc00] sm:$0xff] }
 0x173   :  { %4865 = vmatpush.bf16.msrb.mxu1 %v7588_v51  ;;  %v7617_v51 = vld [vmem:[%s9429_s1 + $0xc40] sm:$0xff] }
 0x174   :  { %4878 = vmatpush.bf16.msrb.mxu2 %v7596_v52  ;;  %v7625_v52 = vld [vmem:[%s9429_s1 + $0xc80] sm:$0xff] }
 0x175   :  { %4891 = vmatpush.bf16.msrb.mxu3 %v7604_v53  ;;  %v7633_v53 = vld [vmem:[%s9429_s1 + $0xcc0] sm:$0xff] }
 0x176   :  { %4853 = vmatpush.bf16.msrb.mxu0 %v7579_v59  ;;  %v1122_v59 = vld [vmem:[#allocation1] sm:$0xff] }
 0x177   :  { %4866 = vmatpush.bf16.msrb.mxu1 %v7587_v60  ;;  %v1124_v60 = vld [vmem:[#allocation1 + $0x12] sm:$0xff] }
 0x178   :  { %4879 = vmatpush.bf16.msrb.mxu2 %v7595_v62  ;;  %v1125_v62 = vld [vmem:[#allocation1 + $0x1b] sm:$0xff] }
 0x179   :  { %4892 = vmatpush.bf16.msrb.mxu3 %v7603_v63  ;;  %v7647_v63 = vld [vmem:[%s9429_s1 + $0xd30] sm:$0xff] }
 0x17a   :  { %4854 = vmatpush.bf16.msrb.mxu0 %v7578_v0  ;;  %v7655_v0 = vld [vmem:[%s9429_s1 + $0xd70] sm:$0xff] }
 0x17b   :  { %4867 = vmatpush.bf16.msrb.mxu1 %v7586_v1  ;;  %v7663_v1 = vld [vmem:[%s9429_s1 + $0xdb0] sm:$0xff] }
 0x17c   :  { %4880 = vmatpush.bf16.msrb.mxu2 %v7594_v2  ;;  %v7671_v2 = vld [vmem:[%s9429_s1 + $0xdf0] sm:$0xff] }
 0x17d   :  { %4893 = vmatpush.bf16.msrb.mxu3 %v7602_v3  ;;  %v9138_v3 = vld [vmem:[#allocation1 + $0x24] sm:$0xff] }
 0x17e   :  { %4855 = vmatpush.bf16.msrb.mxu0 %v7577_v6  ;;  %v4649_v22 = vpop.f32.mrf.mxu0  ;;  %v9144_v6 = vld [vmem:[#allocation1 + $0x3f] sm:$0xff] }
 0x17f   :  { %4868 = vmatpush.bf16.msrb.mxu1 %v7585_v7  ;;  %v4650_v23 = vadd.f32 %v4649_v22, %v4637_v58  ;;  %v4662_v26 = vpop.f32.mrf.mxu1  ;;  %v7672_v58 = vld [vmem:[%s9429_s1 + $0xdf8] sm:$0xff]  ;;  %1131 = vst [vmem:[#allocation1] ss:$9 sm:$0xff] %v35_v56  ;;  %v7646_v7 = vld [vmem:[%s9429_s1 + $0xd28] sm:$0xff] }
 0x180   :  { %4881 = vmatpush.bf16.msrb.mxu2 %v7593_v8  ;;  %v7654_v8 = vld [vmem:[%s9429_s1 + $0xd68] sm:$0xff]  ;;  %v7668_v22 = vld [vmem:[%s9429_s1 + $0xdd8] sm:$0xff] }
 0x181   :  { %4894 = vmatpush.bf16.msrb.mxu3 %v7601_v9  ;;  %4856 = vmatmul.bf16.vlgmr.msrb.gmra.mxu0 %v8928_v34  ;;  %v4663_v29 = vadd.f32 %v4662_v26, %v4650_v23  ;;  %v7662_v9 = vld [vmem:[%s9429_s1 + $0xda8] sm:$0xff] }
 0x182   :  { %4900 = vmatpush.bf16.msra.mxu0 %v7616_v10  ;;  %4869 = vmatmul.bf16.vlgmr.msrb.gmra.mxu1 %v8932_v36  ;;  %v7670_v10 = vld [vmem:[%s9429_s1 + $0xde8] sm:$0xff] }
 0x183   :  { %4913 = vmatpush.bf16.msra.mxu1 %v7624_v11  ;;  %4882 = vmatmul.bf16.vlgmr.msrb.gmra.mxu2 %v8930_v35 }
 0x184   :  { %4926 = vmatpush.bf16.msra.mxu2 %v7632_v12  ;;  %4895 = vmatmul.bf16.vlgmr.msrb.gmra.mxu3 %v8934_v37 }
 0x185   :  { %4939 = vmatpush.bf16.msra.mxu3 %v7640_v13  ;;  %v7645_v13 = vld [vmem:[%s9429_s1 + $0xd20] sm:$0xff] }
 0x186   :  { %4901 = vmatpush.bf16.msra.mxu0 %v7615_v14  ;;  %v4675_v34 = vpop.f32.mrf.mxu2  ;;  %v4651_v37 = vpop.f32.mrf.mxu0  ;;  %v7653_v14 = vld [vmem:[%s9429_s1 + $0xd60] sm:$0xff] }
 0x187   :  { %4914 = vmatpush.bf16.msra.mxu1 %v7623_v15  ;;  %v4676_v35 = vadd.f32 %v4675_v34, %v4663_v29  ;;  %v4688_v36 = vpop.f32.mrf.mxu3  ;;  %v4664_v41 = vpop.f32.mrf.mxu1  ;;  %v7651_v29 = vld [vmem:[%s9429_s1 + $0xd50] sm:$0xff]  ;;  %v7650_v34 = vld [vmem:[%s9429_s1 + $0xd48] sm:$0xff] }
 0x188   :  { %4927 = vmatpush.bf16.msra.mxu2 %v7631_v16  ;;  %v7661_v16 = vld [vmem:[%s9429_s1 + $0xda0] sm:$0xff] }
 0x189   :  { %4940 = vmatpush.bf16.msra.mxu3 %v7639_v17  ;;  %v9073_v38 = vadd.f32 %v4688_v36, %v4676_v35  ;;  %v7669_v17 = vld [vmem:[%s9429_s1 + $0xde0] sm:$0xff]  ;;  %v7658_v35 = vld [vmem:[%s9429_s1 + $0xd88] sm:$0xff] }
 0x18a   :  { %4902 = vmatpush.bf16.msra.mxu0 %v7614_v18  ;;  %v7666_v36 = vld [vmem:[%s9429_s1 + $0xdc8] sm:$0xff]  ;;  %v7657_v41 = vld [vmem:[%s9429_s1 + $0xd80] sm:$0xff] }
 0x18b   :  { %4915 = vmatpush.bf16.msra.mxu1 %v7622_v19  ;;  %v7644_v19 = vld [vmem:[%s9429_s1 + $0xd18] sm:$0xff] }
 0x18c   :  { %4928 = vmatpush.bf16.msra.mxu2 %v7630_v20  ;;  %v7652_v20 = vld [vmem:[%s9429_s1 + $0xd58] sm:$0xff] }
 0x18d   :  { %4941 = vmatpush.bf16.msra.mxu3 %v7638_v21  ;;  %v7660_v21 = vld [vmem:[%s9429_s1 + $0xd98] sm:$0xff] }
 0x18e   :  { %4903 = vmatpush.bf16.msra.mxu0 %v7613_v24  ;;  %v4677_v48 = vpop.f32.mrf.mxu2 }
 0x18f   :  { %4916 = vmatpush.bf16.msra.mxu1 %v7621_v25  ;;  %v4690_v49 = vpop.f32.mrf.mxu3  ;;  %v7687_v48 = vld [vmem:[%s9429_s1 + $0xe70] sm:$0xff] }
 0x190   :  { %4929 = vmatpush.bf16.msra.mxu2 %v7629_v27  ;;  %v7695_v49 = vld [vmem:[%s9429_s1 + $0xeb0] sm:$0xff] }
 0x191   :  { %4942 = vmatpush.bf16.msra.mxu3 %v7637_v28  ;;  %v7643_v28 = vld [vmem:[%s9429_s1 + $0xd10] sm:$0xff] }
 0x192   :  { %4904 = vmatpush.bf16.msra.mxu0 %v7612_v30 }
 0x193   :  { %4917 = vmatpush.bf16.msra.mxu1 %v7620_v31  ;;  %v7659_v31 = vld [vmem:[%s9429_s1 + $0xd90] sm:$0xff] }
 0x194   :  { %4930 = vmatpush.bf16.msra.mxu2 %v7628_v32  ;;  %v7667_v32 = vld [vmem:[%s9429_s1 + $0xdd0] sm:$0xff] }
 0x195   :  { %4943 = vmatpush.bf16.msra.mxu3 %v7636_v33  ;;  %v7642_v33 = vld [vmem:[%s9429_s1 + $0xd08] sm:$0xff] }
 0x196   :  { %4905 = vmatpush.bf16.msra.mxu0 %v7611_v39  ;;  %v7641_v39 = vld [vmem:[%s9429_s1 + $0xd00] sm:$0xff] }
 0x197   :  { %4918 = vmatpush.bf16.msra.mxu1 %v7619_v40  ;;  %v7649_v40 = vld [vmem:[%s9429_s1 + $0xd40] sm:$0xff] }
 0x198   :  { %4931 = vmatpush.bf16.msra.mxu2 %v7627_v42  ;;  %v7665_v42 = vld [vmem:[%s9429_s1 + $0xdc0] sm:$0xff] }
 0x199   :  { %4944 = vmatpush.bf16.msra.mxu3 %v7635_v43  ;;  %v7680_v43 = vld [vmem:[%s9429_s1 + $0xe38] sm:$0xff] }
 0x19a   :  { %4906 = vmatpush.bf16.msra.mxu0 %v7610_v44  ;;  %v7688_v44 = vld [vmem:[%s9429_s1 + $0xe78] sm:$0xff] }
 0x19b   :  { %4919 = vmatpush.bf16.msra.mxu1 %v7618_v45  ;;  %v7696_v45 = vld [vmem:[%s9429_s1 + $0xeb8] sm:$0xff] }
 0x19c   :  { %4932 = vmatpush.bf16.msra.mxu2 %v7626_v46  ;;  %v7704_v46 = vld [vmem:[%s9429_s1 + $0xef8] sm:$0xff] }
 0x19d   :  { %4945 = vmatpush.bf16.msra.mxu3 %v7634_v47  ;;  %v7679_v47 = vld [vmem:[%s9429_s1 + $0xe30] sm:$0xff] }
 0x19e   :  { %4907 = vmatpush.bf16.msra.mxu0 %v7609_v50  ;;  %v4701_v11 = vpop.f32.mrf.mxu0  ;;  %v7703_v50 = vld [vmem:[%s9429_s1 + $0xef0] sm:$0xff] }
 0x19f   :  { %4920 = vmatpush.bf16.msra.mxu1 %v7617_v51  ;;  %v4702_v12 = vadd.f32 %v4701_v11, %v9073_v38  ;;  %v4714_v15 = vpop.f32.mrf.mxu1  ;;  %v7678_v51 = vld [vmem:[%s9429_s1 + $0xe28] sm:$0xff]  ;;  %v7691_v11 = vld [vmem:[%s9429_s1 + $0xe90] sm:$0xff] }
 0x1a0   :  { %4933 = vmatpush.bf16.msra.mxu2 %v7625_v52  ;;  %v7686_v52 = vld [vmem:[%s9429_s1 + $0xe68] sm:$0xff] }
 0x1a1   :  { %4946 = vmatpush.bf16.msra.mxu3 %v7633_v53  ;;  %4908 = vmatmul.bf16.vlgmr.msra.gmra.mxu0 %v1122_v59  ;;  %v4715_v18 = vadd.f32 %v4714_v15, %v4702_v12  ;;  %v7694_v53 = vld [vmem:[%s9429_s1 + $0xea8] sm:$0xff]  ;;  %v7699_v12 = vld [vmem:[%s9429_s1 + $0xed0] sm:$0xff] }
 0x1a2   :  { %4952 = vmatpush.bf16.msrb.mxu0 %v7648_v54  ;;  %4921 = vmatmul.bf16.vlgmr.msra.gmra.mxu1 %v1123_v61  ;;  %v7702_v54 = vld [vmem:[%s9429_s1 + $0xee8] sm:$0xff]  ;;  %v7701_v61 = vld [vmem:[%s9429_s1 + $0xee0] sm:$0xff] }
 0x1a3   :  { %4965 = vmatpush.bf16.msrb.mxu1 %v7656_v55  ;;  %4934 = vmatmul.bf16.vlgmr.msra.gmra.mxu2 %v1124_v60  ;;  %v7693_v60 = vld [vmem:[%s9429_s1 + $0xea0] sm:$0xff]  ;;  %v7690_v15 = vld [vmem:[%s9429_s1 + $0xe88] sm:$0xff] }
 0x1a4   :  { %4978 = vmatpush.bf16.msrb.mxu2 %v7664_v57  ;;  %4947 = vmatmul.bf16.vlgmr.msra.gmra.mxu3 %v1125_v62  ;;  %v7677_v57 = vld [vmem:[%s9429_s1 + $0xe20] sm:$0xff] }
 0x1a5   :  { %4991 = vmatpush.bf16.msrb.mxu3 %v7672_v58  ;;  %v7685_v58 = vld [vmem:[%s9429_s1 + $0xe60] sm:$0xff] }
 0x1a6   :  { %4953 = vmatpush.bf16.msrb.mxu0 %v7647_v63  ;;  %v4727_v23 = vpop.f32.mrf.mxu2  ;;  %v4703_v26 = vpop.f32.mrf.mxu0  ;;  %v7676_v63 = vld [vmem:[%s9429_s1 + $0xe18] sm:$0xff] }
 0x1a7   :  { %4966 = vmatpush.bf16.msrb.mxu1 %v7655_v0  ;;  %v4728_v24 = vadd.f32 %v4727_v23, %v4715_v18  ;;  %v4740_v25 = vpop.f32.mrf.mxu3  ;;  %v4716_v30 = vpop.f32.mrf.mxu1  ;;  %v7684_v0 = vld [vmem:[%s9429_s1 + $0xe58] sm:$0xff] }
 0x1a8   :  { %4979 = vmatpush.bf16.msrb.mxu2 %v7663_v1  ;;  %v7692_v1 = vld [vmem:[%s9429_s1 + $0xe98] sm:$0xff] }
 0x1a9   :  { %4992 = vmatpush.bf16.msrb.mxu3 %v7671_v2  ;;  %v4741_v27 = vadd.f32 %v4740_v25, %v4728_v24  ;;  %v7700_v2 = vld [vmem:[%s9429_s1 + $0xed8] sm:$0xff] }
 0x1aa   :  { %4954 = vmatpush.bf16.msrb.mxu0 %v7646_v7  ;;  %v7712_v23 = vld [vmem:[%s9429_s1 + $0xf38] sm:$0xff] }
 0x1ab   :  { %4967 = vmatpush.bf16.msrb.mxu1 %v7654_v8  ;;  %v7675_v8 = vld [vmem:[%s9429_s1 + $0xe10] sm:$0xff]  ;;  %v7720_v24 = vld [vmem:[%s9429_s1 + $0xf78] sm:$0xff] }
 0x1ac   :  { %4980 = vmatpush.bf16.msrb.mxu2 %v7662_v9  ;;  %v7683_v9 = vld [vmem:[%s9429_s1 + $0xe50] sm:$0xff]  ;;  %v7728_v25 = vld [vmem:[%s9429_s1 + $0xfb8] sm:$0xff] }
 0x1ad   :  { %4993 = vmatpush.bf16.msrb.mxu3 %v7670_v10  ;;  %v7736_v26 = vld [vmem:[%s9429_s1 + $0xff8] sm:$0xff] }
 0x1ae   :  { %4955 = vmatpush.bf16.msrb.mxu0 %v7645_v13  ;;  %v4729_v37 = vpop.f32.mrf.mxu2  ;;  %v7674_v13 = vld [vmem:[%s9429_s1 + $0xe08] sm:$0xff]  ;;  %v1135_v30 = vld [vmem:[#allocation1 + $0x1b] sm:$0xff] }
 0x1af   :  { %4968 = vmatpush.bf16.msrb.mxu1 %v7653_v14  ;;  %v4742_v38 = vpop.f32.mrf.mxu3  ;;  %v7682_v14 = vld [vmem:[%s9429_s1 + $0xe48] sm:$0xff] }
 0x1b0   :  { %4981 = vmatpush.bf16.msrb.mxu2 %v7661_v16  ;;  %v7698_v16 = vld [vmem:[%s9429_s1 + $0xec8] sm:$0xff] }
 0x1b1   :  { %4994 = vmatpush.bf16.msrb.mxu3 %v7669_v17  ;;  %v7726_v37 = vld [vmem:[%s9429_s1 + $0xfa8] sm:$0xff] }
 0x1b2   :  { %4956 = vmatpush.bf16.msrb.mxu0 %v7644_v19  ;;  %v7673_v19 = vld [vmem:[%s9429_s1 + $0xe00] sm:$0xff]  ;;  %v7734_v38 = vld [vmem:[%s9429_s1 + $0xfe8] sm:$0xff] }
 0x1b3   :  { %4969 = vmatpush.bf16.msrb.mxu1 %v7652_v20  ;;  %v7681_v20 = vld [vmem:[%s9429_s1 + $0xe40] sm:$0xff] }
 0x1b4   :  { %4982 = vmatpush.bf16.msrb.mxu2 %v7660_v21  ;;  %v7689_v21 = vld [vmem:[%s9429_s1 + $0xe80] sm:$0xff] }
 0x1b5   :  { %4995 = vmatpush.bf16.msrb.mxu3 %v7668_v22  ;;  %v7697_v22 = vld [vmem:[%s9429_s1 + $0xec0] sm:$0xff] }
 0x1b6   :  { %4957 = vmatpush.bf16.msrb.mxu0 %v7643_v28  ;;  %v1134_v28 = vld [vmem:[#allocation1 + $0x12] sm:$0xff] }
 0x1b7   :  { %4970 = vmatpush.bf16.msrb.mxu1 %v7651_v29  ;;  %v1133_v29 = vld [vmem:[#allocation1 + $0x9] sm:$0xff] }
 0x1b8   :  { %4983 = vmatpush.bf16.msrb.mxu2 %v7659_v31  ;;  %v7711_v31 = vld [vmem:[%s9429_s1 + $0xf30] sm:$0xff] }
 0x1b9   :  { %4996 = vmatpush.bf16.msrb.mxu3 %v7667_v32  ;;  %v7719_v32 = vld [vmem:[%s9429_s1 + $0xf70] sm:$0xff] }
 0x1ba   :  { %4958 = vmatpush.bf16.msrb.mxu0 %v7642_v33  ;;  %v7727_v33 = vld [vmem:[%s9429_s1 + $0xfb0] sm:$0xff] }
 0x1bb   :  { %4971 = vmatpush.bf16.msrb.mxu1 %v7650_v34  ;;  %v7735_v34 = vld [vmem:[%s9429_s1 + $0xff0] sm:$0xff] }
 0x1bc   :  { %4984 = vmatpush.bf16.msrb.mxu2 %v7658_v35  ;;  %v7710_v35 = vld [vmem:[%s9429_s1 + $0xf28] sm:$0xff] }
 0x1bd   :  { %4997 = vmatpush.bf16.msrb.mxu3 %v7666_v36  ;;  %v7718_v36 = vld [vmem:[%s9429_s1 + $0xf68] sm:$0xff] }
 0x1be   :  { %4959 = vmatpush.bf16.msrb.mxu0 %v7641_v39  ;;  %v4753_v55 = vpop.f32.mrf.mxu0 }
 0x1bf   :  { %4972 = vmatpush.bf16.msrb.mxu1 %v7649_v40  ;;  %v4754_v56 = vadd.f32 %v4753_v55, %v4741_v27  ;;  %v4766_v59 = vpop.f32.mrf.mxu1  ;;  %v1132_v27 = vld [vmem:[#allocation1] sm:$0xff] }
 0x1c0   :  { %4985 = vmatpush.bf16.msrb.mxu2 %v7657_v41  ;;  %v7709_v41 = vld [vmem:[%s9429_s1 + $0xf20] sm:$0xff] }
 0x1c1   :  { %4998 = vmatpush.bf16.msrb.mxu3 %v7665_v42  ;;  %4960 = vmatmul.bf16.vlgmr.msrb.gmra.mxu0 %v9138_v3  ;;  %v4767_v62 = vadd.f32 %v4766_v59, %v4754_v56  ;;  %v7717_v42 = vld [vmem:[%s9429_s1 + $0xf60] sm:$0xff]  ;;  %v7707_v56 = vld [vmem:[%s9429_s1 + $0xf10] sm:$0xff] }
 0x1c2   :  { %5004 = vmatpush.bf16.msra.mxu0 %v7680_v43  ;;  %4973 = vmatmul.bf16.vlgmr.msrb.gmra.mxu1 %v9142_v5  ;;  %v7723_v59 = vld [vmem:[%s9429_s1 + $0xf90] sm:$0xff] }
 0x1c3   :  { %5017 = vmatpush.bf16.msra.mxu1 %v7688_v44  ;;  %4986 = vmatmul.bf16.vlgmr.msrb.gmra.mxu2 %v9140_v4  ;;  %v7725_v44 = vld [vmem:[%s9429_s1 + $0xfa0] sm:$0xff] }
 0x1c4   :  { %5030 = vmatpush.bf16.msra.mxu2 %v7696_v45  ;;  %4999 = vmatmul.bf16.vlgmr.msrb.gmra.mxu3 %v9144_v6  ;;  %v7733_v45 = vld [vmem:[%s9429_s1 + $0xfe0] sm:$0xff] }
 0x1c5   :  { %5043 = vmatpush.bf16.msra.mxu3 %v7704_v46 }
 0x1c6   :  { %5005 = vmatpush.bf16.msra.mxu0 %v7679_v47  ;;  %v4779_v3 = vpop.f32.mrf.mxu2  ;;  %v4755_v6 = vpop.f32.mrf.mxu0  ;;  %v7708_v47 = vld [vmem:[%s9429_s1 + $0xf18] sm:$0xff] }
 0x1c7   :  { %5018 = vmatpush.bf16.msra.mxu1 %v7687_v48  ;;  %v4780_v4 = vadd.f32 %v4779_v3, %v4767_v62  ;;  %v4792_v5 = vpop.f32.mrf.mxu3  ;;  %v4768_v10 = vpop.f32.mrf.mxu1  ;;  %v7716_v48 = vld [vmem:[%s9429_s1 + $0xf58] sm:$0xff]  ;;  %v7714_v62 = vld [vmem:[%s9429_s1 + $0xf48] sm:$0xff]  ;;  %v7705_v3 = vld [vmem:[%s9429_s1 + $0xf00] sm:$0xff] }
 0x1c8   :  { %5031 = vmatpush.bf16.msra.mxu2 %v7695_v49  ;;  %v7724_v49 = vld [vmem:[%s9429_s1 + $0xf98] sm:$0xff]  ;;  %v7729_v6 = vld [vmem:[%s9429_s1 + $0xfc0] sm:$0xff] }
 0x1c9   :  { %5044 = vmatpush.bf16.msra.mxu3 %v7703_v50  ;;  %v4793_v7 = vadd.f32 %v4792_v5, %v4780_v4  ;;  %v7732_v50 = vld [vmem:[%s9429_s1 + $0xfd8] sm:$0xff]  ;;  %v7713_v4 = vld [vmem:[%s9429_s1 + $0xf40] sm:$0xff] }
 0x1ca   :  { %5006 = vmatpush.bf16.msra.mxu0 %v7678_v51  ;;  %v7721_v5 = vld [vmem:[%s9429_s1 + $0xf80] sm:$0xff] }
 0x1cb   :  { %5019 = vmatpush.bf16.msra.mxu1 %v7686_v52  ;;  %v1139_v10 = vld [vmem:[#allocation1 + $0x3f] sm:$0xff] }
 0x1cc   :  { %5032 = vmatpush.bf16.msra.mxu2 %v7694_v53 }
 0x1cd   :  { %5045 = vmatpush.bf16.msra.mxu3 %v7702_v54 }
 0x1ce   :  { %5007 = vmatpush.bf16.msra.mxu0 %v7677_v57  ;;  %v4781_v17 = vpop.f32.mrf.mxu2  ;;  %v7715_v57 = vld [vmem:[%s9429_s1 + $0xf50] sm:$0xff] }
 0x1cf   :  { %5020 = vmatpush.bf16.msra.mxu1 %v7685_v58  ;;  %v4794_v18 = vpop.f32.mrf.mxu3 }
 0x1d0   :  { %5033 = vmatpush.bf16.msra.mxu2 %v7693_v60  ;;  %v7731_v60 = vld [vmem:[%s9429_s1 + $0xfd0] sm:$0xff] }
 0x1d1   :  { %5046 = vmatpush.bf16.msra.mxu3 %v7701_v61  ;;  %v7706_v61 = vld [vmem:[%s9429_s1 + $0xf08] sm:$0xff] }
 0x1d2   :  { %5008 = vmatpush.bf16.msra.mxu0 %v7676_v63  ;;  %v7722_v63 = vld [vmem:[%s9429_s1 + $0xf88] sm:$0xff] }
 0x1d3   :  { %5021 = vmatpush.bf16.msra.mxu1 %v7684_v0  ;;  %v7730_v0 = vld [vmem:[%s9429_s1 + $0xfc8] sm:$0xff] }
 0x1d4   :  { %5034 = vmatpush.bf16.msra.mxu2 %v7692_v1 }
 0x1d5   :  { %5047 = vmatpush.bf16.msra.mxu3 %v7700_v2 }
 0x1d6   :  { %5009 = vmatpush.bf16.msra.mxu0 %v7675_v8  ;;  %v1137_v8 = vld [vmem:[#allocation1 + $0x2d] sm:$0xff] }
 0x1d7   :  { %5022 = vmatpush.bf16.msra.mxu1 %v7683_v9  ;;  %v1138_v9 = vld [vmem:[#allocation1 + $0x36] sm:$0xff] }
 0x1d8   :  { %5035 = vmatpush.bf16.msra.mxu2 %v7691_v11 }
 0x1d9   :  { %5048 = vmatpush.bf16.msra.mxu3 %v7699_v12 }
 0x1da   :  { %5010 = vmatpush.bf16.msra.mxu0 %v7674_v13 }
 0x1db   :  { %5023 = vmatpush.bf16.msra.mxu1 %v7682_v14 }
 0x1dc   :  { %5036 = vmatpush.bf16.msra.mxu2 %v7690_v15 }
 0x1dd   :  { %5049 = vmatpush.bf16.msra.mxu3 %v7698_v16 }
 0x1de   :  { %5011 = vmatpush.bf16.msra.mxu0 %v7673_v19  ;;  %v4805_v39 = vpop.f32.mrf.mxu0 }
 0x1df   :  { %5024 = vmatpush.bf16.msra.mxu1 %v7681_v20  ;;  %v4806_v40 = vadd.f32 %v4805_v39, %v4793_v7  ;;  %v4818_v43 = vpop.f32.mrf.mxu1  ;;  %v1136_v7 = vld [vmem:[#allocation1 + $0x24] sm:$0xff] }
 0x1e0   :  { %5037 = vmatpush.bf16.msra.mxu2 %v7689_v21 }
 0x1e1   :  { %5050 = vmatpush.bf16.msra.mxu3 %v7697_v22  ;;  %5012 = vmatmul.bf16.vlgmr.msra.gmra.mxu0 %v1132_v27  ;;  %v4819_v46 = vadd.f32 %v4818_v43, %v4806_v40 }
 0x1e2   :  { %5056 = vmatpush.bf16.msrb.mxu0 %v7712_v23  ;;  %5025 = vmatmul.bf16.vlgmr.msra.gmra.mxu1 %v1133_v29 }
 0x1e3   :  { %5069 = vmatpush.bf16.msrb.mxu1 %v7720_v24  ;;  %5038 = vmatmul.bf16.vlgmr.msra.gmra.mxu2 %v1134_v28 }
 0x1e4   :  { %5082 = vmatpush.bf16.msrb.mxu2 %v7728_v25  ;;  %5051 = vmatmul.bf16.vlgmr.msra.gmra.mxu3 %v1135_v30 }
 0x1e5   :  { %5095 = vmatpush.bf16.msrb.mxu3 %v7736_v26 }
 0x1e6   :  { %5057 = vmatpush.bf16.msrb.mxu0 %v7711_v31  ;;  %v4831_v51 = vpop.f32.mrf.mxu2  ;;  %v4807_v54 = vpop.f32.mrf.mxu0 }
 0x1e7   :  { %5070 = vmatpush.bf16.msrb.mxu1 %v7719_v32  ;;  %v4832_v52 = vadd.f32 %v4831_v51, %v4819_v46  ;;  %v4844_v53 = vpop.f32.mrf.mxu3  ;;  %v4820_v58 = vpop.f32.mrf.mxu1  ;;  %v9_v46 = vstv %s9431_s2 }
 0x1e8   :  { %5083 = vmatpush.bf16.msrb.mxu2 %v7727_v33  ;;  %10 = vst [vmem:[#allocation3] sm:$0x1] %v9_v46 }
 0x1e9   :  { %5096 = vmatpush.bf16.msrb.mxu3 %v7735_v34  ;;  %v4845_v55 = vadd.f32 %v4844_v53, %v4832_v52 }
 0x1ea   :  { %5058 = vmatpush.bf16.msrb.mxu0 %v7710_v35 }
 0x1eb   :  { %5071 = vmatpush.bf16.msrb.mxu1 %v7718_v36 }
 0x1ec   :  { %5084 = vmatpush.bf16.msrb.mxu2 %v7726_v37 }
 0x1ed   :  { %5097 = vmatpush.bf16.msrb.mxu3 %v7734_v38 }
 0x1ee   :  { %5059 = vmatpush.bf16.msrb.mxu0 %v7709_v41  ;;  %v4833_v1 = vpop.f32.mrf.mxu2 }
 0x1ef   :  { %5072 = vmatpush.bf16.msrb.mxu1 %v7717_v42  ;;  %v4846_v2 = vpop.f32.mrf.mxu3 }
 0x1f0   :  { %5085 = vmatpush.bf16.msrb.mxu2 %v7725_v44 }
 0x1f1   :  { %5098 = vmatpush.bf16.msrb.mxu3 %v7733_v45  ;;  %v7745_v45 = vmov 0.0  }
 0x1f2   :  { %5060 = vmatpush.bf16.msrb.mxu0 %v7708_v47  ;;  %26 = vst.msk [vmem:[#allocation2] sm:$0x3] %vm25_vm0, %v7745_v45  ;;  %v11_v47 = vstv %s9432_s3 }
 0x1f3   :  { %5073 = vmatpush.bf16.msrb.mxu1 %v7716_v48  ;;  %12 = vst [vmem:[#allocation4] sm:$0x1] %v11_v47 }
 0x1f4   :  { %5086 = vmatpush.bf16.msrb.mxu2 %v7724_v49 }
 0x1f5   :  { %5099 = vmatpush.bf16.msrb.mxu3 %v7732_v50 }
 0x1f6   :  { %5061 = vmatpush.bf16.msrb.mxu0 %v7707_v56 }
 0x1f7   :  { %5074 = vmatpush.bf16.msrb.mxu1 %v7715_v57 }
 0x1f8   :  { %5087 = vmatpush.bf16.msrb.mxu2 %v7723_v59 }
 0x1f9   :  { %5100 = vmatpush.bf16.msrb.mxu3 %v7731_v60 }
 0x1fa   :  { %5062 = vmatpush.bf16.msrb.mxu0 %v7706_v61 }
 0x1fb   :  { %5075 = vmatpush.bf16.msrb.mxu1 %v7714_v62 }
 0x1fc   :  { %5088 = vmatpush.bf16.msrb.mxu2 %v7722_v63 }
 0x1fd   :  { %5101 = vmatpush.bf16.msrb.mxu3 %v7730_v0 }
 0x1fe   :  { %5063 = vmatpush.bf16.msrb.mxu0 %v7705_v3  ;;  %v4857_v11 = vpop.f32.mrf.mxu0 }
 0x1ff   :  { %5076 = vmatpush.bf16.msrb.mxu1 %v7713_v4  ;;  %v4858_v12 = vadd.f32 %v4857_v11, %v4845_v55  ;;  %v4870_v13 = vpop.f32.mrf.mxu1 }
 0x200   :  { %5089 = vmatpush.bf16.msrb.mxu2 %v7721_v5 }
 0x201   :  { %5102 = vmatpush.bf16.msrb.mxu3 %v7729_v6  ;;  %5064 = vmatmul.bf16.vlgmr.msrb.gmra.mxu0 %v1136_v7  ;;  %v4871_v14 = vadd.f32 %v4870_v13, %v4858_v12  ;;  %v27_v7 = vld [vmem:[#allocation2] sm:$0x3] }
 0x202   :  { %5077 = vmatmul.bf16.vlgmr.msrb.gmra.mxu1 %v1137_v8 }
 0x203   :  { %5090 = vmatmul.bf16.vlgmr.msrb.gmra.mxu2 %v1138_v9 }
 0x204   :  { %5103 = vmatmul.bf16.vlgmr.msrb.gmra.mxu3 %v1139_v10 }
 0x206   :  { %v4883_v15 = vpop.f32.mrf.mxu2  ;;  %v4859_v18 = vpop.f32.mrf.mxu0 }
 0x207   :  { %v4884_v16 = vadd.f32 %v4883_v15, %v4871_v14  ;;  %v4896_v17 = vpop.f32.mrf.mxu3  ;;  %v4872_v20 = vpop.f32.mrf.mxu1 }
 0x209   :  { %v4897_v19 = vadd.f32 %v4896_v17, %v4884_v16 }
 0x20e   :  { %v4885_v21 = vpop.f32.mrf.mxu2 }
 0x20f   :  { %v4898_v22 = vpop.f32.mrf.mxu3 }
 0x21e   :  { %v4909_v23 = vpop.f32.mrf.mxu0 }
 0x21f   :  { %v4910_v24 = vadd.f32 %v4909_v23, %v4897_v19  ;;  %v4922_v25 = vpop.f32.mrf.mxu1 }
 0x221   :  { %v4923_v26 = vadd.f32 %v4922_v25, %v4910_v24 }
 0x226   :  { %v4935_v27 = vpop.f32.mrf.mxu2  ;;  %v4911_v30 = vpop.f32.mrf.mxu0 }
 0x227   :  { %v4936_v28 = vadd.f32 %v4935_v27, %v4923_v26  ;;  %v4948_v29 = vpop.f32.mrf.mxu3  ;;  %v4924_v32 = vpop.f32.mrf.mxu1 }
 0x229   :  { %v4949_v31 = vadd.f32 %v4948_v29, %v4936_v28 }
 0x22e   :  { %v4937_v33 = vpop.f32.mrf.mxu2 }
 0x22f   :  { %v4950_v34 = vpop.f32.mrf.mxu3 }
 0x23e   :  { %v4961_v35 = vpop.f32.mrf.mxu0 }
 0x23f   :  { %v4974_v36 = vpop.f32.mrf.mxu1  ;;  %v4962_v49 = vadd.f32 %v4961_v35, %v4949_v31 }
 0x241   :  { %v4975_v53 = vadd.f32 %v4974_v36, %v4962_v49 }
 0x246   :  { %v4987_v37 = vpop.f32.mrf.mxu2  ;;  %v4963_v39 = vpop.f32.mrf.mxu0 }
 0x247   :  { %v5000_v38 = vpop.f32.mrf.mxu3  ;;  %v4976_v40 = vpop.f32.mrf.mxu1  ;;  %v4988_v54 = vadd.f32 %v4987_v37, %v4975_v53 }
 0x249   :  { %v5001_v57 = vadd.f32 %v5000_v38, %v4988_v54  ;;  %v5144_v38 = vld [vmem:[#allocation3] sm:$0x1] }
 0x24e   :  { %v4989_v41 = vpop.f32.mrf.mxu2 }
 0x24f   :  { %v5002_v42 = vpop.f32.mrf.mxu3 }
 0x250   :  { %v7738_v42 = vld [vmem:[#allocation4] ss:$0 sm:$0xff] }
 0x25e   :  { %v5013_v43 = vpop.f32.mrf.mxu0 }
 0x25f   :  { %v5026_v44 = vpop.f32.mrf.mxu1  ;;  %v5014_v58 = vadd.f32 %v5013_v43, %v5001_v57 }
 0x261   :  { %v5027_v59 = vadd.f32 %v5026_v44, %v5014_v58 }
 0x266   :  { %v5039_v48 = vpop.f32.mrf.mxu2  ;;  %v5015_v51 = vpop.f32.mrf.mxu0 }
 0x267   :  { %v5052_v50 = vpop.f32.mrf.mxu3  ;;  %v5028_v52 = vpop.f32.mrf.mxu1  ;;  %v5040_v60 = vadd.f32 %v5039_v48, %v5027_v59 }
 0x269   :  { %v5053_v61 = vadd.f32 %v5052_v50, %v5040_v60 }
 0x26e   :  { %v5041_v55 = vpop.f32.mrf.mxu2 }
 0x26f   :  { %v5054_v56 = vpop.f32.mrf.mxu3 }
 0x27e   :  { %v5065_v62 = vpop.f32.mrf.mxu0 }
 0x27f   :  { %v5078_v63 = vpop.f32.mrf.mxu1  ;;  %v5066_v0 = vadd.f32 %v5065_v62, %v5053_v61 }
 0x281   :  { %v5079_v1 = vadd.f32 %v5078_v63, %v5066_v0 }
 0x286   :  { %v5091_v2 = vpop.f32.mrf.mxu2  ;;  %v5067_v5 = vpop.f32.mrf.mxu0 }
 0x287   :  { %v5104_v3 = vpop.f32.mrf.mxu3  ;;  %v5092_v4 = vadd.f32 %v5091_v2, %v5079_v1  ;;  %v5080_v6 = vpop.f32.mrf.mxu1 }
 0x289   :  { %v5105_v8 = vadd.f32 %v5104_v3, %v5092_v4 }
 0x28b   :  { %v5108_v9 = vadd.f32 %v5105_v8, %v27_v7 }
 0x28d   :  { %5110 = vst.msk [vmem:[#allocation2] sm:$0x3] %vm25_vm0, %v5108_v9 }
 0x28e   :  { %v5093_v10 = vpop.f32.mrf.mxu2 }
 0x28f   :  { %v5106_v11 = vpop.f32.mrf.mxu3 }
 0x294   :  { %v5114_v12 = vld [vmem:[#allocation2] sm:$0x3] }
 0x295   :  { %v5115_v13 = vsel %vm25_vm0, %v5114_v12, 0.0 }
 0x296   :  { %v5116_v14 = vrot.slane %v5115_v13, 4 }
 0x298   :  { %v5117_v15 = vadd.f32 %v5116_v14, %v5115_v13 }
 0x29a   :  { %v5118_v16 = vrot.slane %v5117_v15, 2 }
 0x29c   :  { %v5119_v17 = vadd.f32 %v5118_v16, %v5117_v15 }
 0x29e   :  { %v5120_v18 = vrot.slane %v5119_v17, 1 }
 0x2a0   :  { %v5121_v19 = vadd.f32 %v5120_v18, %v5119_v17 }
 0x2a2   :  { %v5122_v20 = vmul.f32 0.5, %v5121_v19 }
 0x2a4   :  { %v5123_v21 = vsub.f32 %v5114_v12, %v5122_v20 }
 0x2a6   :  { %v5124_v22 = vmul.f32 %v5123_v21, %v5123_v21 }
 0x2a8   :  { %v5125_v23 = vsel %vm25_vm0, %v5124_v22, 0.0 }
 0x2a9   :  { %v5126_v24 = vrot.slane %v5125_v23, 4 }
 0x2ab   :  { %v5127_v25 = vadd.f32 %v5126_v24, %v5125_v23 }
 0x2ad   :  { %v5128_v26 = vrot.slane %v5127_v25, 2 }
 0x2af   :  { %v5129_v27 = vadd.f32 %v5128_v26, %v5127_v25 }
 0x2b1   :  { %v5130_v28 = vrot.slane %v5129_v27, 1 }
 0x2b3   :  { %v5131_v29 = vadd.f32 %v5130_v28, %v5129_v27 }
 0x2b5   :  { %v5132_v30 = vmul.f32 0.5, %v5131_v29 }
 0x2b7   :  { %v5133_v31 = vadd.f32 1e-05, %v5132_v30 }
 0x2b9   :  { %7739 = vrsqrt.f32 %v5133_v31  ;;  %vm5140_vm2 = vweird.f32 %v5133_v31 }
 0x2bf   :  { %v7740_v32 = vpop.eup %7739 }
 0x2c0   :  { %v5135_v33 = vmul.f32 %v7740_v32, %v5133_v31  ;;  %vm5141_vm1 = vweird.f32 %v7740_v32 }
 0x2c1   :  { %vm5142_vm3 = vmor %vm5140_vm2, %vm5141_vm1 }
 0x2c2   :  { %v5136_v34 = vmul.f32 %v7740_v32, %v5135_v33 }
 0x2c4   :  { %v5137_v35 = vmul.f32 0.5, %v5136_v34 }
 0x2c6   :  { %v5138_v36 = vsub.f32 1.5, %v5137_v35 }
 0x2c8   :  { %v5139_v37 = vmul.f32 %v7740_v32, %v5138_v36 }
 0x2ca   :  { %v5143_v39 = vsel %vm5142_vm3, %v7740_v32, %v5139_v37 }
 0x2cb   :  { %v5145_v40 = vmul.f32 %v5144_v38, %v5143_v39 }
 0x2cd   :  { %v5146_v41 = vperm.slane %v5145_v40, 0 }
 0x2cf   :  { %v5147_v43 = vmul.f32 %v5146_v41, %v5123_v21 }
 0x2d1   :  { %v5152_v44 = vadd.f32 %v7738_v42, %v5147_v43 }
 0x2d3   :  { %v5153_v45 = vsub.f32 0.0, %v5152_v44 }
 0x2d5   :  { %v5154_v46 = vmul.f32 1.442695, %v5153_v45 }
 0x2d7   :  { %7741 = vpow2.f32 %v5154_v46 }
 0x2dd   :  { %v7742_v47 = vpop.eup %7741 }
 0x2de   :  { %v5156_v48 = vadd.f32 1.0, %v7742_v47 }
 0x2e0   :  { %7743 = vrcp.f32 %v5156_v48  ;;  %v5168_v52 = vand.u32 2147483648, %v5156_v48  ;;  %v5166_v54 = vand.u32 2147483647, %v5156_v48  ;;  %vm5162_vm5 = vweird.f32 %v5156_v48 }
 0x2e2   :  { %v5169_v56 = vor.u32 1.1754944e-38, %v5168_v52  ;;  %vm5167_vm7 = vcmp.eq.f32.partialorder %v5166_v54, 8.507059e+37 }
 0x2e6   :  { %v7744_v49 = vpop.eup %7743 }
 0x2e7   :  { %v5158_v50 = vmul.f32 %v7744_v49, %v5156_v48  ;;  %vm5163_vm4 = vweird.f32 %v7744_v49 }
 0x2e8   :  { %vm5164_vm6 = vmor %vm5162_vm5, %vm5163_vm4 }
 0x2e9   :  { %v5159_v51 = vsub.f32 1.0, %v5158_v50 }
 0x2eb   :  { %v5160_v53 = vmul.f32 %v7744_v49, %v5159_v51 }
 0x2ed   :  { %v5161_v55 = vadd.f32 %v7744_v49, %v5160_v53 }
 0x2ef   :  { %v5165_v57 = vsel %vm5164_vm6, %v7744_v49, %v5161_v55 }
 0x2f0   :  { %v5170_v58 = vsel %vm5167_vm7, %v5169_v56, %v5165_v57 }
 0x2f1   :  { %5172 = vst.msk [vmem:[%s9433_s4] sm:$0x3] %vm25_vm0, %v5170_v58 }

</bundles_post_ra>
